<compile_context>
chip_gen: v6e
topology: v6e:2x2x1
jax: 0.10.0
libtpu: 0.0.40
codegen_flags: <defaults>
</compile_context>

<pallas_src>
import functools

import numpy as np
import jax
import jax.numpy as jnp
from jax.experimental import pallas as pl
from jax.experimental.pallas import tpu as pltpu


def _round_up(x, m):
    return (x + m - 1) // m * m


_TM_MAX = 256  # M-tile cap; per-tile VMEM stays well under every generation's limit


# ----------------------------------------------------------------------------
# Pallas kernels
# ----------------------------------------------------------------------------

def _conv_kernel(x_ref, w_ref, b_ref, o_ref, *, relu):
    # (TM, K) bf16 x (K, TN) bf16 -> f32 acc, + folded-BN bias (+ ReLU)
    acc = jnp.dot(x_ref[...], w_ref[...], preferred_element_type=jnp.float32)
    acc = acc + b_ref[...]
    if relu:
        acc = jnp.maximum(acc, 0.0)
    o_ref[...] = acc.astype(o_ref.dtype)


def _conv_res_kernel(x_ref, w_ref, b_ref, r_ref, o_ref, *, relu):
    # same, with identity-residual add before the ReLU
    acc = jnp.dot(x_ref[...], w_ref[...], preferred_element_type=jnp.float32)
    acc = acc + b_ref[...] + r_ref[...].astype(jnp.float32)
    if relu:
        acc = jnp.maximum(acc, 0.0)
    o_ref[...] = acc.astype(o_ref.dtype)


def _conv_ds_kernel(x_ref, w_ref, b_ref, rs_ref, wr_ref, o_ref, *, relu):
    # conv2 matmul + fused 1x1 strided-downsample residual matmul, combined
    # (conv2-BN + downsample-BN) bias, ReLU.
    acc = jnp.dot(x_ref[...], w_ref[...], preferred_element_type=jnp.float32)
    acc = acc + jnp.dot(rs_ref[...], wr_ref[...],
                        preferred_element_type=jnp.float32)
    acc = acc + b_ref[...]
    if relu:
        acc = jnp.maximum(acc, 0.0)
    o_ref[...] = acc.astype(o_ref.dtype)


def _maxpool_kernel(x_ref, o_ref):
    # x: (9, TM, C) -> max over the 9 taps -> (TM, C)
    o_ref[...] = jnp.max(x_ref[...].astype(jnp.float32), axis=0).astype(o_ref.dtype)


# ----------------------------------------------------------------------------
# im2col glue (plain JAX, bf16) + tile selection
# ----------------------------------------------------------------------------

def _extract_patches(x_nhwc, kh, kw, stride, pad):
    """im2col: (N*OH*OW, KH*KW*C) patches, (kh, kw, C) ordering."""
    if pad > 0:
        x_nhwc = jnp.pad(x_nhwc, ((0, 0), (pad, pad), (pad, pad), (0, 0)))
    N, H, W, C = x_nhwc.shape
    oh = (H - kh) // stride + 1
    ow = (W - kw) // stride + 1
    cols = []
    for i in range(kh):
        for j in range(kw):
            cols.append(
                x_nhwc[:, i:i + stride * (oh - 1) + 1:stride,
                          j:j + stride * (ow - 1) + 1:stride, :])
    p = jnp.stack(cols, axis=-2)                 # (N, oh, ow, kh*kw, C)
    return p.reshape(N * oh * ow, kh * kw * C), (N, oh, ow)


def _pick_tiles(M, oc_pad):
    """Pick (TM, M_pad, TN, n_oc) so that there are >= 2 parallel grid steps
    whenever possible (v7x has 2 TensorCores per chip)."""
    TN = 128 if oc_pad > 128 else oc_pad
    n_oc = oc_pad // TN
    TM = min(_TM_MAX, _round_up(M, 16))
    if n_oc == 1 and M > 16 and _round_up(M, TM) // TM < 2:
        TM = max(16, _round_up(TM // 2, 16))
    M_pad = _round_up(M, TM)
    return TM, M_pad, TN, n_oc


# ----------------------------------------------------------------------------
# Fused conv + BN(+residual)(+downsample)(+ReLU)
# ----------------------------------------------------------------------------

def fused_conv_bn(x_nhwc, cp, *, relu, residual=None, ds_x=None, ds_cp=None,
                  bias=None):
    """conv2d(no bias) + folded BN(eval) [+ residual | + fused 1x1 downsample]
    [+ ReLU] as one tiled Pallas call.  Returns channel-padded NHWC bf16."""
    x = x_nhwc.astype(jnp.bfloat16)   # cast BEFORE im2col (halves HBM traffic)
    patches, (N, oh, ow) = _extract_patches(
        x, cp['kh'], cp['kw'], cp['stride'], cp['pad'])
    M, K = patches.shape
    K_pad, OC_pad = cp['k_pad'], cp['oc_pad']

    TM, M_pad, TN, n_oc = _pick_tiles(M, OC_pad)
    if K_pad != K or M_pad != M:
        # K pad is explicit zeros (required for correctness); M pad rows are
        # zeros and are sliced off below.
        patches = jnp.pad(patches, ((0, M_pad - M), (0, K_pad - K)))

    if bias is None:
        bias = cp['bias']

    grid = (M_pad // TM, n_oc)
    x_spec = pl.BlockSpec((TM, K_pad), lambda i, j: (i, 0))
    w_spec = pl.BlockSpec((K_pad, TN), lambda i, j: (0, j))
    b_spec = pl.BlockSpec((1, TN), lambda i, j: (0, j))
    o_spec = pl.BlockSpec((TM, TN), lambda i, j: (i, j))
    out_shape = jax.ShapeDtypeStruct((M_pad, OC_pad), jnp.bfloat16)
    cparams = pltpu.CompilerParams(
        dimension_semantics=("parallel", "parallel"))

    if ds_cp is not None:
        # Fused 1x1 strided downsample residual.
        C_ds = ds_x.shape[-1]
        rs = ds_x.astype(jnp.bfloat16).reshape(M, C_ds)
        if M_pad != M:
            rs = jnp.pad(rs, ((0, M_pad - M), (0, 0)))
        rs_spec = pl.BlockSpec((TM, C_ds), lambda i, j: (i, 0))
        wr_spec = pl.BlockSpec((ds_cp['k_pad'], TN), lambda i, j: (0, j))
        out = pl.pallas_call(
            functools.partial(_conv_ds_kernel, relu=relu),
            out_shape=out_shape,
            grid=grid,
            in_specs=[x_spec, w_spec, b_spec, rs_spec, wr_spec],
            out_specs=o_spec,
            compiler_params=cparams,
        )(patches, cp['w'], bias, rs, ds_cp['w'])
    elif residual is not None:
        r = residual.astype(jnp.bfloat16).reshape(M, OC_pad)
        if M_pad != M:
            r = jnp.pad(r, ((0, M_pad - M), (0, 0)))
        r_spec = pl.BlockSpec((TM, TN), lambda i, j: (i, j))
        out = pl.pallas_call(
            functools.partial(_conv_res_kernel, relu=relu),
            out_shape=out_shape,
            grid=grid,
            in_specs=[x_spec, w_spec, b_spec, r_spec],
            out_specs=o_spec,
            compiler_params=cparams,
        )(patches, cp['w'], bias, r)
    else:
        out = pl.pallas_call(
            functools.partial(_conv_kernel, relu=relu),
            out_shape=out_shape,
            grid=grid,
            in_specs=[x_spec, w_spec, b_spec],
            out_specs=o_spec,
            compiler_params=cparams,
        )(patches, cp['w'], bias)

    if M_pad != M:
        out = out[:M]
    return out.reshape(N, oh, ow, OC_pad)


def maxpool_3x3_s2_p1(x_nhwc):
    """MaxPool2d(kernel=3, stride=2, padding=1) on the post-ReLU, channel-
    padded bf16 activation (zero spatial padding is equivalent to -inf here
    because all values are >= 0, and it keeps padded channels at exactly 0)."""
    xp = jnp.pad(x_nhwc, ((0, 0), (1, 1), (1, 1), (0, 0)))
    N, H, W, C = xp.shape
    oh = (H - 3) // 2 + 1
    ow = (W - 3) // 2 + 1
    cols = [xp[:, i:i + 2 * (oh - 1) + 1:2, j:j + 2 * (ow - 1) + 1:2, :]
            for i in range(3) for j in range(3)]
    M = N * oh * ow
    stacked = jnp.stack(cols, axis=0).reshape(9, M, C)

    TM = min(128, _round_up(M, 16))
    if M > 16 and _round_up(M, TM) // TM < 2:
        TM = max(16, _round_up(TM // 2, 16))
    M_pad = _round_up(M, TM)
    if M_pad != M:
        stacked = jnp.pad(stacked, ((0, 0), (0, M_pad - M), (0, 0)))

    out = pl.pallas_call(
        _maxpool_kernel,
        out_shape=jax.ShapeDtypeStruct((M_pad, C), jnp.bfloat16),
        grid=(M_pad // TM,),
        in_specs=[pl.BlockSpec((9, TM, C), lambda i: (0, i, 0))],
        out_specs=pl.BlockSpec((TM, C), lambda i: (i, 0)),
        compiler_params=pltpu.CompilerParams(dimension_semantics=("parallel",)),
    )(stacked)
    if M_pad != M:
        out = out[:M]
    return out.reshape(N, oh, ow, C)


# ----------------------------------------------------------------------------
# Deterministic parameter construction (ResNet18Conv4: conv1..layer3)
# ----------------------------------------------------------------------------

def _init_conv(key, oc, ic, kh, kw):
    fan_in = ic * kh * kw
    return (jax.random.normal(key, (oc, ic, kh, kw), jnp.float32)
            * (1.0 / np.sqrt(fan_in)))


def _init_bn(key, c):
    k1, k2, k3, k4 = jax.random.split(key, 4)
    return dict(
        gamma=jax.random.uniform(k1, (c,), jnp.float32, 0.5, 1.5),
        beta=jax.random.normal(k2, (c,), jnp.float32) * 0.1,
        mean=jax.random.normal(k3, (c,), jnp.float32) * 0.1,
        var=jax.random.uniform(k4, (c,), jnp.float32, 0.5, 1.5),
    )


def _init_basic_block(key, inplanes, planes, stride):
    keys = jax.random.split(key, 6)
    p = dict(
        conv1=_init_conv(keys[0], planes, inplanes, 3, 3),
        bn1=_init_bn(keys[1], planes),
        conv2=_init_conv(keys[2], planes, planes, 3, 3),
        bn2=_init_bn(keys[3], planes),
        stride=stride,
    )
    if stride != 1 or inplanes != planes:
        p['ds_conv'] = _init_conv(keys[4], planes, inplanes, 1, 1)
        p['ds_bn'] = _init_bn(keys[5], planes)
    return p


def init_resnet18_conv4(key):
    keys = jax.random.split(key, 8)
    return dict(
        conv1=_init_conv(keys[0], 64, 3, 7, 7),
        bn1=_init_bn(keys[1], 64),
        layer1=[_init_basic_block(keys[2], 64, 64, 1),
                _init_basic_block(keys[3], 64, 64, 1)],
        layer2=[_init_basic_block(keys[4], 64, 128, 2),
                _init_basic_block(keys[5], 128, 128, 1)],
        layer3=[_init_basic_block(keys[6], 128, 256, 2),
                _init_basic_block(keys[7], 256, 256, 1)],
    )


# ----------------------------------------------------------------------------
# One-time parameter preparation: fold BN scale into weights, pad per-tap to
# the channel-padded activation layout, pre-transpose / pad / bf16.
# ----------------------------------------------------------------------------

def _prep_conv_bn(w_oihw, bn, stride, pad, ic_pad, eps=1e-5):
    OC, IC, KH, KW = w_oihw.shape
    scale = bn['gamma'] / jnp.sqrt(bn['var'] + eps)           # (OC,)
    bias = bn['beta'] - bn['mean'] * scale                     # (OC,)
    w = jnp.transpose(w_oihw, (2, 3, 1, 0))                    # (KH, KW, IC, OC)
    w = w * scale[None, None, None, :]                         # fold BN scale
    if ic_pad > IC:
        w = jnp.pad(w, ((0, 0), (0, 0), (0, ic_pad - IC), (0, 0)))
    K = KH * KW * ic_pad
    K_pad = _round_up(K, 128)
    OC_pad = _round_up(OC, 128)
    w = w.reshape(K, OC)
    w = jnp.pad(w, ((0, K_pad - K), (0, OC_pad - OC))).astype(jnp.bfloat16)
    bias = jnp.pad(bias, (0, OC_pad - OC)).reshape(1, OC_pad).astype(jnp.float32)
    return dict(w=w, bias=bias, kh=KH, kw=KW, stride=stride, pad=pad,
                oc=OC, oc_pad=OC_pad, k=K, k_pad=K_pad, ic_pad=ic_pad)


def prepare_params(raw):
    p = {}
    c = 3  # conv1 reads the raw 3-channel input (K padded to 128 explicitly)
    p['conv1'] = _prep_conv_bn(raw['conv1'], raw['bn1'], stride=2, pad=3, ic_pad=c)
    c = p['conv1']['oc_pad']
    for name in ('layer1', 'layer2', 'layer3'):
        blocks = []
        for b in raw[name]:
            bp = {}
            bp['conv1'] = _prep_conv_bn(b['conv1'], b['bn1'],
                                        stride=b['stride'], pad=1, ic_pad=c)
            mid = bp['conv1']['oc_pad']
            bp['conv2'] = _prep_conv_bn(b['conv2'], b['bn2'],
                                        stride=1, pad=1, ic_pad=mid)
            if 'ds_conv' in b:
                bp['downsample'] = _prep_conv_bn(b['ds_conv'], b['ds_bn'],
                                                 stride=b['stride'], pad=0,
                                                 ic_pad=c)
                # combined bias for the fused conv2 + downsample epilogue
                bp['conv2_ds_bias'] = bp['conv2']['bias'] + bp['downsample']['bias']
            blocks.append(bp)
            c = bp['conv2']['oc_pad']
        p[name] = blocks
    return p


# ----------------------------------------------------------------------------
# Forward pass (matches Model -> ResNet18Conv4.forward)
# ----------------------------------------------------------------------------

def _basic_block_fwd(x, p):
    out = fused_conv_bn(x, p['conv1'], relu=True)
    if 'downsample' in p:
        s = p['downsample']['stride']
        ds_x = x[:, ::s, ::s, :]          # 1x1 stride-s conv input, pad=0
        return fused_conv_bn(out, p['conv2'], relu=True,
                             ds_x=ds_x, ds_cp=p['downsample'],
                             bias=p['conv2_ds_bias'])
    return fused_conv_bn(out, p['conv2'], relu=True, residual=x)


def model_forward(x_nchw, params):
    x = jnp.transpose(x_nchw, (0, 2, 3, 1))                   # -> NHWC
    x = fused_conv_bn(x, params['conv1'], relu=True)          # channel-padded bf16
    x = maxpool_3x3_s2_p1(x)
    for layer in ('layer1', 'layer2', 'layer3'):
        for blk in params[layer]:
            x = _basic_block_fwd(x, blk)
    oc_final = params['layer3'][-1]['conv2']['oc']
    x = x[..., :oc_final]                                      # no-op here (256==256)
    return jnp.transpose(x.astype(jnp.float32), (0, 3, 1, 2))  # -> NCHW f32


# ----------------------------------------------------------------------------

if __name__ == "__main__":
    key = jax.random.PRNGKey(0)
    pkey, xkey = jax.random.split(key)

    raw_params = init_resnet18_conv4(pkey)
    params = prepare_params(raw_params)

    # Small NCHW input consistent with the module (3 input channels).
    x = jax.random.normal(xkey, (2, 3, 32, 32), jnp.float32)

    fwd = jax.jit(functools.partial(model_forward, params=params))
    out = fwd(x)
    out = jax.block_until_ready(out)

    assert out.shape == (2, 256, 2, 2), out.shape
    assert bool(jnp.all(jnp.isfinite(out)))
    print("KERNEL_OK")
</pallas_src>

<mosaic_0001>
module attributes {stable_mosaic.version = 11 : i64} {
  func.func @_conv_kernel(%arg0: i32, %arg1: i32, %arg2: memref<256x256xbf16, #tpu.memory_space<vmem>>, %arg3: memref<256x128xbf16, #tpu.memory_space<vmem>>, %arg4: memref<1x128xf32, #tpu.memory_space<vmem>>, %arg5: memref<256x128xbf16, #tpu.memory_space<vmem>>) attributes {dimension_semantics = [#tpu.dimension_semantics<parallel>, #tpu.dimension_semantics<parallel>], iteration_bounds = array<i64: 2, 1>, scalar_prefetch = 0 : i64, scratch_operands = 0 : i64, tpu.core_type = #tpu.core_type<tc>, window_params = [{transform_indices = @transform_0, window_bounds = array<i64: 256, 256>}, {transform_indices = @transform_1, window_bounds = array<i64: 256, 128>}, {transform_indices = @transform_2, window_bounds = array<i64: 1, 128>}, {transform_indices = @transform_3, window_bounds = array<i64: 256, 128>}]} {
    %c0 = arith.constant 0 : index
    %c0_0 = arith.constant 0 : index
    %0 = vector.load %arg2[%c0, %c0_0] : memref<256x256xbf16, #tpu.memory_space<vmem>>, vector<256x256xbf16>
    %c0_1 = arith.constant 0 : index
    %c0_2 = arith.constant 0 : index
    %1 = vector.load %arg3[%c0_1, %c0_2] : memref<256x128xbf16, #tpu.memory_space<vmem>>, vector<256x128xbf16>
    %cst = arith.constant dense<0.000000e+00> : vector<256x128xf32>
    %2 = tpu.matmul %0, %1, %cst {dimension_numbers = #tpu.dot_dimension_numbers<[1], [0], [0], [1], [0, 0, 1, 1], [], []>} : vector<256x256xbf16>, vector<256x128xbf16>, vector<256x128xf32> -> vector<256x128xf32>
    %c0_3 = arith.constant 0 : index
    %c0_4 = arith.constant 0 : index
    %3 = vector.load %arg4[%c0_3, %c0_4] : memref<1x128xf32, #tpu.memory_space<vmem>>, vector<1x128xf32>
    %4 = vector.broadcast %3 : vector<1x128xf32> to vector<256x128xf32>
    %5 = arith.addf %2, %4 : vector<256x128xf32>
    %cst_5 = arith.constant 0.000000e+00 : f32
    %6 = vector.broadcast %cst_5 : f32 to vector<256x128xf32>
    %7 = arith.maximumf %5, %6 : vector<256x128xf32>
    %8 = arith.truncf %7 : vector<256x128xf32> to vector<256x128xbf16>
    %c0_6 = arith.constant 0 : index
    %c0_7 = arith.constant 0 : index
    %9 = vector.load %arg5[%c0_6, %c0_7] : memref<256x128xbf16, #tpu.memory_space<vmem>>, vector<256x128xbf16>
    tpu.vector_store %arg5[%c0_6, %c0_7], %8 {strides = array<i32>} : memref<256x128xbf16, #tpu.memory_space<vmem>>, vector<256x128xbf16>,
    return
  }
  func.func @transform_0(%arg0: i32, %arg1: i32) -> (i32, i32) {
    %c0_i32 = arith.constant 0 : i32
    %c0_i32_0 = arith.constant 0 : i32
    return %arg0, %c0_i32 : i32, i32
  }
  func.func @transform_1(%arg0: i32, %arg1: i32) -> (i32, i32) {
    %c0_i32 = arith.constant 0 : i32
    %c0_i32_0 = arith.constant 0 : i32
    return %c0_i32, %arg1 : i32, i32
  }
  func.func @transform_2(%arg0: i32, %arg1: i32) -> (i32, i32) {
    %c0_i32 = arith.constant 0 : i32
    %c0_i32_0 = arith.constant 0 : i32
    return %c0_i32, %arg1 : i32, i32
  }
  func.func @transform_3(%arg0: i32, %arg1: i32) -> (i32, i32) {
    %c0_i32 = arith.constant 0 : i32
    return %arg0, %arg1 : i32, i32
  }
}

module attributes {stable_mosaic.version = 11 : i64} {
  func.func @_maxpool_kernel(%arg0: i32, %arg1: memref<9x64x128xbf16, #tpu.memory_space<vmem>>, %arg2: memref<64x128xbf16, #tpu.memory_space<vmem>>) attributes {dimension_semantics = [#tpu.dimension_semantics<parallel>], iteration_bounds = array<i64: 2>, scalar_prefetch = 0 : i64, scratch_operands = 0 : i64, tpu.core_type = #tpu.core_type<tc>, window_params = [{transform_indices = @transform_0, window_bounds = array<i64: 9, 64, 128>}, {transform_indices = @transform_1, window_bounds = array<i64: 64, 128>}]} {
    %c0 = arith.constant 0 : index
    %c0_0 = arith.constant 0 : index
    %c0_1 = arith.constant 0 : index
    %0 = vector.load %arg1[%c0, %c0_0, %c0_1] : memref<9x64x128xbf16, #tpu.memory_space<vmem>>, vector<9x64x128xbf16>
    %1 = arith.extf %0 : vector<9x64x128xbf16> to vector<9x64x128xf32>
    %cst = arith.constant dense<0xFF800000> : vector<64x128xf32>
    %2 = vector.multi_reduction <maximumf>, %1, %cst [0] : vector<9x64x128xf32> to vector<64x128xf32>
    %3 = arith.truncf %2 : vector<64x128xf32> to vector<64x128xbf16>
    %c0_2 = arith.constant 0 : index
    %c0_3 = arith.constant 0 : index
    %4 = vector.load %arg2[%c0_2, %c0_3] : memref<64x128xbf16, #tpu.memory_space<vmem>>, vector<64x128xbf16>
    tpu.vector_store %arg2[%c0_2, %c0_3], %3 {strides = array<i32>} : memref<64x128xbf16, #tpu.memory_space<vmem>>, vector<64x128xbf16>,
    return
  }
  func.func @transform_0(%arg0: i32) -> (i32, i32, i32) {
    %c0_i32 = arith.constant 0 : i32
    %c0_i32_0 = arith.constant 0 : i32
    %c0_i32_1 = arith.constant 0 : i32
    return %c0_i32, %arg0, %c0_i32_0 : i32, i32, i32
  }
  func.func @transform_1(%arg0: i32) -> (i32, i32) {
    %c0_i32 = arith.constant 0 : i32
    %c0_i32_0 = arith.constant 0 : i32
    return %arg0, %c0_i32 : i32, i32
  }
}

module attributes {stable_mosaic.version = 11 : i64} {
  func.func @_conv_kernel(%arg0: i32, %arg1: i32, %arg2: memref<64x1152xbf16, #tpu.memory_space<vmem>>, %arg3: memref<1152x128xbf16, #tpu.memory_space<vmem>>, %arg4: memref<1x128xf32, #tpu.memory_space<vmem>>, %arg5: memref<64x128xbf16, #tpu.memory_space<vmem>>) attributes {dimension_semantics = [#tpu.dimension_semantics<parallel>, #tpu.dimension_semantics<parallel>], iteration_bounds = array<i64: 2, 1>, scalar_prefetch = 0 : i64, scratch_operands = 0 : i64, tpu.core_type = #tpu.core_type<tc>, window_params = [{transform_indices = @transform_0, window_bounds = array<i64: 64, 1152>}, {transform_indices = @transform_1, window_bounds = array<i64: 1152, 128>}, {transform_indices = @transform_2, window_bounds = array<i64: 1, 128>}, {transform_indices = @transform_3, window_bounds = array<i64: 64, 128>}]} {
    %c0 = arith.constant 0 : index
    %c0_0 = arith.constant 0 : index
    %0 = vector.load %arg2[%c0, %c0_0] : memref<64x1152xbf16, #tpu.memory_space<vmem>>, vector<64x1152xbf16>
    %c0_1 = arith.constant 0 : index
    %c0_2 = arith.constant 0 : index
    %1 = vector.load %arg3[%c0_1, %c0_2] : memref<1152x128xbf16, #tpu.memory_space<vmem>>, vector<1152x128xbf16>
    %cst = arith.constant dense<0.000000e+00> : vector<64x128xf32>
    %2 = tpu.matmul %0, %1, %cst {dimension_numbers = #tpu.dot_dimension_numbers<[1], [0], [0], [1], [0, 0, 1, 1], [], []>} : vector<64x1152xbf16>, vector<1152x128xbf16>, vector<64x128xf32> -> vector<64x128xf32>
    %c0_3 = arith.constant 0 : index
    %c0_4 = arith.constant 0 : index
    %3 = vector.load %arg4[%c0_3, %c0_4] : memref<1x128xf32, #tpu.memory_space<vmem>>, vector<1x128xf32>
    %4 = vector.broadcast %3 : vector<1x128xf32> to vector<64x128xf32>
    %5 = arith.addf %2, %4 : vector<64x128xf32>
    %cst_5 = arith.constant 0.000000e+00 : f32
    %6 = vector.broadcast %cst_5 : f32 to vector<64x128xf32>
    %7 = arith.maximumf %5, %6 : vector<64x128xf32>
    %8 = arith.truncf %7 : vector<64x128xf32> to vector<64x128xbf16>
    %c0_6 = arith.constant 0 : index
    %c0_7 = arith.constant 0 : index
    %9 = vector.load %arg5[%c0_6, %c0_7] : memref<64x128xbf16, #tpu.memory_space<vmem>>, vector<64x128xbf16>
    tpu.vector_store %arg5[%c0_6, %c0_7], %8 {strides = array<i32>} : memref<64x128xbf16, #tpu.memory_space<vmem>>, vector<64x128xbf16>,
    return
  }
  func.func @transform_0(%arg0: i32, %arg1: i32) -> (i32, i32) {
    %c0_i32 = arith.constant 0 : i32
    %c0_i32_0 = arith.constant 0 : i32
    return %arg0, %c0_i32 : i32, i32
  }
  func.func @transform_1(%arg0: i32, %arg1: i32) -> (i32, i32) {
    %c0_i32 = arith.constant 0 : i32
    %c0_i32_0 = arith.constant 0 : i32
    return %c0_i32, %arg1 : i32, i32
  }
  func.func @transform_2(%arg0: i32, %arg1: i32) -> (i32, i32) {
    %c0_i32 = arith.constant 0 : i32
    %c0_i32_0 = arith.constant 0 : i32
    return %c0_i32, %arg1 : i32, i32
  }
  func.func @transform_3(%arg0: i32, %arg1: i32) -> (i32, i32) {
    %c0_i32 = arith.constant 0 : i32
    return %arg0, %arg1 : i32, i32
  }
}

module attributes {stable_mosaic.version = 11 : i64} {
  func.func @_conv_res_kernel(%arg0: i32, %arg1: i32, %arg2: memref<64x1152xbf16, #tpu.memory_space<vmem>>, %arg3: memref<1152x128xbf16, #tpu.memory_space<vmem>>, %arg4: memref<1x128xf32, #tpu.memory_space<vmem>>, %arg5: memref<64x128xbf16, #tpu.memory_space<vmem>>, %arg6: memref<64x128xbf16, #tpu.memory_space<vmem>>) attributes {dimension_semantics = [#tpu.dimension_semantics<parallel>, #tpu.dimension_semantics<parallel>], iteration_bounds = array<i64: 2, 1>, scalar_prefetch = 0 : i64, scratch_operands = 0 : i64, tpu.core_type = #tpu.core_type<tc>, window_params = [{transform_indices = @transform_0, window_bounds = array<i64: 64, 1152>}, {transform_indices = @transform_1, window_bounds = array<i64: 1152, 128>}, {transform_indices = @transform_2, window_bounds = array<i64: 1, 128>}, {transform_indices = @transform_3, window_bounds = array<i64: 64, 128>}, {transform_indices = @transform_4, window_bounds = array<i64: 64, 128>}]} {
    %c0 = arith.constant 0 : index
    %c0_0 = arith.constant 0 : index
    %0 = vector.load %arg2[%c0, %c0_0] : memref<64x1152xbf16, #tpu.memory_space<vmem>>, vector<64x1152xbf16>
    %c0_1 = arith.constant 0 : index
    %c0_2 = arith.constant 0 : index
    %1 = vector.load %arg3[%c0_1, %c0_2] : memref<1152x128xbf16, #tpu.memory_space<vmem>>, vector<1152x128xbf16>
    %cst = arith.constant dense<0.000000e+00> : vector<64x128xf32>
    %2 = tpu.matmul %0, %1, %cst {dimension_numbers = #tpu.dot_dimension_numbers<[1], [0], [0], [1], [0, 0, 1, 1], [], []>} : vector<64x1152xbf16>, vector<1152x128xbf16>, vector<64x128xf32> -> vector<64x128xf32>
    %c0_3 = arith.constant 0 : index
    %c0_4 = arith.constant 0 : index
    %3 = vector.load %arg4[%c0_3, %c0_4] : memref<1x128xf32, #tpu.memory_space<vmem>>, vector<1x128xf32>
    %4 = vector.broadcast %3 : vector<1x128xf32> to vector<64x128xf32>
    %5 = arith.addf %2, %4 : vector<64x128xf32>
    %c0_5 = arith.constant 0 : index
    %c0_6 = arith.constant 0 : index
    %6 = vector.load %arg5[%c0_5, %c0_6] : memref<64x128xbf16, #tpu.memory_space<vmem>>, vector<64x128xbf16>
    %7 = arith.extf %6 : vector<64x128xbf16> to vector<64x128xf32>
    %8 = arith.addf %5, %7 : vector<64x128xf32>
    %cst_7 = arith.constant 0.000000e+00 : f32
    %9 = vector.broadcast %cst_7 : f32 to vector<64x128xf32>
    %10 = arith.maximumf %8, %9 : vector<64x128xf32>
    %11 = arith.truncf %10 : vector<64x128xf32> to vector<64x128xbf16>
    %c0_8 = arith.constant 0 : index
    %c0_9 = arith.constant 0 : index
    %12 = vector.load %arg6[%c0_8, %c0_9] : memref<64x128xbf16, #tpu.memory_space<vmem>>, vector<64x128xbf16>
    tpu.vector_store %arg6[%c0_8, %c0_9], %11 {strides = array<i32>} : memref<64x128xbf16, #tpu.memory_space<vmem>>, vector<64x128xbf16>,
    return
  }
  func.func @transform_0(%arg0: i32, %arg1: i32) -> (i32, i32) {
    %c0_i32 = arith.constant 0 : i32
    %c0_i32_0 = arith.constant 0 : i32
    return %arg0, %c0_i32 : i32, i32
  }
  func.func @transform_1(%arg0: i32, %arg1: i32) -> (i32, i32) {
    %c0_i32 = arith.constant 0 : i32
    %c0_i32_0 = arith.constant 0 : i32
    return %c0_i32, %arg1 : i32, i32
  }
  func.func @transform_2(%arg0: i32, %arg1: i32) -> (i32, i32) {
    %c0_i32 = arith.constant 0 : i32
    %c0_i32_0 = arith.constant 0 : i32
    return %c0_i32, %arg1 : i32, i32
  }
  func.func @transform_3(%arg0: i32, %arg1: i32) -> (i32, i32) {
    %c0_i32 = arith.constant 0 : i32
    return %arg0, %arg1 : i32, i32
  }
  func.func @transform_4(%arg0: i32, %arg1: i32) -> (i32, i32) {
    %c0_i32 = arith.constant 0 : i32
    return %arg0, %arg1 : i32, i32
  }
}

module attributes {stable_mosaic.version = 11 : i64} {
  func.func @_conv_kernel(%arg0: i32, %arg1: i32, %arg2: memref<16x1152xbf16, #tpu.memory_space<vmem>>, %arg3: memref<1152x128xbf16, #tpu.memory_space<vmem>>, %arg4: memref<1x128xf32, #tpu.memory_space<vmem>>, %arg5: memref<16x128xbf16, #tpu.memory_space<vmem>>) attributes {dimension_semantics = [#tpu.dimension_semantics<parallel>, #tpu.dimension_semantics<parallel>], iteration_bounds = array<i64: 2, 1>, scalar_prefetch = 0 : i64, scratch_operands = 0 : i64, tpu.core_type = #tpu.core_type<tc>, window_params = [{transform_indices = @transform_0, window_bounds = array<i64: 16, 1152>}, {transform_indices = @transform_1, window_bounds = array<i64: 1152, 128>}, {transform_indices = @transform_2, window_bounds = array<i64: 1, 128>}, {transform_indices = @transform_3, window_bounds = array<i64: 16, 128>}]} {
    %c0 = arith.constant 0 : index
    %c0_0 = arith.constant 0 : index
    %0 = vector.load %arg2[%c0, %c0_0] : memref<16x1152xbf16, #tpu.memory_space<vmem>>, vector<16x1152xbf16>
    %c0_1 = arith.constant 0 : index
    %c0_2 = arith.constant 0 : index
    %1 = vector.load %arg3[%c0_1, %c0_2] : memref<1152x128xbf16, #tpu.memory_space<vmem>>, vector<1152x128xbf16>
    %cst = arith.constant dense<0.000000e+00> : vector<16x128xf32>
    %2 = tpu.matmul %0, %1, %cst {dimension_numbers = #tpu.dot_dimension_numbers<[1], [0], [0], [1], [0, 0, 1, 1], [], []>} : vector<16x1152xbf16>, vector<1152x128xbf16>, vector<16x128xf32> -> vector<16x128xf32>
    %c0_3 = arith.constant 0 : index
    %c0_4 = arith.constant 0 : index
    %3 = vector.load %arg4[%c0_3, %c0_4] : memref<1x128xf32, #tpu.memory_space<vmem>>, vector<1x128xf32>
    %4 = vector.broadcast %3 : vector<1x128xf32> to vector<16x128xf32>
    %5 = arith.addf %2, %4 : vector<16x128xf32>
    %cst_5 = arith.constant 0.000000e+00 : f32
    %6 = vector.broadcast %cst_5 : f32 to vector<16x128xf32>
    %7 = arith.maximumf %5, %6 : vector<16x128xf32>
    %8 = arith.truncf %7 : vector<16x128xf32> to vector<16x128xbf16>
    %c0_6 = arith.constant 0 : index
    %c0_7 = arith.constant 0 : index
    %9 = vector.load %arg5[%c0_6, %c0_7] : memref<16x128xbf16, #tpu.memory_space<vmem>>, vector<16x128xbf16>
    tpu.vector_store %arg5[%c0_6, %c0_7], %8 {strides = array<i32>} : memref<16x128xbf16, #tpu.memory_space<vmem>>, vector<16x128xbf16>,
    return
  }
  func.func @transform_0(%arg0: i32, %arg1: i32) -> (i32, i32) {
    %c0_i32 = arith.constant 0 : i32
    %c0_i32_0 = arith.constant 0 : i32
    return %arg0, %c0_i32 : i32, i32
  }
  func.func @transform_1(%arg0: i32, %arg1: i32) -> (i32, i32) {
    %c0_i32 = arith.constant 0 : i32
    %c0_i32_0 = arith.constant 0 : i32
    return %c0_i32, %arg1 : i32, i32
  }
  func.func @transform_2(%arg0: i32, %arg1: i32) -> (i32, i32) {
    %c0_i32 = arith.constant 0 : i32
    %c0_i32_0 = arith.constant 0 : i32
    return %c0_i32, %arg1 : i32, i32
  }
  func.func @transform_3(%arg0: i32, %arg1: i32) -> (i32, i32) {
    %c0_i32 = arith.constant 0 : i32
    return %arg0, %arg1 : i32, i32
  }
}

module attributes {stable_mosaic.version = 11 : i64} {
  func.func @_conv_res_kernel(%arg0: i32, %arg1: i32, %arg2: memref<16x1152xbf16, #tpu.memory_space<vmem>>, %arg3: memref<1152x128xbf16, #tpu.memory_space<vmem>>, %arg4: memref<1x128xf32, #tpu.memory_space<vmem>>, %arg5: memref<16x128xbf16, #tpu.memory_space<vmem>>, %arg6: memref<16x128xbf16, #tpu.memory_space<vmem>>) attributes {dimension_semantics = [#tpu.dimension_semantics<parallel>, #tpu.dimension_semantics<parallel>], iteration_bounds = array<i64: 2, 1>, scalar_prefetch = 0 : i64, scratch_operands = 0 : i64, tpu.core_type = #tpu.core_type<tc>, window_params = [{transform_indices = @transform_0, window_bounds = array<i64: 16, 1152>}, {transform_indices = @transform_1, window_bounds = array<i64: 1152, 128>}, {transform_indices = @transform_2, window_bounds = array<i64: 1, 128>}, {transform_indices = @transform_3, window_bounds = array<i64: 16, 128>}, {transform_indices = @transform_4, window_bounds = array<i64: 16, 128>}]} {
    %c0 = arith.constant 0 : index
    %c0_0 = arith.constant 0 : index
    %0 = vector.load %arg2[%c0, %c0_0] : memref<16x1152xbf16, #tpu.memory_space<vmem>>, vector<16x1152xbf16>
    %c0_1 = arith.constant 0 : index
    %c0_2 = arith.constant 0 : index
    %1 = vector.load %arg3[%c0_1, %c0_2] : memref<1152x128xbf16, #tpu.memory_space<vmem>>, vector<1152x128xbf16>
    %cst = arith.constant dense<0.000000e+00> : vector<16x128xf32>
    %2 = tpu.matmul %0, %1, %cst {dimension_numbers = #tpu.dot_dimension_numbers<[1], [0], [0], [1], [0, 0, 1, 1], [], []>} : vector<16x1152xbf16>, vector<1152x128xbf16>, vector<16x128xf32> -> vector<16x128xf32>
    %c0_3 = arith.constant 0 : index
    %c0_4 = arith.constant 0 : index
    %3 = vector.load %arg4[%c0_3, %c0_4] : memref<1x128xf32, #tpu.memory_space<vmem>>, vector<1x128xf32>
    %4 = vector.broadcast %3 : vector<1x128xf32> to vector<16x128xf32>
    %5 = arith.addf %2, %4 : vector<16x128xf32>
    %c0_5 = arith.constant 0 : index
    %c0_6 = arith.constant 0 : index
    %6 = vector.load %arg5[%c0_5, %c0_6] : memref<16x128xbf16, #tpu.memory_space<vmem>>, vector<16x128xbf16>
    %7 = arith.extf %6 : vector<16x128xbf16> to vector<16x128xf32>
    %8 = arith.addf %5, %7 : vector<16x128xf32>
    %cst_7 = arith.constant 0.000000e+00 : f32
    %9 = vector.broadcast %cst_7 : f32 to vector<16x128xf32>
    %10 = arith.maximumf %8, %9 : vector<16x128xf32>
    %11 = arith.truncf %10 : vector<16x128xf32> to vector<16x128xbf16>
    %c0_8 = arith.constant 0 : index
    %c0_9 = arith.constant 0 : index
    %12 = vector.load %arg6[%c0_8, %c0_9] : memref<16x128xbf16, #tpu.memory_space<vmem>>, vector<16x128xbf16>
    tpu.vector_store %arg6[%c0_8, %c0_9], %11 {strides = array<i32>} : memref<16x128xbf16, #tpu.memory_space<vmem>>, vector<16x128xbf16>,
    return
  }
  func.func @transform_0(%arg0: i32, %arg1: i32) -> (i32, i32) {
    %c0_i32 = arith.constant 0 : i32
    %c0_i32_0 = arith.constant 0 : i32
    return %arg0, %c0_i32 : i32, i32
  }
  func.func @transform_1(%arg0: i32, %arg1: i32) -> (i32, i32) {
    %c0_i32 = arith.constant 0 : i32
    %c0_i32_0 = arith.constant 0 : i32
    return %c0_i32, %arg1 : i32, i32
  }
  func.func @transform_2(%arg0: i32, %arg1: i32) -> (i32, i32) {
    %c0_i32 = arith.constant 0 : i32
    %c0_i32_0 = arith.constant 0 : i32
    return %c0_i32, %arg1 : i32, i32
  }
  func.func @transform_3(%arg0: i32, %arg1: i32) -> (i32, i32) {
    %c0_i32 = arith.constant 0 : i32
    return %arg0, %arg1 : i32, i32
  }
  func.func @transform_4(%arg0: i32, %arg1: i32) -> (i32, i32) {
    %c0_i32 = arith.constant 0 : i32
    return %arg0, %arg1 : i32, i32
  }
}

module attributes {stable_mosaic.version = 11 : i64} {
  func.func @_conv_ds_kernel(%arg0: i32, %arg1: i32, %arg2: memref<16x1152xbf16, #tpu.memory_space<vmem>>, %arg3: memref<1152x128xbf16, #tpu.memory_space<vmem>>, %arg4: memref<1x128xf32, #tpu.memory_space<vmem>>, %arg5: memref<16x128xbf16, #tpu.memory_space<vmem>>, %arg6: memref<128x128xbf16, #tpu.memory_space<vmem>>, %arg7: memref<16x128xbf16, #tpu.memory_space<vmem>>) attributes {dimension_semantics = [#tpu.dimension_semantics<parallel>, #tpu.dimension_semantics<parallel>], iteration_bounds = array<i64: 2, 1>, scalar_prefetch = 0 : i64, scratch_operands = 0 : i64, tpu.core_type = #tpu.core_type<tc>, window_params = [{transform_indices = @transform_0, window_bounds = array<i64: 16, 1152>}, {transform_indices = @transform_1, window_bounds = array<i64: 1152, 128>}, {transform_indices = @transform_2, window_bounds = array<i64: 1, 128>}, {transform_indices = @transform_3, window_bounds = array<i64: 16, 128>}, {transform_indices = @transform_4, window_bounds = array<i64: 128, 128>}, {transform_indices = @transform_5, window_bounds = array<i64: 16, 128>}]} {
    %c0 = arith.constant 0 : index
    %c0_0 = arith.constant 0 : index
    %0 = vector.load %arg2[%c0, %c0_0] : memref<16x1152xbf16, #tpu.memory_space<vmem>>, vector<16x1152xbf16>
    %c0_1 = arith.constant 0 : index
    %c0_2 = arith.constant 0 : index
    %1 = vector.load %arg3[%c0_1, %c0_2] : memref<1152x128xbf16, #tpu.memory_space<vmem>>, vector<1152x128xbf16>
    %cst = arith.constant dense<0.000000e+00> : vector<16x128xf32>
    %2 = tpu.matmul %0, %1, %cst {dimension_numbers = #tpu.dot_dimension_numbers<[1], [0], [0], [1], [0, 0, 1, 1], [], []>} : vector<16x1152xbf16>, vector<1152x128xbf16>, vector<16x128xf32> -> vector<16x128xf32>
    %c0_3 = arith.constant 0 : index
    %c0_4 = arith.constant 0 : index
    %3 = vector.load %arg5[%c0_3, %c0_4] : memref<16x128xbf16, #tpu.memory_space<vmem>>, vector<16x128xbf16>
    %c0_5 = arith.constant 0 : index
    %c0_6 = arith.constant 0 : index
    %4 = vector.load %arg6[%c0_5, %c0_6] : memref<128x128xbf16, #tpu.memory_space<vmem>>, vector<128x128xbf16>
    %cst_7 = arith.constant dense<0.000000e+00> : vector<16x128xf32>
    %5 = tpu.matmul %3, %4, %cst_7 {dimension_numbers = #tpu.dot_dimension_numbers<[1], [0], [0], [1], [0, 0, 1, 1], [], []>} : vector<16x128xbf16>, vector<128x128xbf16>, vector<16x128xf32> -> vector<16x128xf32>
    %6 = arith.addf %2, %5 : vector<16x128xf32>
    %c0_8 = arith.constant 0 : index
    %c0_9 = arith.constant 0 : index
    %7 = vector.load %arg4[%c0_8, %c0_9] : memref<1x128xf32, #tpu.memory_space<vmem>>, vector<1x128xf32>
    %8 = vector.broadcast %7 : vector<1x128xf32> to vector<16x128xf32>
    %9 = arith.addf %6, %8 : vector<16x128xf32>
    %cst_10 = arith.constant 0.000000e+00 : f32
    %10 = vector.broadcast %cst_10 : f32 to vector<16x128xf32>
    %11 = arith.maximumf %9, %10 : vector<16x128xf32>
    %12 = arith.truncf %11 : vector<16x128xf32> to vector<16x128xbf16>
    %c0_11 = arith.constant 0 : index
    %c0_12 = arith.constant 0 : index
    %13 = vector.load %arg7[%c0_11, %c0_12] : memref<16x128xbf16, #tpu.memory_space<vmem>>, vector<16x128xbf16>
    tpu.vector_store %arg7[%c0_11, %c0_12], %12 {strides = array<i32>} : memref<16x128xbf16, #tpu.memory_space<vmem>>, vector<16x128xbf16>,
    return
  }
  func.func @transform_0(%arg0: i32, %arg1: i32) -> (i32, i32) {
    %c0_i32 = arith.constant 0 : i32
    %c0_i32_0 = arith.constant 0 : i32
    return %arg0, %c0_i32 : i32, i32
  }
  func.func @transform_1(%arg0: i32, %arg1: i32) -> (i32, i32) {
    %c0_i32 = arith.constant 0 : i32
    %c0_i32_0 = arith.constant 0 : i32
    return %c0_i32, %arg1 : i32, i32
  }
  func.func @transform_2(%arg0: i32, %arg1: i32) -> (i32, i32) {
    %c0_i32 = arith.constant 0 : i32
    %c0_i32_0 = arith.constant 0 : i32
    return %c0_i32, %arg1 : i32, i32
  }
  func.func @transform_3(%arg0: i32, %arg1: i32) -> (i32, i32) {
    %c0_i32 = arith.constant 0 : i32
    %c0_i32_0 = arith.constant 0 : i32
    return %arg0, %c0_i32 : i32, i32
  }
  func.func @transform_4(%arg0: i32, %arg1: i32) -> (i32, i32) {
    %c0_i32 = arith.constant 0 : i32
    %c0_i32_0 = arith.constant 0 : i32
    return %c0_i32, %arg1 : i32, i32
  }
  func.func @transform_5(%arg0: i32, %arg1: i32) -> (i32, i32) {
    %c0_i32 = arith.constant 0 : i32
    return %arg0, %arg1 : i32, i32
  }
}

module attributes {stable_mosaic.version = 11 : i64} {
  func.func @_conv_kernel(%arg0: i32, %arg1: i32, %arg2: memref<16x1152xbf16, #tpu.memory_space<vmem>>, %arg3: memref<1152x128xbf16, #tpu.memory_space<vmem>>, %arg4: memref<1x128xf32, #tpu.memory_space<vmem>>, %arg5: memref<16x128xbf16, #tpu.memory_space<vmem>>) attributes {dimension_semantics = [#tpu.dimension_semantics<parallel>, #tpu.dimension_semantics<parallel>], iteration_bounds = array<i64: 1, 2>, scalar_prefetch = 0 : i64, scratch_operands = 0 : i64, tpu.core_type = #tpu.core_type<tc>, window_params = [{transform_indices = @transform_0, window_bounds = array<i64: 16, 1152>}, {transform_indices = @transform_1, window_bounds = array<i64: 1152, 128>}, {transform_indices = @transform_2, window_bounds = array<i64: 1, 128>}, {transform_indices = @transform_3, window_bounds = array<i64: 16, 128>}]} {
    %c0 = arith.constant 0 : index
    %c0_0 = arith.constant 0 : index
    %0 = vector.load %arg2[%c0, %c0_0] : memref<16x1152xbf16, #tpu.memory_space<vmem>>, vector<16x1152xbf16>
    %c0_1 = arith.constant 0 : index
    %c0_2 = arith.constant 0 : index
    %1 = vector.load %arg3[%c0_1, %c0_2] : memref<1152x128xbf16, #tpu.memory_space<vmem>>, vector<1152x128xbf16>
    %cst = arith.constant dense<0.000000e+00> : vector<16x128xf32>
    %2 = tpu.matmul %0, %1, %cst {dimension_numbers = #tpu.dot_dimension_numbers<[1], [0], [0], [1], [0, 0, 1, 1], [], []>} : vector<16x1152xbf16>, vector<1152x128xbf16>, vector<16x128xf32> -> vector<16x128xf32>
    %c0_3 = arith.constant 0 : index
    %c0_4 = arith.constant 0 : index
    %3 = vector.load %arg4[%c0_3, %c0_4] : memref<1x128xf32, #tpu.memory_space<vmem>>, vector<1x128xf32>
    %4 = vector.broadcast %3 : vector<1x128xf32> to vector<16x128xf32>
    %5 = arith.addf %2, %4 : vector<16x128xf32>
    %cst_5 = arith.constant 0.000000e+00 : f32
    %6 = vector.broadcast %cst_5 : f32 to vector<16x128xf32>
    %7 = arith.maximumf %5, %6 : vector<16x128xf32>
    %8 = arith.truncf %7 : vector<16x128xf32> to vector<16x128xbf16>
    %c0_6 = arith.constant 0 : index
    %c0_7 = arith.constant 0 : index
    %9 = vector.load %arg5[%c0_6, %c0_7] : memref<16x128xbf16, #tpu.memory_space<vmem>>, vector<16x128xbf16>
    tpu.vector_store %arg5[%c0_6, %c0_7], %8 {strides = array<i32>} : memref<16x128xbf16, #tpu.memory_space<vmem>>, vector<16x128xbf16>,
    return
  }
  func.func @transform_0(%arg0: i32, %arg1: i32) -> (i32, i32) {
    %c0_i32 = arith.constant 0 : i32
    %c0_i32_0 = arith.constant 0 : i32
    return %arg0, %c0_i32 : i32, i32
  }
  func.func @transform_1(%arg0: i32, %arg1: i32) -> (i32, i32) {
    %c0_i32 = arith.constant 0 : i32
    %c0_i32_0 = arith.constant 0 : i32
    return %c0_i32, %arg1 : i32, i32
  }
  func.func @transform_2(%arg0: i32, %arg1: i32) -> (i32, i32) {
    %c0_i32 = arith.constant 0 : i32
    %c0_i32_0 = arith.constant 0 : i32
    return %c0_i32, %arg1 : i32, i32
  }
  func.func @transform_3(%arg0: i32, %arg1: i32) -> (i32, i32) {
    %c0_i32 = arith.constant 0 : i32
    return %arg0, %arg1 : i32, i32
  }
}

module attributes {stable_mosaic.version = 11 : i64} {
  func.func @_conv_kernel(%arg0: i32, %arg1: i32, %arg2: memref<16x2304xbf16, #tpu.memory_space<vmem>>, %arg3: memref<2304x128xbf16, #tpu.memory_space<vmem>>, %arg4: memref<1x128xf32, #tpu.memory_space<vmem>>, %arg5: memref<16x128xbf16, #tpu.memory_space<vmem>>) attributes {dimension_semantics = [#tpu.dimension_semantics<parallel>, #tpu.dimension_semantics<parallel>], iteration_bounds = array<i64: 1, 2>, scalar_prefetch = 0 : i64, scratch_operands = 0 : i64, tpu.core_type = #tpu.core_type<tc>, window_params = [{transform_indices = @transform_0, window_bounds = array<i64: 16, 2304>}, {transform_indices = @transform_1, window_bounds = array<i64: 2304, 128>}, {transform_indices = @transform_2, window_bounds = array<i64: 1, 128>}, {transform_indices = @transform_3, window_bounds = array<i64: 16, 128>}]} {
    %c0 = arith.constant 0 : index
    %c0_0 = arith.constant 0 : index
    %0 = vector.load %arg2[%c0, %c0_0] : memref<16x2304xbf16, #tpu.memory_space<vmem>>, vector<16x2304xbf16>
    %c0_1 = arith.constant 0 : index
    %c0_2 = arith.constant 0 : index
    %1 = vector.load %arg3[%c0_1, %c0_2] : memref<2304x128xbf16, #tpu.memory_space<vmem>>, vector<2304x128xbf16>
    %cst = arith.constant dense<0.000000e+00> : vector<16x128xf32>
    %2 = tpu.matmul %0, %1, %cst {dimension_numbers = #tpu.dot_dimension_numbers<[1], [0], [0], [1], [0, 0, 1, 1], [], []>} : vector<16x2304xbf16>, vector<2304x128xbf16>, vector<16x128xf32> -> vector<16x128xf32>
    %c0_3 = arith.constant 0 : index
    %c0_4 = arith.constant 0 : index
    %3 = vector.load %arg4[%c0_3, %c0_4] : memref<1x128xf32, #tpu.memory_space<vmem>>, vector<1x128xf32>
    %4 = vector.broadcast %3 : vector<1x128xf32> to vector<16x128xf32>
    %5 = arith.addf %2, %4 : vector<16x128xf32>
    %cst_5 = arith.constant 0.000000e+00 : f32
    %6 = vector.broadcast %cst_5 : f32 to vector<16x128xf32>
    %7 = arith.maximumf %5, %6 : vector<16x128xf32>
    %8 = arith.truncf %7 : vector<16x128xf32> to vector<16x128xbf16>
    %c0_6 = arith.constant 0 : index
    %c0_7 = arith.constant 0 : index
    %9 = vector.load %arg5[%c0_6, %c0_7] : memref<16x128xbf16, #tpu.memory_space<vmem>>, vector<16x128xbf16>
    tpu.vector_store %arg5[%c0_6, %c0_7], %8 {strides = array<i32>} : memref<16x128xbf16, #tpu.memory_space<vmem>>, vector<16x128xbf16>,
    return
  }
  func.func @transform_0(%arg0: i32, %arg1: i32) -> (i32, i32) {
    %c0_i32 = arith.constant 0 : i32
    %c0_i32_0 = arith.constant 0 : i32
    return %arg0, %c0_i32 : i32, i32
  }
  func.func @transform_1(%arg0: i32, %arg1: i32) -> (i32, i32) {
    %c0_i32 = arith.constant 0 : i32
    %c0_i32_0 = arith.constant 0 : i32
    return %c0_i32, %arg1 : i32, i32
  }
  func.func @transform_2(%arg0: i32, %arg1: i32) -> (i32, i32) {
    %c0_i32 = arith.constant 0 : i32
    %c0_i32_0 = arith.constant 0 : i32
    return %c0_i32, %arg1 : i32, i32
  }
  func.func @transform_3(%arg0: i32, %arg1: i32) -> (i32, i32) {
    %c0_i32 = arith.constant 0 : i32
    return %arg0, %arg1 : i32, i32
  }
}

module attributes {stable_mosaic.version = 11 : i64} {
  func.func @_conv_ds_kernel(%arg0: i32, %arg1: i32, %arg2: memref<16x2304xbf16, #tpu.memory_space<vmem>>, %arg3: memref<2304x128xbf16, #tpu.memory_space<vmem>>, %arg4: memref<1x128xf32, #tpu.memory_space<vmem>>, %arg5: memref<16x128xbf16, #tpu.memory_space<vmem>>, %arg6: memref<128x128xbf16, #tpu.memory_space<vmem>>, %arg7: memref<16x128xbf16, #tpu.memory_space<vmem>>) attributes {dimension_semantics = [#tpu.dimension_semantics<parallel>, #tpu.dimension_semantics<parallel>], iteration_bounds = array<i64: 1, 2>, scalar_prefetch = 0 : i64, scratch_operands = 0 : i64, tpu.core_type = #tpu.core_type<tc>, window_params = [{transform_indices = @transform_0, window_bounds = array<i64: 16, 2304>}, {transform_indices = @transform_1, window_bounds = array<i64: 2304, 128>}, {transform_indices = @transform_2, window_bounds = array<i64: 1, 128>}, {transform_indices = @transform_3, window_bounds = array<i64: 16, 128>}, {transform_indices = @transform_4, window_bounds = array<i64: 128, 128>}, {transform_indices = @transform_5, window_bounds = array<i64: 16, 128>}]} {
    %c0 = arith.constant 0 : index
    %c0_0 = arith.constant 0 : index
    %0 = vector.load %arg2[%c0, %c0_0] : memref<16x2304xbf16, #tpu.memory_space<vmem>>, vector<16x2304xbf16>
    %c0_1 = arith.constant 0 : index
    %c0_2 = arith.constant 0 : index
    %1 = vector.load %arg3[%c0_1, %c0_2] : memref<2304x128xbf16, #tpu.memory_space<vmem>>, vector<2304x128xbf16>
    %cst = arith.constant dense<0.000000e+00> : vector<16x128xf32>
    %2 = tpu.matmul %0, %1, %cst {dimension_numbers = #tpu.dot_dimension_numbers<[1], [0], [0], [1], [0, 0, 1, 1], [], []>} : vector<16x2304xbf16>, vector<2304x128xbf16>, vector<16x128xf32> -> vector<16x128xf32>
    %c0_3 = arith.constant 0 : index
    %c0_4 = arith.constant 0 : index
    %3 = vector.load %arg5[%c0_3, %c0_4] : memref<16x128xbf16, #tpu.memory_space<vmem>>, vector<16x128xbf16>
    %c0_5 = arith.constant 0 : index
    %c0_6 = arith.constant 0 : index
    %4 = vector.load %arg6[%c0_5, %c0_6] : memref<128x128xbf16, #tpu.memory_space<vmem>>, vector<128x128xbf16>
    %cst_7 = arith.constant dense<0.000000e+00> : vector<16x128xf32>
    %5 = tpu.matmul %3, %4, %cst_7 {dimension_numbers = #tpu.dot_dimension_numbers<[1], [0], [0], [1], [0, 0, 1, 1], [], []>} : vector<16x128xbf16>, vector<128x128xbf16>, vector<16x128xf32> -> vector<16x128xf32>
    %6 = arith.addf %2, %5 : vector<16x128xf32>
    %c0_8 = arith.constant 0 : index
    %c0_9 = arith.constant 0 : index
    %7 = vector.load %arg4[%c0_8, %c0_9] : memref<1x128xf32, #tpu.memory_space<vmem>>, vector<1x128xf32>
    %8 = vector.broadcast %7 : vector<1x128xf32> to vector<16x128xf32>
    %9 = arith.addf %6, %8 : vector<16x128xf32>
    %cst_10 = arith.constant 0.000000e+00 : f32
    %10 = vector.broadcast %cst_10 : f32 to vector<16x128xf32>
    %11 = arith.maximumf %9, %10 : vector<16x128xf32>
    %12 = arith.truncf %11 : vector<16x128xf32> to vector<16x128xbf16>
    %c0_11 = arith.constant 0 : index
    %c0_12 = arith.constant 0 : index
    %13 = vector.load %arg7[%c0_11, %c0_12] : memref<16x128xbf16, #tpu.memory_space<vmem>>, vector<16x128xbf16>
    tpu.vector_store %arg7[%c0_11, %c0_12], %12 {strides = array<i32>} : memref<16x128xbf16, #tpu.memory_space<vmem>>, vector<16x128xbf16>,
    return
  }
  func.func @transform_0(%arg0: i32, %arg1: i32) -> (i32, i32) {
    %c0_i32 = arith.constant 0 : i32
    %c0_i32_0 = arith.constant 0 : i32
    return %arg0, %c0_i32 : i32, i32
  }
  func.func @transform_1(%arg0: i32, %arg1: i32) -> (i32, i32) {
    %c0_i32 = arith.constant 0 : i32
    %c0_i32_0 = arith.constant 0 : i32
    return %c0_i32, %arg1 : i32, i32
  }
  func.func @transform_2(%arg0: i32, %arg1: i32) -> (i32, i32) {
    %c0_i32 = arith.constant 0 : i32
    %c0_i32_0 = arith.constant 0 : i32
    return %c0_i32, %arg1 : i32, i32
  }
  func.func @transform_3(%arg0: i32, %arg1: i32) -> (i32, i32) {
    %c0_i32 = arith.constant 0 : i32
    %c0_i32_0 = arith.constant 0 : i32
    return %arg0, %c0_i32 : i32, i32
  }
  func.func @transform_4(%arg0: i32, %arg1: i32) -> (i32, i32) {
    %c0_i32 = arith.constant 0 : i32
    %c0_i32_0 = arith.constant 0 : i32
    return %c0_i32, %arg1 : i32, i32
  }
  func.func @transform_5(%arg0: i32, %arg1: i32) -> (i32, i32) {
    %c0_i32 = arith.constant 0 : i32
    return %arg0, %arg1 : i32, i32
  }
}

module attributes {stable_mosaic.version = 11 : i64} {
  func.func @_conv_res_kernel(%arg0: i32, %arg1: i32, %arg2: memref<16x2304xbf16, #tpu.memory_space<vmem>>, %arg3: memref<2304x128xbf16, #tpu.memory_space<vmem>>, %arg4: memref<1x128xf32, #tpu.memory_space<vmem>>, %arg5: memref<16x128xbf16, #tpu.memory_space<vmem>>, %arg6: memref<16x128xbf16, #tpu.memory_space<vmem>>) attributes {dimension_semantics = [#tpu.dimension_semantics<parallel>, #tpu.dimension_semantics<parallel>], iteration_bounds = array<i64: 1, 2>, scalar_prefetch = 0 : i64, scratch_operands = 0 : i64, tpu.core_type = #tpu.core_type<tc>, window_params = [{transform_indices = @transform_0, window_bounds = array<i64: 16, 2304>}, {transform_indices = @transform_1, window_bounds = array<i64: 2304, 128>}, {transform_indices = @transform_2, window_bounds = array<i64: 1, 128>}, {transform_indices = @transform_3, window_bounds = array<i64: 16, 128>}, {transform_indices = @transform_4, window_bounds = array<i64: 16, 128>}]} {
    %c0 = arith.constant 0 : index
    %c0_0 = arith.constant 0 : index
    %0 = vector.load %arg2[%c0, %c0_0] : memref<16x2304xbf16, #tpu.memory_space<vmem>>, vector<16x2304xbf16>
    %c0_1 = arith.constant 0 : index
    %c0_2 = arith.constant 0 : index
    %1 = vector.load %arg3[%c0_1, %c0_2] : memref<2304x128xbf16, #tpu.memory_space<vmem>>, vector<2304x128xbf16>
    %cst = arith.constant dense<0.000000e+00> : vector<16x128xf32>
    %2 = tpu.matmul %0, %1, %cst {dimension_numbers = #tpu.dot_dimension_numbers<[1], [0], [0], [1], [0, 0, 1, 1], [], []>} : vector<16x2304xbf16>, vector<2304x128xbf16>, vector<16x128xf32> -> vector<16x128xf32>
    %c0_3 = arith.constant 0 : index
    %c0_4 = arith.constant 0 : index
    %3 = vector.load %arg4[%c0_3, %c0_4] : memref<1x128xf32, #tpu.memory_space<vmem>>, vector<1x128xf32>
    %4 = vector.broadcast %3 : vector<1x128xf32> to vector<16x128xf32>
    %5 = arith.addf %2, %4 : vector<16x128xf32>
    %c0_5 = arith.constant 0 : index
    %c0_6 = arith.constant 0 : index
    %6 = vector.load %arg5[%c0_5, %c0_6] : memref<16x128xbf16, #tpu.memory_space<vmem>>, vector<16x128xbf16>
    %7 = arith.extf %6 : vector<16x128xbf16> to vector<16x128xf32>
    %8 = arith.addf %5, %7 : vector<16x128xf32>
    %cst_7 = arith.constant 0.000000e+00 : f32
    %9 = vector.broadcast %cst_7 : f32 to vector<16x128xf32>
    %10 = arith.maximumf %8, %9 : vector<16x128xf32>
    %11 = arith.truncf %10 : vector<16x128xf32> to vector<16x128xbf16>
    %c0_8 = arith.constant 0 : index
    %c0_9 = arith.constant 0 : index
    %12 = vector.load %arg6[%c0_8, %c0_9] : memref<16x128xbf16, #tpu.memory_space<vmem>>, vector<16x128xbf16>
    tpu.vector_store %arg6[%c0_8, %c0_9], %11 {strides = array<i32>} : memref<16x128xbf16, #tpu.memory_space<vmem>>, vector<16x128xbf16>,
    return
  }
  func.func @transform_0(%arg0: i32, %arg1: i32) -> (i32, i32) {
    %c0_i32 = arith.constant 0 : i32
    %c0_i32_0 = arith.constant 0 : i32
    return %arg0, %c0_i32 : i32, i32
  }
  func.func @transform_1(%arg0: i32, %arg1: i32) -> (i32, i32) {
    %c0_i32 = arith.constant 0 : i32
    %c0_i32_0 = arith.constant 0 : i32
    return %c0_i32, %arg1 : i32, i32
  }
  func.func @transform_2(%arg0: i32, %arg1: i32) -> (i32, i32) {
    %c0_i32 = arith.constant 0 : i32
    %c0_i32_0 = arith.constant 0 : i32
    return %c0_i32, %arg1 : i32, i32
  }
  func.func @transform_3(%arg0: i32, %arg1: i32) -> (i32, i32) {
    %c0_i32 = arith.constant 0 : i32
    return %arg0, %arg1 : i32, i32
  }
  func.func @transform_4(%arg0: i32, %arg1: i32) -> (i32, i32) {
    %c0_i32 = arith.constant 0 : i32
    return %arg0, %arg1 : i32, i32
  }
}

</mosaic_0001>

<bundles_post_ra>
// kernel: model_forward.14
= control target key start
LH: loop header
LB: loop body
LE: loop exit
PB: predicated region body
PF: predicated region fallthrough
CT: control target
= control target key end

     0   :  { %s1494_s12 = smov 0   ;;  %s1496_s13 = smov 0   ;;  %s1668_s0 = inlined_call_operand.vmem [shape: bf16[512,256], index: 0, kind: input, shape index: {}]   ;;  %s1669_s1 = inlined_call_operand.vmem [shape: bf16[256,128], index: 1, kind: input, shape index: {}]   ;;  %s1670_s2 = inlined_call_operand.vmem [shape: f32[1,128], index: 2, kind: input, shape index: {}]   ;;  %s1671_s3 = inlined_call_operand.vmem [shape: bf16[512,128], index: 3, kind: output, shape index: {}]  }
   0x1   :  { %s1498_s14 = smov 0  }
   0x2 LB: > { %s25_s15 = sadd.s32 1, %s1468_s13  ;;  %p1017_p0 = scmp.ge.s32.totalorder %s1472_s14, 1  ;;  %s1472_s14 = sphi %s1498_s14, %s13_s14   ;;  %s1468_s13 = sphi %s1496_s13, %s1673_s13   ;;  %s1464_s12 = sphi %s1494_s12, %s1672_s12  }
   0x3   : > { %p27_p1 = scmp.ge.s32.totalorder %s25_s15, 2  ;;  %p170_p2 = scmp.lt.s32.totalorder %s1472_s14, 3 }
   0x5   : > { %s1675_s15 = smov (%p27_p1, %s25_s15), 0  ;;  %p171_p3 = pnand %p1017_p0, %p170_p2 }
   0x6   : > { %s1018_s18 = sshll.u32 (!%p171_p3), %s1464_s12, 5 }
   0x7   : > { %174 = sbr.rel (%p171_p3) target bundleno = 309 (0x135), region = 32  ;;  %p206_p4 = scmp.lt.s32.totalorder (!%p171_p3), %s1018_s18, 63 }
   0xc   : > { %v1386_v0 = vld [vmem:[%s1669_s1 + $0x78] sm:$0xff]   ;;  %v1388_v2 = vld [vmem:[%s1669_s1 + $0x70] sm:$0xff]   ;;  %v1390_v4 = vld [vmem:[%s1669_s1 + $0x68] sm:$0xff]   ;;  %s1677_s18 = smov (!%p206_p4, %s1018_s18), 63 }
   0xd   : > { %v1387_v1 = vld [vmem:[%s1669_s1 + $0x38] sm:$0xff]   ;;  %1234 = vmatprep.subr.bf16.mxu0 %v1386_v0  ;;  %1346 = vmatprep.subr.bf16.mxu1 %v1386_v0  ;;  %v1389_v3 = vld [vmem:[%s1669_s1 + $0x30] sm:$0xff]   ;;  %v1391_v5 = vld [vmem:[%s1669_s1 + $0x28] sm:$0xff]   ;;  %s1106_s6 = sshll.u32 %s1677_s18, 3  ;;  %s1022_s5 = sshll.u32 %s1677_s18, 2 }
   0xe   : > { %1235 = vmatpush3.bf16.msra.mxu0 %v1387_v1  ;;  %1354 = vmatpush3.bf16.msra.mxu1 %v1387_v1  ;;  %v1392_v6 = vld [vmem:[%s1669_s1 + $0x60] sm:$0xff]   ;;  %v1394_v8 = vld [vmem:[%s1669_s1 + $0x58] sm:$0xff]   ;;  %s1545_s11 = scalar_lea.vmem %s1668_s0, %s1106_s6  ;;  %v1396_v10 = vld [vmem:[%s1669_s1 + $0x50] sm:$0xff]   ;;  %s1613_s8 = scalar_lea.vmem %s1671_s3, %s1022_s5 }
   0xf   : > { %1236 = vmatprep.subr.bf16.mxu0 %v1388_v2  ;;  %1347 = vmatprep.subr.bf16.mxu1 %v1388_v2  ;;  %v1393_v7 = vld [vmem:[%s1669_s1 + $0x20] sm:$0xff]   ;;  %v1395_v9 = vld [vmem:[%s1669_s1 + $0x18] sm:$0xff]   ;;  %v1397_v13 = vld [vmem:[%s1669_s1 + $0x10] sm:$0xff]  }
  0x10   : > { %v1404_v11 = vld [vmem:[%s1545_s11 + $0x4] ss:$8 sps:$4 sm:$0xff]   ;;  %v1402_v18 = vld [vmem:[%s1545_s11] ss:$8 sps:$4 sm:$0xff]   ;;  %v1408_v20 = vld [vmem:[%s1545_s11 + $0x14] ss:$8 sps:$4 sm:$0xff]  }
  0x11   : > { %v1407_v12 = vld [vmem:[%s1545_s11 + $0x84] ss:$8 sps:$4 sm:$0xff]   ;;  %588 = vmatprep.mubr.bf16.mxu0 %v1404_v11  ;;  %v1405_v19 = vld [vmem:[%s1545_s11 + $0x80] ss:$8 sps:$4 sm:$0xff]   ;;  %v1410_v21 = vld [vmem:[%s1545_s11 + $0x94] ss:$8 sps:$4 sm:$0xff]  }
  0x12   : > { %1237 = vmatpush3.bf16.msra.mxu0 %v1389_v3  ;;  %1355 = vmatpush3.bf16.msra.mxu1 %v1389_v3  ;;  %v1398_v14 = vld [vmem:[%s1669_s1 + $0x48] sm:$0xff]   ;;  %v1400_v16 = vld [vmem:[%s1669_s1 + $0x40] sm:$0xff]   ;;  %v1412_v22 = vld [vmem:[%s1545_s11 + $0x10] ss:$8 sps:$4 sm:$0xff]  }
  0x13   : > { %1238 = vmatprep.subr.bf16.mxu0 %v1390_v4  ;;  %1348 = vmatprep.subr.bf16.mxu1 %v1390_v4  ;;  %v1399_v15 = vld [vmem:[%s1669_s1 + $0x8] sm:$0xff]   ;;  %v1401_v17 = vld [vmem:[%s1669_s1] sm:$0xff]   ;;  %v1413_v23 = vld [vmem:[%s1545_s11 + $0x90] ss:$8 sps:$4 sm:$0xff]  }
  0x14   : > { %652 = vmatprep.mubr.bf16.mxu1 %v1407_v12  ;;  %v1414_v24 = vld [vmem:[%s1545_s11 + $0x24] ss:$8 sps:$4 sm:$0xff]   ;;  %v1418_v26 = vld [vmem:[%s1545_s11 + $0x20] ss:$8 sps:$4 sm:$0xff]   ;;  %v1420_v28 = vld [vmem:[%s1545_s11 + $0x34] ss:$8 sps:$4 sm:$0xff]  }
  0x15   : > { %v1416_v25 = vld [vmem:[%s1545_s11 + $0xa4] ss:$8 sps:$4 sm:$0xff]   ;;  %v1419_v27 = vld [vmem:[%s1545_s11 + $0xa0] ss:$8 sps:$4 sm:$0xff]   ;;  %v1422_v29 = vld [vmem:[%s1545_s11 + $0xb4] ss:$8 sps:$4 sm:$0xff]  }
  0x16   : > { %1239 = vmatpush3.bf16.msra.mxu0 %v1391_v5  ;;  %1356 = vmatpush3.bf16.msra.mxu1 %v1391_v5  ;;  %v1424_v30 = vld [vmem:[%s1545_s11 + $0x30] ss:$8 sps:$4 sm:$0xff]   ;;  %v1426_v32 = vld [vmem:[%s1545_s11 + $0x44] ss:$8 sps:$4 sm:$0xff]   ;;  %v1430_v34 = vld [vmem:[%s1545_s11 + $0x40] ss:$8 sps:$4 sm:$0xff]  }
  0x17   : > { %1240 = vmatprep.subr.bf16.mxu0 %v1392_v6  ;;  %1349 = vmatprep.subr.bf16.mxu1 %v1392_v6  ;;  %v1425_v31 = vld [vmem:[%s1545_s11 + $0xb0] ss:$8 sps:$4 sm:$0xff]   ;;  %v1428_v33 = vld [vmem:[%s1545_s11 + $0xc4] ss:$8 sps:$4 sm:$0xff]   ;;  %v1431_v35 = vld [vmem:[%s1545_s11 + $0xc0] ss:$8 sps:$4 sm:$0xff]  }
  0x18   : > { %v1432_v36 = vld [vmem:[%s1545_s11 + $0x54] ss:$8 sps:$4 sm:$0xff]   ;;  %v1436_v38 = vld [vmem:[%s1545_s11 + $0x50] ss:$8 sps:$4 sm:$0xff]   ;;  %v1438_v40 = vld [vmem:[%s1545_s11 + $0x64] ss:$8 sps:$4 sm:$0xff]  }
  0x19   : > { %v1434_v37 = vld [vmem:[%s1545_s11 + $0xd4] ss:$8 sps:$4 sm:$0xff]   ;;  %v1437_v39 = vld [vmem:[%s1545_s11 + $0xd0] ss:$8 sps:$4 sm:$0xff]   ;;  %v1440_v41 = vld [vmem:[%s1545_s11 + $0xe4] ss:$8 sps:$4 sm:$0xff]  }
  0x1a   : > { %1241 = vmatpush3.bf16.msra.mxu0 %v1393_v7  ;;  %1357 = vmatpush3.bf16.msra.mxu1 %v1393_v7  ;;  %v1442_v42 = vld [vmem:[%s1545_s11 + $0x60] ss:$8 sps:$4 sm:$0xff]   ;;  %v1444_v44 = vld [vmem:[%s1545_s11 + $0x74] ss:$8 sps:$4 sm:$0xff]   ;;  %v1448_v46 = vld [vmem:[%s1545_s11 + $0x70] ss:$8 sps:$4 sm:$0xff]  }
  0x1b   : > { %1242 = vmatprep.subr.bf16.mxu0 %v1394_v8  ;;  %1350 = vmatprep.subr.bf16.mxu1 %v1394_v8  ;;  %v1443_v43 = vld [vmem:[%s1545_s11 + $0xe0] ss:$8 sps:$4 sm:$0xff]   ;;  %v1446_v45 = vld [vmem:[%s1545_s11 + $0xf4] ss:$8 sps:$4 sm:$0xff]   ;;  %v1449_v47 = vld [vmem:[%s1545_s11 + $0xf0] ss:$8 sps:$4 sm:$0xff]  }
  0x1c   : > { %v1603_v52 = vld [vmem:[%s1670_s2] ss:$0 sm:$0xff] }
  0x1e   : > { %1243 = vmatpush3.bf16.msra.mxu0 %v1395_v9  ;;  %1358 = vmatpush3.bf16.msra.mxu1 %v1395_v9 }
  0x1f   : > { %1244 = vmatprep.subr.bf16.mxu0 %v1396_v10  ;;  %1351 = vmatprep.subr.bf16.mxu1 %v1396_v10 }
  0x22   : > { %1245 = vmatpush3.bf16.msra.mxu0 %v1397_v13  ;;  %1359 = vmatpush3.bf16.msra.mxu1 %v1397_v13 }
  0x23   : > { %1246 = vmatprep.subr.bf16.mxu0 %v1398_v14  ;;  %1352 = vmatprep.subr.bf16.mxu1 %v1398_v14 }
  0x26   : > { %1247 = vmatpush3.bf16.msra.mxu0 %v1399_v15  ;;  %1360 = vmatpush3.bf16.msra.mxu1 %v1399_v15 }
  0x27   : > { %1248 = vmatprep.subr.bf16.mxu0 %v1400_v16  ;;  %1353 = vmatprep.subr.bf16.mxu1 %v1400_v16 }
  0x2a   : > { %1249 = vmatpush3.bf16.msra.mxu0 %v1401_v17  ;;  %1361 = vmatpush3.bf16.msra.mxu1 %v1401_v17 }
  0x2d   : > { %589 = vmatmul.mubr.bf16.vlgmr.msra.gmra.mxu0 %v1402_v18  ;;  %653 = vmatmul.mubr.bf16.vlgmr.msra.gmra.mxu1 %v1405_v19 }
  0x2e   : > { %596 = vmatprep.mubr.bf16.mxu0 %v1408_v20  ;;  %660 = vmatprep.mubr.bf16.mxu1 %v1410_v21 }
  0x35   : > { %597 = vmatmul.mubr.bf16.gmra.mxu0 %v1412_v22  ;;  %661 = vmatmul.mubr.bf16.gmra.mxu1 %v1413_v23 }
  0x36   : > { %604 = vmatprep.mubr.bf16.mxu0 %v1414_v24  ;;  %668 = vmatprep.mubr.bf16.mxu1 %v1416_v25 }
  0x3d   : > { %605 = vmatmul.mubr.bf16.gmra.mxu0 %v1418_v26  ;;  %669 = vmatmul.mubr.bf16.gmra.mxu1 %v1419_v27 }
  0x3e   : > { %612 = vmatprep.mubr.bf16.mxu0 %v1420_v28  ;;  %676 = vmatprep.mubr.bf16.mxu1 %v1422_v29 }
  0x45   : > { %613 = vmatmul.mubr.bf16.gmra.mxu0 %v1424_v30  ;;  %677 = vmatmul.mubr.bf16.gmra.mxu1 %v1425_v31 }
  0x46   : > { %620 = vmatprep.mubr.bf16.mxu0 %v1426_v32  ;;  %684 = vmatprep.mubr.bf16.mxu1 %v1428_v33 }
  0x4d   : > { %621 = vmatmul.mubr.bf16.gmra.mxu0 %v1430_v34  ;;  %685 = vmatmul.mubr.bf16.gmra.mxu1 %v1431_v35 }
  0x4e   : > { %628 = vmatprep.mubr.bf16.mxu0 %v1432_v36  ;;  %692 = vmatprep.mubr.bf16.mxu1 %v1434_v37 }
  0x55   : > { %629 = vmatmul.mubr.bf16.gmra.mxu0 %v1436_v38  ;;  %693 = vmatmul.mubr.bf16.gmra.mxu1 %v1437_v39 }
  0x56   : > { %636 = vmatprep.mubr.bf16.mxu0 %v1438_v40  ;;  %700 = vmatprep.mubr.bf16.mxu1 %v1440_v41 }
  0x5d   : > { %637 = vmatmul.mubr.bf16.gmra.mxu0 %v1442_v42  ;;  %701 = vmatmul.mubr.bf16.gmra.mxu1 %v1443_v43 }
  0x5e   : > { %644 = vmatprep.mubr.bf16.mxu0 %v1444_v44  ;;  %708 = vmatprep.mubr.bf16.mxu1 %v1446_v45 }
  0x65   : > { %645 = vmatmul.mubr.bf16.gmra.mxu0 %v1448_v46  ;;  %709 = vmatmul.mubr.bf16.gmra.mxu1 %v1449_v47 }
  0xed   : > { %v1250_v48 = vpop.f32.mrf.mxu0  ;;  %v1298_v49 = vpop.f32.mrf.mxu1 }
  0xef   : > { %v1251_v50 = vpop.f32.mrf.mxu0  ;;  %v1299_v51 = vpop.f32.mrf.mxu1 }
  0xf0   : > { %v1252_v53 = vadd.f32 %v1251_v50, %v1250_v48  ;;  %v1300_v54 = vadd.f32 %v1299_v51, %v1298_v49 }
  0xf1   : > { %v1253_v55 = vpop.f32.mrf.mxu0  ;;  %v1301_v56 = vpop.f32.mrf.mxu1 }
  0xf2   : > { %v591_v57 = vadd.f32 %v1252_v53, %v1603_v52  ;;  %v655_v58 = vadd.f32 %v1300_v54, %v1603_v52 }
  0xf3   : > { %v1254_v59 = vpop.f32.mrf.mxu0  ;;  %v1302_v60 = vpop.f32.mrf.mxu1 }
  0xf4   : > { %v1255_v61 = vadd.f32 %v1254_v59, %v1253_v55  ;;  %v1303_v62 = vadd.f32 %v1302_v60, %v1301_v56  ;;  %v717_v3 = vmax.f32 %v591_v57, 0.0  ;;  %v733_v4 = vmax.f32 %v655_v58, 0.0 }
  0xf5   : > { %v1256_v63 = vpop.f32.mrf.mxu0  ;;  %v1304_v0 = vpop.f32.mrf.mxu1 }
  0xf6   : > { %v594_v1 = vadd.f32 %v1255_v61, %v1603_v52  ;;  %v658_v2 = vadd.f32 %v1303_v62, %v1603_v52 }
  0xf7   : > { %v1257_v5 = vpop.f32.mrf.mxu0  ;;  %v1305_v6 = vpop.f32.mrf.mxu1 }
  0xf8   : > { %v718_v7 = vmax.f32 %v594_v1, 0.0  ;;  %v734_v8 = vmax.f32 %v658_v2, 0.0  ;;  %v1258_v9 = vadd.f32 %v1257_v5, %v1256_v63  ;;  %v1306_v10 = vadd.f32 %v1305_v6, %v1304_v0 }
  0xf9   : > { %v1259_v11 = vpop.f32.mrf.mxu0  ;;  %v1307_v12 = vpop.f32.mrf.mxu1 }
  0xfa   : > { %v1142_v13 = vpack.c.bf16 %v718_v7, %v717_v3  ;;  %v1182_v14 = vpack.c.bf16 %v734_v8, %v733_v4  ;;  %v599_v15 = vadd.f32 %v1258_v9, %v1603_v52  ;;  %v663_v16 = vadd.f32 %v1306_v10, %v1603_v52 }
  0xfb   : > { %v1260_v17 = vpop.f32.mrf.mxu0  ;;  %v1308_v18 = vpop.f32.mrf.mxu1 }
  0xfc   : > { %1143 = vst [vmem:[%s1613_s8] sm:$0xff] %v1142_v13   ;;  %1226 = vst [vmem:[%s1613_s8 + $0x40] sm:$0xff] %v1182_v14   ;;  %v1261_v19 = vadd.f32 %v1260_v17, %v1259_v11  ;;  %v1309_v20 = vadd.f32 %v1308_v18, %v1307_v12  ;;  %v719_v25 = vmax.f32 %v599_v15, 0.0  ;;  %v735_v26 = vmax.f32 %v663_v16, 0.0 }
  0xfd   : > { %v1262_v21 = vpop.f32.mrf.mxu0  ;;  %v1310_v22 = vpop.f32.mrf.mxu1 }
  0xfe   : > { %v602_v23 = vadd.f32 %v1261_v19, %v1603_v52  ;;  %v666_v24 = vadd.f32 %v1309_v20, %v1603_v52 }
  0xff   : > { %v1263_v27 = vpop.f32.mrf.mxu0  ;;  %v1311_v28 = vpop.f32.mrf.mxu1 }
 0x100   : > { %v720_v29 = vmax.f32 %v602_v23, 0.0  ;;  %v736_v30 = vmax.f32 %v666_v24, 0.0  ;;  %v1264_v31 = vadd.f32 %v1263_v27, %v1262_v21  ;;  %v1312_v32 = vadd.f32 %v1311_v28, %v1310_v22 }
 0x101   : > { %v1265_v33 = vpop.f32.mrf.mxu0  ;;  %v1313_v34 = vpop.f32.mrf.mxu1 }
 0x102   : > { %v1147_v35 = vpack.c.bf16 %v720_v29, %v719_v25  ;;  %v1187_v36 = vpack.c.bf16 %v736_v30, %v735_v26  ;;  %v607_v37 = vadd.f32 %v1264_v31, %v1603_v52  ;;  %v671_v38 = vadd.f32 %v1312_v32, %v1603_v52 }
 0x103   : > { %v1266_v39 = vpop.f32.mrf.mxu0  ;;  %v1314_v40 = vpop.f32.mrf.mxu1 }
 0x104   : > { %1219 = vst [vmem:[%s1613_s8 + $0x8] sm:$0xff] %v1147_v35   ;;  %1227 = vst [vmem:[%s1613_s8 + $0x48] sm:$0xff] %v1187_v36   ;;  %v1267_v41 = vadd.f32 %v1266_v39, %v1265_v33  ;;  %v1315_v42 = vadd.f32 %v1314_v40, %v1313_v34  ;;  %v721_v47 = vmax.f32 %v607_v37, 0.0  ;;  %v737_v48 = vmax.f32 %v671_v38, 0.0 }
 0x105   : > { %v1268_v43 = vpop.f32.mrf.mxu0  ;;  %v1316_v44 = vpop.f32.mrf.mxu1 }
 0x106   : > { %v610_v45 = vadd.f32 %v1267_v41, %v1603_v52  ;;  %v674_v46 = vadd.f32 %v1315_v42, %v1603_v52 }
 0x107   : > { %v1269_v49 = vpop.f32.mrf.mxu0  ;;  %v1317_v50 = vpop.f32.mrf.mxu1 }
 0x108   : > { %v722_v51 = vmax.f32 %v610_v45, 0.0  ;;  %v738_v53 = vmax.f32 %v674_v46, 0.0  ;;  %v1270_v54 = vadd.f32 %v1269_v49, %v1268_v43  ;;  %v1318_v55 = vadd.f32 %v1317_v50, %v1316_v44 }
 0x109   : > { %v1271_v56 = vpop.f32.mrf.mxu0  ;;  %v1319_v57 = vpop.f32.mrf.mxu1 }
 0x10a   : > { %v1152_v58 = vpack.c.bf16 %v722_v51, %v721_v47  ;;  %v1192_v59 = vpack.c.bf16 %v738_v53, %v737_v48  ;;  %v615_v60 = vadd.f32 %v1270_v54, %v1603_v52  ;;  %v679_v61 = vadd.f32 %v1318_v55, %v1603_v52 }
 0x10b   : > { %v1272_v62 = vpop.f32.mrf.mxu0  ;;  %v1320_v63 = vpop.f32.mrf.mxu1 }
 0x10c   : > { %1220 = vst [vmem:[%s1613_s8 + $0x10] sm:$0xff] %v1152_v58   ;;  %1228 = vst [vmem:[%s1613_s8 + $0x50] sm:$0xff] %v1192_v59   ;;  %v1273_v0 = vadd.f32 %v1272_v62, %v1271_v56  ;;  %v1321_v1 = vadd.f32 %v1320_v63, %v1319_v57  ;;  %v723_v6 = vmax.f32 %v615_v60, 0.0  ;;  %v739_v7 = vmax.f32 %v679_v61, 0.0 }
 0x10d   : > { %v1274_v2 = vpop.f32.mrf.mxu0  ;;  %v1322_v3 = vpop.f32.mrf.mxu1 }
 0x10e   : > { %v618_v4 = vadd.f32 %v1273_v0, %v1603_v52  ;;  %v682_v5 = vadd.f32 %v1321_v1, %v1603_v52 }
 0x10f   : > { %v1275_v8 = vpop.f32.mrf.mxu0  ;;  %v1323_v9 = vpop.f32.mrf.mxu1 }
 0x110   : > { %v724_v10 = vmax.f32 %v618_v4, 0.0  ;;  %v740_v11 = vmax.f32 %v682_v5, 0.0  ;;  %v1276_v12 = vadd.f32 %v1275_v8, %v1274_v2  ;;  %v1324_v13 = vadd.f32 %v1323_v9, %v1322_v3 }
 0x111   : > { %v1277_v14 = vpop.f32.mrf.mxu0  ;;  %v1325_v15 = vpop.f32.mrf.mxu1 }
 0x112   : > { %v1157_v16 = vpack.c.bf16 %v724_v10, %v723_v6  ;;  %v1197_v17 = vpack.c.bf16 %v740_v11, %v739_v7  ;;  %v623_v18 = vadd.f32 %v1276_v12, %v1603_v52  ;;  %v687_v19 = vadd.f32 %v1324_v13, %v1603_v52 }
 0x113   : > { %v1278_v20 = vpop.f32.mrf.mxu0  ;;  %v1326_v21 = vpop.f32.mrf.mxu1 }
 0x114   : > { %1221 = vst [vmem:[%s1613_s8 + $0x18] sm:$0xff] %v1157_v16   ;;  %1229 = vst [vmem:[%s1613_s8 + $0x58] sm:$0xff] %v1197_v17   ;;  %v1279_v22 = vadd.f32 %v1278_v20, %v1277_v14  ;;  %v1327_v23 = vadd.f32 %v1326_v21, %v1325_v15  ;;  %v725_v28 = vmax.f32 %v623_v18, 0.0  ;;  %v741_v29 = vmax.f32 %v687_v19, 0.0 }
 0x115   : > { %v1280_v24 = vpop.f32.mrf.mxu0  ;;  %v1328_v25 = vpop.f32.mrf.mxu1 }
 0x116   : > { %v626_v26 = vadd.f32 %v1279_v22, %v1603_v52  ;;  %v690_v27 = vadd.f32 %v1327_v23, %v1603_v52 }
 0x117   : > { %v1281_v30 = vpop.f32.mrf.mxu0  ;;  %v1329_v31 = vpop.f32.mrf.mxu1 }
 0x118   : > { %v726_v32 = vmax.f32 %v626_v26, 0.0  ;;  %v742_v33 = vmax.f32 %v690_v27, 0.0  ;;  %v1282_v34 = vadd.f32 %v1281_v30, %v1280_v24  ;;  %v1330_v35 = vadd.f32 %v1329_v31, %v1328_v25 }
 0x119   : > { %v1283_v36 = vpop.f32.mrf.mxu0  ;;  %v1331_v37 = vpop.f32.mrf.mxu1 }
 0x11a   : > { %v1162_v38 = vpack.c.bf16 %v726_v32, %v725_v28  ;;  %v1202_v39 = vpack.c.bf16 %v742_v33, %v741_v29  ;;  %v631_v40 = vadd.f32 %v1282_v34, %v1603_v52  ;;  %v695_v41 = vadd.f32 %v1330_v35, %v1603_v52 }
 0x11b   : > { %v1284_v42 = vpop.f32.mrf.mxu0  ;;  %v1332_v43 = vpop.f32.mrf.mxu1 }
 0x11c   : > { %1222 = vst [vmem:[%s1613_s8 + $0x20] sm:$0xff] %v1162_v38   ;;  %1230 = vst [vmem:[%s1613_s8 + $0x60] sm:$0xff] %v1202_v39   ;;  %v1285_v44 = vadd.f32 %v1284_v42, %v1283_v36  ;;  %v1333_v45 = vadd.f32 %v1332_v43, %v1331_v37  ;;  %v727_v50 = vmax.f32 %v631_v40, 0.0  ;;  %v743_v51 = vmax.f32 %v695_v41, 0.0 }
 0x11d   : > { %v1286_v46 = vpop.f32.mrf.mxu0  ;;  %v1334_v47 = vpop.f32.mrf.mxu1 }
 0x11e   : > { %v634_v48 = vadd.f32 %v1285_v44, %v1603_v52  ;;  %v698_v49 = vadd.f32 %v1333_v45, %v1603_v52 }
 0x11f   : > { %v1287_v53 = vpop.f32.mrf.mxu0  ;;  %v1335_v54 = vpop.f32.mrf.mxu1 }
 0x120   : > { %v728_v55 = vmax.f32 %v634_v48, 0.0  ;;  %v744_v56 = vmax.f32 %v698_v49, 0.0  ;;  %v1288_v57 = vadd.f32 %v1287_v53, %v1286_v46  ;;  %v1336_v58 = vadd.f32 %v1335_v54, %v1334_v47 }
 0x121   : > { %v1289_v59 = vpop.f32.mrf.mxu0  ;;  %v1337_v60 = vpop.f32.mrf.mxu1 }
 0x122   : > { %v1167_v61 = vpack.c.bf16 %v728_v55, %v727_v50  ;;  %v1207_v62 = vpack.c.bf16 %v744_v56, %v743_v51  ;;  %v639_v63 = vadd.f32 %v1288_v57, %v1603_v52  ;;  %v703_v0 = vadd.f32 %v1336_v58, %v1603_v52 }
 0x123   : > { %v1290_v1 = vpop.f32.mrf.mxu0  ;;  %v1338_v2 = vpop.f32.mrf.mxu1 }
 0x124   : > { %1223 = vst [vmem:[%s1613_s8 + $0x28] sm:$0xff] %v1167_v61   ;;  %1231 = vst [vmem:[%s1613_s8 + $0x68] sm:$0xff] %v1207_v62   ;;  %v1291_v3 = vadd.f32 %v1290_v1, %v1289_v59  ;;  %v1339_v4 = vadd.f32 %v1338_v2, %v1337_v60  ;;  %v729_v9 = vmax.f32 %v639_v63, 0.0  ;;  %v745_v10 = vmax.f32 %v703_v0, 0.0 }
 0x125   : > { %v1292_v5 = vpop.f32.mrf.mxu0  ;;  %v1340_v6 = vpop.f32.mrf.mxu1 }
 0x126   : > { %v642_v7 = vadd.f32 %v1291_v3, %v1603_v52  ;;  %v706_v8 = vadd.f32 %v1339_v4, %v1603_v52 }
 0x127   : > { %v1293_v11 = vpop.f32.mrf.mxu0  ;;  %v1341_v12 = vpop.f32.mrf.mxu1 }
 0x128   : > { %v730_v13 = vmax.f32 %v642_v7, 0.0  ;;  %v746_v14 = vmax.f32 %v706_v8, 0.0  ;;  %v1294_v15 = vadd.f32 %v1293_v11, %v1292_v5  ;;  %v1342_v16 = vadd.f32 %v1341_v12, %v1340_v6 }
 0x129   : > { %v1295_v17 = vpop.f32.mrf.mxu0  ;;  %v1343_v18 = vpop.f32.mrf.mxu1 }
 0x12a   : > { %v1172_v19 = vpack.c.bf16 %v730_v13, %v729_v9  ;;  %v1212_v20 = vpack.c.bf16 %v746_v14, %v745_v10  ;;  %v647_v23 = vadd.f32 %v1294_v15, %v1603_v52  ;;  %v711_v24 = vadd.f32 %v1342_v16, %v1603_v52 }
 0x12b   : > { %v1296_v21 = vpop.f32.mrf.mxu0  ;;  %v1344_v22 = vpop.f32.mrf.mxu1 }
 0x12c   : > { %1224 = vst [vmem:[%s1613_s8 + $0x30] sm:$0xff] %v1172_v19   ;;  %1232 = vst [vmem:[%s1613_s8 + $0x70] sm:$0xff] %v1212_v20   ;;  %v1297_v25 = vadd.f32 %v1296_v21, %v1295_v17  ;;  %v1345_v26 = vadd.f32 %v1344_v22, %v1343_v18  ;;  %v731_v29 = vmax.f32 %v647_v23, 0.0  ;;  %v747_v30 = vmax.f32 %v711_v24, 0.0 }
 0x12e   : > { %v650_v27 = vadd.f32 %v1297_v25, %v1603_v52  ;;  %v714_v28 = vadd.f32 %v1345_v26, %v1603_v52 }
 0x130   : > { %v732_v31 = vmax.f32 %v650_v27, 0.0  ;;  %v748_v32 = vmax.f32 %v714_v28, 0.0 }
 0x132   : > { %v1177_v33 = vpack.c.bf16 %v732_v31, %v731_v29  ;;  %v1217_v34 = vpack.c.bf16 %v748_v32, %v747_v30 }
 0x134   : > { %1225 = vst [vmem:[%s1613_s8 + $0x38] sm:$0xff] %v1177_v33   ;;  %1233 = vst [vmem:[%s1613_s8 + $0x78] sm:$0xff] %v1217_v34  }
 0x135 PF: > { %s13_s14 = sadd.s32 1, %s1472_s14   ;;  %s1672_s12 = smov %s1468_s13 }
 0x136   : > { %p10_p5 = scmp.ge.s32.totalorder %s13_s14, 4   ;;  %s1673_s13 = smov %s1675_s15 }
 0x138   :  { %12 = sbr.rel (!%p10_p5) target bundleno = 2 (0x2), region = 68 }

// kernel: model_forward.15
= control target key start
LH: loop header
LB: loop body
LE: loop exit
PB: predicated region body
PF: predicated region fallthrough
CT: control target
= control target key end

     0   :  { %s1047_s6 = smov 0   ;;  %s1049_s7 = smov 0   ;;  %s1228_s0 = inlined_call_operand.vmem [shape: bf16[9,128,128], index: 0, kind: input, shape index: {}]   ;;  %s1229_s1 = inlined_call_operand.vmem [shape: bf16[128,128], index: 1, kind: output, shape index: {}]  }
   0x1   :  { %s1051_s8 = smov 0  }
   0x2 LB: > { %s757_s9 = sadd.s32 4294967295, %s1035_s8   ;;  %s1064_s10 = sadd.s32 1, %s1035_s8   ;;  %s1035_s8 = sphi %s1051_s8, %s1232_s8   ;;  %s1031_s7 = sphi %s1049_s7, %s1231_s7   ;;  %s1027_s6 = sphi %s1047_s6, %s1230_s6  }
   0x3   : > { %s15_s11 = ssub.s32 %s1035_s8, %s1064_s10  ;;  %s18_s12 = sadd.s32 1, %s1031_s7 }
   0x4   : > { %p16_p0 = scmp.eq.s32.totalorder %s15_s11, 0  ;;  %p25_p1 = scmp.ne.s32.totalorder %s1031_s7, %s1027_s6 }
   0x5   : > { %p26_p2 = scmp.eq.s32.totalorder %s1035_s8, 0  ;;  %p760_p4 = scmp.ge.s32.totalorder %s1035_s8, 2 }
   0x6   : > { %s1073_s13 = scalar_select %p16_p0, %s1031_s7, %s18_s12  }
   0x7   : > { %p27_p3 = por %p26_p2, %p25_p1  ;;  %77 = sbr.rel (%p760_p4) target bundleno = 35 (0x23), region = 16 }
   0xc   : > { %80 = sbr.rel (!%p27_p3) target bundleno = 35 (0x23), region = 20  ;;  %s82_s14 = sand.u32 (%p27_p3), 1, %s1031_s7  }
   0xd   : > { %s776_s15 = sshll.u32 (%p27_p3), %s1035_s8, 5  ;;  %s987_s16 = smul.u32 (%p27_p3), 288, %s82_s14 }
   0xe   : > { %s1081_s19 = scalar_lea.vmem (%p27_p3), %s1228_s0, %s776_s15 }
   0xf   : > { %v104_v0 = vld [vmem:[%s1081_s19] sm:$0xff] (%p27_p3)   ;;  %v108_v1 = vld [vmem:[%s1081_s19 + $0x8] sm:$0xff] (%p27_p3)   ;;  %v112_v2 = vld [vmem:[%s1081_s19 + $0x10] sm:$0xff] (%p27_p3)   ;;  %s1089_s20 = scalar_lea.vmem (%p27_p3), [#allocation2], %s987_s16 }
  0x10   : > { %v116_v3 = vld [vmem:[%s1081_s19 + $0x18] sm:$0xff] (%p27_p3)   ;;  %v120_v4 = vld [vmem:[%s1081_s19 + $0x40] sm:$0xff] (%p27_p3)   ;;  %v124_v5 = vld [vmem:[%s1081_s19 + $0x48] sm:$0xff] (%p27_p3)   ;;  %105 = vst [vmem:[%s1089_s20] sm:$0xff] (%p27_p3), %v104_v0  }
  0x11   : > { %109 = vst [vmem:[%s1089_s20 + $0x8] sm:$0xff] %v108_v1   ;;  %113 = vst [vmem:[%s1089_s20 + $0x10] sm:$0xff] %v112_v2   ;;  %v128_v6 = vld [vmem:[%s1081_s19 + $0x50] sm:$0xff]   ;;  %v132_v7 = vld [vmem:[%s1081_s19 + $0x58] sm:$0xff]  }
  0x12   : > { %117 = vst [vmem:[%s1089_s20 + $0x18] sm:$0xff] %v116_v3   ;;  %121 = vst [vmem:[%s1089_s20 + $0x20] sm:$0xff] %v120_v4   ;;  %v136_v8 = vld [vmem:[%s1081_s19 + $0x80] sm:$0xff]   ;;  %v140_v9 = vld [vmem:[%s1081_s19 + $0x88] sm:$0xff]  }
  0x13   : > { %125 = vst [vmem:[%s1089_s20 + $0x28] sm:$0xff] %v124_v5   ;;  %129 = vst [vmem:[%s1089_s20 + $0x30] sm:$0xff] %v128_v6   ;;  %v144_v10 = vld [vmem:[%s1081_s19 + $0x90] sm:$0xff]   ;;  %v148_v11 = vld [vmem:[%s1081_s19 + $0x98] sm:$0xff]  }
  0x14   : > { %133 = vst [vmem:[%s1089_s20 + $0x38] sm:$0xff] %v132_v7   ;;  %137 = vst [vmem:[%s1089_s20 + $0x40] sm:$0xff] %v136_v8   ;;  %v152_v12 = vld [vmem:[%s1081_s19 + $0xc0] sm:$0xff]   ;;  %v156_v13 = vld [vmem:[%s1081_s19 + $0xc8] sm:$0xff]  }
  0x15   : > { %141 = vst [vmem:[%s1089_s20 + $0x48] sm:$0xff] %v140_v9   ;;  %145 = vst [vmem:[%s1089_s20 + $0x50] sm:$0xff] %v144_v10   ;;  %v160_v14 = vld [vmem:[%s1081_s19 + $0xd0] sm:$0xff]   ;;  %v164_v15 = vld [vmem:[%s1081_s19 + $0xd8] sm:$0xff]  }
  0x16   : > { %149 = vst [vmem:[%s1089_s20 + $0x58] sm:$0xff] %v148_v11   ;;  %153 = vst [vmem:[%s1089_s20 + $0x60] sm:$0xff] %v152_v12   ;;  %v168_v16 = vld [vmem:[%s1081_s19 + $0x100] sm:$0xff]   ;;  %v172_v17 = vld [vmem:[%s1081_s19 + $0x108] sm:$0xff]  }
  0x17   : > { %157 = vst [vmem:[%s1089_s20 + $0x68] sm:$0xff] %v156_v13   ;;  %161 = vst [vmem:[%s1089_s20 + $0x70] sm:$0xff] %v160_v14   ;;  %v176_v18 = vld [vmem:[%s1081_s19 + $0x110] sm:$0xff]   ;;  %v180_v19 = vld [vmem:[%s1081_s19 + $0x118] sm:$0xff]  }
  0x18   : > { %165 = vst [vmem:[%s1089_s20 + $0x78] sm:$0xff] %v164_v15   ;;  %169 = vst [vmem:[%s1089_s20 + $0x80] sm:$0xff] %v168_v16   ;;  %v184_v20 = vld [vmem:[%s1081_s19 + $0x140] sm:$0xff]   ;;  %v188_v21 = vld [vmem:[%s1081_s19 + $0x148] sm:$0xff]  }
  0x19   : > { %173 = vst [vmem:[%s1089_s20 + $0x88] sm:$0xff] %v172_v17   ;;  %177 = vst [vmem:[%s1089_s20 + $0x90] sm:$0xff] %v176_v18   ;;  %v192_v22 = vld [vmem:[%s1081_s19 + $0x150] sm:$0xff]   ;;  %v196_v23 = vld [vmem:[%s1081_s19 + $0x158] sm:$0xff]  }
  0x1a   : > { %181 = vst [vmem:[%s1089_s20 + $0x98] sm:$0xff] %v180_v19   ;;  %185 = vst [vmem:[%s1089_s20 + $0xa0] sm:$0xff] %v184_v20   ;;  %v200_v24 = vld [vmem:[%s1081_s19 + $0x180] sm:$0xff]   ;;  %v204_v25 = vld [vmem:[%s1081_s19 + $0x188] sm:$0xff]  }
  0x1b   : > { %189 = vst [vmem:[%s1089_s20 + $0xa8] sm:$0xff] %v188_v21   ;;  %193 = vst [vmem:[%s1089_s20 + $0xb0] sm:$0xff] %v192_v22   ;;  %v208_v26 = vld [vmem:[%s1081_s19 + $0x190] sm:$0xff]   ;;  %v212_v27 = vld [vmem:[%s1081_s19 + $0x198] sm:$0xff]  }
  0x1c   : > { %197 = vst [vmem:[%s1089_s20 + $0xb8] sm:$0xff] %v196_v23   ;;  %201 = vst [vmem:[%s1089_s20 + $0xc0] sm:$0xff] %v200_v24   ;;  %v216_v28 = vld [vmem:[%s1081_s19 + $0x1c0] sm:$0xff]   ;;  %v220_v29 = vld [vmem:[%s1081_s19 + $0x1c8] sm:$0xff]  }
  0x1d   : > { %205 = vst [vmem:[%s1089_s20 + $0xc8] sm:$0xff] %v204_v25   ;;  %209 = vst [vmem:[%s1089_s20 + $0xd0] sm:$0xff] %v208_v26   ;;  %v224_v30 = vld [vmem:[%s1081_s19 + $0x1d0] sm:$0xff]   ;;  %v228_v31 = vld [vmem:[%s1081_s19 + $0x1d8] sm:$0xff]  }
  0x1e   : > { %213 = vst [vmem:[%s1089_s20 + $0xd8] sm:$0xff] %v212_v27   ;;  %217 = vst [vmem:[%s1089_s20 + $0xe0] sm:$0xff] %v216_v28   ;;  %v232_v32 = vld [vmem:[%s1081_s19 + $0x200] sm:$0xff]   ;;  %v236_v33 = vld [vmem:[%s1081_s19 + $0x208] sm:$0xff]  }
  0x1f   : > { %221 = vst [vmem:[%s1089_s20 + $0xe8] sm:$0xff] %v220_v29   ;;  %225 = vst [vmem:[%s1089_s20 + $0xf0] sm:$0xff] %v224_v30   ;;  %v240_v34 = vld [vmem:[%s1081_s19 + $0x210] sm:$0xff]   ;;  %v244_v35 = vld [vmem:[%s1081_s19 + $0x218] sm:$0xff]  }
  0x20   : > { %229 = vst [vmem:[%s1089_s20 + $0xf8] sm:$0xff] %v228_v31   ;;  %233 = vst [vmem:[%s1089_s20 + $0x100] sm:$0xff] %v232_v32  }
  0x21   : > { %237 = vst [vmem:[%s1089_s20 + $0x108] sm:$0xff] %v236_v33   ;;  %241 = vst [vmem:[%s1089_s20 + $0x110] sm:$0xff] %v240_v34  }
  0x22   : > { %245 = vst [vmem:[%s1089_s20 + $0x118] sm:$0xff] %v244_v35  }
  0x23 PF: > { %p763_p5 = scmp.ge.s32.totalorder %s1035_s8, 1  ;;  %p414_p6 = scmp.lt.s32.totalorder %s1035_s8, 3 }
  0x25   : > { %p415_p7 = pnand %p763_p5, %p414_p6 }
  0x26   : > { %s421_s21 = sand.u32 (!%p415_p7), 1, %s1027_s6   ;;  %s1172_s24 = sshll.u32 (!%p415_p7), %s757_s9, 3 }
  0x27   : > { %418 = sbr.rel (%p415_p7) target bundleno = 90 (0x5a), region = 61  ;;  %p442_p8 = scmp.lt.s32.totalorder (!%p415_p7), %s1172_s24, 15 }
  0x28   : > { %s988_s22 = smul.u32 (!%p415_p7), 288, %s421_s21 }
  0x2a   : > { %s1160_s23 = scalar_lea.vmem (!%p415_p7), [#allocation2], %s988_s22 }
  0x2c   : > { %v786_v36 = vld [vmem:[%s1160_s23] sm:$0xff]   ;;  %v949_v52 = vld [vmem:[%s1160_s23 + $0x8] sm:$0xff]   ;;  %s1234_s24 = smov (!%p442_p8, %s1172_s24), 15  ;;  %v950_v27 = vld [vmem:[%s1160_s23 + $0x10] sm:$0xff]  }
  0x2d   : > { %v952_v37 = vld [vmem:[%s1160_s23 + $0x20] sm:$0xff]   ;;  %v787_v39 = vunpack.c.l.bf16 %v786_v36  ;;  %v788_v40 = vunpack.c.h.bf16 %v786_v36  ;;  %v953_v53 = vld [vmem:[%s1160_s23 + $0x28] sm:$0xff]   ;;  %v791_v63 = vunpack.c.l.bf16 %v949_v52  ;;  %v792_v0 = vunpack.c.h.bf16 %v949_v52  ;;  %v954_v32 = vld [vmem:[%s1160_s23 + $0x30] sm:$0xff]   ;;  %s765_s25 = sshll.u32 %s1234_s24, 2 }
  0x2e   : > { %v956_v38 = vld [vmem:[%s1160_s23 + $0x40] sm:$0xff]   ;;  %v803_v41 = vunpack.c.l.bf16 %v952_v37  ;;  %v804_v42 = vunpack.c.h.bf16 %v952_v37  ;;  %v957_v61 = vld [vmem:[%s1160_s23 + $0x48] sm:$0xff]   ;;  %v807_v1 = vunpack.c.l.bf16 %v953_v53  ;;  %v808_v2 = vunpack.c.h.bf16 %v953_v53  ;;  %s1198_s28 = scalar_lea.vmem %s1229_s1, %s765_s25 }
  0x2f   : > { %v960_v43 = vld [vmem:[%s1160_s23 + $0x60] sm:$0xff]   ;;  %v819_v44 = vunpack.c.l.bf16 %v956_v38  ;;  %v820_v45 = vunpack.c.h.bf16 %v956_v38  ;;  %v961_v7 = vld [vmem:[%s1160_s23 + $0x68] sm:$0xff]   ;;  %v823_v10 = vunpack.c.l.bf16 %v957_v61  ;;  %v824_v11 = vunpack.c.h.bf16 %v957_v61  ;;  %v966_v61 = vld [vmem:[%s1160_s23 + $0x90] sm:$0xff]  }
  0x30   : > { %v964_v46 = vld [vmem:[%s1160_s23 + $0x80] sm:$0xff]   ;;  %v835_v48 = vunpack.c.l.bf16 %v960_v43  ;;  %v836_v49 = vunpack.c.h.bf16 %v960_v43  ;;  %v591_v50 = vmax.f32 %v787_v39, %v803_v41  ;;  %v599_v51 = vmax.f32 %v788_v40, %v804_v42  ;;  %v965_v12 = vld [vmem:[%s1160_s23 + $0x88] sm:$0xff]   ;;  %v958_v42 = vld [vmem:[%s1160_s23 + $0x50] sm:$0xff]  }
  0x31   : > { %v968_v47 = vld [vmem:[%s1160_s23 + $0xa0] sm:$0xff]   ;;  %v851_v54 = vunpack.c.l.bf16 %v964_v46  ;;  %v852_v56 = vunpack.c.h.bf16 %v964_v46  ;;  %v969_v17 = vld [vmem:[%s1160_s23 + $0xa8] sm:$0xff]   ;;  %v839_v18 = vunpack.c.l.bf16 %v961_v7  ;;  %v840_v19 = vunpack.c.h.bf16 %v961_v7  ;;  %v951_v7 = vld [vmem:[%s1160_s23 + $0x18] sm:$0xff]  }
  0x32   : > { %v972_v55 = vld [vmem:[%s1160_s23 + $0xc0] sm:$0xff]   ;;  %v867_v57 = vunpack.c.l.bf16 %v968_v47  ;;  %v592_v59 = vmax.f32 %v591_v50, %v819_v44  ;;  %v600_v60 = vmax.f32 %v599_v51, %v820_v45  ;;  %v868_v3 = vunpack.c.h.bf16 %v968_v47  ;;  %v973_v20 = vld [vmem:[%s1160_s23 + $0xc8] sm:$0xff]   ;;  %v962_v47 = vld [vmem:[%s1160_s23 + $0x70] sm:$0xff]  }
  0x33   : > { %v976_v58 = vld [vmem:[%s1160_s23 + $0xe0] sm:$0xff]   ;;  %v883_v4 = vunpack.c.l.bf16 %v972_v55  ;;  %v884_v8 = vunpack.c.h.bf16 %v972_v55  ;;  %v607_v21 = vmax.f32 %v791_v63, %v807_v1  ;;  %v615_v22 = vmax.f32 %v792_v0, %v808_v2  ;;  %v977_v37 = vld [vmem:[%s1160_s23 + $0xe8] sm:$0xff]   ;;  %v970_v0 = vld [vmem:[%s1160_s23 + $0xb0] sm:$0xff]  }
  0x34   : > { %v980_v62 = vld [vmem:[%s1160_s23 + $0x100] sm:$0xff]   ;;  %v593_v5 = vmax.f32 %v592_v59, %v835_v48  ;;  %v601_v6 = vmax.f32 %v600_v60, %v836_v49  ;;  %v899_v9 = vunpack.c.l.bf16 %v976_v58  ;;  %v900_v13 = vunpack.c.h.bf16 %v976_v58 }
  0x35   : > { %v915_v14 = vunpack.c.l.bf16 %v980_v62  ;;  %v916_v23 = vunpack.c.h.bf16 %v980_v62  ;;  %v855_v26 = vunpack.c.l.bf16 %v965_v12  ;;  %v856_v28 = vunpack.c.h.bf16 %v965_v12  ;;  %v955_v12 = vld [vmem:[%s1160_s23 + $0x38] sm:$0xff]  }
  0x36   : > { %v594_v15 = vmax.f32 %v593_v5, %v851_v54  ;;  %v602_v16 = vmax.f32 %v601_v6, %v852_v56  ;;  %v871_v29 = vunpack.c.l.bf16 %v969_v17  ;;  %v608_v30 = vmax.f32 %v607_v21, %v823_v10  ;;  %v981_v54 = vld [vmem:[%s1160_s23 + $0x108] sm:$0xff]  }
  0x37   : > { %v616_v31 = vmax.f32 %v615_v22, %v824_v11  ;;  %v872_v35 = vunpack.c.h.bf16 %v969_v17  ;;  %v887_v36 = vunpack.c.l.bf16 %v973_v20  ;;  %v795_v40 = vunpack.c.l.bf16 %v950_v27  ;;  %v974_v17 = vld [vmem:[%s1160_s23 + $0xd0] sm:$0xff]   ;;  %v959_v22 = vld [vmem:[%s1160_s23 + $0x58] sm:$0xff]  }
  0x38   : > { %v595_v24 = vmax.f32 %v594_v15, %v867_v57  ;;  %v603_v25 = vmax.f32 %v602_v16, %v868_v3  ;;  %v609_v38 = vmax.f32 %v608_v30, %v839_v18  ;;  %v796_v41 = vunpack.c.h.bf16 %v950_v27 }
  0x39   : > { %v617_v39 = vmax.f32 %v616_v31, %v840_v19  ;;  %v811_v45 = vunpack.c.l.bf16 %v954_v32  ;;  %v812_v46 = vunpack.c.h.bf16 %v954_v32  ;;  %v888_v48 = vunpack.c.h.bf16 %v973_v20  ;;  %v963_v32 = vld [vmem:[%s1160_s23 + $0x78] sm:$0xff]  }
  0x3a   : > { %v596_v33 = vmax.f32 %v595_v24, %v883_v4  ;;  %v604_v34 = vmax.f32 %v603_v25, %v884_v8  ;;  %v903_v49 = vunpack.c.l.bf16 %v977_v37  ;;  %v610_v50 = vmax.f32 %v609_v38, %v855_v26  ;;  %v978_v25 = vld [vmem:[%s1160_s23 + $0xf0] sm:$0xff]  }
  0x3b   : > { %v618_v51 = vmax.f32 %v617_v39, %v856_v28  ;;  %v827_v55 = vunpack.c.l.bf16 %v958_v42  ;;  %v828_v56 = vunpack.c.h.bf16 %v958_v42  ;;  %v904_v57 = vunpack.c.h.bf16 %v977_v37 }
  0x3c   : > { %v597_v43 = vmax.f32 %v596_v33, %v899_v9  ;;  %v605_v44 = vmax.f32 %v604_v34, %v900_v13  ;;  %v611_v58 = vmax.f32 %v610_v50, %v871_v29  ;;  %v843_v60 = vunpack.c.l.bf16 %v962_v47  ;;  %v982_v34 = vld [vmem:[%s1160_s23 + $0x110] sm:$0xff]   ;;  %v971_v50 = vld [vmem:[%s1160_s23 + $0xb8] sm:$0xff]  }
  0x3d   : > { %v619_v59 = vmax.f32 %v618_v51, %v872_v35  ;;  %v844_v63 = vunpack.c.h.bf16 %v962_v47  ;;  %v623_v1 = vmax.f32 %v795_v40, %v811_v45  ;;  %v631_v2 = vmax.f32 %v796_v41, %v812_v46  ;;  %v967_v41 = vld [vmem:[%s1160_s23 + $0x98] sm:$0xff]  }
  0x3e   : > { %v598_v52 = vmax.f32 %v597_v43, %v915_v14  ;;  %v606_v53 = vmax.f32 %v605_v44, %v916_v23  ;;  %v919_v3 = vunpack.c.l.bf16 %v981_v54  ;;  %v920_v4 = vunpack.c.h.bf16 %v981_v54 }
  0x3f   : > { %v612_v5 = vmax.f32 %v611_v58, %v887_v36  ;;  %v620_v6 = vmax.f32 %v619_v59, %v888_v48  ;;  %v859_v8 = vunpack.c.l.bf16 %v966_v61  ;;  %v860_v9 = vunpack.c.h.bf16 %v966_v61 }
  0x40   : > { %v932_v62 = vpack.c.bf16 %v606_v53, %v598_v52  ;;  %v624_v10 = vmax.f32 %v623_v1, %v827_v55  ;;  %v632_v11 = vmax.f32 %v631_v2, %v828_v56  ;;  %v875_v15 = vunpack.c.l.bf16 %v970_v0 }
  0x41   : > { %v613_v13 = vmax.f32 %v612_v5, %v903_v49  ;;  %v621_v14 = vmax.f32 %v620_v6, %v904_v57  ;;  %v876_v16 = vunpack.c.h.bf16 %v970_v0  ;;  %v799_v20 = vunpack.c.l.bf16 %v951_v7  ;;  %v975_v57 = vld [vmem:[%s1160_s23 + $0xd8] sm:$0xff]  }
  0x42   : > { %933 = vst [vmem:[%s1198_s28] sm:$0xff] %v932_v62   ;;  %v625_v18 = vmax.f32 %v624_v10, %v843_v60  ;;  %v633_v19 = vmax.f32 %v632_v11, %v844_v63  ;;  %v800_v21 = vunpack.c.h.bf16 %v951_v7  ;;  %v815_v26 = vunpack.c.l.bf16 %v955_v12  ;;  %v979_v0 = vld [vmem:[%s1160_s23 + $0xf8] sm:$0xff]  }
  0x43   : > { %v614_v23 = vmax.f32 %v613_v13, %v919_v3  ;;  %v622_v24 = vmax.f32 %v621_v14, %v920_v4  ;;  %v816_v27 = vunpack.c.h.bf16 %v955_v12  ;;  %v891_v28 = vunpack.c.l.bf16 %v974_v17  ;;  %v983_v6 = vld [vmem:[%s1160_s23 + $0x118] sm:$0xff]  }
  0x44   : > { %v892_v29 = vunpack.c.h.bf16 %v974_v17  ;;  %v626_v30 = vmax.f32 %v625_v18, %v859_v8  ;;  %v634_v31 = vmax.f32 %v633_v19, %v860_v9  ;;  %v831_v35 = vunpack.c.l.bf16 %v959_v22 }
  0x45   : > { %v937_v33 = vpack.c.bf16 %v622_v24, %v614_v23  ;;  %v832_v36 = vunpack.c.h.bf16 %v959_v22  ;;  %v907_v37 = vunpack.c.l.bf16 %v978_v25  ;;  %v908_v38 = vunpack.c.h.bf16 %v978_v25 }
  0x46   : > { %v627_v39 = vmax.f32 %v626_v30, %v875_v15  ;;  %v635_v40 = vmax.f32 %v634_v31, %v876_v16  ;;  %v847_v42 = vunpack.c.l.bf16 %v963_v32  ;;  %v848_v43 = vunpack.c.h.bf16 %v963_v32 }
  0x47   : > { %984 = vst [vmem:[%s1198_s28 + $0x8] sm:$0xff] %v937_v33   ;;  %v639_v44 = vmax.f32 %v799_v20, %v815_v26  ;;  %v647_v45 = vmax.f32 %v800_v21, %v816_v27  ;;  %v923_v46 = vunpack.c.l.bf16 %v982_v34  ;;  %v924_v47 = vunpack.c.h.bf16 %v982_v34 }
  0x48   : > { %v628_v48 = vmax.f32 %v627_v39, %v891_v28  ;;  %v636_v49 = vmax.f32 %v635_v40, %v892_v29  ;;  %v863_v51 = vunpack.c.l.bf16 %v967_v41  ;;  %v864_v52 = vunpack.c.h.bf16 %v967_v41 }
  0x49   : > { %v640_v53 = vmax.f32 %v639_v44, %v831_v35  ;;  %v648_v54 = vmax.f32 %v647_v45, %v832_v36  ;;  %v879_v58 = vunpack.c.l.bf16 %v971_v50  ;;  %v880_v59 = vunpack.c.h.bf16 %v971_v50 }
  0x4a   : > { %v629_v55 = vmax.f32 %v628_v48, %v907_v37  ;;  %v637_v56 = vmax.f32 %v636_v49, %v908_v38  ;;  %v895_v1 = vunpack.c.l.bf16 %v975_v57  ;;  %v896_v2 = vunpack.c.h.bf16 %v975_v57 }
  0x4b   : > { %v641_v60 = vmax.f32 %v640_v53, %v847_v42  ;;  %v649_v61 = vmax.f32 %v648_v54, %v848_v43  ;;  %v911_v7 = vunpack.c.l.bf16 %v979_v0  ;;  %v912_v8 = vunpack.c.h.bf16 %v979_v0 }
  0x4c   : > { %v630_v62 = vmax.f32 %v629_v55, %v923_v46  ;;  %v638_v63 = vmax.f32 %v637_v56, %v924_v47  ;;  %v927_v11 = vunpack.c.l.bf16 %v983_v6  ;;  %v928_v12 = vunpack.c.h.bf16 %v983_v6 }
  0x4d   : > { %v642_v3 = vmax.f32 %v641_v60, %v863_v51  ;;  %v650_v4 = vmax.f32 %v649_v61, %v864_v52 }
  0x4e   : > { %v942_v5 = vpack.c.bf16 %v638_v63, %v630_v62 }
  0x4f   : > { %v643_v9 = vmax.f32 %v642_v3, %v879_v58  ;;  %v651_v10 = vmax.f32 %v650_v4, %v880_v59 }
  0x50   : > { %985 = vst [vmem:[%s1198_s28 + $0x10] sm:$0xff] %v942_v5  }
  0x51   : > { %v644_v13 = vmax.f32 %v643_v9, %v895_v1  ;;  %v652_v14 = vmax.f32 %v651_v10, %v896_v2 }
  0x53   : > { %v645_v15 = vmax.f32 %v644_v13, %v911_v7  ;;  %v653_v16 = vmax.f32 %v652_v14, %v912_v8 }
  0x55   : > { %v646_v17 = vmax.f32 %v645_v15, %v927_v11  ;;  %v654_v18 = vmax.f32 %v653_v16, %v928_v12 }
  0x57   : > { %v947_v19 = vpack.c.bf16 %v654_v18, %v646_v17 }
  0x59   : > { %986 = vst [vmem:[%s1198_s28 + $0x18] sm:$0xff] %v947_v19  }
  0x5a PF: > { %p8_p9 = scmp.ge.s32.totalorder %s1064_s10, 4   ;;  %s1230_s6 = smov %s1031_s7 }
  0x5b   : > { %s1231_s7 = smov %s1073_s13  ;;  %s1232_s8 = smov %s1064_s10 }
  0x5c   :  { %10 = sbr.rel (!%p8_p9) target bundleno = 2 (0x2), region = 100 }

// kernel: model_forward.17
= control target key start
LH: loop header
LB: loop body
LE: loop exit
PB: predicated region body
PF: predicated region fallthrough
CT: control target
= control target key end

     0   :  { %s2202_s15 = smov 0   ;;  %s2204_s16 = smov 0   ;;  %s2608_s0 = inlined_call_operand.vmem [shape: bf16[128,1152], index: 0, kind: input, shape index: {}]   ;;  %s2609_s1 = inlined_call_operand.vmem [shape: bf16[1152,128], index: 1, kind: input, shape index: {}]   ;;  %s2610_s2 = inlined_call_operand.vmem [shape: f32[1,128], index: 2, kind: input, shape index: {}]   ;;  %s2611_s3 = inlined_call_operand.vmem [shape: bf16[128,128], index: 3, kind: input, shape index: {}]   ;;  %s2612_s4 = inlined_call_operand.vmem [shape: bf16[128,128], index: 4, kind: output, shape index: {}]  }
   0x1   :  { %s2206_s17 = smov 0  }
   0x2 LB: > { %s26_s18 = sadd.s32 1, %s2171_s16  ;;  %p1616_p0 = scmp.ge.s32.totalorder %s2175_s17, 1  ;;  %s2175_s17 = sphi %s2206_s17, %s14_s17   ;;  %s2171_s16 = sphi %s2204_s16, %s2618_s16   ;;  %s2167_s15 = sphi %s2202_s15, %s2617_s15  }
   0x3   : > { %p28_p1 = scmp.ge.s32.totalorder %s26_s18, 2  ;;  %p211_p2 = scmp.lt.s32.totalorder %s2175_s17, 3 }
   0x5   : > { %s2620_s18 = smov (%p28_p1, %s26_s18), 0  ;;  %p212_p3 = pnand %p1616_p0, %p211_p2 }
   0x7   : > { %215 = sbr.rel (%p212_p3) target bundleno = 320 (0x140), region = 36 }
   0xc   : > { %v2029_v0 = vld [vmem:[%s2609_s1 + $0x78] sm:$0xff]   ;;  %v2033_v4 = vld [vmem:[%s2609_s1 + $0x70] sm:$0xff]   ;;  %v2037_v8 = vld [vmem:[%s2609_s1 + $0x68] sm:$0xff]   ;;  %s1617_s27 = sshll.u32 %s2167_s15, 3 }
   0xd   : > { %v2030_v1 = vld [vmem:[%s2609_s1 + $0xf8] sm:$0xff]   ;;  %1792 = vmatprep.subr.bf16.mxu0 %v2029_v0  ;;  %v2034_v5 = vld [vmem:[%s2609_s1 + $0xf0] sm:$0xff]   ;;  %v2038_v9 = vld [vmem:[%s2609_s1 + $0xe8] sm:$0xff]   ;;  %p257_p4 = scmp.lt.s32.totalorder %s1617_s27, 15 }
   0xe   : > { %v2031_v2 = vld [vmem:[%s2609_s1 + $0x38] sm:$0xff]   ;;  %1832 = vmatprep.subr.bf16.mxu1 %v2030_v1  ;;  %v2035_v6 = vld [vmem:[%s2609_s1 + $0x30] sm:$0xff]   ;;  %v2039_v10 = vld [vmem:[%s2609_s1 + $0x28] sm:$0xff]  }
   0xf   : > { %v2032_v3 = vld [vmem:[%s2609_s1 + $0xb8] sm:$0xff]   ;;  %1793 = vmatpush3.bf16.msra.mxu0 %v2031_v2  ;;  %v2036_v7 = vld [vmem:[%s2609_s1 + $0xb0] sm:$0xff]   ;;  %v2040_v11 = vld [vmem:[%s2609_s1 + $0xa8] sm:$0xff]   ;;  %s2622_s27 = smov (!%p257_p4, %s1617_s27), 15 }
  0x10   : > { %1833 = vmatpush3.bf16.msra.mxu1 %v2032_v3  ;;  %1794 = vmatprep.subr.bf16.mxu0 %v2033_v4  ;;  %v2041_v12 = vld [vmem:[%s2609_s1 + $0x60] sm:$0xff]   ;;  %v2045_v16 = vld [vmem:[%s2609_s1 + $0x58] sm:$0xff]   ;;  %v2049_v20 = vld [vmem:[%s2609_s1 + $0x50] sm:$0xff]   ;;  %s2004_s28 = smul.u32 36, %s2622_s27 }
  0x11   : > { %1834 = vmatprep.subr.bf16.mxu1 %v2034_v5  ;;  %v2042_v13 = vld [vmem:[%s2609_s1 + $0xe0] sm:$0xff]   ;;  %v2046_v17 = vld [vmem:[%s2609_s1 + $0xd8] sm:$0xff]   ;;  %v2050_v21 = vld [vmem:[%s2609_s1 + $0xd0] sm:$0xff]  }
  0x12   : > { %v2043_v14 = vld [vmem:[%s2609_s1 + $0x20] sm:$0xff]   ;;  %v2047_v18 = vld [vmem:[%s2609_s1 + $0x18] sm:$0xff]   ;;  %v2051_v22 = vld [vmem:[%s2609_s1 + $0x10] sm:$0xff]   ;;  %s2319_s12 = scalar_lea.vmem %s2608_s0, %s2004_s28 }
  0x13   : > { %1795 = vmatpush3.bf16.msra.mxu0 %v2035_v6  ;;  %v2044_v15 = vld [vmem:[%s2609_s1 + $0xa0] sm:$0xff]   ;;  %v2048_v19 = vld [vmem:[%s2609_s1 + $0x98] sm:$0xff]   ;;  %v2052_v23 = vld [vmem:[%s2609_s1 + $0x90] sm:$0xff]  }
  0x14   : > { %1835 = vmatpush3.bf16.msra.mxu1 %v2036_v7  ;;  %1796 = vmatprep.subr.bf16.mxu0 %v2037_v8  ;;  %v2053_v24 = vld [vmem:[%s2609_s1 + $0x48] sm:$0xff]   ;;  %v2057_v28 = vld [vmem:[%s2609_s1 + $0x40] sm:$0xff]   ;;  %v2067_v36 = vld [vmem:[%s2609_s1 + $0x178] sm:$0xff]  }
  0x15   : > { %1836 = vmatprep.subr.bf16.mxu1 %v2038_v9  ;;  %v2054_v25 = vld [vmem:[%s2609_s1 + $0xc8] sm:$0xff]   ;;  %v2058_v29 = vld [vmem:[%s2609_s1 + $0xc0] sm:$0xff]   ;;  %v2068_v37 = vld [vmem:[%s2609_s1 + $0x1f8] sm:$0xff]  }
  0x16   : > { %v2055_v26 = vld [vmem:[%s2609_s1 + $0x8] sm:$0xff]   ;;  %v2059_v30 = vld [vmem:[%s2609_s1] sm:$0xff]   ;;  %v2069_v38 = vld [vmem:[%s2609_s1 + $0x138] sm:$0xff]  }
  0x17   : > { %1797 = vmatpush3.bf16.msra.mxu0 %v2039_v10  ;;  %v2056_v27 = vld [vmem:[%s2609_s1 + $0x88] sm:$0xff]   ;;  %v2060_v31 = vld [vmem:[%s2609_s1 + $0x80] sm:$0xff]   ;;  %v2070_v39 = vld [vmem:[%s2609_s1 + $0x1b8] sm:$0xff]  }
  0x18   : > { %1837 = vmatpush3.bf16.msra.mxu1 %v2040_v11  ;;  %1798 = vmatprep.subr.bf16.mxu0 %v2041_v12  ;;  %v2061_v32 = vld [vmem:[%s2319_s12] ss:$36 sps:$4 sm:$0xff]   ;;  %v2064_v34 = vld [vmem:[%s2319_s12 + $0x8] ss:$36 sps:$4 sm:$0xff]   ;;  %v2071_v40 = vld [vmem:[%s2609_s1 + $0x170] sm:$0xff]  }
  0x19   : > { %1838 = vmatprep.subr.bf16.mxu1 %v2042_v13  ;;  %v2063_v33 = vld [vmem:[%s2319_s12 + $0x4] ss:$36 sps:$4 sm:$0xff]   ;;  %v2066_v35 = vld [vmem:[%s2319_s12 + $0xc] ss:$36 sps:$4 sm:$0xff]   ;;  %v2077_v45 = vld [vmem:[%s2319_s12 + $0x54] ss:$36 sps:$4 sm:$0xff]  }
  0x1a   : > { %1128 = vmatprep.mubr.bf16.mxu0 %v2063_v33  ;;  %1193 = vmatprep.mubr.bf16.mxu1 %v2066_v35  ;;  %v2072_v41 = vld [vmem:[%s2609_s1 + $0x1f0] sm:$0xff]   ;;  %v2079_v46 = vld [vmem:[%s2319_s12 + $0x48] ss:$36 sps:$4 sm:$0xff]   ;;  %v2085_v52 = vld [vmem:[%s2609_s1 + $0x160] sm:$0xff]  }
  0x1b   : > { %1799 = vmatpush3.bf16.msra.mxu0 %v2043_v14  ;;  %v2073_v42 = vld [vmem:[%s2609_s1 + $0x130] sm:$0xff]   ;;  %v2081_v48 = vld [vmem:[%s2609_s1 + $0x168] sm:$0xff]   ;;  %v2086_v53 = vld [vmem:[%s2609_s1 + $0x1e0] sm:$0xff]  }
  0x1c   : > { %1839 = vmatpush3.bf16.msra.mxu1 %v2044_v15  ;;  %1800 = vmatprep.subr.bf16.mxu0 %v2045_v16  ;;  %v2074_v43 = vld [vmem:[%s2609_s1 + $0x1b0] sm:$0xff]   ;;  %v2082_v49 = vld [vmem:[%s2609_s1 + $0x1e8] sm:$0xff]   ;;  %v2087_v54 = vld [vmem:[%s2609_s1 + $0x120] sm:$0xff]  }
  0x1d   : > { %1840 = vmatprep.subr.bf16.mxu1 %v2046_v17  ;;  %v2075_v44 = vld [vmem:[%s2319_s12 + $0x4c] ss:$36 sps:$4 sm:$0xff]   ;;  %v2088_v55 = vld [vmem:[%s2609_s1 + $0x1a0] sm:$0xff]   ;;  %v2089_v56 = vld [vmem:[%s2319_s12 + $0x94] ss:$36 sps:$4 sm:$0xff]  }
  0x1e   : > { %v2080_v47 = vld [vmem:[%s2319_s12 + $0x50] ss:$36 sps:$4 sm:$0xff]   ;;  %v2083_v50 = vld [vmem:[%s2609_s1 + $0x128] sm:$0xff]   ;;  %v2091_v57 = vld [vmem:[%s2319_s12 + $0x9c] ss:$36 sps:$4 sm:$0xff]  }
  0x1f   : > { %1801 = vmatpush3.bf16.msra.mxu0 %v2047_v18  ;;  %v2084_v51 = vld [vmem:[%s2609_s1 + $0x1a8] sm:$0xff]   ;;  %v2093_v58 = vld [vmem:[%s2319_s12 + $0x90] ss:$36 sps:$4 sm:$0xff]   ;;  %v2094_v59 = vld [vmem:[%s2319_s12 + $0x98] ss:$36 sps:$4 sm:$0xff]  }
  0x20   : > { %1841 = vmatpush3.bf16.msra.mxu1 %v2048_v19  ;;  %1802 = vmatprep.subr.bf16.mxu0 %v2049_v20  ;;  %v2095_v60 = vld [vmem:[%s2609_s1 + $0x158] sm:$0xff]   ;;  %v2099_v0 = vld [vmem:[%s2609_s1 + $0x150] sm:$0xff]   ;;  %v2105_v5 = vld [vmem:[%s2319_s12 + $0xe4] ss:$36 sps:$4 sm:$0xff]  }
  0x21   : > { %1842 = vmatprep.subr.bf16.mxu1 %v2050_v21  ;;  %v2096_v61 = vld [vmem:[%s2609_s1 + $0x1d8] sm:$0xff]   ;;  %v2100_v1 = vld [vmem:[%s2609_s1 + $0x1d0] sm:$0xff]   ;;  %v2108_v7 = vld [vmem:[%s2319_s12 + $0xe0] ss:$36 sps:$4 sm:$0xff]  }
  0x22   : > { %v2097_v62 = vld [vmem:[%s2609_s1 + $0x118] sm:$0xff]   ;;  %v2101_v2 = vld [vmem:[%s2609_s1 + $0x110] sm:$0xff]   ;;  %v2109_v8 = vld [vmem:[%s2609_s1 + $0x148] sm:$0xff]  }
  0x23   : > { %1803 = vmatpush3.bf16.msra.mxu0 %v2051_v22  ;;  %v2098_v63 = vld [vmem:[%s2609_s1 + $0x198] sm:$0xff]   ;;  %v2102_v3 = vld [vmem:[%s2609_s1 + $0x190] sm:$0xff]   ;;  %v2110_v9 = vld [vmem:[%s2609_s1 + $0x1c8] sm:$0xff]  }
  0x24   : > { %1843 = vmatpush3.bf16.msra.mxu1 %v2052_v23  ;;  %1804 = vmatprep.subr.bf16.mxu0 %v2053_v24  ;;  %v2103_v4 = vld [vmem:[%s2319_s12 + $0xdc] ss:$36 sps:$4 sm:$0xff]   ;;  %v2111_v10 = vld [vmem:[%s2609_s1 + $0x108] sm:$0xff]   ;;  %v2117_v16 = vld [vmem:[%s2319_s12 + $0x10] ss:$36 sps:$4 sm:$0xff]  }
  0x25   : > { %1844 = vmatprep.subr.bf16.mxu1 %v2054_v25  ;;  %v2107_v6 = vld [vmem:[%s2319_s12 + $0xd8] ss:$36 sps:$4 sm:$0xff]   ;;  %v2112_v11 = vld [vmem:[%s2609_s1 + $0x188] sm:$0xff]   ;;  %v2113_v12 = vld [vmem:[%s2609_s1 + $0x140] sm:$0xff]  }
  0x26   : > { %v2114_v13 = vld [vmem:[%s2609_s1 + $0x1c0] sm:$0xff]   ;;  %v2119_v17 = vld [vmem:[%s2319_s12 + $0x14] ss:$36 sps:$4 sm:$0xff]   ;;  %v2141_v33 = vld [vmem:[%s2319_s12 + $0xec] ss:$36 sps:$4 sm:$0xff]  }
  0x27   : > { %1805 = vmatpush3.bf16.msra.mxu0 %v2055_v26  ;;  %v2115_v14 = vld [vmem:[%s2609_s1 + $0x100] sm:$0xff]   ;;  %v2120_v18 = vld [vmem:[%s2319_s12 + $0x18] ss:$36 sps:$4 sm:$0xff]   ;;  %v2124_v21 = vld [vmem:[%s2609_s1 + $0x230] sm:$0xff]  }
  0x28   : > { %1845 = vmatpush3.bf16.msra.mxu1 %v2056_v27  ;;  %1806 = vmatprep.subr.bf16.mxu0 %v2057_v28  ;;  %v2116_v15 = vld [vmem:[%s2609_s1 + $0x180] sm:$0xff]   ;;  %v2123_v20 = vld [vmem:[%s2609_s1 + $0x238] sm:$0xff]   ;;  %v2131_v26 = vld [vmem:[%s2609_s1 + $0x228] sm:$0xff]  }
  0x29   : > { %1846 = vmatprep.subr.bf16.mxu1 %v2058_v29  ;;  %v2122_v19 = vld [vmem:[%s2319_s12 + $0x1c] ss:$36 sps:$4 sm:$0xff]   ;;  %v2127_v23 = vld [vmem:[%s2319_s12 + $0x64] ss:$36 sps:$4 sm:$0xff]   ;;  %v2135_v28 = vld [vmem:[%s2319_s12 + $0xac] ss:$36 sps:$4 sm:$0xff]  }
  0x2a   : > { %v2125_v22 = vld [vmem:[%s2319_s12 + $0x5c] ss:$36 sps:$4 sm:$0xff]   ;;  %v2133_v27 = vld [vmem:[%s2319_s12 + $0xa4] ss:$36 sps:$4 sm:$0xff]   ;;  %v2140_v35 = vld [vmem:[%s2609_s1 + $0x210] sm:$0xff]  }
  0x2b   : > { %1807 = vmatpush3.bf16.msra.mxu0 %v2059_v30  ;;  %v2129_v24 = vld [vmem:[%s2319_s12 + $0x58] ss:$36 sps:$4 sm:$0xff]   ;;  %v2130_v25 = vld [vmem:[%s2319_s12 + $0x60] ss:$36 sps:$4 sm:$0xff]  }
  0x2c   : > { %1847 = vmatpush3.bf16.msra.mxu1 %v2060_v31  ;;  %1872 = vmatprep.subr.bf16.mxu0 %v2067_v36  ;;  %v2132_v29 = vld [vmem:[%s2609_s1 + $0x220] sm:$0xff]   ;;  %v2138_v31 = vld [vmem:[%s2319_s12 + $0xa8] ss:$36 sps:$4 sm:$0xff]  }
  0x2d   : > { %1912 = vmatprep.subr.bf16.mxu1 %v2068_v37  ;;  %v2137_v30 = vld [vmem:[%s2319_s12 + $0xa0] ss:$36 sps:$4 sm:$0xff]   ;;  %v2145_v36 = vld [vmem:[%s2319_s12 + $0xe8] ss:$36 sps:$4 sm:$0xff]  }
  0x2e   : > { %1129 = vmatmul.mubr.bf16.vlgmr.msra.gmra.mxu0 %v2061_v32  ;;  %v2139_v32 = vld [vmem:[%s2609_s1 + $0x218] sm:$0xff]   ;;  %v2147_v37 = vld [vmem:[%s2609_s1 + $0x208] sm:$0xff]  }
  0x2f   : > { %1194 = vmatmul.mubr.bf16.vlgmr.msra.gmra.mxu1 %v2064_v34  ;;  %1873 = vmatpush3.bf16.msra.mxu0 %v2069_v38  ;;  %v2143_v34 = vld [vmem:[%s2319_s12 + $0xf4] ss:$36 sps:$4 sm:$0xff]  }
  0x30   : > { %1913 = vmatpush3.bf16.msra.mxu1 %v2070_v39  ;;  %1874 = vmatprep.subr.bf16.mxu0 %v2071_v40  ;;  %v2146_v38 = vld [vmem:[%s2319_s12 + $0xf0] ss:$36 sps:$4 sm:$0xff]   ;;  %v2149_v39 = vld [vmem:[%s2319_s12 + $0x20] ss:$36 sps:$4 sm:$0xff]  }
  0x31   : > { %1914 = vmatprep.subr.bf16.mxu1 %v2072_v41  ;;  %1136 = vmatprep.mubr.bf16.mxu0 %v2075_v44  ;;  %v2150_v40 = vld [vmem:[%s2319_s12 + $0xb0] ss:$36 sps:$4 sm:$0xff]   ;;  %v2148_v41 = vld [vmem:[%s2609_s1 + $0x200] sm:$0xff]  }
  0x32   : > { %1201 = vmatprep.mubr.bf16.mxu1 %v2077_v45 }
  0x33   : > { %1875 = vmatpush3.bf16.msra.mxu0 %v2073_v42  ;;  %v2151_v42 = vld [vmem:[%s2319_s12 + $0x68] ss:$36 sps:$4 sm:$0xff]  }
  0x34   : > { %1915 = vmatpush3.bf16.msra.mxu1 %v2074_v43  ;;  %1876 = vmatprep.subr.bf16.mxu0 %v2081_v48  ;;  %v2152_v43 = vld [vmem:[%s2319_s12 + $0xf8] ss:$36 sps:$4 sm:$0xff]   ;;  %s1620_s12 = sshll.u32 %s2622_s27, 2 }
  0x35   : > { %1916 = vmatprep.subr.bf16.mxu1 %v2082_v49  ;;  %s2540_s21 = scalar_lea.vmem %s2611_s3, %s1620_s12  ;;  %s286_s24 = scalar_lea.vmem %s2612_s4, %s1620_s12 }
  0x36   : > { %1137 = vmatmul.mubr.bf16.gmra.mxu0 %v2079_v46 }
  0x37   : > { %1202 = vmatmul.mubr.bf16.gmra.mxu1 %v2080_v47  ;;  %1877 = vmatpush3.bf16.msra.mxu0 %v2083_v50 }
  0x38   : > { %1917 = vmatpush3.bf16.msra.mxu1 %v2084_v51  ;;  %1878 = vmatprep.subr.bf16.mxu0 %v2085_v52 }
  0x39   : > { %1918 = vmatprep.subr.bf16.mxu1 %v2086_v53  ;;  %1144 = vmatprep.mubr.bf16.mxu0 %v2089_v56 }
  0x3a   : > { %1209 = vmatprep.mubr.bf16.mxu1 %v2091_v57 }
  0x3b   : > { %1879 = vmatpush3.bf16.msra.mxu0 %v2087_v54 }
  0x3c   : > { %1919 = vmatpush3.bf16.msra.mxu1 %v2088_v55  ;;  %1880 = vmatprep.subr.bf16.mxu0 %v2095_v60 }
  0x3d   : > { %1920 = vmatprep.subr.bf16.mxu1 %v2096_v61 }
  0x3e   : > { %1145 = vmatmul.mubr.bf16.gmra.mxu0 %v2093_v58 }
  0x3f   : > { %1210 = vmatmul.mubr.bf16.gmra.mxu1 %v2094_v59  ;;  %1881 = vmatpush3.bf16.msra.mxu0 %v2097_v62 }
  0x40   : > { %1921 = vmatpush3.bf16.msra.mxu1 %v2098_v63  ;;  %1882 = vmatprep.subr.bf16.mxu0 %v2099_v0 }
  0x41   : > { %1922 = vmatprep.subr.bf16.mxu1 %v2100_v1  ;;  %1152 = vmatprep.mubr.bf16.mxu0 %v2103_v4 }
  0x42   : > { %1217 = vmatprep.mubr.bf16.mxu1 %v2105_v5 }
  0x43   : > { %1883 = vmatpush3.bf16.msra.mxu0 %v2101_v2 }
  0x44   : > { %1923 = vmatpush3.bf16.msra.mxu1 %v2102_v3  ;;  %1884 = vmatprep.subr.bf16.mxu0 %v2109_v8 }
  0x45   : > { %1924 = vmatprep.subr.bf16.mxu1 %v2110_v9 }
  0x46   : > { %1153 = vmatmul.mubr.bf16.gmra.mxu0 %v2107_v6 }
  0x47   : > { %1218 = vmatmul.mubr.bf16.gmra.mxu1 %v2108_v7  ;;  %1885 = vmatpush3.bf16.msra.mxu0 %v2111_v10 }
  0x48   : > { %1925 = vmatpush3.bf16.msra.mxu1 %v2112_v11  ;;  %1886 = vmatprep.subr.bf16.mxu0 %v2113_v12 }
  0x49   : > { %1926 = vmatprep.subr.bf16.mxu1 %v2114_v13  ;;  %1258 = vmatprep.mubr.bf16.mxu0 %v2119_v17 }
  0x4a   : > { %1323 = vmatprep.mubr.bf16.mxu1 %v2122_v19 }
  0x4b   : > { %1887 = vmatpush3.bf16.msra.mxu0 %v2115_v14 }
  0x4c   : > { %1927 = vmatpush3.bf16.msra.mxu1 %v2116_v15  ;;  %1964 = vmatprep.subr.bf16.mxu0 %v2123_v20 }
  0x4d   : > { %1988 = vmatprep.subr.bf16.mxu1 %v2123_v20 }
  0x4e   : > { %1259 = vmatmul.mubr.bf16.vlgmr.msra.gmra.mxu0 %v2117_v16 }
  0x4f   : > { %1324 = vmatmul.mubr.bf16.vlgmr.msra.gmra.mxu1 %v2120_v18  ;;  %1965 = vmatpush3.bf16.msra.mxu0 %v2123_v20 }
  0x50   : > { %1996 = vmatpush3.bf16.msra.mxu1 %v2123_v20  ;;  %1966 = vmatprep.subr.bf16.mxu0 %v2124_v21 }
  0x51   : > { %1989 = vmatprep.subr.bf16.mxu1 %v2124_v21  ;;  %1266 = vmatprep.mubr.bf16.mxu0 %v2125_v22 }
  0x52   : > { %1331 = vmatprep.mubr.bf16.mxu1 %v2127_v23 }
  0x53   : > { %1967 = vmatpush3.bf16.msra.mxu0 %v2124_v21 }
  0x54   : > { %1997 = vmatpush3.bf16.msra.mxu1 %v2124_v21  ;;  %1968 = vmatprep.subr.bf16.mxu0 %v2131_v26 }
  0x55   : > { %1990 = vmatprep.subr.bf16.mxu1 %v2131_v26 }
  0x56   : > { %1267 = vmatmul.mubr.bf16.gmra.mxu0 %v2129_v24 }
  0x57   : > { %1332 = vmatmul.mubr.bf16.gmra.mxu1 %v2130_v25  ;;  %1274 = vmatprep.mubr.bf16.mxu0 %v2133_v27 }
  0x58   : > { %1969 = vmatpush3.bf16.msra.mxu0 %v2131_v26  ;;  %1339 = vmatprep.mubr.bf16.mxu1 %v2135_v28 }
  0x59   : > { %1998 = vmatpush3.bf16.msra.mxu1 %v2131_v26  ;;  %1970 = vmatprep.subr.bf16.mxu0 %v2132_v29 }
  0x5a   : > { %1991 = vmatprep.subr.bf16.mxu1 %v2132_v29 }
  0x5c   : > { %1971 = vmatpush3.bf16.msra.mxu0 %v2132_v29 }
  0x5d   : > { %1999 = vmatpush3.bf16.msra.mxu1 %v2132_v29  ;;  %1972 = vmatprep.subr.bf16.mxu0 %v2139_v32 }
  0x5e   : > { %1275 = vmatmul.mubr.bf16.gmra.mxu0 %v2137_v30  ;;  %1992 = vmatprep.subr.bf16.mxu1 %v2139_v32  ;;  %v1623_v30 = vld [vmem:[%s2610_s2] ss:$0 sm:$0xff] }
  0x5f   : > { %1340 = vmatmul.mubr.bf16.gmra.mxu1 %v2138_v31  ;;  %1282 = vmatprep.mubr.bf16.mxu0 %v2141_v33 }
  0x60   : > { %1973 = vmatpush3.bf16.msra.mxu0 %v2139_v32  ;;  %1347 = vmatprep.mubr.bf16.mxu1 %v2143_v34 }
  0x61   : > { %2000 = vmatpush3.bf16.msra.mxu1 %v2139_v32  ;;  %1974 = vmatprep.subr.bf16.mxu0 %v2140_v35 }
  0x62   : > { %1993 = vmatprep.subr.bf16.mxu1 %v2140_v35 }
  0x64   : > { %1975 = vmatpush3.bf16.msra.mxu0 %v2140_v35 }
  0x65   : > { %2001 = vmatpush3.bf16.msra.mxu1 %v2140_v35  ;;  %1976 = vmatprep.subr.bf16.mxu0 %v2147_v37 }
  0x66   : > { %1283 = vmatmul.mubr.bf16.gmra.mxu0 %v2145_v36  ;;  %1994 = vmatprep.subr.bf16.mxu1 %v2147_v37 }
  0x67   : > { %1348 = vmatmul.mubr.bf16.gmra.mxu1 %v2146_v38  ;;  %1980 = vmatprep.mubr.bf16.mxu0 %v2149_v39  ;;  %v2547_v39 = vld [vmem:[%s2540_s21 + $0x8] sm:$0xff]  }
  0x68   : > { %1977 = vmatpush3.bf16.msra.mxu0 %v2147_v37  ;;  %1984 = vmatprep.mubr.bf16.mxu1 %v2150_v40 }
  0x69   : > { %2002 = vmatpush3.bf16.msra.mxu1 %v2147_v37  ;;  %1978 = vmatprep.subr.bf16.mxu0 %v2148_v41 }
  0x6a   : > { %1995 = vmatprep.subr.bf16.mxu1 %v2148_v41 }
  0x6c   : > { %1979 = vmatpush3.bf16.msra.mxu0 %v2148_v41 }
  0x6d   : > { %2003 = vmatpush3.bf16.msra.mxu1 %v2148_v41  ;;  %v2550_v41 = vld [vmem:[%s2540_s21 + $0x18] sm:$0xff]  }
  0x6f   : > { %1981 = vmatmul.mubr.bf16.vlgmr.msra.gmra.mxu0 %v2151_v42 }
  0x70   : > { %1985 = vmatmul.mubr.bf16.vlgmr.msra.gmra.mxu1 %v2152_v43 }
  0xee   : > { %v1808_v44 = vpop.f32.mrf.mxu0 }
  0xef   : > { %v2483_v45 = vpop.f32.mrf.mxu1 }
  0xf0   : > { %v1809_v46 = vpop.f32.mrf.mxu0 }
  0xf1   : > { %v1849_v47 = vpop.f32.mrf.mxu1  ;;  %v1810_v27 = vadd.f32 %v1809_v46, %v1808_v44 }
  0xf2   : > { %v1811_v48 = vpop.f32.mrf.mxu0  ;;  %v1850_v42 = vadd.f32 %v1849_v47, %v2483_v45 }
  0xf3   : > { %v2485_v49 = vpop.f32.mrf.mxu1  ;;  %v1131_v35 = vadd.f32 %v1810_v27, %v1623_v30 }
  0xf4   : > { %v1812_v50 = vpop.f32.mrf.mxu0 }
  0xf5   : > { %v2487_v51 = vpop.f32.mrf.mxu1  ;;  %v1813_v36 = vadd.f32 %v1812_v50, %v1811_v48  ;;  %v1196_v48 = vadd.f32 %v1850_v42, %v1131_v35 }
  0xf6   : > { %v1814_v52 = vpop.f32.mrf.mxu0  ;;  %v1853_v45 = vadd.f32 %v2487_v51, %v2485_v49 }
  0xf7   : > { %v2489_v53 = vpop.f32.mrf.mxu1  ;;  %v1134_v50 = vadd.f32 %v1813_v36, %v1623_v30 }
  0xf8   : > { %v1815_v54 = vpop.f32.mrf.mxu0 }
  0xf9   : > { %v2491_v55 = vpop.f32.mrf.mxu1  ;;  %v1816_v31 = vadd.f32 %v1815_v54, %v1814_v52 }
  0xfa   : > { %v1817_v56 = vpop.f32.mrf.mxu0 }
  0xfb   : > { %v2493_v57 = vpop.f32.mrf.mxu1  ;;  %v1139_v43 = vadd.f32 %v1816_v31, %v1623_v30 }
  0xfc   : > { %v1818_v58 = vpop.f32.mrf.mxu0 }
  0xfd   : > { %v2495_v59 = vpop.f32.mrf.mxu1  ;;  %v1819_v40 = vadd.f32 %v1818_v58, %v1817_v56  ;;  %v1199_v58 = vadd.f32 %v1853_v45, %v1134_v50  ;;  %v1787_v45 = vld [vmem:[%s2540_s21 + $0x10] sm:$0xff]  }
  0xfe   : > { %v1820_v60 = vpop.f32.mrf.mxu0 }
  0xff   : > { %v2497_v61 = vpop.f32.mrf.mxu1  ;;  %v1142_v47 = vadd.f32 %v1819_v40, %v1623_v30 }
 0x100   : > { %v1821_v62 = vpop.f32.mrf.mxu0 }
 0x101   : > { %v2499_v63 = vpop.f32.mrf.mxu1  ;;  %v1822_v44 = vadd.f32 %v1821_v62, %v1820_v60 }
 0x102   : > { %v2501_v0 = vpop.f32.mrf.mxu0  ;;  %v1862_v49 = vadd.f32 %v2499_v63, %v2497_v61 }
 0x103   : > { %v2503_v1 = vpop.f32.mrf.mxu1 }
 0x104   : > { %v1824_v2 = vpop.f32.mrf.mxu0 }
 0x105   : > { %v2505_v3 = vpop.f32.mrf.mxu1  ;;  %v1825_v31 = vadd.f32 %v1824_v2, %v2501_v0 }
 0x106   : > { %v1826_v4 = vpop.f32.mrf.mxu0 }
 0x107   : > { %v1866_v5 = vpop.f32.mrf.mxu1 }
 0x108   : > { %v1827_v6 = vpop.f32.mrf.mxu0 }
 0x109   : > { %v1867_v7 = vpop.f32.mrf.mxu1  ;;  %v1828_v34 = vadd.f32 %v1827_v6, %v1826_v4  ;;  %v1856_v6 = vadd.f32 %v2491_v55, %v2489_v53  ;;  %v1859_v53 = vadd.f32 %v2495_v59, %v2493_v57  ;;  %v1150_v57 = vadd.f32 %v1825_v31, %v1623_v30 }
 0x10a   : > { %v1829_v8 = vpop.f32.mrf.mxu0  ;;  %v1868_v60 = vadd.f32 %v1867_v7, %v1866_v5 }
 0x10b   : > { %v2507_v9 = vpop.f32.mrf.mxu1  ;;  %v1207_v2 = vadd.f32 %v1859_v53, %v1142_v47  ;;  %v2615_v53 = vunpack.c.l.bf16 %v2547_v39 }
 0x10c   : > { %v1830_v10 = vpop.f32.mrf.mxu0 }
 0x10d   : > { %v2509_v11 = vpop.f32.mrf.mxu1  ;;  %v1831_v46 = vadd.f32 %v1830_v10, %v1829_v8  ;;  %v1204_v8 = vadd.f32 %v1856_v6, %v1139_v43  ;;  %v1147_v10 = vadd.f32 %v1822_v44, %v1623_v30 }
 0x10e   : > { %v1888_v12 = vpop.f32.mrf.mxu0  ;;  %v1871_v51 = vadd.f32 %v2509_v11, %v2507_v9  ;;  %v1751_v11 = vld [vmem:[%s2540_s21] sm:$0xff]  }
 0x10f   : > { %v2511_v13 = vpop.f32.mrf.mxu1  ;;  %v1212_v43 = vadd.f32 %v1862_v49, %v1147_v10  ;;  %v1752_v6 = vunpack.c.l.bf16 %v1751_v11 }
 0x110   : > { %v1889_v14 = vpop.f32.mrf.mxu0 }
 0x111   : > { %v2513_v15 = vpop.f32.mrf.mxu1  ;;  %v1890_v42 = vadd.f32 %v1889_v14, %v1888_v12 }
 0x112   : > { %v2515_v16 = vpop.f32.mrf.mxu0 }
 0x113   : > { %v2517_v17 = vpop.f32.mrf.mxu1  ;;  %v1261_v44 = vadd.f32 %v1890_v42, %v1196_v48 }
 0x114   : > { %v2519_v18 = vpop.f32.mrf.mxu0 }
 0x115   : > { %v2521_v19 = vpop.f32.mrf.mxu1  ;;  %v1893_v61 = vadd.f32 %v2519_v18, %v2515_v16 }
 0x116   : > { %2613 = vst [vmem:[#allocation2_spill] sm:$0xff] %v2521_v19  ;;  %v1894_v20 = vpop.f32.mrf.mxu0  ;;  %v1155_v19 = vadd.f32 %v1828_v34, %v1623_v30  ;;  %v1158_v34 = vadd.f32 %v1831_v46, %v1623_v30  ;;  %v1930_v46 = vadd.f32 %v2513_v15, %v2511_v13 }
 0x117   : > { %v2523_v21 = vpop.f32.mrf.mxu1 }
 0x118   : > { %v1895_v22 = vpop.f32.mrf.mxu0  ;;  %v1220_v55 = vadd.f32 %v1868_v60, %v1155_v19  ;;  %v1223_v59 = vadd.f32 %v1871_v51, %v1158_v34  ;;  %v1760_v34 = vunpack.c.l.bf16 %v1787_v45 }
 0x119   : > { %v2525_v23 = vpop.f32.mrf.mxu1  ;;  %v1896_v62 = vadd.f32 %v1895_v22, %v1894_v20 }
 0x11a   : > { %v1897_v24 = vpop.f32.mrf.mxu0  ;;  %v1936_v63 = vadd.f32 %v2525_v23, %v2523_v21 }
 0x11b   : > { %v2527_v25 = vpop.f32.mrf.mxu1  ;;  %v1269_v20 = vadd.f32 %v1896_v62, %v1204_v8 }
 0x11c   : > { %v1898_v26 = vpop.f32.mrf.mxu0 }
 0x11d   : > { %v2530_v28 = vpop.f32.mrf.mxu1  ;;  %v1899_v22 = vadd.f32 %v1898_v26, %v1897_v24  ;;  %v1334_v50 = vadd.f32 %v1936_v63, %v1269_v20  ;;  %v2614_v8 = vld [vmem:[#allocation2_spill] sm:$0xff] }
 0x11e   : > { %v1900_v29 = vpop.f32.mrf.mxu0  ;;  %v1933_v10 = vadd.f32 %v2614_v8, %v2517_v17  ;;  %v1753_v17 = vunpack.c.h.bf16 %v1751_v11 }
 0x11f   : > { %v2542_v32 = vpop.f32.mrf.mxu1 }
 0x120   : > { %v1901_v33 = vpop.f32.mrf.mxu0 }
 0x121   : > { %v2544_v37 = vpop.f32.mrf.mxu1  ;;  %v1902_v5 = vadd.f32 %v1901_v33, %v1900_v29  ;;  %v1865_v29 = vadd.f32 %v2505_v3, %v2503_v1  ;;  %v1939_v1 = vadd.f32 %v2530_v28, %v2527_v25 }
 0x122   : > { %v1903_v38 = vpop.f32.mrf.mxu0  ;;  %v1942_v18 = vadd.f32 %v2544_v37, %v2542_v32 }
 0x123   : > { %v2553_v52 = vpop.f32.mrf.mxu1  ;;  %v1277_v24 = vadd.f32 %v1902_v5, %v1212_v43  ;;  %v1215_v16 = vadd.f32 %v1865_v29, %v1150_v57  ;;  %v2616_v5 = vunpack.c.l.bf16 %v2550_v41 }
 0x124   : > { %v1904_v54 = vpop.f32.mrf.mxu0 }
 0x125   : > { %v2558_v27 = vpop.f32.mrf.mxu1  ;;  %v1905_v26 = vadd.f32 %v1904_v54, %v1903_v38  ;;  %v1326_v54 = vadd.f32 %v1930_v46, %v1261_v44  ;;  %v1342_v60 = vadd.f32 %v1942_v18, %v1277_v24 }
 0x126   : > { %v1906_v56 = vpop.f32.mrf.mxu0  ;;  %v1945_v25 = vadd.f32 %v2558_v27, %v2553_v52  ;;  %v1761_v52 = vunpack.c.h.bf16 %v1787_v45 }
 0x127   : > { %v1946_v35 = vpop.f32.mrf.mxu1  ;;  %v1280_v47 = vadd.f32 %v1905_v26, %v1215_v16 }
 0x128   : > { %v1907_v36 = vpop.f32.mrf.mxu0 }
 0x129   : > { %v1908_v4 = vadd.f32 %v1907_v36, %v1906_v56  ;;  %v1947_v7 = vpop.f32.mrf.mxu1  ;;  %v1264_v56 = vadd.f32 %v1893_v61, %v1199_v58  ;;  %v1757_v58 = vunpack.c.h.bf16 %v2547_v39  ;;  %v1765_v36 = vunpack.c.h.bf16 %v2550_v41 }
 0x12a   : > { %v1909_v0 = vpop.f32.mrf.mxu0  ;;  %v1948_v12 = vadd.f32 %v1947_v7, %v1946_v35  ;;  %v1345_v20 = vadd.f32 %v1945_v25, %v1280_v47 }
 0x12b   : > { %v1285_v40 = vadd.f32 %v1908_v4, %v1220_v55  ;;  %v1949_v14 = vpop.f32.mrf.mxu1  ;;  %v1272_v4 = vadd.f32 %v1899_v22, %v1207_v2  ;;  %v1329_v51 = vadd.f32 %v1933_v10, %v1264_v56 }
 0x12c   : > { %v1910_v19 = vpop.f32.mrf.mxu0 }
 0x12d   : > { %v1911_v9 = vadd.f32 %v1910_v19, %v1909_v0  ;;  %v1950_v33 = vpop.f32.mrf.mxu1  ;;  %v1350_v30 = vadd.f32 %v1948_v12, %v1285_v40  ;;  %v1337_v31 = vadd.f32 %v1939_v1, %v1272_v4 }
 0x12e   : > { %v1951_v21 = vadd.f32 %v1950_v33, %v1949_v14 }
 0x12f   : > { %v1288_v48 = vadd.f32 %v1911_v9, %v1223_v59  ;;  %v1982_v23 = vpop.f32.mrf.mxu0 }
 0x130   : > { %v1399_v3 = vadd.f32 %v1982_v23, %v1334_v50  ;;  %v1986_v38 = vpop.f32.mrf.mxu1 }
 0x131   : > { %v1415_v13 = vadd.f32 %v1986_v38, %v1350_v30  ;;  %v1390_v15 = vpop.f32.mrf.mxu0  ;;  %v1353_v62 = vadd.f32 %v1951_v21, %v1288_v48 }
 0x132   : > { %v1391_v32 = vadd.f32 %v1390_v15, %v1326_v54  ;;  %v1406_v37 = vpop.f32.mrf.mxu1  ;;  %v1439_v55 = vadd.f32 %v2615_v53, %v1399_v3 }
 0x133   : > { %v1407_v28 = vadd.f32 %v1406_v37, %v1342_v60  ;;  %v1983_v35 = vpop.f32.mrf.mxu0  ;;  %v1443_v7 = vadd.f32 %v2616_v5, %v1415_v13 }
 0x134   : > { %v1402_v42 = vadd.f32 %v1983_v35, %v1337_v31  ;;  %v1987_v49 = vpop.f32.mrf.mxu1  ;;  %v1437_v27 = vadd.f32 %v1752_v6, %v1391_v32  ;;  %v1447_v12 = vmax.f32 %v1439_v55, 0.0 }
 0x135   : > { %v1418_v0 = vadd.f32 %v1987_v49, %v1353_v62  ;;  %v1393_v2 = vpop.f32.mrf.mxu0  ;;  %v1441_v57 = vadd.f32 %v1760_v34, %v1407_v28  ;;  %v1451_v44 = vmax.f32 %v1443_v7, 0.0 }
 0x136   : > { %v1440_v22 = vadd.f32 %v1757_v58, %v1402_v42  ;;  %v1394_v40 = vadd.f32 %v1393_v2, %v1329_v51  ;;  %v1409_v43 = vpop.f32.mrf.mxu1  ;;  %v1445_v63 = vmax.f32 %v1437_v27, 0.0 }
 0x137   : > { %v1444_v59 = vadd.f32 %v1765_v36, %v1418_v0  ;;  %v1410_v39 = vadd.f32 %v1409_v43, %v1345_v20  ;;  %v1449_v29 = vmax.f32 %v1441_v57, 0.0 }
 0x138   : > { %v1448_v14 = vmax.f32 %v1440_v22, 0.0  ;;  %v1438_v19 = vadd.f32 %v1753_v17, %v1394_v40 }
 0x139   : > { %v1452_v41 = vmax.f32 %v1444_v59, 0.0  ;;  %v1442_v61 = vadd.f32 %v1761_v52, %v1410_v39 }
 0x13a   : > { %v1774_v9 = vpack.c.bf16 %v1448_v14, %v1447_v12  ;;  %v1446_v11 = vmax.f32 %v1438_v19, 0.0 }
 0x13b   : > { %v1784_v24 = vpack.c.bf16 %v1452_v41, %v1451_v44  ;;  %v1450_v26 = vmax.f32 %v1442_v61, 0.0 }
 0x13c   : > { %1789 = vst [vmem:[%s286_s24 + $0x8] sm:$0xff] %v1774_v9   ;;  %v1769_v33 = vpack.c.bf16 %v1446_v11, %v1445_v63 }
 0x13d   : > { %1791 = vst [vmem:[%s286_s24 + $0x18] sm:$0xff] %v1784_v24   ;;  %v1779_v30 = vpack.c.bf16 %v1450_v26, %v1449_v29 }
 0x13e   : > { %1770 = vst [vmem:[%s286_s24] sm:$0xff] %v1769_v33  }
 0x13f   : > { %1790 = vst [vmem:[%s286_s24 + $0x10] sm:$0xff] %v1779_v30  }
 0x140 PF: > { %s14_s17 = sadd.s32 1, %s2175_s17   ;;  %s2617_s15 = smov %s2171_s16 }
 0x141   : > { %p11_p5 = scmp.ge.s32.totalorder %s14_s17, 4   ;;  %s2618_s16 = smov %s2620_s18 }
 0x143   :  { %13 = sbr.rel (!%p11_p5) target bundleno = 2 (0x2), region = 75 }

// kernel: model_forward.16
= control target key start
LH: loop header
LB: loop body
LE: loop exit
PB: predicated region body
PF: predicated region fallthrough
CT: control target
= control target key end

     0   :  { %s2077_s12 = smov 0   ;;  %s2079_s13 = smov 0   ;;  %s2437_s0 = inlined_call_operand.vmem [shape: bf16[128,1152], index: 0, kind: input, shape index: {}]   ;;  %s2438_s1 = inlined_call_operand.vmem [shape: bf16[1152,128], index: 1, kind: input, shape index: {}]   ;;  %s2439_s2 = inlined_call_operand.vmem [shape: f32[1,128], index: 2, kind: input, shape index: {}]   ;;  %s2440_s3 = inlined_call_operand.vmem [shape: bf16[128,128], index: 3, kind: output, shape index: {}]  }
   0x1   :  { %s2081_s14 = smov 0  }
   0x2 LB: > { %s25_s15 = sadd.s32 1, %s2051_s13  ;;  %p1517_p0 = scmp.ge.s32.totalorder %s2055_s14, 1  ;;  %s2055_s14 = sphi %s2081_s14, %s13_s14   ;;  %s2051_s13 = sphi %s2079_s13, %s2452_s13   ;;  %s2047_s12 = sphi %s2077_s12, %s2451_s12  }
   0x3   : > { %p27_p1 = scmp.ge.s32.totalorder %s25_s15, 2  ;;  %p170_p2 = scmp.lt.s32.totalorder %s2055_s14, 3 }
   0x5   : > { %s2454_s15 = smov (%p27_p1, %s25_s15), 0  ;;  %p171_p3 = pnand %p1517_p0, %p170_p2 }
   0x7   : > { %174 = sbr.rel (%p171_p3) target bundleno = 318 (0x13e), region = 32 }
   0xc   : > { %v1909_v0 = vld [vmem:[%s2438_s1 + $0x78] sm:$0xff]   ;;  %v1913_v4 = vld [vmem:[%s2438_s1 + $0x70] sm:$0xff]   ;;  %v1917_v8 = vld [vmem:[%s2438_s1 + $0x68] sm:$0xff]   ;;  %s1518_s23 = sshll.u32 %s2047_s12, 3 }
   0xd   : > { %v1910_v1 = vld [vmem:[%s2438_s1 + $0xf8] sm:$0xff]   ;;  %1672 = vmatprep.subr.bf16.mxu0 %v1909_v0  ;;  %v1914_v5 = vld [vmem:[%s2438_s1 + $0xf0] sm:$0xff]   ;;  %v1918_v9 = vld [vmem:[%s2438_s1 + $0xe8] sm:$0xff]   ;;  %p206_p4 = scmp.lt.s32.totalorder %s1518_s23, 15 }
   0xe   : > { %v1911_v2 = vld [vmem:[%s2438_s1 + $0x38] sm:$0xff]   ;;  %1712 = vmatprep.subr.bf16.mxu1 %v1910_v1  ;;  %v1915_v6 = vld [vmem:[%s2438_s1 + $0x30] sm:$0xff]   ;;  %v1919_v10 = vld [vmem:[%s2438_s1 + $0x28] sm:$0xff]  }
   0xf   : > { %v1912_v3 = vld [vmem:[%s2438_s1 + $0xb8] sm:$0xff]   ;;  %1673 = vmatpush3.bf16.msra.mxu0 %v1911_v2  ;;  %v1916_v7 = vld [vmem:[%s2438_s1 + $0xb0] sm:$0xff]   ;;  %v1920_v11 = vld [vmem:[%s2438_s1 + $0xa8] sm:$0xff]   ;;  %s2456_s23 = smov (!%p206_p4, %s1518_s23), 15 }
  0x10   : > { %1713 = vmatpush3.bf16.msra.mxu1 %v1912_v3  ;;  %1674 = vmatprep.subr.bf16.mxu0 %v1913_v4  ;;  %v1921_v12 = vld [vmem:[%s2438_s1 + $0x60] sm:$0xff]   ;;  %v1925_v16 = vld [vmem:[%s2438_s1 + $0x58] sm:$0xff]   ;;  %v1929_v20 = vld [vmem:[%s2438_s1 + $0x50] sm:$0xff]   ;;  %s1884_s22 = smul.u32 36, %s2456_s23  ;;  %s1521_s4 = sshll.u32 %s2456_s23, 2 }
  0x11   : > { %1714 = vmatprep.subr.bf16.mxu1 %v1914_v5  ;;  %v1922_v13 = vld [vmem:[%s2438_s1 + $0xe0] sm:$0xff]   ;;  %v1926_v17 = vld [vmem:[%s2438_s1 + $0xd8] sm:$0xff]   ;;  %v1930_v21 = vld [vmem:[%s2438_s1 + $0xd0] sm:$0xff]   ;;  %s226_s7 = scalar_lea.vmem %s2440_s3, %s1521_s4 }
  0x12   : > { %v1923_v14 = vld [vmem:[%s2438_s1 + $0x20] sm:$0xff]   ;;  %v1927_v18 = vld [vmem:[%s2438_s1 + $0x18] sm:$0xff]   ;;  %v1931_v22 = vld [vmem:[%s2438_s1 + $0x10] sm:$0xff]   ;;  %s2194_s6 = scalar_lea.vmem %s2437_s0, %s1884_s22 }
  0x13   : > { %1675 = vmatpush3.bf16.msra.mxu0 %v1915_v6  ;;  %v1924_v15 = vld [vmem:[%s2438_s1 + $0xa0] sm:$0xff]   ;;  %v1928_v19 = vld [vmem:[%s2438_s1 + $0x98] sm:$0xff]   ;;  %v1932_v23 = vld [vmem:[%s2438_s1 + $0x90] sm:$0xff]  }
  0x14   : > { %1715 = vmatpush3.bf16.msra.mxu1 %v1916_v7  ;;  %1676 = vmatprep.subr.bf16.mxu0 %v1917_v8  ;;  %v1933_v24 = vld [vmem:[%s2438_s1 + $0x48] sm:$0xff]   ;;  %v1937_v28 = vld [vmem:[%s2438_s1 + $0x40] sm:$0xff]   ;;  %v1947_v36 = vld [vmem:[%s2438_s1 + $0x178] sm:$0xff]  }
  0x15   : > { %1716 = vmatprep.subr.bf16.mxu1 %v1918_v9  ;;  %v1934_v25 = vld [vmem:[%s2438_s1 + $0xc8] sm:$0xff]   ;;  %v1938_v29 = vld [vmem:[%s2438_s1 + $0xc0] sm:$0xff]   ;;  %v1948_v37 = vld [vmem:[%s2438_s1 + $0x1f8] sm:$0xff]  }
  0x16   : > { %v1935_v26 = vld [vmem:[%s2438_s1 + $0x8] sm:$0xff]   ;;  %v1939_v30 = vld [vmem:[%s2438_s1] sm:$0xff]   ;;  %v1949_v38 = vld [vmem:[%s2438_s1 + $0x138] sm:$0xff]  }
  0x17   : > { %1677 = vmatpush3.bf16.msra.mxu0 %v1919_v10  ;;  %v1936_v27 = vld [vmem:[%s2438_s1 + $0x88] sm:$0xff]   ;;  %v1940_v31 = vld [vmem:[%s2438_s1 + $0x80] sm:$0xff]   ;;  %v1950_v39 = vld [vmem:[%s2438_s1 + $0x1b8] sm:$0xff]  }
  0x18   : > { %1717 = vmatpush3.bf16.msra.mxu1 %v1920_v11  ;;  %1678 = vmatprep.subr.bf16.mxu0 %v1921_v12  ;;  %v1941_v32 = vld [vmem:[%s2194_s6] ss:$36 sps:$4 sm:$0xff]   ;;  %v1944_v34 = vld [vmem:[%s2194_s6 + $0x8] ss:$36 sps:$4 sm:$0xff]   ;;  %v1951_v40 = vld [vmem:[%s2438_s1 + $0x170] sm:$0xff]  }
  0x19   : > { %1718 = vmatprep.subr.bf16.mxu1 %v1922_v13  ;;  %v1943_v33 = vld [vmem:[%s2194_s6 + $0x4] ss:$36 sps:$4 sm:$0xff]   ;;  %v1946_v35 = vld [vmem:[%s2194_s6 + $0xc] ss:$36 sps:$4 sm:$0xff]   ;;  %v1957_v45 = vld [vmem:[%s2194_s6 + $0x54] ss:$36 sps:$4 sm:$0xff]  }
  0x1a   : > { %1068 = vmatprep.mubr.bf16.mxu0 %v1943_v33  ;;  %1133 = vmatprep.mubr.bf16.mxu1 %v1946_v35  ;;  %v1952_v41 = vld [vmem:[%s2438_s1 + $0x1f0] sm:$0xff]   ;;  %v1959_v46 = vld [vmem:[%s2194_s6 + $0x48] ss:$36 sps:$4 sm:$0xff]   ;;  %v1965_v52 = vld [vmem:[%s2438_s1 + $0x160] sm:$0xff]  }
  0x1b   : > { %1679 = vmatpush3.bf16.msra.mxu0 %v1923_v14  ;;  %v1953_v42 = vld [vmem:[%s2438_s1 + $0x130] sm:$0xff]   ;;  %v1961_v48 = vld [vmem:[%s2438_s1 + $0x168] sm:$0xff]   ;;  %v1966_v53 = vld [vmem:[%s2438_s1 + $0x1e0] sm:$0xff]  }
  0x1c   : > { %1719 = vmatpush3.bf16.msra.mxu1 %v1924_v15  ;;  %1680 = vmatprep.subr.bf16.mxu0 %v1925_v16  ;;  %v1954_v43 = vld [vmem:[%s2438_s1 + $0x1b0] sm:$0xff]   ;;  %v1962_v49 = vld [vmem:[%s2438_s1 + $0x1e8] sm:$0xff]   ;;  %v1967_v54 = vld [vmem:[%s2438_s1 + $0x120] sm:$0xff]  }
  0x1d   : > { %1720 = vmatprep.subr.bf16.mxu1 %v1926_v17  ;;  %v1955_v44 = vld [vmem:[%s2194_s6 + $0x4c] ss:$36 sps:$4 sm:$0xff]   ;;  %v1968_v55 = vld [vmem:[%s2438_s1 + $0x1a0] sm:$0xff]   ;;  %v1969_v56 = vld [vmem:[%s2194_s6 + $0x94] ss:$36 sps:$4 sm:$0xff]  }
  0x1e   : > { %v1960_v47 = vld [vmem:[%s2194_s6 + $0x50] ss:$36 sps:$4 sm:$0xff]   ;;  %v1963_v50 = vld [vmem:[%s2438_s1 + $0x128] sm:$0xff]   ;;  %v1971_v57 = vld [vmem:[%s2194_s6 + $0x9c] ss:$36 sps:$4 sm:$0xff]  }
  0x1f   : > { %1681 = vmatpush3.bf16.msra.mxu0 %v1927_v18  ;;  %v1964_v51 = vld [vmem:[%s2438_s1 + $0x1a8] sm:$0xff]   ;;  %v1973_v58 = vld [vmem:[%s2194_s6 + $0x90] ss:$36 sps:$4 sm:$0xff]   ;;  %v1974_v59 = vld [vmem:[%s2194_s6 + $0x98] ss:$36 sps:$4 sm:$0xff]  }
  0x20   : > { %1721 = vmatpush3.bf16.msra.mxu1 %v1928_v19  ;;  %1682 = vmatprep.subr.bf16.mxu0 %v1929_v20  ;;  %v1975_v60 = vld [vmem:[%s2438_s1 + $0x158] sm:$0xff]   ;;  %v1979_v0 = vld [vmem:[%s2438_s1 + $0x150] sm:$0xff]   ;;  %v1985_v5 = vld [vmem:[%s2194_s6 + $0xe4] ss:$36 sps:$4 sm:$0xff]  }
  0x21   : > { %1722 = vmatprep.subr.bf16.mxu1 %v1930_v21  ;;  %v1976_v61 = vld [vmem:[%s2438_s1 + $0x1d8] sm:$0xff]   ;;  %v1980_v1 = vld [vmem:[%s2438_s1 + $0x1d0] sm:$0xff]   ;;  %v1988_v7 = vld [vmem:[%s2194_s6 + $0xe0] ss:$36 sps:$4 sm:$0xff]  }
  0x22   : > { %v1977_v62 = vld [vmem:[%s2438_s1 + $0x118] sm:$0xff]   ;;  %v1981_v2 = vld [vmem:[%s2438_s1 + $0x110] sm:$0xff]   ;;  %v1989_v8 = vld [vmem:[%s2438_s1 + $0x148] sm:$0xff]  }
  0x23   : > { %1683 = vmatpush3.bf16.msra.mxu0 %v1931_v22  ;;  %v1978_v63 = vld [vmem:[%s2438_s1 + $0x198] sm:$0xff]   ;;  %v1982_v3 = vld [vmem:[%s2438_s1 + $0x190] sm:$0xff]   ;;  %v1990_v9 = vld [vmem:[%s2438_s1 + $0x1c8] sm:$0xff]  }
  0x24   : > { %1723 = vmatpush3.bf16.msra.mxu1 %v1932_v23  ;;  %1684 = vmatprep.subr.bf16.mxu0 %v1933_v24  ;;  %v1983_v4 = vld [vmem:[%s2194_s6 + $0xdc] ss:$36 sps:$4 sm:$0xff]   ;;  %v1991_v10 = vld [vmem:[%s2438_s1 + $0x108] sm:$0xff]   ;;  %v1997_v16 = vld [vmem:[%s2194_s6 + $0x10] ss:$36 sps:$4 sm:$0xff]  }
  0x25   : > { %1724 = vmatprep.subr.bf16.mxu1 %v1934_v25  ;;  %v1987_v6 = vld [vmem:[%s2194_s6 + $0xd8] ss:$36 sps:$4 sm:$0xff]   ;;  %v1992_v11 = vld [vmem:[%s2438_s1 + $0x188] sm:$0xff]   ;;  %v1993_v12 = vld [vmem:[%s2438_s1 + $0x140] sm:$0xff]  }
  0x26   : > { %v1994_v13 = vld [vmem:[%s2438_s1 + $0x1c0] sm:$0xff]   ;;  %v1999_v17 = vld [vmem:[%s2194_s6 + $0x14] ss:$36 sps:$4 sm:$0xff]   ;;  %v2021_v33 = vld [vmem:[%s2194_s6 + $0xec] ss:$36 sps:$4 sm:$0xff]  }
  0x27   : > { %1685 = vmatpush3.bf16.msra.mxu0 %v1935_v26  ;;  %v1995_v14 = vld [vmem:[%s2438_s1 + $0x100] sm:$0xff]   ;;  %v2000_v18 = vld [vmem:[%s2194_s6 + $0x18] ss:$36 sps:$4 sm:$0xff]   ;;  %v2004_v21 = vld [vmem:[%s2438_s1 + $0x230] sm:$0xff]  }
  0x28   : > { %1725 = vmatpush3.bf16.msra.mxu1 %v1936_v27  ;;  %1686 = vmatprep.subr.bf16.mxu0 %v1937_v28  ;;  %v1996_v15 = vld [vmem:[%s2438_s1 + $0x180] sm:$0xff]   ;;  %v2003_v20 = vld [vmem:[%s2438_s1 + $0x238] sm:$0xff]   ;;  %v2011_v26 = vld [vmem:[%s2438_s1 + $0x228] sm:$0xff]  }
  0x29   : > { %1726 = vmatprep.subr.bf16.mxu1 %v1938_v29  ;;  %v2002_v19 = vld [vmem:[%s2194_s6 + $0x1c] ss:$36 sps:$4 sm:$0xff]   ;;  %v2007_v23 = vld [vmem:[%s2194_s6 + $0x64] ss:$36 sps:$4 sm:$0xff]   ;;  %v2015_v28 = vld [vmem:[%s2194_s6 + $0xac] ss:$36 sps:$4 sm:$0xff]  }
  0x2a   : > { %v2005_v22 = vld [vmem:[%s2194_s6 + $0x5c] ss:$36 sps:$4 sm:$0xff]   ;;  %v2013_v27 = vld [vmem:[%s2194_s6 + $0xa4] ss:$36 sps:$4 sm:$0xff]   ;;  %v2020_v35 = vld [vmem:[%s2438_s1 + $0x210] sm:$0xff]  }
  0x2b   : > { %1687 = vmatpush3.bf16.msra.mxu0 %v1939_v30  ;;  %v2009_v24 = vld [vmem:[%s2194_s6 + $0x58] ss:$36 sps:$4 sm:$0xff]   ;;  %v2010_v25 = vld [vmem:[%s2194_s6 + $0x60] ss:$36 sps:$4 sm:$0xff]  }
  0x2c   : > { %1727 = vmatpush3.bf16.msra.mxu1 %v1940_v31  ;;  %1752 = vmatprep.subr.bf16.mxu0 %v1947_v36  ;;  %v2012_v29 = vld [vmem:[%s2438_s1 + $0x220] sm:$0xff]   ;;  %v2018_v31 = vld [vmem:[%s2194_s6 + $0xa8] ss:$36 sps:$4 sm:$0xff]  }
  0x2d   : > { %1792 = vmatprep.subr.bf16.mxu1 %v1948_v37  ;;  %v2017_v30 = vld [vmem:[%s2194_s6 + $0xa0] ss:$36 sps:$4 sm:$0xff]   ;;  %v2025_v36 = vld [vmem:[%s2194_s6 + $0xe8] ss:$36 sps:$4 sm:$0xff]  }
  0x2e   : > { %1069 = vmatmul.mubr.bf16.vlgmr.msra.gmra.mxu0 %v1941_v32  ;;  %v2019_v32 = vld [vmem:[%s2438_s1 + $0x218] sm:$0xff]   ;;  %v2027_v37 = vld [vmem:[%s2438_s1 + $0x208] sm:$0xff]  }
  0x2f   : > { %1134 = vmatmul.mubr.bf16.vlgmr.msra.gmra.mxu1 %v1944_v34  ;;  %1753 = vmatpush3.bf16.msra.mxu0 %v1949_v38  ;;  %v2023_v34 = vld [vmem:[%s2194_s6 + $0xf4] ss:$36 sps:$4 sm:$0xff]  }
  0x30   : > { %1793 = vmatpush3.bf16.msra.mxu1 %v1950_v39  ;;  %1754 = vmatprep.subr.bf16.mxu0 %v1951_v40  ;;  %v2026_v38 = vld [vmem:[%s2194_s6 + $0xf0] ss:$36 sps:$4 sm:$0xff]   ;;  %v2029_v39 = vld [vmem:[%s2194_s6 + $0x20] ss:$36 sps:$4 sm:$0xff]  }
  0x31   : > { %1794 = vmatprep.subr.bf16.mxu1 %v1952_v41  ;;  %1076 = vmatprep.mubr.bf16.mxu0 %v1955_v44  ;;  %v2030_v40 = vld [vmem:[%s2194_s6 + $0xb0] ss:$36 sps:$4 sm:$0xff]   ;;  %v2028_v41 = vld [vmem:[%s2438_s1 + $0x200] sm:$0xff]  }
  0x32   : > { %1141 = vmatprep.mubr.bf16.mxu1 %v1957_v45 }
  0x33   : > { %1755 = vmatpush3.bf16.msra.mxu0 %v1953_v42  ;;  %v2031_v42 = vld [vmem:[%s2194_s6 + $0x68] ss:$36 sps:$4 sm:$0xff]  }
  0x34   : > { %1795 = vmatpush3.bf16.msra.mxu1 %v1954_v43  ;;  %1756 = vmatprep.subr.bf16.mxu0 %v1961_v48  ;;  %v2032_v43 = vld [vmem:[%s2194_s6 + $0xf8] ss:$36 sps:$4 sm:$0xff]  }
  0x35   : > { %1796 = vmatprep.subr.bf16.mxu1 %v1962_v49 }
  0x36   : > { %1077 = vmatmul.mubr.bf16.gmra.mxu0 %v1959_v46 }
  0x37   : > { %1142 = vmatmul.mubr.bf16.gmra.mxu1 %v1960_v47  ;;  %1757 = vmatpush3.bf16.msra.mxu0 %v1963_v50 }
  0x38   : > { %1797 = vmatpush3.bf16.msra.mxu1 %v1964_v51  ;;  %1758 = vmatprep.subr.bf16.mxu0 %v1965_v52 }
  0x39   : > { %1798 = vmatprep.subr.bf16.mxu1 %v1966_v53  ;;  %1084 = vmatprep.mubr.bf16.mxu0 %v1969_v56 }
  0x3a   : > { %1149 = vmatprep.mubr.bf16.mxu1 %v1971_v57 }
  0x3b   : > { %1759 = vmatpush3.bf16.msra.mxu0 %v1967_v54 }
  0x3c   : > { %1799 = vmatpush3.bf16.msra.mxu1 %v1968_v55  ;;  %1760 = vmatprep.subr.bf16.mxu0 %v1975_v60 }
  0x3d   : > { %1800 = vmatprep.subr.bf16.mxu1 %v1976_v61 }
  0x3e   : > { %1085 = vmatmul.mubr.bf16.gmra.mxu0 %v1973_v58 }
  0x3f   : > { %1150 = vmatmul.mubr.bf16.gmra.mxu1 %v1974_v59  ;;  %1761 = vmatpush3.bf16.msra.mxu0 %v1977_v62 }
  0x40   : > { %1801 = vmatpush3.bf16.msra.mxu1 %v1978_v63  ;;  %1762 = vmatprep.subr.bf16.mxu0 %v1979_v0 }
  0x41   : > { %1802 = vmatprep.subr.bf16.mxu1 %v1980_v1  ;;  %1092 = vmatprep.mubr.bf16.mxu0 %v1983_v4 }
  0x42   : > { %1157 = vmatprep.mubr.bf16.mxu1 %v1985_v5 }
  0x43   : > { %1763 = vmatpush3.bf16.msra.mxu0 %v1981_v2 }
  0x44   : > { %1803 = vmatpush3.bf16.msra.mxu1 %v1982_v3  ;;  %1764 = vmatprep.subr.bf16.mxu0 %v1989_v8 }
  0x45   : > { %1804 = vmatprep.subr.bf16.mxu1 %v1990_v9 }
  0x46   : > { %1093 = vmatmul.mubr.bf16.gmra.mxu0 %v1987_v6 }
  0x47   : > { %1158 = vmatmul.mubr.bf16.gmra.mxu1 %v1988_v7  ;;  %1765 = vmatpush3.bf16.msra.mxu0 %v1991_v10 }
  0x48   : > { %1805 = vmatpush3.bf16.msra.mxu1 %v1992_v11  ;;  %1766 = vmatprep.subr.bf16.mxu0 %v1993_v12 }
  0x49   : > { %1806 = vmatprep.subr.bf16.mxu1 %v1994_v13  ;;  %1198 = vmatprep.mubr.bf16.mxu0 %v1999_v17 }
  0x4a   : > { %1263 = vmatprep.mubr.bf16.mxu1 %v2002_v19 }
  0x4b   : > { %1767 = vmatpush3.bf16.msra.mxu0 %v1995_v14 }
  0x4c   : > { %1807 = vmatpush3.bf16.msra.mxu1 %v1996_v15  ;;  %1844 = vmatprep.subr.bf16.mxu0 %v2003_v20 }
  0x4d   : > { %1868 = vmatprep.subr.bf16.mxu1 %v2003_v20 }
  0x4e   : > { %1199 = vmatmul.mubr.bf16.vlgmr.msra.gmra.mxu0 %v1997_v16 }
  0x4f   : > { %1264 = vmatmul.mubr.bf16.vlgmr.msra.gmra.mxu1 %v2000_v18  ;;  %1845 = vmatpush3.bf16.msra.mxu0 %v2003_v20 }
  0x50   : > { %1876 = vmatpush3.bf16.msra.mxu1 %v2003_v20  ;;  %1846 = vmatprep.subr.bf16.mxu0 %v2004_v21 }
  0x51   : > { %1869 = vmatprep.subr.bf16.mxu1 %v2004_v21  ;;  %1206 = vmatprep.mubr.bf16.mxu0 %v2005_v22 }
  0x52   : > { %1271 = vmatprep.mubr.bf16.mxu1 %v2007_v23 }
  0x53   : > { %1847 = vmatpush3.bf16.msra.mxu0 %v2004_v21 }
  0x54   : > { %1877 = vmatpush3.bf16.msra.mxu1 %v2004_v21  ;;  %1848 = vmatprep.subr.bf16.mxu0 %v2011_v26 }
  0x55   : > { %1870 = vmatprep.subr.bf16.mxu1 %v2011_v26 }
  0x56   : > { %1207 = vmatmul.mubr.bf16.gmra.mxu0 %v2009_v24 }
  0x57   : > { %1272 = vmatmul.mubr.bf16.gmra.mxu1 %v2010_v25  ;;  %1214 = vmatprep.mubr.bf16.mxu0 %v2013_v27 }
  0x58   : > { %1849 = vmatpush3.bf16.msra.mxu0 %v2011_v26  ;;  %1279 = vmatprep.mubr.bf16.mxu1 %v2015_v28 }
  0x59   : > { %1878 = vmatpush3.bf16.msra.mxu1 %v2011_v26  ;;  %1850 = vmatprep.subr.bf16.mxu0 %v2012_v29 }
  0x5a   : > { %1871 = vmatprep.subr.bf16.mxu1 %v2012_v29 }
  0x5c   : > { %1851 = vmatpush3.bf16.msra.mxu0 %v2012_v29 }
  0x5d   : > { %1879 = vmatpush3.bf16.msra.mxu1 %v2012_v29  ;;  %1852 = vmatprep.subr.bf16.mxu0 %v2019_v32 }
  0x5e   : > { %1215 = vmatmul.mubr.bf16.gmra.mxu0 %v2017_v30  ;;  %1872 = vmatprep.subr.bf16.mxu1 %v2019_v32  ;;  %v1522_v30 = vld [vmem:[%s2439_s2] ss:$0 sm:$0xff] }
  0x5f   : > { %1280 = vmatmul.mubr.bf16.gmra.mxu1 %v2018_v31  ;;  %1222 = vmatprep.mubr.bf16.mxu0 %v2021_v33 }
  0x60   : > { %1853 = vmatpush3.bf16.msra.mxu0 %v2019_v32  ;;  %1287 = vmatprep.mubr.bf16.mxu1 %v2023_v34 }
  0x61   : > { %1880 = vmatpush3.bf16.msra.mxu1 %v2019_v32  ;;  %1854 = vmatprep.subr.bf16.mxu0 %v2020_v35 }
  0x62   : > { %1873 = vmatprep.subr.bf16.mxu1 %v2020_v35 }
  0x64   : > { %1855 = vmatpush3.bf16.msra.mxu0 %v2020_v35 }
  0x65   : > { %1881 = vmatpush3.bf16.msra.mxu1 %v2020_v35  ;;  %1856 = vmatprep.subr.bf16.mxu0 %v2027_v37 }
  0x66   : > { %1223 = vmatmul.mubr.bf16.gmra.mxu0 %v2025_v36  ;;  %1874 = vmatprep.subr.bf16.mxu1 %v2027_v37 }
  0x67   : > { %1288 = vmatmul.mubr.bf16.gmra.mxu1 %v2026_v38  ;;  %1860 = vmatprep.mubr.bf16.mxu0 %v2029_v39 }
  0x68   : > { %1857 = vmatpush3.bf16.msra.mxu0 %v2027_v37  ;;  %1864 = vmatprep.mubr.bf16.mxu1 %v2030_v40 }
  0x69   : > { %1882 = vmatpush3.bf16.msra.mxu1 %v2027_v37  ;;  %1858 = vmatprep.subr.bf16.mxu0 %v2028_v41 }
  0x6a   : > { %1875 = vmatprep.subr.bf16.mxu1 %v2028_v41 }
  0x6c   : > { %1859 = vmatpush3.bf16.msra.mxu0 %v2028_v41 }
  0x6d   : > { %1883 = vmatpush3.bf16.msra.mxu1 %v2028_v41 }
  0x6f   : > { %1861 = vmatmul.mubr.bf16.vlgmr.msra.gmra.mxu0 %v2031_v42 }
  0x70   : > { %1865 = vmatmul.mubr.bf16.vlgmr.msra.gmra.mxu1 %v2032_v43 }
  0xee   : > { %v1688_v44 = vpop.f32.mrf.mxu0 }
  0xef   : > { %v1728_v45 = vpop.f32.mrf.mxu1 }
  0xf0   : > { %v1689_v46 = vpop.f32.mrf.mxu0 }
  0xf1   : > { %v1729_v47 = vpop.f32.mrf.mxu1  ;;  %v1690_v29 = vadd.f32 %v1689_v46, %v1688_v44 }
  0xf2   : > { %v1691_v48 = vpop.f32.mrf.mxu0  ;;  %v1730_v42 = vadd.f32 %v1729_v47, %v1728_v45 }
  0xf3   : > { %v2358_v49 = vpop.f32.mrf.mxu1  ;;  %v1071_v38 = vadd.f32 %v1690_v29, %v1522_v30 }
  0xf4   : > { %v1692_v50 = vpop.f32.mrf.mxu0 }
  0xf5   : > { %v2360_v51 = vpop.f32.mrf.mxu1  ;;  %v1693_v33 = vadd.f32 %v1692_v50, %v1691_v48 }
  0xf6   : > { %v1694_v52 = vpop.f32.mrf.mxu0  ;;  %v1733_v50 = vadd.f32 %v2360_v51, %v2358_v49 }
  0xf7   : > { %v2362_v53 = vpop.f32.mrf.mxu1  ;;  %v1074_v44 = vadd.f32 %v1693_v33, %v1522_v30 }
  0xf8   : > { %v1695_v54 = vpop.f32.mrf.mxu0 }
  0xf9   : > { %v1735_v55 = vpop.f32.mrf.mxu1  ;;  %v1696_v34 = vadd.f32 %v1695_v54, %v1694_v52 }
  0xfa   : > { %v1697_v56 = vpop.f32.mrf.mxu0  ;;  %v1736_v52 = vadd.f32 %v1735_v55, %v2362_v53 }
  0xfb   : > { %v2364_v57 = vpop.f32.mrf.mxu1  ;;  %v1079_v46 = vadd.f32 %v1696_v34, %v1522_v30 }
  0xfc   : > { %v1698_v58 = vpop.f32.mrf.mxu0 }
  0xfd   : > { %v2366_v59 = vpop.f32.mrf.mxu1  ;;  %v1699_v39 = vadd.f32 %v1698_v58, %v1697_v56 }
  0xfe   : > { %v1700_v60 = vpop.f32.mrf.mxu0  ;;  %v1739_v45 = vadd.f32 %v2366_v59, %v2364_v57 }
  0xff   : > { %v2368_v61 = vpop.f32.mrf.mxu1  ;;  %v1082_v48 = vadd.f32 %v1699_v39, %v1522_v30 }
 0x100   : > { %v1701_v62 = vpop.f32.mrf.mxu0 }
 0x101   : > { %v2370_v63 = vpop.f32.mrf.mxu1 }
 0x102   : > { %v1703_v0 = vpop.f32.mrf.mxu0  ;;  %v1742_v55 = vadd.f32 %v2370_v63, %v2368_v61 }
 0x103   : > { %v2372_v1 = vpop.f32.mrf.mxu1 }
 0x104   : > { %v1704_v2 = vpop.f32.mrf.mxu0 }
 0x105   : > { %v2374_v3 = vpop.f32.mrf.mxu1  ;;  %v1705_v54 = vadd.f32 %v1704_v2, %v1703_v0 }
 0x106   : > { %v1706_v4 = vpop.f32.mrf.mxu0 }
 0x107   : > { %v1746_v5 = vpop.f32.mrf.mxu1  ;;  %v1090_v0 = vadd.f32 %v1705_v54, %v1522_v30 }
 0x108   : > { %v1707_v6 = vpop.f32.mrf.mxu0 }
 0x109   : > { %v1747_v7 = vpop.f32.mrf.mxu1  ;;  %v1708_v35 = vadd.f32 %v1707_v6, %v1706_v4 }
 0x10a   : > { %v1709_v8 = vpop.f32.mrf.mxu0  ;;  %v1748_v56 = vadd.f32 %v1747_v7, %v1746_v5 }
 0x10b   : > { %v1749_v9 = vpop.f32.mrf.mxu1 }
 0x10c   : > { %v1710_v10 = vpop.f32.mrf.mxu0 }
 0x10d   : > { %v1750_v11 = vpop.f32.mrf.mxu1  ;;  %v1711_v43 = vadd.f32 %v1710_v10, %v1709_v8  ;;  %v1144_v8 = vadd.f32 %v1736_v52, %v1079_v46 }
 0x10e   : > { %v1768_v12 = vpop.f32.mrf.mxu0  ;;  %v1751_v49 = vadd.f32 %v1750_v11, %v1749_v9 }
 0x10f   : > { %v2376_v13 = vpop.f32.mrf.mxu1  ;;  %v1098_v47 = vadd.f32 %v1711_v43, %v1522_v30 }
 0x110   : > { %v1769_v14 = vpop.f32.mrf.mxu0 }
 0x111   : > { %v2378_v15 = vpop.f32.mrf.mxu1  ;;  %v1770_v51 = vadd.f32 %v1769_v14, %v1768_v12  ;;  %v1163_v7 = vadd.f32 %v1751_v49, %v1098_v47 }
 0x112   : > { %v2380_v16 = vpop.f32.mrf.mxu0 }
 0x113   : > { %v2382_v17 = vpop.f32.mrf.mxu1 }
 0x114   : > { %2441 = vst [vmem:[#allocation2_spill] sm:$0xff] %v2382_v17  ;;  %v1772_v18 = vpop.f32.mrf.mxu0  ;;  %v1095_v17 = vadd.f32 %v1708_v35, %v1522_v30  ;;  %v1147_v35 = vadd.f32 %v1739_v45, %v1082_v48 }
 0x115   : > { %v2384_v19 = vpop.f32.mrf.mxu1 }
 0x116   : > { %2442 = vst [vmem:[#allocation3_spill] sm:$0xff] %v2384_v19  ;;  %v1774_v20 = vpop.f32.mrf.mxu0  ;;  %v1702_v19 = vadd.f32 %v1701_v62, %v1700_v60  ;;  %v1139_v62 = vadd.f32 %v1733_v50, %v1074_v44  ;;  %v1160_v29 = vadd.f32 %v1748_v56, %v1095_v17 }
 0x117   : > { %v2386_v21 = vpop.f32.mrf.mxu1 }
 0x118   : > { %v1775_v22 = vpop.f32.mrf.mxu0  ;;  %v1087_v10 = vadd.f32 %v1702_v19, %v1522_v30 }
 0x119   : > { %v2388_v23 = vpop.f32.mrf.mxu1  ;;  %v1776_v6 = vadd.f32 %v1775_v22, %v1774_v20  ;;  %v1773_v20 = vadd.f32 %v1772_v18, %v2380_v16  ;;  %v1810_v18 = vadd.f32 %v2378_v15, %v2376_v13 }
 0x11a   : > { %v1777_v24 = vpop.f32.mrf.mxu0  ;;  %v1152_v17 = vadd.f32 %v1742_v55, %v1087_v10  ;;  %v1816_v61 = vadd.f32 %v2388_v23, %v2386_v21 }
 0x11b   : > { %v2390_v25 = vpop.f32.mrf.mxu1  ;;  %v1209_v22 = vadd.f32 %v1776_v6, %v1144_v8  ;;  %v2449_v44 = vld [vmem:[#allocation2_spill] sm:$0xff] }
 0x11c   : > { %2443 = vst [vmem:[#allocation4_spill] sm:$0xff] %v2390_v25  ;;  %v1778_v26 = vpop.f32.mrf.mxu0  ;;  %v1136_v25 = vadd.f32 %v1730_v42, %v1071_v38  ;;  %v1204_v38 = vadd.f32 %v1773_v20, %v1139_v62 }
 0x11d   : > { %v2392_v27 = vpop.f32.mrf.mxu1  ;;  %v1779_v53 = vadd.f32 %v1778_v26, %v1777_v24  ;;  %v2450_v46 = vld [vmem:[#allocation3_spill] sm:$0xff] }
 0x11e   : > { %2444 = vst [vmem:[#allocation5_spill] sm:$0xff] %v2392_v27  ;;  %v1780_v28 = vpop.f32.mrf.mxu0  ;;  %v1201_v14 = vadd.f32 %v1770_v51, %v1136_v25  ;;  %v1813_v48 = vadd.f32 %v2450_v46, %v2449_v44 }
 0x11f   : > { %v2397_v31 = vpop.f32.mrf.mxu1  ;;  %v1212_v63 = vadd.f32 %v1779_v53, %v1147_v35 }
 0x120   : > { %2445 = vst [vmem:[#allocation6_spill] sm:$0xff] %v2397_v31  ;;  %v1781_v32 = vpop.f32.mrf.mxu0  ;;  %v1266_v52 = vadd.f32 %v1810_v18, %v1201_v14 }
 0x121   : > { %v2399_v36 = vpop.f32.mrf.mxu1  ;;  %v1782_v2 = vadd.f32 %v1781_v32, %v1780_v28 }
 0x122   : > { %v1783_v37 = vpop.f32.mrf.mxu0 }
 0x123   : > { %v2401_v40 = vpop.f32.mrf.mxu1  ;;  %v1217_v28 = vadd.f32 %v1782_v2, %v1152_v17  ;;  %v2446_v39 = vld [vmem:[#allocation4_spill] sm:$0xff] }
 0x124   : > { %v1784_v41 = vpop.f32.mrf.mxu0 }
 0x125   : > { %v1824_v27 = vpop.f32.mrf.mxu1  ;;  %v1785_v9 = vadd.f32 %v1784_v41, %v1783_v37  ;;  %v1274_v37 = vadd.f32 %v1816_v61, %v1209_v22 }
 0x126   : > { %v1786_v31 = vpop.f32.mrf.mxu0  ;;  %v1825_v15 = vadd.f32 %v1824_v27, %v2401_v40 }
 0x127   : > { %v1826_v58 = vpop.f32.mrf.mxu1  ;;  %v2448_v41 = vld [vmem:[#allocation6_spill] sm:$0xff] }
 0x128   : > { %v1787_v4 = vpop.f32.mrf.mxu0  ;;  %v1822_v21 = vadd.f32 %v2399_v36, %v2448_v41  ;;  %v1269_v36 = vadd.f32 %v1813_v48, %v1204_v38 }
 0x129   : > { %v1788_v60 = vadd.f32 %v1787_v4, %v1786_v31  ;;  %v1827_v33 = vpop.f32.mrf.mxu1  ;;  %v1745_v31 = vadd.f32 %v2374_v3, %v2372_v1  ;;  %v2447_v1 = vld [vmem:[#allocation5_spill] sm:$0xff] }
 0x12a   : > { %v1789_v34 = vpop.f32.mrf.mxu0  ;;  %v1828_v11 = vadd.f32 %v1827_v33, %v1826_v58  ;;  %v1819_v3 = vadd.f32 %v2447_v1, %v2446_v39  ;;  %v1282_v58 = vadd.f32 %v1822_v21, %v1217_v28 }
 0x12b   : > { %v1225_v5 = vadd.f32 %v1788_v60, %v1160_v29  ;;  %v1829_v57 = vpop.f32.mrf.mxu1  ;;  %v1155_v26 = vadd.f32 %v1745_v31, %v1090_v0 }
 0x12c   : > { %v1790_v59 = vpop.f32.mrf.mxu0  ;;  %v1277_v13 = vadd.f32 %v1819_v3, %v1212_v63 }
 0x12d   : > { %v1791_v19 = vadd.f32 %v1790_v59, %v1789_v34  ;;  %v1830_v12 = vpop.f32.mrf.mxu1  ;;  %v1290_v16 = vadd.f32 %v1828_v11, %v1225_v5  ;;  %v1220_v23 = vadd.f32 %v1785_v9, %v1155_v26 }
 0x12e   : > { %v1831_v30 = vadd.f32 %v1830_v12, %v1829_v57 }
 0x12f   : > { %v1228_v24 = vadd.f32 %v1791_v19, %v1163_v7  ;;  %v1862_v32 = vpop.f32.mrf.mxu0  ;;  %v1285_v10 = vadd.f32 %v1825_v15, %v1220_v23 }
 0x130   : > { %v1866_v25 = vpop.f32.mrf.mxu1  ;;  %v1339_v50 = vadd.f32 %v1862_v32, %v1274_v37 }
 0x131   : > { %v1330_v42 = vpop.f32.mrf.mxu0  ;;  %v1293_v43 = vadd.f32 %v1831_v30, %v1228_v24  ;;  %v1355_v56 = vadd.f32 %v1866_v25, %v1290_v16 }
 0x132   : > { %v1346_v54 = vpop.f32.mrf.mxu1  ;;  %v1331_v45 = vadd.f32 %v1330_v42, %v1266_v52  ;;  %v1363_v29 = vmax.f32 %v1339_v50, 0.0 }
 0x133   : > { %v1863_v4 = vpop.f32.mrf.mxu0  ;;  %v1347_v60 = vadd.f32 %v1346_v54, %v1282_v58  ;;  %v1367_v49 = vmax.f32 %v1355_v56, 0.0 }
 0x134   : > { %v1342_v47 = vadd.f32 %v1863_v4, %v1277_v13  ;;  %v1867_v6 = vpop.f32.mrf.mxu1  ;;  %v1361_v51 = vmax.f32 %v1331_v45, 0.0 }
 0x135   : > { %v1358_v62 = vadd.f32 %v1867_v6, %v1293_v43  ;;  %v1333_v8 = vpop.f32.mrf.mxu0  ;;  %v1365_v0 = vmax.f32 %v1347_v60, 0.0 }
 0x136   : > { %v1364_v33 = vmax.f32 %v1342_v47, 0.0  ;;  %v1334_v34 = vadd.f32 %v1333_v8, %v1269_v36  ;;  %v1349_v35 = vpop.f32.mrf.mxu1 }
 0x137   : > { %v1368_v27 = vmax.f32 %v1358_v62, 0.0  ;;  %v1350_v40 = vadd.f32 %v1349_v35, %v1285_v10 }
 0x138   : > { %v1657_v53 = vpack.c.bf16 %v1364_v33, %v1363_v29  ;;  %v1362_v55 = vmax.f32 %v1334_v34, 0.0 }
 0x139   : > { %v1667_v2 = vpack.c.bf16 %v1368_v27, %v1367_v49  ;;  %v1366_v5 = vmax.f32 %v1350_v40, 0.0 }
 0x13a   : > { %1669 = vst [vmem:[%s226_s7 + $0x8] sm:$0xff] %v1657_v53   ;;  %v1652_v57 = vpack.c.bf16 %v1362_v55, %v1361_v51 }
 0x13b   : > { %1671 = vst [vmem:[%s226_s7 + $0x18] sm:$0xff] %v1667_v2   ;;  %v1662_v59 = vpack.c.bf16 %v1366_v5, %v1365_v0 }
 0x13c   : > { %1653 = vst [vmem:[%s226_s7] sm:$0xff] %v1652_v57  }
 0x13d   : > { %1670 = vst [vmem:[%s226_s7 + $0x10] sm:$0xff] %v1662_v59  }
 0x13e PF: > { %s13_s14 = sadd.s32 1, %s2055_s14   ;;  %s2451_s12 = smov %s2051_s13 }
 0x13f   : > { %p10_p5 = scmp.ge.s32.totalorder %s13_s14, 4   ;;  %s2452_s13 = smov %s2454_s15 }
 0x141   :  { %12 = sbr.rel (!%p10_p5) target bundleno = 2 (0x2), region = 68 }

// kernel: model_forward.20
= control target key start
LH: loop header
LB: loop body
LE: loop exit
PB: predicated region body
PF: predicated region fallthrough
CT: control target
= control target key end

     0   :  { %s1566_s12 = smov 0   ;;  %s1568_s13 = smov 0   ;;  %s1836_s0 = inlined_call_operand.vmem [shape: bf16[32,1152], index: 0, kind: input, shape index: {}]   ;;  %s1837_s1 = inlined_call_operand.vmem [shape: bf16[1152,128], index: 1, kind: input, shape index: {}]   ;;  %s1838_s2 = inlined_call_operand.vmem [shape: f32[1,128], index: 2, kind: input, shape index: {}]   ;;  %s1839_s3 = inlined_call_operand.vmem [shape: bf16[32,128], index: 3, kind: output, shape index: {}]  }
   0x1   :  { %s1570_s14 = smov 0  }
   0x2 LB: > { %s25_s15 = sadd.s32 1, %s1538_s13  ;;  %p1193_p0 = scmp.ge.s32.totalorder %s1542_s14, 1  ;;  %s1542_s14 = sphi %s1570_s14, %s13_s14   ;;  %s1538_s13 = sphi %s1568_s13, %s1841_s13   ;;  %s1534_s12 = sphi %s1566_s12, %s1840_s12  }
   0x3   : > { %p27_p1 = scmp.ge.s32.totalorder %s25_s15, 2  ;;  %p170_p2 = scmp.lt.s32.totalorder %s1542_s14, 3 }
   0x5   : > { %s1843_s15 = smov (%p27_p1, %s25_s15), 0  ;;  %p171_p3 = pnand %p1193_p0, %p170_p2 }
   0x6   : > { %s1194_s21 = sshll.u32 (!%p171_p3), %s1534_s12, 1 }
   0x7   : > { %174 = sbr.rel (%p171_p3) target bundleno = 313 (0x139), region = 32  ;;  %p206_p4 = scmp.lt.s32.totalorder (!%p171_p3), %s1194_s21, 3 }
   0xc   : > { %v1435_v0 = vld [vmem:[%s1837_s1 + $0x78] sm:$0xff]   ;;  %v1439_v4 = vld [vmem:[%s1837_s1 + $0x70] sm:$0xff]   ;;  %v1443_v8 = vld [vmem:[%s1837_s1 + $0x68] sm:$0xff]   ;;  %s1845_s21 = smov (!%p206_p4, %s1194_s21), 3  ;;  %vm1545_vm0 = vmmov 0  }
   0xd   : > { %v1436_v1 = vld [vmem:[%s1837_s1 + $0x38] sm:$0xff]   ;;  %1291 = vmatprep.subr.bf16.mxu0 %v1435_v0  ;;  %v1440_v5 = vld [vmem:[%s1837_s1 + $0x30] sm:$0xff]   ;;  %v1444_v9 = vld [vmem:[%s1837_s1 + $0x28] sm:$0xff]   ;;  %s1408_s20 = smul.u32 36, %s1845_s21 }
   0xe   : > { %v1437_v2 = vld [vmem:[%s1837_s1 + $0xf8] sm:$0xff]   ;;  %1292 = vmatpush3.bf16.msra.mxu0 %v1436_v1  ;;  %v1441_v6 = vld [vmem:[%s1837_s1 + $0xf0] sm:$0xff]   ;;  %v1445_v10 = vld [vmem:[%s1837_s1 + $0xe8] sm:$0xff]  }
   0xf   : > { %v1438_v3 = vld [vmem:[%s1837_s1 + $0xb8] sm:$0xff]   ;;  %1313 = vmatprep.subr.bf16.mxu1 %v1437_v2  ;;  %1293 = vmatprep.subr.bf16.mxu0 %v1439_v4  ;;  %v1442_v7 = vld [vmem:[%s1837_s1 + $0xb0] sm:$0xff]   ;;  %v1446_v11 = vld [vmem:[%s1837_s1 + $0xa8] sm:$0xff]   ;;  %s1680_s4 = scalar_lea.vmem %s1836_s0, %s1408_s20 }
  0x10   : > { %1314 = vmatpush3.bf16.msra.mxu1 %v1438_v3  ;;  %v1447_v12 = vld [vmem:[%s1837_s1 + $0x60] sm:$0xff]   ;;  %v1451_v16 = vld [vmem:[%s1837_s1 + $0x58] sm:$0xff]   ;;  %v1455_v20 = vld [vmem:[%s1837_s1 + $0x50] sm:$0xff]  }
  0x11   : > { %1315 = vmatprep.subr.bf16.mxu1 %v1441_v6  ;;  %v1448_v13 = vld [vmem:[%s1837_s1 + $0x20] sm:$0xff]   ;;  %v1452_v17 = vld [vmem:[%s1837_s1 + $0x18] sm:$0xff]   ;;  %v1456_v21 = vld [vmem:[%s1837_s1 + $0x10] sm:$0xff]   ;;  %v1544_v6 = vmov 0.0  }
  0x12   : > { %1294 = vmatpush3.bf16.msra.mxu0 %v1440_v5  ;;  %v1449_v14 = vld [vmem:[%s1837_s1 + $0xe0] sm:$0xff]   ;;  %v1453_v18 = vld [vmem:[%s1837_s1 + $0xd8] sm:$0xff]   ;;  %v1457_v22 = vld [vmem:[%s1837_s1 + $0xd0] sm:$0xff]  }
  0x13   : > { %1295 = vmatprep.subr.bf16.mxu0 %v1443_v8  ;;  %v1450_v15 = vld [vmem:[%s1837_s1 + $0xa0] sm:$0xff]   ;;  %v1454_v19 = vld [vmem:[%s1837_s1 + $0x98] sm:$0xff]   ;;  %v1458_v23 = vld [vmem:[%s1837_s1 + $0x90] sm:$0xff]  }
  0x14   : > { %1316 = vmatpush3.bf16.msra.mxu1 %v1442_v7  ;;  %v1459_v24 = vld [vmem:[%s1837_s1 + $0x48] sm:$0xff]   ;;  %v1463_v28 = vld [vmem:[%s1837_s1 + $0x40] sm:$0xff]   ;;  %v1470_v34 = vld [vmem:[%s1837_s1 + $0x178] sm:$0xff]  }
  0x15   : > { %1317 = vmatprep.subr.bf16.mxu1 %v1445_v10  ;;  %v1460_v25 = vld [vmem:[%s1837_s1 + $0x8] sm:$0xff]   ;;  %v1464_v29 = vld [vmem:[%s1837_s1] sm:$0xff]   ;;  %v1474_v37 = vld [vmem:[%s1837_s1 + $0x138] sm:$0xff]  }
  0x16   : > { %1296 = vmatpush3.bf16.msra.mxu0 %v1444_v9  ;;  %v1461_v26 = vld [vmem:[%s1837_s1 + $0xc8] sm:$0xff]   ;;  %v1465_v30 = vld [vmem:[%s1837_s1 + $0xc0] sm:$0xff]   ;;  %v1475_v38 = vld [vmem:[%s1837_s1 + $0x1f8] sm:$0xff]  }
  0x17   : > { %1297 = vmatprep.subr.bf16.mxu0 %v1447_v12  ;;  %v1462_v27 = vld [vmem:[%s1837_s1 + $0x88] sm:$0xff]   ;;  %v1466_v31 = vld [vmem:[%s1680_s4] ss:$36 sps:$4 sm:$0xff]   ;;  %v1476_v39 = vld [vmem:[%s1837_s1 + $0x1b8] sm:$0xff]  }
  0x18   : > { %1318 = vmatpush3.bf16.msra.mxu1 %v1446_v11  ;;  %v1468_v32 = vld [vmem:[%s1680_s4 + $0x4] ss:$36 sps:$4 sm:$0xff]   ;;  %v1473_v36 = vld [vmem:[%s1680_s4 + $0xc] ss:$36 sps:$4 sm:$0xff]   ;;  %v1489_v52 = vld [vmem:[%s1837_s1 + $0x158] sm:$0xff]  }
  0x19   : > { %1319 = vmatprep.subr.bf16.mxu1 %v1449_v14  ;;  %v1469_v33 = vld [vmem:[%s1837_s1 + $0x80] sm:$0xff]   ;;  %900 = vmatprep.mubr.bf16.mxu0 %v1468_v32  ;;  %v1471_v35 = vld [vmem:[%s1680_s4 + $0x8] ss:$36 sps:$4 sm:$0xff]   ;;  %v1477_v40 = vld [vmem:[%s1837_s1 + $0x170] sm:$0xff]  }
  0x1a   : > { %1298 = vmatpush3.bf16.msra.mxu0 %v1448_v13  ;;  %941 = vmatprep.mubr.bf16.mxu1 %v1473_v36  ;;  %v1478_v41 = vld [vmem:[%s1837_s1 + $0x130] sm:$0xff]   ;;  %v1481_v44 = vld [vmem:[%s1837_s1 + $0x168] sm:$0xff]   ;;  %v1485_v48 = vld [vmem:[%s1837_s1 + $0x160] sm:$0xff]  }
  0x1b   : > { %1299 = vmatprep.subr.bf16.mxu0 %v1451_v16  ;;  %v1479_v42 = vld [vmem:[%s1837_s1 + $0x1f0] sm:$0xff]   ;;  %v1482_v45 = vld [vmem:[%s1837_s1 + $0x128] sm:$0xff]   ;;  %v1486_v49 = vld [vmem:[%s1837_s1 + $0x120] sm:$0xff]  }
  0x1c   : > { %1320 = vmatpush3.bf16.msra.mxu1 %v1450_v15  ;;  %v1480_v43 = vld [vmem:[%s1837_s1 + $0x1b0] sm:$0xff]   ;;  %v1483_v46 = vld [vmem:[%s1837_s1 + $0x1e8] sm:$0xff]   ;;  %v1487_v50 = vld [vmem:[%s1837_s1 + $0x1e0] sm:$0xff]  }
  0x1d   : > { %1321 = vmatprep.subr.bf16.mxu1 %v1453_v18  ;;  %v1484_v47 = vld [vmem:[%s1837_s1 + $0x1a8] sm:$0xff]   ;;  %v1488_v51 = vld [vmem:[%s1837_s1 + $0x1a0] sm:$0xff]   ;;  %v1490_v53 = vld [vmem:[%s1837_s1 + $0x118] sm:$0xff]  }
  0x1e   : > { %1300 = vmatpush3.bf16.msra.mxu0 %v1452_v17  ;;  %v1491_v54 = vld [vmem:[%s1837_s1 + $0x1d8] sm:$0xff]   ;;  %v1493_v56 = vld [vmem:[%s1837_s1 + $0x150] sm:$0xff]   ;;  %v1497_v60 = vld [vmem:[%s1837_s1 + $0x148] sm:$0xff]  }
  0x1f   : > { %1301 = vmatprep.subr.bf16.mxu0 %v1455_v20  ;;  %v1492_v55 = vld [vmem:[%s1837_s1 + $0x198] sm:$0xff]   ;;  %v1494_v57 = vld [vmem:[%s1837_s1 + $0x110] sm:$0xff]   ;;  %v1498_v61 = vld [vmem:[%s1837_s1 + $0x108] sm:$0xff]  }
  0x20   : > { %1322 = vmatpush3.bf16.msra.mxu1 %v1454_v19  ;;  %v1495_v58 = vld [vmem:[%s1837_s1 + $0x1d0] sm:$0xff]   ;;  %v1499_v62 = vld [vmem:[%s1837_s1 + $0x1c8] sm:$0xff]   ;;  %v1501_v0 = vld [vmem:[%s1837_s1 + $0x140] sm:$0xff]  }
  0x21   : > { %1323 = vmatprep.subr.bf16.mxu1 %v1457_v22  ;;  %v1496_v59 = vld [vmem:[%s1837_s1 + $0x190] sm:$0xff]   ;;  %v1500_v63 = vld [vmem:[%s1837_s1 + $0x188] sm:$0xff]   ;;  %v1502_v1 = vld [vmem:[%s1837_s1 + $0x100] sm:$0xff]  }
  0x22   : > { %1302 = vmatpush3.bf16.msra.mxu0 %v1456_v21  ;;  %v1503_v2 = vld [vmem:[%s1837_s1 + $0x1c0] sm:$0xff]   ;;  %v1504_v3 = vld [vmem:[%s1680_s4 + $0x10] ss:$36 sps:$4 sm:$0xff]   ;;  %v1508_v7 = vld [vmem:[%s1680_s4 + $0x18] ss:$36 sps:$4 sm:$0xff]  }
  0x23   : > { %1303 = vmatprep.subr.bf16.mxu0 %v1459_v24  ;;  %v1506_v4 = vld [vmem:[%s1680_s4 + $0x14] ss:$36 sps:$4 sm:$0xff]   ;;  %v1507_v5 = vld [vmem:[%s1837_s1 + $0x180] sm:$0xff]   ;;  %v1513_v11 = vld [vmem:[%s1837_s1 + $0x228] sm:$0xff]  }
  0x24   : > { %1324 = vmatpush3.bf16.msra.mxu1 %v1458_v23  ;;  %v1510_v8 = vld [vmem:[%s1680_s4 + $0x1c] ss:$36 sps:$4 sm:$0xff]   ;;  %v1512_v10 = vld [vmem:[%s1837_s1 + $0x230] sm:$0xff]   ;;  %v1517_v15 = vld [vmem:[%s1837_s1 + $0x208] sm:$0xff]  }
  0x25   : > { %1325 = vmatprep.subr.bf16.mxu1 %v1461_v26  ;;  %v1511_v9 = vld [vmem:[%s1837_s1 + $0x238] sm:$0xff]   ;;  %v1514_v12 = vld [vmem:[%s1837_s1 + $0x220] sm:$0xff]   ;;  %v1516_v14 = vld [vmem:[%s1837_s1 + $0x210] sm:$0xff]  }
  0x26   : > { %1304 = vmatpush3.bf16.msra.mxu0 %v1460_v25  ;;  %v1515_v13 = vld [vmem:[%s1837_s1 + $0x218] sm:$0xff]   ;;  %v1518_v16 = vld [vmem:[%s1837_s1 + $0x200] sm:$0xff]  }
  0x27   : > { %1305 = vmatprep.subr.bf16.mxu0 %v1463_v28  ;;  %v1519_v17 = vld [vmem:[%s1680_s4 + $0x20] ss:$36 sps:$4 sm:$0xff]   ;;  %s1197_s4 = sshll.u32 %s1845_s21, 2 }
  0x28   : > { %1326 = vmatpush3.bf16.msra.mxu1 %v1462_v27  ;;  %s226_s7 = scalar_lea.vmem %s1839_s3, %s1197_s4 }
  0x29   : > { %1327 = vmatprep.subr.bf16.mxu1 %v1465_v30  ;;  %v1198_v30 = vld [vmem:[%s1838_s2] ss:$0 sm:$0xff] }
  0x2a   : > { %1306 = vmatpush3.bf16.msra.mxu0 %v1464_v29 }
  0x2b   : > { %1335 = vmatprep.subr.bf16.mxu0 %v1470_v34 }
  0x2c   : > { %1328 = vmatpush3.bf16.msra.mxu1 %v1469_v33 }
  0x2d   : > { %901 = vmatmul.mubr.bf16.vlgmr.msra.gmra.mxu0 %v1466_v31  ;;  %1357 = vmatprep.subr.bf16.mxu1 %v1475_v38 }
  0x2e   : > { %1336 = vmatpush3.bf16.msra.mxu0 %v1474_v37  ;;  %982 = vmatprep.mubr.bf16.mxu0 %v1506_v4 }
  0x2f   : > { %942 = vmatmul.mubr.bf16.vlgmr.msra.gmra.mxu1 %v1471_v35  ;;  %1337 = vmatprep.subr.bf16.mxu0 %v1477_v40 }
  0x30   : > { %1358 = vmatpush3.bf16.msra.mxu1 %v1476_v39  ;;  %1023 = vmatprep.mubr.bf16.mxu1 %v1510_v8 }
  0x31   : > { %1359 = vmatprep.subr.bf16.mxu1 %v1479_v42 }
  0x32   : > { %1338 = vmatpush3.bf16.msra.mxu0 %v1478_v41 }
  0x33   : > { %1339 = vmatprep.subr.bf16.mxu0 %v1481_v44 }
  0x34   : > { %1360 = vmatpush3.bf16.msra.mxu1 %v1480_v43 }
  0x35   : > { %1361 = vmatprep.subr.bf16.mxu1 %v1483_v46 }
  0x36   : > { %1340 = vmatpush3.bf16.msra.mxu0 %v1482_v45 }
  0x37   : > { %1341 = vmatprep.subr.bf16.mxu0 %v1485_v48 }
  0x38   : > { %1362 = vmatpush3.bf16.msra.mxu1 %v1484_v47 }
  0x39   : > { %1363 = vmatprep.subr.bf16.mxu1 %v1487_v50 }
  0x3a   : > { %1342 = vmatpush3.bf16.msra.mxu0 %v1486_v49 }
  0x3b   : > { %1343 = vmatprep.subr.bf16.mxu0 %v1489_v52 }
  0x3c   : > { %1364 = vmatpush3.bf16.msra.mxu1 %v1488_v51 }
  0x3d   : > { %1365 = vmatprep.subr.bf16.mxu1 %v1491_v54 }
  0x3e   : > { %1344 = vmatpush3.bf16.msra.mxu0 %v1490_v53 }
  0x3f   : > { %1345 = vmatprep.subr.bf16.mxu0 %v1493_v56 }
  0x40   : > { %1366 = vmatpush3.bf16.msra.mxu1 %v1492_v55 }
  0x41   : > { %1367 = vmatprep.subr.bf16.mxu1 %v1495_v58 }
  0x42   : > { %1346 = vmatpush3.bf16.msra.mxu0 %v1494_v57 }
  0x43   : > { %1347 = vmatprep.subr.bf16.mxu0 %v1497_v60 }
  0x44   : > { %1368 = vmatpush3.bf16.msra.mxu1 %v1496_v59 }
  0x45   : > { %1369 = vmatprep.subr.bf16.mxu1 %v1499_v62 }
  0x46   : > { %1348 = vmatpush3.bf16.msra.mxu0 %v1498_v61 }
  0x47   : > { %1349 = vmatprep.subr.bf16.mxu0 %v1501_v0 }
  0x48   : > { %1370 = vmatpush3.bf16.msra.mxu1 %v1500_v63 }
  0x49   : > { %1371 = vmatprep.subr.bf16.mxu1 %v1503_v2 }
  0x4a   : > { %1350 = vmatpush3.bf16.msra.mxu0 %v1502_v1 }
  0x4b   : > { %1388 = vmatprep.subr.bf16.mxu0 %v1544_v6 }
  0x4c   : > { %1372 = vmatpush3.bf16.msra.mxu1 %v1507_v5 }
  0x4d   : > { %983 = vmatmul.mubr.bf16.vlgmr.msra.gmra.mxu0 %v1504_v3 }
  0x4e   : > { %1404 = vmatprep.mubr.msk.bf16.mxu0 %vm1545_vm0, %v1544_v6  ;;  %1389 = vmatpush3.bf16.msra.mxu0 %v1511_v9 }
  0x4f   : > { %1024 = vmatmul.mubr.bf16.vlgmr.msra.gmra.mxu1 %v1508_v7  ;;  %1390 = vmatprep.subr.bf16.mxu0 %v1544_v6 }
  0x52   : > { %1391 = vmatpush3.bf16.msra.mxu0 %v1512_v10 }
  0x53   : > { %1392 = vmatprep.subr.bf16.mxu0 %v1544_v6 }
  0x56   : > { %1393 = vmatpush3.bf16.msra.mxu0 %v1513_v11 }
  0x57   : > { %1394 = vmatprep.subr.bf16.mxu0 %v1544_v6 }
  0x5a   : > { %1395 = vmatpush3.bf16.msra.mxu0 %v1514_v12 }
  0x5b   : > { %1396 = vmatprep.subr.bf16.mxu0 %v1544_v6 }
  0x5e   : > { %1397 = vmatpush3.bf16.msra.mxu0 %v1515_v13 }
  0x5f   : > { %1398 = vmatprep.subr.bf16.mxu0 %v1544_v6 }
  0x62   : > { %1399 = vmatpush3.bf16.msra.mxu0 %v1516_v14 }
  0x63   : > { %1400 = vmatprep.subr.bf16.mxu0 %v1544_v6 }
  0x66   : > { %1401 = vmatpush3.bf16.msra.mxu0 %v1517_v15 }
  0x67   : > { %1402 = vmatprep.subr.bf16.mxu0 %v1544_v6 }
  0x6a   : > { %1403 = vmatpush3.bf16.msra.mxu0 %v1518_v16 }
  0x6d   : > { %1405 = vmatmul.mubr.bf16.vlgmr.msra.gmra.mxu0 %v1519_v17 }
  0xed   : > { %v1307_v18 = vpop.f32.mrf.mxu0 }
  0xef   : > { %v1308_v19 = vpop.f32.mrf.mxu0  ;;  %v1329_v20 = vpop.f32.mrf.mxu1 }
  0xf0   : > { %v1309_v29 = vadd.f32 %v1308_v19, %v1307_v18 }
  0xf1   : > { %v1310_v21 = vpop.f32.mrf.mxu0  ;;  %v1330_v22 = vpop.f32.mrf.mxu1 }
  0xf2   : > { %v903_v34 = vadd.f32 %v1309_v29, %v1198_v30  ;;  %v1331_v35 = vadd.f32 %v1330_v22, %v1329_v20 }
  0xf3   : > { %v1311_v23 = vpop.f32.mrf.mxu0  ;;  %v1332_v24 = vpop.f32.mrf.mxu1 }
  0xf4   : > { %v1312_v33 = vadd.f32 %v1311_v23, %v1310_v21  ;;  %v944_v41 = vadd.f32 %v1331_v35, %v903_v34 }
  0xf5   : > { %v1333_v26 = vpop.f32.mrf.mxu1 }
  0xf6   : > { %v906_v38 = vadd.f32 %v1312_v33, %v1198_v30  ;;  %v1334_v39 = vadd.f32 %v1333_v26, %v1332_v24 }
  0xf8   : > { %v947_v44 = vadd.f32 %v1334_v39, %v906_v38 }
 0x10d   : > { %v1351_v25 = vpop.f32.mrf.mxu0 }
 0x10f   : > { %v1352_v27 = vpop.f32.mrf.mxu0  ;;  %v1373_v28 = vpop.f32.mrf.mxu1 }
 0x110   : > { %v1353_v40 = vadd.f32 %v1352_v27, %v1351_v25 }
 0x111   : > { %v1354_v31 = vpop.f32.mrf.mxu0  ;;  %v1374_v32 = vpop.f32.mrf.mxu1 }
 0x112   : > { %v985_v45 = vadd.f32 %v1353_v40, %v944_v41  ;;  %v1375_v46 = vadd.f32 %v1374_v32, %v1373_v28 }
 0x113   : > { %v1355_v36 = vpop.f32.mrf.mxu0  ;;  %v1376_v37 = vpop.f32.mrf.mxu1 }
 0x114   : > { %v1356_v42 = vadd.f32 %v1355_v36, %v1354_v31  ;;  %v1026_v50 = vadd.f32 %v1375_v46, %v985_v45 }
 0x115   : > { %v1377_v43 = vpop.f32.mrf.mxu1 }
 0x116   : > { %v988_v47 = vadd.f32 %v1356_v42, %v947_v44  ;;  %v1378_v48 = vadd.f32 %v1377_v43, %v1376_v37 }
 0x118   : > { %v1029_v53 = vadd.f32 %v1378_v48, %v988_v47 }
 0x12d   : > { %v1066_v49 = vpop.f32.mrf.mxu0 }
 0x12e   : > { %v1067_v52 = vadd.f32 %v1066_v49, %v1026_v50 }
 0x12f   : > { %v1406_v51 = vpop.f32.mrf.mxu0 }
 0x130   : > { %v1073_v57 = vmax.f32 %v1067_v52, 0.0 }
 0x131   : > { %v1069_v54 = vpop.f32.mrf.mxu0 }
 0x132   : > { %v1070_v55 = vadd.f32 %v1069_v54, %v1029_v53 }
 0x133   : > { %v1407_v56 = vpop.f32.mrf.mxu0 }
 0x134   : > { %v1074_v58 = vmax.f32 %v1070_v55, 0.0 }
 0x136   : > { %v1289_v59 = vpack.c.bf16 %v1074_v58, %v1073_v57 }
 0x138   : > { %1290 = vst [vmem:[%s226_s7] sm:$0xff] %v1289_v59  }
 0x139 PF: > { %s13_s14 = sadd.s32 1, %s1542_s14   ;;  %s1840_s12 = smov %s1538_s13 }
 0x13a   : > { %p10_p5 = scmp.ge.s32.totalorder %s13_s14, 4   ;;  %s1841_s13 = smov %s1843_s15 }
 0x13c   :  { %12 = sbr.rel (!%p10_p5) target bundleno = 2 (0x2), region = 68 }

// kernel: model_forward.23
= control target key start
LH: loop header
LB: loop body
LE: loop exit
PB: predicated region body
PF: predicated region fallthrough
CT: control target
= control target key end

     0   :  { %s1658_s15 = smov 0   ;;  %s1660_s16 = smov 0   ;;  %s1931_s0 = inlined_call_operand.vmem [shape: bf16[32,1152], index: 0, kind: input, shape index: {}]   ;;  %s1932_s1 = inlined_call_operand.vmem [shape: bf16[1152,128], index: 1, kind: input, shape index: {}]   ;;  %s1933_s2 = inlined_call_operand.vmem [shape: f32[1,128], index: 2, kind: input, shape index: {}]   ;;  %s1934_s3 = inlined_call_operand.vmem [shape: bf16[32,128], index: 3, kind: input, shape index: {}]   ;;  %s1935_s4 = inlined_call_operand.vmem [shape: bf16[32,128], index: 4, kind: output, shape index: {}]  }
   0x1   :  { %s1662_s17 = smov 0  }
   0x2 LB: > { %s26_s18 = sadd.s32 1, %s1625_s16  ;;  %p1274_p0 = scmp.ge.s32.totalorder %s1629_s17, 1  ;;  %s1629_s17 = sphi %s1662_s17, %s14_s17   ;;  %s1625_s16 = sphi %s1660_s16, %s1937_s16   ;;  %s1621_s15 = sphi %s1658_s15, %s1936_s15  }
   0x3   : > { %p28_p1 = scmp.ge.s32.totalorder %s26_s18, 2  ;;  %p211_p2 = scmp.lt.s32.totalorder %s1629_s17, 3 }
   0x5   : > { %s1939_s18 = smov (%p28_p1, %s26_s18), 0  ;;  %p212_p3 = pnand %p1274_p0, %p211_p2 }
   0x6   : > { %s1275_s25 = sshll.u32 (!%p212_p3), %s1621_s15, 1 }
   0x7   : > { %215 = sbr.rel (%p212_p3) target bundleno = 315 (0x13b), region = 36  ;;  %p257_p4 = scmp.lt.s32.totalorder (!%p212_p3), %s1275_s25, 3 }
   0xc   : > { %v1522_v0 = vld [vmem:[%s1932_s1 + $0x78] sm:$0xff]   ;;  %v1526_v4 = vld [vmem:[%s1932_s1 + $0x70] sm:$0xff]   ;;  %v1530_v8 = vld [vmem:[%s1932_s1 + $0x68] sm:$0xff]   ;;  %s1941_s25 = smov (!%p257_p4, %s1275_s25), 3  ;;  %vm1632_vm0 = vmmov 0  }
   0xd   : > { %v1523_v1 = vld [vmem:[%s1932_s1 + $0x38] sm:$0xff]   ;;  %1378 = vmatprep.subr.bf16.mxu0 %v1522_v0  ;;  %v1527_v5 = vld [vmem:[%s1932_s1 + $0x30] sm:$0xff]   ;;  %v1531_v9 = vld [vmem:[%s1932_s1 + $0x28] sm:$0xff]   ;;  %s1495_s26 = smul.u32 36, %s1941_s25 }
   0xe   : > { %v1524_v2 = vld [vmem:[%s1932_s1 + $0xf8] sm:$0xff]   ;;  %1379 = vmatpush3.bf16.msra.mxu0 %v1523_v1  ;;  %v1528_v6 = vld [vmem:[%s1932_s1 + $0xf0] sm:$0xff]   ;;  %v1532_v10 = vld [vmem:[%s1932_s1 + $0xe8] sm:$0xff]  }
   0xf   : > { %v1525_v3 = vld [vmem:[%s1932_s1 + $0xb8] sm:$0xff]   ;;  %1400 = vmatprep.subr.bf16.mxu1 %v1524_v2  ;;  %1380 = vmatprep.subr.bf16.mxu0 %v1526_v4  ;;  %v1529_v7 = vld [vmem:[%s1932_s1 + $0xb0] sm:$0xff]   ;;  %v1533_v11 = vld [vmem:[%s1932_s1 + $0xa8] sm:$0xff]   ;;  %s1772_s10 = scalar_lea.vmem %s1931_s0, %s1495_s26 }
  0x10   : > { %1401 = vmatpush3.bf16.msra.mxu1 %v1525_v3  ;;  %v1534_v12 = vld [vmem:[%s1932_s1 + $0x60] sm:$0xff]   ;;  %v1538_v16 = vld [vmem:[%s1932_s1 + $0x58] sm:$0xff]   ;;  %v1542_v20 = vld [vmem:[%s1932_s1 + $0x50] sm:$0xff]  }
  0x11   : > { %1402 = vmatprep.subr.bf16.mxu1 %v1528_v6  ;;  %v1535_v13 = vld [vmem:[%s1932_s1 + $0x20] sm:$0xff]   ;;  %v1539_v17 = vld [vmem:[%s1932_s1 + $0x18] sm:$0xff]   ;;  %v1543_v21 = vld [vmem:[%s1932_s1 + $0x10] sm:$0xff]   ;;  %v1631_v6 = vmov 0.0  }
  0x12   : > { %1381 = vmatpush3.bf16.msra.mxu0 %v1527_v5  ;;  %v1536_v14 = vld [vmem:[%s1932_s1 + $0xe0] sm:$0xff]   ;;  %v1540_v18 = vld [vmem:[%s1932_s1 + $0xd8] sm:$0xff]   ;;  %v1544_v22 = vld [vmem:[%s1932_s1 + $0xd0] sm:$0xff]  }
  0x13   : > { %1382 = vmatprep.subr.bf16.mxu0 %v1530_v8  ;;  %v1537_v15 = vld [vmem:[%s1932_s1 + $0xa0] sm:$0xff]   ;;  %v1541_v19 = vld [vmem:[%s1932_s1 + $0x98] sm:$0xff]   ;;  %v1545_v23 = vld [vmem:[%s1932_s1 + $0x90] sm:$0xff]  }
  0x14   : > { %1403 = vmatpush3.bf16.msra.mxu1 %v1529_v7  ;;  %v1546_v24 = vld [vmem:[%s1932_s1 + $0x48] sm:$0xff]   ;;  %v1550_v28 = vld [vmem:[%s1932_s1 + $0x40] sm:$0xff]   ;;  %v1557_v34 = vld [vmem:[%s1932_s1 + $0x178] sm:$0xff]  }
  0x15   : > { %1404 = vmatprep.subr.bf16.mxu1 %v1532_v10  ;;  %v1547_v25 = vld [vmem:[%s1932_s1 + $0x8] sm:$0xff]   ;;  %v1551_v29 = vld [vmem:[%s1932_s1] sm:$0xff]   ;;  %v1561_v37 = vld [vmem:[%s1932_s1 + $0x138] sm:$0xff]  }
  0x16   : > { %1383 = vmatpush3.bf16.msra.mxu0 %v1531_v9  ;;  %v1548_v26 = vld [vmem:[%s1932_s1 + $0xc8] sm:$0xff]   ;;  %v1552_v30 = vld [vmem:[%s1932_s1 + $0xc0] sm:$0xff]   ;;  %v1562_v38 = vld [vmem:[%s1932_s1 + $0x1f8] sm:$0xff]  }
  0x17   : > { %1384 = vmatprep.subr.bf16.mxu0 %v1534_v12  ;;  %v1549_v27 = vld [vmem:[%s1932_s1 + $0x88] sm:$0xff]   ;;  %v1553_v31 = vld [vmem:[%s1772_s10] ss:$36 sps:$4 sm:$0xff]   ;;  %v1563_v39 = vld [vmem:[%s1932_s1 + $0x1b8] sm:$0xff]  }
  0x18   : > { %1405 = vmatpush3.bf16.msra.mxu1 %v1533_v11  ;;  %v1555_v32 = vld [vmem:[%s1772_s10 + $0x4] ss:$36 sps:$4 sm:$0xff]   ;;  %v1560_v36 = vld [vmem:[%s1772_s10 + $0xc] ss:$36 sps:$4 sm:$0xff]   ;;  %v1576_v52 = vld [vmem:[%s1932_s1 + $0x158] sm:$0xff]  }
  0x19   : > { %1406 = vmatprep.subr.bf16.mxu1 %v1536_v14  ;;  %v1556_v33 = vld [vmem:[%s1932_s1 + $0x80] sm:$0xff]   ;;  %960 = vmatprep.mubr.bf16.mxu0 %v1555_v32  ;;  %v1558_v35 = vld [vmem:[%s1772_s10 + $0x8] ss:$36 sps:$4 sm:$0xff]   ;;  %v1564_v40 = vld [vmem:[%s1932_s1 + $0x170] sm:$0xff]  }
  0x1a   : > { %1385 = vmatpush3.bf16.msra.mxu0 %v1535_v13  ;;  %1001 = vmatprep.mubr.bf16.mxu1 %v1560_v36  ;;  %v1565_v41 = vld [vmem:[%s1932_s1 + $0x130] sm:$0xff]   ;;  %v1568_v44 = vld [vmem:[%s1932_s1 + $0x168] sm:$0xff]   ;;  %v1572_v48 = vld [vmem:[%s1932_s1 + $0x160] sm:$0xff]  }
  0x1b   : > { %1386 = vmatprep.subr.bf16.mxu0 %v1538_v16  ;;  %v1566_v42 = vld [vmem:[%s1932_s1 + $0x1f0] sm:$0xff]   ;;  %v1569_v45 = vld [vmem:[%s1932_s1 + $0x128] sm:$0xff]   ;;  %v1573_v49 = vld [vmem:[%s1932_s1 + $0x120] sm:$0xff]  }
  0x1c   : > { %1407 = vmatpush3.bf16.msra.mxu1 %v1537_v15  ;;  %v1567_v43 = vld [vmem:[%s1932_s1 + $0x1b0] sm:$0xff]   ;;  %v1570_v46 = vld [vmem:[%s1932_s1 + $0x1e8] sm:$0xff]   ;;  %v1574_v50 = vld [vmem:[%s1932_s1 + $0x1e0] sm:$0xff]  }
  0x1d   : > { %1408 = vmatprep.subr.bf16.mxu1 %v1540_v18  ;;  %v1571_v47 = vld [vmem:[%s1932_s1 + $0x1a8] sm:$0xff]   ;;  %v1575_v51 = vld [vmem:[%s1932_s1 + $0x1a0] sm:$0xff]   ;;  %v1577_v53 = vld [vmem:[%s1932_s1 + $0x118] sm:$0xff]  }
  0x1e   : > { %1387 = vmatpush3.bf16.msra.mxu0 %v1539_v17  ;;  %v1578_v54 = vld [vmem:[%s1932_s1 + $0x1d8] sm:$0xff]   ;;  %v1580_v56 = vld [vmem:[%s1932_s1 + $0x150] sm:$0xff]   ;;  %v1584_v60 = vld [vmem:[%s1932_s1 + $0x148] sm:$0xff]  }
  0x1f   : > { %1388 = vmatprep.subr.bf16.mxu0 %v1542_v20  ;;  %v1579_v55 = vld [vmem:[%s1932_s1 + $0x198] sm:$0xff]   ;;  %v1581_v57 = vld [vmem:[%s1932_s1 + $0x110] sm:$0xff]   ;;  %v1585_v61 = vld [vmem:[%s1932_s1 + $0x108] sm:$0xff]  }
  0x20   : > { %1409 = vmatpush3.bf16.msra.mxu1 %v1541_v19  ;;  %v1582_v58 = vld [vmem:[%s1932_s1 + $0x1d0] sm:$0xff]   ;;  %v1586_v62 = vld [vmem:[%s1932_s1 + $0x1c8] sm:$0xff]   ;;  %v1588_v0 = vld [vmem:[%s1932_s1 + $0x140] sm:$0xff]  }
  0x21   : > { %1410 = vmatprep.subr.bf16.mxu1 %v1544_v22  ;;  %v1583_v59 = vld [vmem:[%s1932_s1 + $0x190] sm:$0xff]   ;;  %v1587_v63 = vld [vmem:[%s1932_s1 + $0x188] sm:$0xff]   ;;  %v1589_v1 = vld [vmem:[%s1932_s1 + $0x100] sm:$0xff]  }
  0x22   : > { %1389 = vmatpush3.bf16.msra.mxu0 %v1543_v21  ;;  %v1590_v2 = vld [vmem:[%s1932_s1 + $0x1c0] sm:$0xff]   ;;  %v1591_v3 = vld [vmem:[%s1772_s10 + $0x10] ss:$36 sps:$4 sm:$0xff]   ;;  %v1595_v7 = vld [vmem:[%s1772_s10 + $0x18] ss:$36 sps:$4 sm:$0xff]  }
  0x23   : > { %1390 = vmatprep.subr.bf16.mxu0 %v1546_v24  ;;  %v1593_v4 = vld [vmem:[%s1772_s10 + $0x14] ss:$36 sps:$4 sm:$0xff]   ;;  %v1594_v5 = vld [vmem:[%s1932_s1 + $0x180] sm:$0xff]   ;;  %v1600_v11 = vld [vmem:[%s1932_s1 + $0x228] sm:$0xff]  }
  0x24   : > { %1411 = vmatpush3.bf16.msra.mxu1 %v1545_v23  ;;  %v1597_v8 = vld [vmem:[%s1772_s10 + $0x1c] ss:$36 sps:$4 sm:$0xff]   ;;  %v1599_v10 = vld [vmem:[%s1932_s1 + $0x230] sm:$0xff]   ;;  %v1604_v15 = vld [vmem:[%s1932_s1 + $0x208] sm:$0xff]  }
  0x25   : > { %1412 = vmatprep.subr.bf16.mxu1 %v1548_v26  ;;  %v1598_v9 = vld [vmem:[%s1932_s1 + $0x238] sm:$0xff]   ;;  %v1601_v12 = vld [vmem:[%s1932_s1 + $0x220] sm:$0xff]   ;;  %v1603_v14 = vld [vmem:[%s1932_s1 + $0x210] sm:$0xff]  }
  0x26   : > { %1391 = vmatpush3.bf16.msra.mxu0 %v1547_v25  ;;  %v1602_v13 = vld [vmem:[%s1932_s1 + $0x218] sm:$0xff]   ;;  %v1605_v16 = vld [vmem:[%s1932_s1 + $0x200] sm:$0xff]  }
  0x27   : > { %1392 = vmatprep.subr.bf16.mxu0 %v1550_v28  ;;  %v1606_v17 = vld [vmem:[%s1772_s10 + $0x20] ss:$36 sps:$4 sm:$0xff]   ;;  %s1278_s10 = sshll.u32 %s1941_s25, 2 }
  0x28   : > { %1413 = vmatpush3.bf16.msra.mxu1 %v1549_v27  ;;  %s277_s21 = scalar_lea.vmem %s1934_s3, %s1278_s10  ;;  %s286_s23 = scalar_lea.vmem %s1935_s4, %s1278_s10 }
  0x29   : > { %1414 = vmatprep.subr.bf16.mxu1 %v1552_v30  ;;  %v1281_v30 = vld [vmem:[%s1933_s2] ss:$0 sm:$0xff] }
  0x2a   : > { %1393 = vmatpush3.bf16.msra.mxu0 %v1551_v29 }
  0x2b   : > { %1422 = vmatprep.subr.bf16.mxu0 %v1557_v34 }
  0x2c   : > { %1415 = vmatpush3.bf16.msra.mxu1 %v1556_v33 }
  0x2d   : > { %961 = vmatmul.mubr.bf16.vlgmr.msra.gmra.mxu0 %v1553_v31  ;;  %1444 = vmatprep.subr.bf16.mxu1 %v1562_v38 }
  0x2e   : > { %1423 = vmatpush3.bf16.msra.mxu0 %v1561_v37  ;;  %1042 = vmatprep.mubr.bf16.mxu0 %v1593_v4 }
  0x2f   : > { %1002 = vmatmul.mubr.bf16.vlgmr.msra.gmra.mxu1 %v1558_v35  ;;  %1424 = vmatprep.subr.bf16.mxu0 %v1564_v40 }
  0x30   : > { %1445 = vmatpush3.bf16.msra.mxu1 %v1563_v39  ;;  %1083 = vmatprep.mubr.bf16.mxu1 %v1597_v8 }
  0x31   : > { %1446 = vmatprep.subr.bf16.mxu1 %v1566_v42 }
  0x32   : > { %1425 = vmatpush3.bf16.msra.mxu0 %v1565_v41 }
  0x33   : > { %1426 = vmatprep.subr.bf16.mxu0 %v1568_v44 }
  0x34   : > { %1447 = vmatpush3.bf16.msra.mxu1 %v1567_v43 }
  0x35   : > { %1448 = vmatprep.subr.bf16.mxu1 %v1570_v46 }
  0x36   : > { %1427 = vmatpush3.bf16.msra.mxu0 %v1569_v45 }
  0x37   : > { %1428 = vmatprep.subr.bf16.mxu0 %v1572_v48 }
  0x38   : > { %1449 = vmatpush3.bf16.msra.mxu1 %v1571_v47  ;;  %v1370_v47 = vld [vmem:[%s277_s21] sm:$0xff]  }
  0x39   : > { %1450 = vmatprep.subr.bf16.mxu1 %v1574_v50 }
  0x3a   : > { %1429 = vmatpush3.bf16.msra.mxu0 %v1573_v49 }
  0x3b   : > { %1430 = vmatprep.subr.bf16.mxu0 %v1576_v52 }
  0x3c   : > { %1451 = vmatpush3.bf16.msra.mxu1 %v1575_v51 }
  0x3d   : > { %1452 = vmatprep.subr.bf16.mxu1 %v1578_v54 }
  0x3e   : > { %1431 = vmatpush3.bf16.msra.mxu0 %v1577_v53  ;;  %v1371_v53 = vunpack.c.l.bf16 %v1370_v47 }
  0x3f   : > { %1432 = vmatprep.subr.bf16.mxu0 %v1580_v56  ;;  %v1372_v56 = vunpack.c.h.bf16 %v1370_v47 }
  0x40   : > { %1453 = vmatpush3.bf16.msra.mxu1 %v1579_v55 }
  0x41   : > { %1454 = vmatprep.subr.bf16.mxu1 %v1582_v58 }
  0x42   : > { %1433 = vmatpush3.bf16.msra.mxu0 %v1581_v57 }
  0x43   : > { %1434 = vmatprep.subr.bf16.mxu0 %v1584_v60 }
  0x44   : > { %1455 = vmatpush3.bf16.msra.mxu1 %v1583_v59 }
  0x45   : > { %1456 = vmatprep.subr.bf16.mxu1 %v1586_v62 }
  0x46   : > { %1435 = vmatpush3.bf16.msra.mxu0 %v1585_v61 }
  0x47   : > { %1436 = vmatprep.subr.bf16.mxu0 %v1588_v0 }
  0x48   : > { %1457 = vmatpush3.bf16.msra.mxu1 %v1587_v63 }
  0x49   : > { %1458 = vmatprep.subr.bf16.mxu1 %v1590_v2 }
  0x4a   : > { %1437 = vmatpush3.bf16.msra.mxu0 %v1589_v1 }
  0x4b   : > { %1475 = vmatprep.subr.bf16.mxu0 %v1631_v6 }
  0x4c   : > { %1459 = vmatpush3.bf16.msra.mxu1 %v1594_v5 }
  0x4d   : > { %1043 = vmatmul.mubr.bf16.vlgmr.msra.gmra.mxu0 %v1591_v3 }
  0x4e   : > { %1491 = vmatprep.mubr.msk.bf16.mxu0 %vm1632_vm0, %v1631_v6  ;;  %1476 = vmatpush3.bf16.msra.mxu0 %v1598_v9 }
  0x4f   : > { %1084 = vmatmul.mubr.bf16.vlgmr.msra.gmra.mxu1 %v1595_v7  ;;  %1477 = vmatprep.subr.bf16.mxu0 %v1631_v6 }
  0x52   : > { %1478 = vmatpush3.bf16.msra.mxu0 %v1599_v10 }
  0x53   : > { %1479 = vmatprep.subr.bf16.mxu0 %v1631_v6 }
  0x56   : > { %1480 = vmatpush3.bf16.msra.mxu0 %v1600_v11 }
  0x57   : > { %1481 = vmatprep.subr.bf16.mxu0 %v1631_v6 }
  0x5a   : > { %1482 = vmatpush3.bf16.msra.mxu0 %v1601_v12 }
  0x5b   : > { %1483 = vmatprep.subr.bf16.mxu0 %v1631_v6 }
  0x5e   : > { %1484 = vmatpush3.bf16.msra.mxu0 %v1602_v13 }
  0x5f   : > { %1485 = vmatprep.subr.bf16.mxu0 %v1631_v6 }
  0x62   : > { %1486 = vmatpush3.bf16.msra.mxu0 %v1603_v14 }
  0x63   : > { %1487 = vmatprep.subr.bf16.mxu0 %v1631_v6 }
  0x66   : > { %1488 = vmatpush3.bf16.msra.mxu0 %v1604_v15 }
  0x67   : > { %1489 = vmatprep.subr.bf16.mxu0 %v1631_v6 }
  0x6a   : > { %1490 = vmatpush3.bf16.msra.mxu0 %v1605_v16 }
  0x6d   : > { %1492 = vmatmul.mubr.bf16.vlgmr.msra.gmra.mxu0 %v1606_v17 }
  0xed   : > { %v1394_v18 = vpop.f32.mrf.mxu0 }
  0xef   : > { %v1395_v19 = vpop.f32.mrf.mxu0  ;;  %v1416_v20 = vpop.f32.mrf.mxu1 }
  0xf0   : > { %v1396_v29 = vadd.f32 %v1395_v19, %v1394_v18 }
  0xf1   : > { %v1397_v21 = vpop.f32.mrf.mxu0  ;;  %v1417_v22 = vpop.f32.mrf.mxu1 }
  0xf2   : > { %v963_v33 = vadd.f32 %v1396_v29, %v1281_v30  ;;  %v1418_v34 = vadd.f32 %v1417_v22, %v1416_v20 }
  0xf3   : > { %v1398_v23 = vpop.f32.mrf.mxu0  ;;  %v1419_v24 = vpop.f32.mrf.mxu1 }
  0xf4   : > { %v1399_v35 = vadd.f32 %v1398_v23, %v1397_v21  ;;  %v1004_v39 = vadd.f32 %v1418_v34, %v963_v33 }
  0xf5   : > { %v1420_v26 = vpop.f32.mrf.mxu1 }
  0xf6   : > { %v966_v40 = vadd.f32 %v1399_v35, %v1281_v30  ;;  %v1421_v41 = vadd.f32 %v1420_v26, %v1419_v24 }
  0xf8   : > { %v1007_v46 = vadd.f32 %v1421_v41, %v966_v40 }
 0x10d   : > { %v1438_v25 = vpop.f32.mrf.mxu0 }
 0x10f   : > { %v1439_v27 = vpop.f32.mrf.mxu0  ;;  %v1460_v28 = vpop.f32.mrf.mxu1 }
 0x110   : > { %v1440_v36 = vadd.f32 %v1439_v27, %v1438_v25 }
 0x111   : > { %v1441_v31 = vpop.f32.mrf.mxu0  ;;  %v1461_v32 = vpop.f32.mrf.mxu1 }
 0x112   : > { %v1045_v42 = vadd.f32 %v1440_v36, %v1004_v39  ;;  %v1462_v43 = vadd.f32 %v1461_v32, %v1460_v28 }
 0x113   : > { %v1442_v37 = vpop.f32.mrf.mxu0  ;;  %v1463_v38 = vpop.f32.mrf.mxu1 }
 0x114   : > { %v1443_v44 = vadd.f32 %v1442_v37, %v1441_v31  ;;  %v1086_v50 = vadd.f32 %v1462_v43, %v1045_v42 }
 0x115   : > { %v1464_v45 = vpop.f32.mrf.mxu1 }
 0x116   : > { %v1048_v48 = vadd.f32 %v1443_v44, %v1007_v46  ;;  %v1465_v49 = vadd.f32 %v1464_v45, %v1463_v38 }
 0x118   : > { %v1089_v55 = vadd.f32 %v1465_v49, %v1048_v48 }
 0x12d   : > { %v1126_v51 = vpop.f32.mrf.mxu0 }
 0x12e   : > { %v1127_v52 = vadd.f32 %v1126_v51, %v1086_v50 }
 0x12f   : > { %v1493_v54 = vpop.f32.mrf.mxu0 }
 0x130   : > { %v1137_v58 = vadd.f32 %v1371_v53, %v1127_v52 }
 0x131   : > { %v1129_v57 = vpop.f32.mrf.mxu0 }
 0x132   : > { %v1130_v59 = vadd.f32 %v1129_v57, %v1089_v55  ;;  %v1139_v62 = vmax.f32 %v1137_v58, 0.0 }
 0x133   : > { %v1494_v60 = vpop.f32.mrf.mxu0 }
 0x134   : > { %v1138_v61 = vadd.f32 %v1372_v56, %v1130_v59 }
 0x136   : > { %v1140_v63 = vmax.f32 %v1138_v61, 0.0 }
 0x138   : > { %v1376_v0 = vpack.c.bf16 %v1140_v63, %v1139_v62 }
 0x13a   : > { %1377 = vst [vmem:[%s286_s23] sm:$0xff] %v1376_v0  }
 0x13b PF: > { %s14_s17 = sadd.s32 1, %s1629_s17   ;;  %s1936_s15 = smov %s1625_s16 }
 0x13c   : > { %p11_p5 = scmp.ge.s32.totalorder %s14_s17, 4   ;;  %s1937_s16 = smov %s1939_s18 }
 0x13e   :  { %13 = sbr.rel (!%p11_p5) target bundleno = 2 (0x2), region = 75 }

// kernel: model_forward.21
= control target key start
LH: loop header
LB: loop body
LE: loop exit
PB: predicated region body
PF: predicated region fallthrough
CT: control target
= control target key end

     0   :  { %s1861_s18 = smov 0   ;;  %s1863_s19 = smov 0   ;;  %s2182_s0 = inlined_call_operand.vmem [shape: bf16[32,1152], index: 0, kind: input, shape index: {}]   ;;  %s2183_s1 = inlined_call_operand.vmem [shape: bf16[1152,128], index: 1, kind: input, shape index: {}]   ;;  %s2184_s2 = inlined_call_operand.vmem [shape: f32[1,128], index: 2, kind: input, shape index: {}]   ;;  %s2185_s3 = inlined_call_operand.vmem [shape: bf16[32,128], index: 3, kind: input, shape index: {}]   ;;  %s2186_s4 = inlined_call_operand.vmem [shape: bf16[128,128], index: 4, kind: input, shape index: {}]   ;;  %s2187_s5 = inlined_call_operand.vmem [shape: bf16[32,128], index: 5, kind: output, shape index: {}]  }
   0x1   :  { %s1865_s20 = smov 0  }
   0x2 LB: > { %s27_s21 = sadd.s32 1, %s1823_s19  ;;  %p1429_p0 = scmp.ge.s32.totalorder %s1827_s20, 1  ;;  %s1827_s20 = sphi %s1865_s20, %s15_s20   ;;  %s1823_s19 = sphi %s1863_s19, %s2189_s19   ;;  %s1819_s18 = sphi %s1861_s18, %s2188_s18  }
   0x3   : > { %p29_p1 = scmp.ge.s32.totalorder %s27_s21, 2  ;;  %p240_p2 = scmp.lt.s32.totalorder %s1827_s20, 3 }
   0x5   : > { %s2191_s21 = smov (%p29_p1, %s27_s21), 0  ;;  %p241_p3 = pnand %p1429_p0, %p240_p2 }
   0x6   : > { %s1430_s15 = sshll.u32 (!%p241_p3), %s1819_s18, 1 }
   0x7   : > { %244 = sbr.rel (%p241_p3) target bundleno = 321 (0x141), region = 40  ;;  %p289_p4 = scmp.lt.s32.totalorder (!%p241_p3), %s1430_s15, 3 }
   0xc   : > { %v1711_v0 = vld [vmem:[%s2186_s4 + $0x38] sm:$0xff]   ;;  %v1829_v1 = vmov 0.0   ;;  %vm1830_vm0 = vmmov 0   ;;  %v1714_v4 = vld [vmem:[%s2186_s4 + $0x30] sm:$0xff]   ;;  %v1717_v7 = vld [vmem:[%s2186_s4 + $0x28] sm:$0xff]   ;;  %s2193_s15 = smov (!%p289_p4, %s1430_s15), 3 }
   0xd   : > { %1644 = vmatprep.subr.bf16.mxu0 %v1829_v1  ;;  %v1712_v2 = vld [vmem:[%s2183_s1 + $0x78] sm:$0xff]   ;;  %1660 = vmatprep.mubr.msk.bf16.mxu0 %vm1830_vm0, %v1829_v1  ;;  %v1715_v5 = vld [vmem:[%s2183_s1 + $0x70] sm:$0xff]   ;;  %v1718_v8 = vld [vmem:[%s2183_s1 + $0x68] sm:$0xff]   ;;  %s1684_s10 = smul.u32 36, %s2193_s15  ;;  %s1433_s13 = sshll.u32 %s2193_s15, 2 }
   0xe   : > { %1645 = vmatpush3.bf16.msra.mxu0 %v1711_v0  ;;  %v1713_v3 = vld [vmem:[%s2183_s1 + $0x38] sm:$0xff]   ;;  %1547 = vmatprep.subr.bf16.mxu1 %v1712_v2  ;;  %v1716_v6 = vld [vmem:[%s2183_s1 + $0x30] sm:$0xff]   ;;  %v1719_v9 = vld [vmem:[%s2183_s1 + $0x28] sm:$0xff]   ;;  %s306_s29 = scalar_lea.vmem %s2185_s3, %s1433_s13  ;;  %s319_s12 = scalar_lea.vmem %s2187_s5, %s1433_s13 }
   0xf   : > { %1646 = vmatprep.subr.bf16.mxu0 %v1829_v1  ;;  %1548 = vmatpush3.bf16.msra.mxu1 %v1713_v3  ;;  %v1720_v10 = vld [vmem:[%s2186_s4 + $0x20] sm:$0xff]   ;;  %v1724_v13 = vld [vmem:[%s2183_s1 + $0x58] sm:$0xff]   ;;  %v1727_v16 = vld [vmem:[%s2183_s1 + $0x50] sm:$0xff]   ;;  %s1961_s26 = scalar_lea.vmem %s2182_s0, %s1684_s10 }
  0x10   : > { %1549 = vmatprep.subr.bf16.mxu1 %v1715_v5  ;;  %v1721_v11 = vld [vmem:[%s2183_s1 + $0x60] sm:$0xff]   ;;  %v1723_v14 = vld [vmem:[%s2186_s4 + $0x18] sm:$0xff]   ;;  %v1726_v17 = vld [vmem:[%s2186_s4 + $0x10] sm:$0xff]  }
  0x11   : > { %v1722_v12 = vld [vmem:[%s2183_s1 + $0x20] sm:$0xff]   ;;  %v1725_v15 = vld [vmem:[%s2183_s1 + $0x18] sm:$0xff]   ;;  %v1728_v18 = vld [vmem:[%s2183_s1 + $0x10] sm:$0xff]  }
  0x12   : > { %1647 = vmatpush3.bf16.msra.mxu0 %v1714_v4  ;;  %v1730_v19 = vld [vmem:[%s2183_s1 + $0x48] sm:$0xff]   ;;  %v1732_v22 = vld [vmem:[%s2186_s4] sm:$0xff]   ;;  %v1739_v26 = vld [vmem:[%s2183_s1 + $0xf8] sm:$0xff]  }
  0x13   : > { %1648 = vmatprep.subr.bf16.mxu0 %v1829_v1  ;;  %1550 = vmatpush3.bf16.msra.mxu1 %v1716_v6  ;;  %v1729_v20 = vld [vmem:[%s2186_s4 + $0x8] sm:$0xff]   ;;  %v1733_v23 = vld [vmem:[%s2183_s1 + $0x40] sm:$0xff]   ;;  %v1741_v29 = vld [vmem:[%s2183_s1 + $0x178] sm:$0xff]  }
  0x14   : > { %1551 = vmatprep.subr.bf16.mxu1 %v1718_v8  ;;  %v1731_v21 = vld [vmem:[%s2183_s1 + $0x8] sm:$0xff]   ;;  %v1734_v24 = vld [vmem:[%s2183_s1] sm:$0xff]   ;;  %v1740_v30 = vld [vmem:[%s2183_s1 + $0xb8] sm:$0xff]  }
  0x15   : > { %v1738_v25 = vld [vmem:[%s1961_s26 + $0x4] ss:$36 sps:$4 sm:$0xff]   ;;  %v1743_v31 = vld [vmem:[%s2183_s1 + $0xf0] sm:$0xff]   ;;  %v1742_v32 = vld [vmem:[%s2183_s1 + $0x138] sm:$0xff]  }
  0x16   : > { %1649 = vmatpush3.bf16.msra.mxu0 %v1717_v7  ;;  %v1735_v27 = vld [vmem:[%s306_s29] sm:$0xff]   ;;  %1099 = vmatprep.mubr.bf16.mxu1 %v1738_v25  ;;  %v1745_v33 = vld [vmem:[%s2183_s1 + $0x170] sm:$0xff]   ;;  %v1747_v35 = vld [vmem:[%s2183_s1 + $0xe8] sm:$0xff]  }
  0x17   : > { %1650 = vmatprep.subr.bf16.mxu0 %v1829_v1  ;;  %1552 = vmatpush3.bf16.msra.mxu1 %v1719_v9  ;;  %v1736_v28 = vld [vmem:[%s1961_s26] ss:$36 sps:$4 sm:$0xff]   ;;  %v1744_v34 = vld [vmem:[%s2183_s1 + $0xb0] sm:$0xff]   ;;  %v1749_v37 = vld [vmem:[%s2183_s1 + $0x168] sm:$0xff]  }
  0x18   : > { %1553 = vmatprep.subr.bf16.mxu1 %v1721_v11  ;;  %v1746_v36 = vld [vmem:[%s2183_s1 + $0x130] sm:$0xff]   ;;  %v1748_v38 = vld [vmem:[%s2183_s1 + $0xa8] sm:$0xff]   ;;  %v1751_v39 = vld [vmem:[%s2183_s1 + $0xe0] sm:$0xff]  }
  0x19   : > { %v1750_v40 = vld [vmem:[%s2183_s1 + $0x128] sm:$0xff]   ;;  %v1753_v41 = vld [vmem:[%s2183_s1 + $0x160] sm:$0xff]   ;;  %v1755_v43 = vld [vmem:[%s2183_s1 + $0xd8] sm:$0xff]  }
  0x1a   : > { %1651 = vmatpush3.bf16.msra.mxu0 %v1720_v10  ;;  %v1752_v42 = vld [vmem:[%s2183_s1 + $0xa0] sm:$0xff]   ;;  %v1757_v45 = vld [vmem:[%s2183_s1 + $0x158] sm:$0xff]   ;;  %v1759_v47 = vld [vmem:[%s2183_s1 + $0xd0] sm:$0xff]  }
  0x1b   : > { %1652 = vmatprep.subr.bf16.mxu0 %v1829_v1  ;;  %1554 = vmatpush3.bf16.msra.mxu1 %v1722_v12  ;;  %v1754_v44 = vld [vmem:[%s2183_s1 + $0x120] sm:$0xff]   ;;  %v1756_v46 = vld [vmem:[%s2183_s1 + $0x98] sm:$0xff]   ;;  %v1761_v49 = vld [vmem:[%s2183_s1 + $0x150] sm:$0xff]  }
  0x1c   : > { %1555 = vmatprep.subr.bf16.mxu1 %v1724_v13  ;;  %v1758_v48 = vld [vmem:[%s2183_s1 + $0x118] sm:$0xff]   ;;  %v1760_v50 = vld [vmem:[%s2183_s1 + $0x90] sm:$0xff]   ;;  %v1763_v51 = vld [vmem:[%s2183_s1 + $0xc8] sm:$0xff]  }
  0x1d   : > { %v1762_v52 = vld [vmem:[%s2183_s1 + $0x110] sm:$0xff]   ;;  %v1765_v53 = vld [vmem:[%s2183_s1 + $0x148] sm:$0xff]   ;;  %v1767_v55 = vld [vmem:[%s2183_s1 + $0xc0] sm:$0xff]  }
  0x1e   : > { %1653 = vmatpush3.bf16.msra.mxu0 %v1723_v14  ;;  %v1764_v54 = vld [vmem:[%s2183_s1 + $0x88] sm:$0xff]   ;;  %v1769_v57 = vld [vmem:[%s2183_s1 + $0x140] sm:$0xff]   ;;  %v1776_v62 = vld [vmem:[%s1961_s26 + $0x14] ss:$36 sps:$4 sm:$0xff]  }
  0x1f   : > { %1654 = vmatprep.subr.bf16.mxu0 %v1829_v1  ;;  %1556 = vmatpush3.bf16.msra.mxu1 %v1725_v15  ;;  %v1766_v56 = vld [vmem:[%s2183_s1 + $0x108] sm:$0xff]   ;;  %v1768_v58 = vld [vmem:[%s2183_s1 + $0x80] sm:$0xff]   ;;  %v1774_v63 = vld [vmem:[%s1961_s26 + $0x10] ss:$36 sps:$4 sm:$0xff]  }
  0x20   : > { %1557 = vmatprep.subr.bf16.mxu1 %v1727_v16  ;;  %v1770_v59 = vld [vmem:[%s2183_s1 + $0x100] sm:$0xff]   ;;  %v1773_v60 = vld [vmem:[%s1961_s26 + $0xc] ss:$36 sps:$4 sm:$0xff]   ;;  %v1777_v0 = vld [vmem:[%s2183_s1 + $0x1f8] sm:$0xff]  }
  0x21   : > { %v1771_v61 = vld [vmem:[%s1961_s26 + $0x8] ss:$36 sps:$4 sm:$0xff]   ;;  %v1778_v2 = vld [vmem:[%s2183_s1 + $0x1b8] sm:$0xff]   ;;  %v1780_v4 = vld [vmem:[%s2183_s1 + $0x1f0] sm:$0xff]  }
  0x22   : > { %1655 = vmatpush3.bf16.msra.mxu0 %v1726_v17  ;;  %v1779_v3 = vld [vmem:[%s2183_s1 + $0x238] sm:$0xff]   ;;  %v1781_v5 = vld [vmem:[%s2183_s1 + $0x1b0] sm:$0xff]   ;;  %v1783_v6 = vld [vmem:[%s2183_s1 + $0x1e8] sm:$0xff]  }
  0x23   : > { %1656 = vmatprep.subr.bf16.mxu0 %v1829_v1  ;;  %1558 = vmatpush3.bf16.msra.mxu1 %v1728_v18  ;;  %v1782_v7 = vld [vmem:[%s2183_s1 + $0x230] sm:$0xff]   ;;  %v1784_v8 = vld [vmem:[%s2183_s1 + $0x1a8] sm:$0xff]   ;;  %v1786_v9 = vld [vmem:[%s2183_s1 + $0x1e0] sm:$0xff]  }
  0x24   : > { %1559 = vmatprep.subr.bf16.mxu1 %v1730_v19  ;;  %v1785_v10 = vld [vmem:[%s2183_s1 + $0x228] sm:$0xff]   ;;  %v1787_v11 = vld [vmem:[%s2183_s1 + $0x1a0] sm:$0xff]   ;;  %v1789_v12 = vld [vmem:[%s2183_s1 + $0x1d8] sm:$0xff]  }
  0x25   : > { %v1788_v13 = vld [vmem:[%s2183_s1 + $0x220] sm:$0xff]   ;;  %v1790_v14 = vld [vmem:[%s2183_s1 + $0x198] sm:$0xff]   ;;  %v1792_v15 = vld [vmem:[%s2183_s1 + $0x1d0] sm:$0xff]  }
  0x26   : > { %1657 = vmatpush3.bf16.msra.mxu0 %v1729_v20  ;;  %v1791_v16 = vld [vmem:[%s2183_s1 + $0x218] sm:$0xff]   ;;  %v1793_v17 = vld [vmem:[%s2183_s1 + $0x190] sm:$0xff]   ;;  %v1795_v18 = vld [vmem:[%s2183_s1 + $0x1c8] sm:$0xff]  }
  0x27   : > { %1658 = vmatprep.subr.bf16.mxu0 %v1829_v1  ;;  %1560 = vmatpush3.bf16.msra.mxu1 %v1731_v21  ;;  %v1794_v19 = vld [vmem:[%s2183_s1 + $0x210] sm:$0xff]   ;;  %v1796_v20 = vld [vmem:[%s2183_s1 + $0x188] sm:$0xff]   ;;  %v1803_v21 = vld [vmem:[%s1961_s26 + $0x1c] ss:$36 sps:$4 sm:$0xff]  }
  0x28   : > { %1561 = vmatprep.subr.bf16.mxu1 %v1733_v23  ;;  %v1797_v23 = vld [vmem:[%s2183_s1 + $0x208] sm:$0xff]   ;;  %v1800_v25 = vld [vmem:[%s2183_s1 + $0x200] sm:$0xff]  }
  0x2a   : > { %1659 = vmatpush3.bf16.msra.mxu0 %v1732_v22  ;;  %v1798_v22 = vld [vmem:[%s2183_s1 + $0x1c0] sm:$0xff]  }
  0x2b   : > { %1569 = vmatprep.subr.bf16.mxu0 %v1739_v26  ;;  %1562 = vmatpush3.bf16.msra.mxu1 %v1734_v24  ;;  %v1799_v24 = vld [vmem:[%s2183_s1 + $0x180] sm:$0xff]   ;;  %v1801_v26 = vld [vmem:[%s1961_s26 + $0x18] ss:$36 sps:$4 sm:$0xff]  }
  0x2c   : > { %1591 = vmatprep.subr.bf16.mxu1 %v1741_v29 }
  0x2d   : > { %1661 = vmatmul.mubr.bf16.vlgmr.msra.gmra.mxu0 %v1735_v27  ;;  %v1804_v27 = vld [vmem:[%s1961_s26 + $0x20] ss:$36 sps:$4 sm:$0xff]  }
  0x2e   : > { %1570 = vmatpush3.bf16.msra.mxu0 %v1740_v30  ;;  %1100 = vmatmul.mubr.bf16.vlgmr.msra.gmra.mxu1 %v1736_v28 }
  0x2f   : > { %1571 = vmatprep.subr.bf16.mxu0 %v1743_v31  ;;  %1592 = vmatpush3.bf16.msra.mxu1 %v1742_v32 }
  0x30   : > { %1593 = vmatprep.subr.bf16.mxu1 %v1745_v33  ;;  %1140 = vmatprep.mubr.bf16.mxu0 %v1773_v60 }
  0x31   : > { %1181 = vmatprep.mubr.bf16.mxu1 %v1776_v62 }
  0x32   : > { %1572 = vmatpush3.bf16.msra.mxu0 %v1744_v34 }
  0x33   : > { %1573 = vmatprep.subr.bf16.mxu0 %v1747_v35  ;;  %1594 = vmatpush3.bf16.msra.mxu1 %v1746_v36 }
  0x34   : > { %1595 = vmatprep.subr.bf16.mxu1 %v1749_v37 }
  0x36   : > { %1574 = vmatpush3.bf16.msra.mxu0 %v1748_v38 }
  0x37   : > { %1575 = vmatprep.subr.bf16.mxu0 %v1751_v39  ;;  %1596 = vmatpush3.bf16.msra.mxu1 %v1750_v40 }
  0x38   : > { %1597 = vmatprep.subr.bf16.mxu1 %v1753_v41 }
  0x3a   : > { %1576 = vmatpush3.bf16.msra.mxu0 %v1752_v42 }
  0x3b   : > { %1577 = vmatprep.subr.bf16.mxu0 %v1755_v43  ;;  %1598 = vmatpush3.bf16.msra.mxu1 %v1754_v44 }
  0x3c   : > { %1599 = vmatprep.subr.bf16.mxu1 %v1757_v45 }
  0x3e   : > { %1578 = vmatpush3.bf16.msra.mxu0 %v1756_v46 }
  0x3f   : > { %1579 = vmatprep.subr.bf16.mxu0 %v1759_v47  ;;  %1600 = vmatpush3.bf16.msra.mxu1 %v1758_v48 }
  0x40   : > { %1601 = vmatprep.subr.bf16.mxu1 %v1761_v49 }
  0x42   : > { %1580 = vmatpush3.bf16.msra.mxu0 %v1760_v50 }
  0x43   : > { %1581 = vmatprep.subr.bf16.mxu0 %v1763_v51  ;;  %1602 = vmatpush3.bf16.msra.mxu1 %v1762_v52 }
  0x44   : > { %1603 = vmatprep.subr.bf16.mxu1 %v1765_v53 }
  0x46   : > { %1582 = vmatpush3.bf16.msra.mxu0 %v1764_v54 }
  0x47   : > { %1583 = vmatprep.subr.bf16.mxu0 %v1767_v55  ;;  %1604 = vmatpush3.bf16.msra.mxu1 %v1766_v56 }
  0x48   : > { %1605 = vmatprep.subr.bf16.mxu1 %v1769_v57 }
  0x4a   : > { %1584 = vmatpush3.bf16.msra.mxu0 %v1768_v58 }
  0x4b   : > { %1613 = vmatprep.subr.bf16.mxu0 %v1777_v0  ;;  %1606 = vmatpush3.bf16.msra.mxu1 %v1770_v59 }
  0x4c   : > { %1664 = vmatprep.subr.bf16.mxu1 %v1829_v1 }
  0x4d   : > { %1141 = vmatmul.mubr.bf16.vlgmr.msra.gmra.mxu0 %v1771_v61 }
  0x4e   : > { %1614 = vmatpush3.bf16.msra.mxu0 %v1778_v2  ;;  %1182 = vmatmul.mubr.bf16.vlgmr.msra.gmra.mxu1 %v1774_v63 }
  0x4f   : > { %1615 = vmatprep.subr.bf16.mxu0 %v1780_v4  ;;  %1665 = vmatpush3.bf16.msra.mxu1 %v1779_v3  ;;  %v1526_v3 = vld [vmem:[%s2184_s2] ss:$0 sm:$0xff] }
  0x50   : > { %1680 = vmatprep.mubr.msk.bf16.mxu1 %vm1830_vm0, %v1829_v1  ;;  %1666 = vmatprep.subr.bf16.mxu1 %v1829_v1 }
  0x51   : > { %1222 = vmatprep.mubr.bf16.mxu0 %v1803_v21 }
  0x52   : > { %1616 = vmatpush3.bf16.msra.mxu0 %v1781_v5 }
  0x53   : > { %1617 = vmatprep.subr.bf16.mxu0 %v1783_v6  ;;  %1667 = vmatpush3.bf16.msra.mxu1 %v1782_v7 }
  0x54   : > { %1668 = vmatprep.subr.bf16.mxu1 %v1829_v1 }
  0x56   : > { %1618 = vmatpush3.bf16.msra.mxu0 %v1784_v8 }
  0x57   : > { %1619 = vmatprep.subr.bf16.mxu0 %v1786_v9  ;;  %1669 = vmatpush3.bf16.msra.mxu1 %v1785_v10 }
  0x58   : > { %1670 = vmatprep.subr.bf16.mxu1 %v1829_v1 }
  0x5a   : > { %1620 = vmatpush3.bf16.msra.mxu0 %v1787_v11 }
  0x5b   : > { %1621 = vmatprep.subr.bf16.mxu0 %v1789_v12  ;;  %1671 = vmatpush3.bf16.msra.mxu1 %v1788_v13 }
  0x5c   : > { %1672 = vmatprep.subr.bf16.mxu1 %v1829_v1 }
  0x5e   : > { %1622 = vmatpush3.bf16.msra.mxu0 %v1790_v14 }
  0x5f   : > { %1623 = vmatprep.subr.bf16.mxu0 %v1792_v15  ;;  %1673 = vmatpush3.bf16.msra.mxu1 %v1791_v16 }
  0x60   : > { %1674 = vmatprep.subr.bf16.mxu1 %v1829_v1 }
  0x62   : > { %1624 = vmatpush3.bf16.msra.mxu0 %v1793_v17 }
  0x63   : > { %1625 = vmatprep.subr.bf16.mxu0 %v1795_v18  ;;  %1675 = vmatpush3.bf16.msra.mxu1 %v1794_v19 }
  0x64   : > { %1676 = vmatprep.subr.bf16.mxu1 %v1829_v1 }
  0x66   : > { %1626 = vmatpush3.bf16.msra.mxu0 %v1796_v20 }
  0x67   : > { %1627 = vmatprep.subr.bf16.mxu0 %v1798_v22  ;;  %1677 = vmatpush3.bf16.msra.mxu1 %v1797_v23 }
  0x68   : > { %1678 = vmatprep.subr.bf16.mxu1 %v1829_v1 }
  0x6a   : > { %1628 = vmatpush3.bf16.msra.mxu0 %v1799_v24 }
  0x6b   : > { %1679 = vmatpush3.bf16.msra.mxu1 %v1800_v25 }
  0x6d   : > { %1223 = vmatmul.mubr.bf16.vlgmr.msra.gmra.mxu0 %v1801_v26 }
  0x6e   : > { %1681 = vmatmul.mubr.bf16.vlgmr.msra.gmra.mxu1 %v1804_v27 }
  0xed   : > { %v582_v28 = vpop.f32.mrf.mxu0 }
  0xee   : > { %v1563_v32 = vpop.f32.mrf.mxu1 }
  0xef   : > { %v1662_v29 = vpop.f32.mrf.mxu0 }
  0xf0   : > { %v1564_v33 = vpop.f32.mrf.mxu1 }
  0xf1   : > { %v585_v30 = vpop.f32.mrf.mxu0  ;;  %v1565_v1 = vadd.f32 %v1564_v33, %v1563_v32 }
  0xf2   : > { %v1566_v34 = vpop.f32.mrf.mxu1 }
  0xf3   : > { %v1663_v31 = vpop.f32.mrf.mxu0  ;;  %v1102_v44 = vadd.f32 %v1565_v1, %v582_v28 }
  0xf4   : > { %v1567_v36 = vpop.f32.mrf.mxu1 }
  0xf5   : > { %v1568_v45 = vadd.f32 %v1567_v36, %v1566_v34 }
  0xf7   : > { %v1105_v51 = vadd.f32 %v1568_v45, %v585_v30 }
 0x10d   : > { %v1585_v35 = vpop.f32.mrf.mxu0 }
 0x10e   : > { %v1607_v37 = vpop.f32.mrf.mxu1 }
 0x10f   : > { %v1586_v38 = vpop.f32.mrf.mxu0 }
 0x110   : > { %v1608_v39 = vpop.f32.mrf.mxu1  ;;  %v1587_v41 = vadd.f32 %v1586_v38, %v1585_v35 }
 0x111   : > { %v1588_v40 = vpop.f32.mrf.mxu0  ;;  %v1609_v47 = vadd.f32 %v1608_v39, %v1607_v37 }
 0x112   : > { %v1610_v42 = vpop.f32.mrf.mxu1  ;;  %v1143_v46 = vadd.f32 %v1587_v41, %v1102_v44 }
 0x113   : > { %v1589_v43 = vpop.f32.mrf.mxu0 }
 0x114   : > { %v1590_v48 = vadd.f32 %v1589_v43, %v1588_v40  ;;  %v1611_v49 = vpop.f32.mrf.mxu1  ;;  %v1184_v54 = vadd.f32 %v1609_v47, %v1143_v46 }
 0x115   : > { %v1612_v56 = vadd.f32 %v1611_v49, %v1610_v42 }
 0x116   : > { %v1146_v55 = vadd.f32 %v1590_v48, %v1105_v51 }
 0x118   : > { %v1187_v63 = vadd.f32 %v1612_v56, %v1146_v55 }
 0x12d   : > { %v1629_v50 = vpop.f32.mrf.mxu0 }
 0x12e   : > { %v1265_v52 = vpop.f32.mrf.mxu1 }
 0x12f   : > { %v1630_v53 = vpop.f32.mrf.mxu0 }
 0x130   : > { %v1631_v57 = vadd.f32 %v1630_v53, %v1629_v50  ;;  %v1682_v58 = vpop.f32.mrf.mxu1 }
 0x131   : > { %v1632_v59 = vpop.f32.mrf.mxu0 }
 0x132   : > { %v1225_v60 = vadd.f32 %v1631_v57, %v1184_v54  ;;  %v1268_v61 = vpop.f32.mrf.mxu1 }
 0x133   : > { %v1633_v62 = vpop.f32.mrf.mxu0 }
 0x134   : > { %v1266_v0 = vadd.f32 %v1265_v52, %v1225_v60  ;;  %v1634_v2 = vadd.f32 %v1633_v62, %v1632_v59  ;;  %v1683_v4 = vpop.f32.mrf.mxu1 }
 0x136   : > { %v1228_v5 = vadd.f32 %v1634_v2, %v1187_v63  ;;  %v1279_v6 = vadd.f32 %v1526_v3, %v1266_v0 }
 0x138   : > { %v1269_v7 = vadd.f32 %v1268_v61, %v1228_v5  ;;  %v1281_v9 = vmax.f32 %v1279_v6, 0.0 }
 0x13a   : > { %v1280_v8 = vadd.f32 %v1526_v3, %v1269_v7 }
 0x13c   : > { %v1282_v10 = vmax.f32 %v1280_v8, 0.0 }
 0x13e   : > { %v1536_v11 = vpack.c.bf16 %v1282_v10, %v1281_v9 }
 0x140   : > { %1537 = vst [vmem:[%s319_s12] sm:$0xff] %v1536_v11  }
 0x141 PF: > { %s15_s20 = sadd.s32 1, %s1827_s20   ;;  %s2188_s18 = smov %s1823_s19 }
 0x142   : > { %p12_p5 = scmp.ge.s32.totalorder %s15_s20, 4   ;;  %s2189_s19 = smov %s2191_s21 }
 0x144   :  { %14 = sbr.rel (!%p12_p5) target bundleno = 2 (0x2), region = 82 }

// kernel: model_forward.24
= control target key start
LH: loop header
LB: loop body
LE: loop exit
PB: predicated region body
PF: predicated region fallthrough
CT: control target
= control target key end

     0   :  { %s2250_s12 = smov 0   ;;  %s2252_s13 = smov 0   ;;  %s2724_s0 = inlined_call_operand.vmem [shape: bf16[16,1152], index: 0, kind: input, shape index: {}]   ;;  %s2725_s1 = inlined_call_operand.vmem [shape: bf16[1152,256], index: 1, kind: input, shape index: {}]   ;;  %s2726_s2 = inlined_call_operand.vmem [shape: f32[1,256], index: 2, kind: input, shape index: {}]   ;;  %s2727_s3 = inlined_call_operand.vmem [shape: bf16[16,256], index: 3, kind: output, shape index: {}]  }
   0x1   :  { %s2254_s14 = smov 0   ;;  %s2256_s15 = smov 0  }
   0x2   :  { %s2258_s16 = smov 0  }
   0x3 LB: > { %s22_s17 = sadd.s32 1, %s2222_s15  ;;  %s1839_s18 = sadd.s32 4294967295, %s2226_s16   ;;  %s2226_s16 = sphi %s2258_s16, %s13_s16   ;;  %s2222_s15 = sphi %s2256_s15, %s2732_s15   ;;  %s2218_s14 = sphi %s2254_s14, %s2731_s14   ;;  %s2214_s13 = sphi %s2252_s13, %s2730_s13   ;;  %s2210_s12 = sphi %s2250_s12, %s2729_s12  }
   0x4   : > { %p23_p0 = scmp.ge.s32.totalorder %s22_s17, 2  ;;  %p65_p1 = scmp.ne.s32.totalorder %s2214_s13, %s2210_s12 }
   0x5   : > { %p66_p2 = scmp.eq.s32.totalorder %s2226_s16, 0  ;;  %p123_p4 = scmp.eq.s32.totalorder %s1839_s18, 1 }
   0x6   : > { %s2734_s17 = smov (%p23_p0, %s22_s17), 0  ;;  %s58_s20 = sadd.s32 1, %s2214_s13 }
   0x7   : > { %p67_p3 = por %p66_p2, %p65_p1  ;;  %s55_s19 = ssub.s32 %s2222_s15, %s2734_s17 }
   0x8   : > { %p56_p5 = scmp.eq.s32.totalorder %s55_s19, 0  ;;  %p2285_p6 = por %p123_p4, %p65_p1 }
   0x9   : > { %p1843_p7 = scmp.ge.s32.totalorder %s2226_s16, 2 }
   0xa   : > { %s2290_s22 = scalar_select %p56_p5, %s2214_s13, %s58_s20  }
   0xb   : > { %155 = sbr.rel (%p1843_p7) target bundleno = 116 (0x74), region = 20 }
  0x10   : > { %158 = sbr.rel (!%p67_p3) target bundleno = 116 (0x74), region = 24  ;;  %s160_s23 = sand.u32 (%p67_p3), 1, %s2214_s13  }
  0x11   : > { %s1844_s24 = sshll.u32 (%p67_p3), %s2222_s15, 2  ;;  %s2059_s25 = smul.u32 (%p67_p3), 576, %s160_s23 }
  0x12   : > { %s2298_s28 = scalar_lea.vmem (%p67_p3), %s2725_s1, %s1844_s24 }
  0x13   : > { %v181_v0 = vld [vmem:[%s2298_s28] sm:$0xf] (%p67_p3)  ;;  %v183_v1 = vld [vmem:[%s2298_s28 + $0x8] sm:$0xf] (%p67_p3)  ;;  %v185_v2 = vld [vmem:[%s2298_s28 + $0x10] sm:$0xf] (%p67_p3) }
  0x14   : > { %v187_v3 = vld [vmem:[%s2298_s28 + $0x18] sm:$0xf] (%p67_p3)  ;;  %v189_v4 = vld [vmem:[%s2298_s28 + $0x20] sm:$0xf] (%p67_p3)  ;;  %s2305_s29 = scalar_lea.vmem (%p67_p3), [#allocation2], %s2059_s25 }
  0x15   : > { %182 = vst [vmem:[%s2305_s29] sm:$0xf] %v181_v0  ;;  %184 = vst [vmem:[%s2305_s29 + $0x4] sm:$0xf] %v183_v1  ;;  %v191_v5 = vld [vmem:[%s2298_s28 + $0x28] sm:$0xf] }
  0x16   : > { %186 = vst [vmem:[%s2305_s29 + $0x8] sm:$0xf] %v185_v2  ;;  %188 = vst [vmem:[%s2305_s29 + $0xc] sm:$0xf] %v187_v3  ;;  %v193_v6 = vld [vmem:[%s2298_s28 + $0x30] sm:$0xf] }
  0x17   : > { %190 = vst [vmem:[%s2305_s29 + $0x10] sm:$0xf] %v189_v4  ;;  %v195_v7 = vld [vmem:[%s2298_s28 + $0x38] sm:$0xf]  ;;  %192 = vst [vmem:[%s2305_s29 + $0x14] sm:$0xf] %v191_v5 }
  0x18   : > { %194 = vst [vmem:[%s2305_s29 + $0x18] sm:$0xf] %v193_v6  ;;  %196 = vst [vmem:[%s2305_s29 + $0x1c] sm:$0xf] %v195_v7  ;;  %v197_v8 = vld [vmem:[%s2298_s28 + $0x40] sm:$0xf] }
  0x19   : > { %v199_v9 = vld [vmem:[%s2298_s28 + $0x48] sm:$0xf]  ;;  %v201_v10 = vld [vmem:[%s2298_s28 + $0x50] sm:$0xf]  ;;  %198 = vst [vmem:[%s2305_s29 + $0x20] sm:$0xf] %v197_v8 }
  0x1a   : > { %200 = vst [vmem:[%s2305_s29 + $0x24] sm:$0xf] %v199_v9  ;;  %202 = vst [vmem:[%s2305_s29 + $0x28] sm:$0xf] %v201_v10  ;;  %v203_v11 = vld [vmem:[%s2298_s28 + $0x58] sm:$0xf] }
  0x1b   : > { %v205_v12 = vld [vmem:[%s2298_s28 + $0x60] sm:$0xf]  ;;  %v207_v13 = vld [vmem:[%s2298_s28 + $0x68] sm:$0xf]  ;;  %204 = vst [vmem:[%s2305_s29 + $0x2c] sm:$0xf] %v203_v11 }
  0x1c   : > { %206 = vst [vmem:[%s2305_s29 + $0x30] sm:$0xf] %v205_v12  ;;  %208 = vst [vmem:[%s2305_s29 + $0x34] sm:$0xf] %v207_v13  ;;  %v209_v14 = vld [vmem:[%s2298_s28 + $0x70] sm:$0xf] }
  0x1d   : > { %v211_v15 = vld [vmem:[%s2298_s28 + $0x78] sm:$0xf]  ;;  %v213_v16 = vld [vmem:[%s2298_s28 + $0x80] sm:$0xf]  ;;  %210 = vst [vmem:[%s2305_s29 + $0x38] sm:$0xf] %v209_v14 }
  0x1e   : > { %212 = vst [vmem:[%s2305_s29 + $0x3c] sm:$0xf] %v211_v15  ;;  %214 = vst [vmem:[%s2305_s29 + $0x40] sm:$0xf] %v213_v16  ;;  %v215_v17 = vld [vmem:[%s2298_s28 + $0x88] sm:$0xf] }
  0x1f   : > { %v217_v18 = vld [vmem:[%s2298_s28 + $0x90] sm:$0xf]  ;;  %v219_v19 = vld [vmem:[%s2298_s28 + $0x98] sm:$0xf]  ;;  %216 = vst [vmem:[%s2305_s29 + $0x44] sm:$0xf] %v215_v17 }
  0x20   : > { %218 = vst [vmem:[%s2305_s29 + $0x48] sm:$0xf] %v217_v18  ;;  %220 = vst [vmem:[%s2305_s29 + $0x4c] sm:$0xf] %v219_v19  ;;  %v221_v20 = vld [vmem:[%s2298_s28 + $0xa0] sm:$0xf] }
  0x21   : > { %v223_v21 = vld [vmem:[%s2298_s28 + $0xa8] sm:$0xf]  ;;  %v225_v22 = vld [vmem:[%s2298_s28 + $0xb0] sm:$0xf]  ;;  %222 = vst [vmem:[%s2305_s29 + $0x50] sm:$0xf] %v221_v20 }
  0x22   : > { %224 = vst [vmem:[%s2305_s29 + $0x54] sm:$0xf] %v223_v21  ;;  %226 = vst [vmem:[%s2305_s29 + $0x58] sm:$0xf] %v225_v22  ;;  %v227_v23 = vld [vmem:[%s2298_s28 + $0xb8] sm:$0xf] }
  0x23   : > { %v229_v24 = vld [vmem:[%s2298_s28 + $0xc0] sm:$0xf]  ;;  %v231_v25 = vld [vmem:[%s2298_s28 + $0xc8] sm:$0xf]  ;;  %228 = vst [vmem:[%s2305_s29 + $0x5c] sm:$0xf] %v227_v23 }
  0x24   : > { %230 = vst [vmem:[%s2305_s29 + $0x60] sm:$0xf] %v229_v24  ;;  %232 = vst [vmem:[%s2305_s29 + $0x64] sm:$0xf] %v231_v25  ;;  %v233_v26 = vld [vmem:[%s2298_s28 + $0xd0] sm:$0xf] }
  0x25   : > { %v235_v27 = vld [vmem:[%s2298_s28 + $0xd8] sm:$0xf]  ;;  %v237_v28 = vld [vmem:[%s2298_s28 + $0xe0] sm:$0xf]  ;;  %234 = vst [vmem:[%s2305_s29 + $0x68] sm:$0xf] %v233_v26 }
  0x26   : > { %236 = vst [vmem:[%s2305_s29 + $0x6c] sm:$0xf] %v235_v27  ;;  %238 = vst [vmem:[%s2305_s29 + $0x70] sm:$0xf] %v237_v28  ;;  %v239_v29 = vld [vmem:[%s2298_s28 + $0xe8] sm:$0xf] }
  0x27   : > { %v241_v30 = vld [vmem:[%s2298_s28 + $0xf0] sm:$0xf]  ;;  %v243_v31 = vld [vmem:[%s2298_s28 + $0xf8] sm:$0xf]  ;;  %240 = vst [vmem:[%s2305_s29 + $0x74] sm:$0xf] %v239_v29 }
  0x28   : > { %242 = vst [vmem:[%s2305_s29 + $0x78] sm:$0xf] %v241_v30  ;;  %244 = vst [vmem:[%s2305_s29 + $0x7c] sm:$0xf] %v243_v31  ;;  %v245_v32 = vld [vmem:[%s2298_s28 + $0x100] sm:$0xf] }
  0x29   : > { %v247_v33 = vld [vmem:[%s2298_s28 + $0x108] sm:$0xf]  ;;  %v249_v34 = vld [vmem:[%s2298_s28 + $0x110] sm:$0xf]  ;;  %246 = vst [vmem:[%s2305_s29 + $0x80] sm:$0xf] %v245_v32 }
  0x2a   : > { %248 = vst [vmem:[%s2305_s29 + $0x84] sm:$0xf] %v247_v33  ;;  %250 = vst [vmem:[%s2305_s29 + $0x88] sm:$0xf] %v249_v34  ;;  %v251_v35 = vld [vmem:[%s2298_s28 + $0x118] sm:$0xf] }
  0x2b   : > { %v253_v36 = vld [vmem:[%s2298_s28 + $0x120] sm:$0xf]  ;;  %v255_v37 = vld [vmem:[%s2298_s28 + $0x128] sm:$0xf]  ;;  %252 = vst [vmem:[%s2305_s29 + $0x8c] sm:$0xf] %v251_v35 }
  0x2c   : > { %254 = vst [vmem:[%s2305_s29 + $0x90] sm:$0xf] %v253_v36  ;;  %256 = vst [vmem:[%s2305_s29 + $0x94] sm:$0xf] %v255_v37  ;;  %v257_v38 = vld [vmem:[%s2298_s28 + $0x130] sm:$0xf] }
  0x2d   : > { %v259_v39 = vld [vmem:[%s2298_s28 + $0x138] sm:$0xf]  ;;  %v261_v40 = vld [vmem:[%s2298_s28 + $0x140] sm:$0xf]  ;;  %258 = vst [vmem:[%s2305_s29 + $0x98] sm:$0xf] %v257_v38 }
  0x2e   : > { %260 = vst [vmem:[%s2305_s29 + $0x9c] sm:$0xf] %v259_v39  ;;  %262 = vst [vmem:[%s2305_s29 + $0xa0] sm:$0xf] %v261_v40  ;;  %v263_v41 = vld [vmem:[%s2298_s28 + $0x148] sm:$0xf] }
  0x2f   : > { %v265_v42 = vld [vmem:[%s2298_s28 + $0x150] sm:$0xf]  ;;  %v267_v43 = vld [vmem:[%s2298_s28 + $0x158] sm:$0xf]  ;;  %264 = vst [vmem:[%s2305_s29 + $0xa4] sm:$0xf] %v263_v41 }
  0x30   : > { %266 = vst [vmem:[%s2305_s29 + $0xa8] sm:$0xf] %v265_v42  ;;  %268 = vst [vmem:[%s2305_s29 + $0xac] sm:$0xf] %v267_v43  ;;  %v269_v44 = vld [vmem:[%s2298_s28 + $0x160] sm:$0xf] }
  0x31   : > { %v271_v45 = vld [vmem:[%s2298_s28 + $0x168] sm:$0xf]  ;;  %v273_v46 = vld [vmem:[%s2298_s28 + $0x170] sm:$0xf]  ;;  %270 = vst [vmem:[%s2305_s29 + $0xb0] sm:$0xf] %v269_v44 }
  0x32   : > { %272 = vst [vmem:[%s2305_s29 + $0xb4] sm:$0xf] %v271_v45  ;;  %274 = vst [vmem:[%s2305_s29 + $0xb8] sm:$0xf] %v273_v46  ;;  %v275_v47 = vld [vmem:[%s2298_s28 + $0x178] sm:$0xf] }
  0x33   : > { %v277_v48 = vld [vmem:[%s2298_s28 + $0x180] sm:$0xf]  ;;  %v279_v49 = vld [vmem:[%s2298_s28 + $0x188] sm:$0xf]  ;;  %276 = vst [vmem:[%s2305_s29 + $0xbc] sm:$0xf] %v275_v47 }
  0x34   : > { %278 = vst [vmem:[%s2305_s29 + $0xc0] sm:$0xf] %v277_v48  ;;  %280 = vst [vmem:[%s2305_s29 + $0xc4] sm:$0xf] %v279_v49  ;;  %v281_v50 = vld [vmem:[%s2298_s28 + $0x190] sm:$0xf] }
  0x35   : > { %v283_v51 = vld [vmem:[%s2298_s28 + $0x198] sm:$0xf]  ;;  %v285_v52 = vld [vmem:[%s2298_s28 + $0x1a0] sm:$0xf]  ;;  %282 = vst [vmem:[%s2305_s29 + $0xc8] sm:$0xf] %v281_v50 }
  0x36   : > { %284 = vst [vmem:[%s2305_s29 + $0xcc] sm:$0xf] %v283_v51  ;;  %286 = vst [vmem:[%s2305_s29 + $0xd0] sm:$0xf] %v285_v52  ;;  %v287_v53 = vld [vmem:[%s2298_s28 + $0x1a8] sm:$0xf] }
  0x37   : > { %v289_v54 = vld [vmem:[%s2298_s28 + $0x1b0] sm:$0xf]  ;;  %v291_v55 = vld [vmem:[%s2298_s28 + $0x1b8] sm:$0xf]  ;;  %288 = vst [vmem:[%s2305_s29 + $0xd4] sm:$0xf] %v287_v53 }
  0x38   : > { %290 = vst [vmem:[%s2305_s29 + $0xd8] sm:$0xf] %v289_v54  ;;  %292 = vst [vmem:[%s2305_s29 + $0xdc] sm:$0xf] %v291_v55  ;;  %v293_v56 = vld [vmem:[%s2298_s28 + $0x1c0] sm:$0xf] }
  0x39   : > { %v295_v57 = vld [vmem:[%s2298_s28 + $0x1c8] sm:$0xf]  ;;  %v297_v58 = vld [vmem:[%s2298_s28 + $0x1d0] sm:$0xf]  ;;  %294 = vst [vmem:[%s2305_s29 + $0xe0] sm:$0xf] %v293_v56 }
  0x3a   : > { %296 = vst [vmem:[%s2305_s29 + $0xe4] sm:$0xf] %v295_v57  ;;  %298 = vst [vmem:[%s2305_s29 + $0xe8] sm:$0xf] %v297_v58  ;;  %v299_v59 = vld [vmem:[%s2298_s28 + $0x1d8] sm:$0xf] }
  0x3b   : > { %v301_v60 = vld [vmem:[%s2298_s28 + $0x1e0] sm:$0xf]  ;;  %v303_v61 = vld [vmem:[%s2298_s28 + $0x1e8] sm:$0xf]  ;;  %300 = vst [vmem:[%s2305_s29 + $0xec] sm:$0xf] %v299_v59 }
  0x3c   : > { %302 = vst [vmem:[%s2305_s29 + $0xf0] sm:$0xf] %v301_v60  ;;  %304 = vst [vmem:[%s2305_s29 + $0xf4] sm:$0xf] %v303_v61  ;;  %v305_v62 = vld [vmem:[%s2298_s28 + $0x1f0] sm:$0xf] }
  0x3d   : > { %v307_v63 = vld [vmem:[%s2298_s28 + $0x1f8] sm:$0xf]  ;;  %v309_v0 = vld [vmem:[%s2298_s28 + $0x200] sm:$0xf]  ;;  %306 = vst [vmem:[%s2305_s29 + $0xf8] sm:$0xf] %v305_v62 }
  0x3e   : > { %308 = vst [vmem:[%s2305_s29 + $0xfc] sm:$0xf] %v307_v63  ;;  %310 = vst [vmem:[%s2305_s29 + $0x100] sm:$0xf] %v309_v0  ;;  %v311_v1 = vld [vmem:[%s2298_s28 + $0x208] sm:$0xf] }
  0x3f   : > { %v313_v2 = vld [vmem:[%s2298_s28 + $0x210] sm:$0xf]  ;;  %v315_v3 = vld [vmem:[%s2298_s28 + $0x218] sm:$0xf]  ;;  %312 = vst [vmem:[%s2305_s29 + $0x104] sm:$0xf] %v311_v1 }
  0x40   : > { %314 = vst [vmem:[%s2305_s29 + $0x108] sm:$0xf] %v313_v2  ;;  %316 = vst [vmem:[%s2305_s29 + $0x10c] sm:$0xf] %v315_v3  ;;  %v317_v4 = vld [vmem:[%s2298_s28 + $0x220] sm:$0xf] }
  0x41   : > { %v319_v5 = vld [vmem:[%s2298_s28 + $0x228] sm:$0xf]  ;;  %v321_v6 = vld [vmem:[%s2298_s28 + $0x230] sm:$0xf]  ;;  %318 = vst [vmem:[%s2305_s29 + $0x110] sm:$0xf] %v317_v4 }
  0x42   : > { %320 = vst [vmem:[%s2305_s29 + $0x114] sm:$0xf] %v319_v5  ;;  %322 = vst [vmem:[%s2305_s29 + $0x118] sm:$0xf] %v321_v6  ;;  %v323_v7 = vld [vmem:[%s2298_s28 + $0x238] sm:$0xf] }
  0x43   : > { %v325_v8 = vld [vmem:[%s2298_s28 + $0x240] sm:$0xf]  ;;  %v327_v9 = vld [vmem:[%s2298_s28 + $0x248] sm:$0xf]  ;;  %324 = vst [vmem:[%s2305_s29 + $0x11c] sm:$0xf] %v323_v7 }
  0x44   : > { %326 = vst [vmem:[%s2305_s29 + $0x120] sm:$0xf] %v325_v8  ;;  %328 = vst [vmem:[%s2305_s29 + $0x124] sm:$0xf] %v327_v9  ;;  %v329_v10 = vld [vmem:[%s2298_s28 + $0x250] sm:$0xf] }
  0x45   : > { %v331_v11 = vld [vmem:[%s2298_s28 + $0x258] sm:$0xf]  ;;  %v333_v12 = vld [vmem:[%s2298_s28 + $0x260] sm:$0xf]  ;;  %330 = vst [vmem:[%s2305_s29 + $0x128] sm:$0xf] %v329_v10 }
  0x46   : > { %332 = vst [vmem:[%s2305_s29 + $0x12c] sm:$0xf] %v331_v11  ;;  %334 = vst [vmem:[%s2305_s29 + $0x130] sm:$0xf] %v333_v12  ;;  %v335_v13 = vld [vmem:[%s2298_s28 + $0x268] sm:$0xf] }
  0x47   : > { %v337_v14 = vld [vmem:[%s2298_s28 + $0x270] sm:$0xf]  ;;  %v339_v15 = vld [vmem:[%s2298_s28 + $0x278] sm:$0xf]  ;;  %336 = vst [vmem:[%s2305_s29 + $0x134] sm:$0xf] %v335_v13 }
  0x48   : > { %338 = vst [vmem:[%s2305_s29 + $0x138] sm:$0xf] %v337_v14  ;;  %340 = vst [vmem:[%s2305_s29 + $0x13c] sm:$0xf] %v339_v15  ;;  %v341_v16 = vld [vmem:[%s2298_s28 + $0x280] sm:$0xf] }
  0x49   : > { %v343_v17 = vld [vmem:[%s2298_s28 + $0x288] sm:$0xf]  ;;  %v345_v18 = vld [vmem:[%s2298_s28 + $0x290] sm:$0xf]  ;;  %342 = vst [vmem:[%s2305_s29 + $0x140] sm:$0xf] %v341_v16 }
  0x4a   : > { %344 = vst [vmem:[%s2305_s29 + $0x144] sm:$0xf] %v343_v17  ;;  %346 = vst [vmem:[%s2305_s29 + $0x148] sm:$0xf] %v345_v18  ;;  %v347_v19 = vld [vmem:[%s2298_s28 + $0x298] sm:$0xf] }
  0x4b   : > { %v349_v20 = vld [vmem:[%s2298_s28 + $0x2a0] sm:$0xf]  ;;  %v351_v21 = vld [vmem:[%s2298_s28 + $0x2a8] sm:$0xf]  ;;  %348 = vst [vmem:[%s2305_s29 + $0x14c] sm:$0xf] %v347_v19 }
  0x4c   : > { %350 = vst [vmem:[%s2305_s29 + $0x150] sm:$0xf] %v349_v20  ;;  %352 = vst [vmem:[%s2305_s29 + $0x154] sm:$0xf] %v351_v21  ;;  %v353_v22 = vld [vmem:[%s2298_s28 + $0x2b0] sm:$0xf] }
  0x4d   : > { %v355_v23 = vld [vmem:[%s2298_s28 + $0x2b8] sm:$0xf]  ;;  %v357_v24 = vld [vmem:[%s2298_s28 + $0x2c0] sm:$0xf]  ;;  %354 = vst [vmem:[%s2305_s29 + $0x158] sm:$0xf] %v353_v22 }
  0x4e   : > { %356 = vst [vmem:[%s2305_s29 + $0x15c] sm:$0xf] %v355_v23  ;;  %358 = vst [vmem:[%s2305_s29 + $0x160] sm:$0xf] %v357_v24  ;;  %v359_v25 = vld [vmem:[%s2298_s28 + $0x2c8] sm:$0xf] }
  0x4f   : > { %v361_v26 = vld [vmem:[%s2298_s28 + $0x2d0] sm:$0xf]  ;;  %v363_v27 = vld [vmem:[%s2298_s28 + $0x2d8] sm:$0xf]  ;;  %360 = vst [vmem:[%s2305_s29 + $0x164] sm:$0xf] %v359_v25 }
  0x50   : > { %362 = vst [vmem:[%s2305_s29 + $0x168] sm:$0xf] %v361_v26  ;;  %364 = vst [vmem:[%s2305_s29 + $0x16c] sm:$0xf] %v363_v27  ;;  %v365_v28 = vld [vmem:[%s2298_s28 + $0x2e0] sm:$0xf] }
  0x51   : > { %v367_v29 = vld [vmem:[%s2298_s28 + $0x2e8] sm:$0xf]  ;;  %v369_v30 = vld [vmem:[%s2298_s28 + $0x2f0] sm:$0xf]  ;;  %366 = vst [vmem:[%s2305_s29 + $0x170] sm:$0xf] %v365_v28 }
  0x52   : > { %368 = vst [vmem:[%s2305_s29 + $0x174] sm:$0xf] %v367_v29  ;;  %370 = vst [vmem:[%s2305_s29 + $0x178] sm:$0xf] %v369_v30  ;;  %v371_v31 = vld [vmem:[%s2298_s28 + $0x2f8] sm:$0xf] }
  0x53   : > { %v373_v32 = vld [vmem:[%s2298_s28 + $0x300] sm:$0xf]  ;;  %v375_v33 = vld [vmem:[%s2298_s28 + $0x308] sm:$0xf]  ;;  %372 = vst [vmem:[%s2305_s29 + $0x17c] sm:$0xf] %v371_v31 }
  0x54   : > { %374 = vst [vmem:[%s2305_s29 + $0x180] sm:$0xf] %v373_v32  ;;  %376 = vst [vmem:[%s2305_s29 + $0x184] sm:$0xf] %v375_v33  ;;  %v377_v34 = vld [vmem:[%s2298_s28 + $0x310] sm:$0xf] }
  0x55   : > { %v379_v35 = vld [vmem:[%s2298_s28 + $0x318] sm:$0xf]  ;;  %v381_v36 = vld [vmem:[%s2298_s28 + $0x320] sm:$0xf]  ;;  %378 = vst [vmem:[%s2305_s29 + $0x188] sm:$0xf] %v377_v34 }
  0x56   : > { %380 = vst [vmem:[%s2305_s29 + $0x18c] sm:$0xf] %v379_v35  ;;  %382 = vst [vmem:[%s2305_s29 + $0x190] sm:$0xf] %v381_v36  ;;  %v383_v37 = vld [vmem:[%s2298_s28 + $0x328] sm:$0xf] }
  0x57   : > { %v385_v38 = vld [vmem:[%s2298_s28 + $0x330] sm:$0xf]  ;;  %v387_v39 = vld [vmem:[%s2298_s28 + $0x338] sm:$0xf]  ;;  %384 = vst [vmem:[%s2305_s29 + $0x194] sm:$0xf] %v383_v37 }
  0x58   : > { %386 = vst [vmem:[%s2305_s29 + $0x198] sm:$0xf] %v385_v38  ;;  %388 = vst [vmem:[%s2305_s29 + $0x19c] sm:$0xf] %v387_v39  ;;  %v389_v40 = vld [vmem:[%s2298_s28 + $0x340] sm:$0xf] }
  0x59   : > { %v391_v41 = vld [vmem:[%s2298_s28 + $0x348] sm:$0xf]  ;;  %v393_v42 = vld [vmem:[%s2298_s28 + $0x350] sm:$0xf]  ;;  %390 = vst [vmem:[%s2305_s29 + $0x1a0] sm:$0xf] %v389_v40 }
  0x5a   : > { %392 = vst [vmem:[%s2305_s29 + $0x1a4] sm:$0xf] %v391_v41  ;;  %394 = vst [vmem:[%s2305_s29 + $0x1a8] sm:$0xf] %v393_v42  ;;  %v395_v43 = vld [vmem:[%s2298_s28 + $0x358] sm:$0xf] }
  0x5b   : > { %v397_v44 = vld [vmem:[%s2298_s28 + $0x360] sm:$0xf]  ;;  %v399_v45 = vld [vmem:[%s2298_s28 + $0x368] sm:$0xf]  ;;  %396 = vst [vmem:[%s2305_s29 + $0x1ac] sm:$0xf] %v395_v43 }
  0x5c   : > { %398 = vst [vmem:[%s2305_s29 + $0x1b0] sm:$0xf] %v397_v44  ;;  %400 = vst [vmem:[%s2305_s29 + $0x1b4] sm:$0xf] %v399_v45  ;;  %v401_v46 = vld [vmem:[%s2298_s28 + $0x370] sm:$0xf] }
  0x5d   : > { %v403_v47 = vld [vmem:[%s2298_s28 + $0x378] sm:$0xf]  ;;  %v405_v48 = vld [vmem:[%s2298_s28 + $0x380] sm:$0xf]  ;;  %402 = vst [vmem:[%s2305_s29 + $0x1b8] sm:$0xf] %v401_v46 }
  0x5e   : > { %404 = vst [vmem:[%s2305_s29 + $0x1bc] sm:$0xf] %v403_v47  ;;  %406 = vst [vmem:[%s2305_s29 + $0x1c0] sm:$0xf] %v405_v48  ;;  %v407_v49 = vld [vmem:[%s2298_s28 + $0x388] sm:$0xf] }
  0x5f   : > { %v409_v50 = vld [vmem:[%s2298_s28 + $0x390] sm:$0xf]  ;;  %v411_v51 = vld [vmem:[%s2298_s28 + $0x398] sm:$0xf]  ;;  %408 = vst [vmem:[%s2305_s29 + $0x1c4] sm:$0xf] %v407_v49 }
  0x60   : > { %410 = vst [vmem:[%s2305_s29 + $0x1c8] sm:$0xf] %v409_v50  ;;  %412 = vst [vmem:[%s2305_s29 + $0x1cc] sm:$0xf] %v411_v51  ;;  %v413_v52 = vld [vmem:[%s2298_s28 + $0x3a0] sm:$0xf] }
  0x61   : > { %v415_v53 = vld [vmem:[%s2298_s28 + $0x3a8] sm:$0xf]  ;;  %v417_v54 = vld [vmem:[%s2298_s28 + $0x3b0] sm:$0xf]  ;;  %414 = vst [vmem:[%s2305_s29 + $0x1d0] sm:$0xf] %v413_v52 }
  0x62   : > { %416 = vst [vmem:[%s2305_s29 + $0x1d4] sm:$0xf] %v415_v53  ;;  %418 = vst [vmem:[%s2305_s29 + $0x1d8] sm:$0xf] %v417_v54  ;;  %v419_v55 = vld [vmem:[%s2298_s28 + $0x3b8] sm:$0xf] }
  0x63   : > { %v421_v56 = vld [vmem:[%s2298_s28 + $0x3c0] sm:$0xf]  ;;  %v423_v57 = vld [vmem:[%s2298_s28 + $0x3c8] sm:$0xf]  ;;  %420 = vst [vmem:[%s2305_s29 + $0x1dc] sm:$0xf] %v419_v55 }
  0x64   : > { %422 = vst [vmem:[%s2305_s29 + $0x1e0] sm:$0xf] %v421_v56  ;;  %424 = vst [vmem:[%s2305_s29 + $0x1e4] sm:$0xf] %v423_v57  ;;  %v425_v58 = vld [vmem:[%s2298_s28 + $0x3d0] sm:$0xf] }
  0x65   : > { %v427_v59 = vld [vmem:[%s2298_s28 + $0x3d8] sm:$0xf]  ;;  %v429_v60 = vld [vmem:[%s2298_s28 + $0x3e0] sm:$0xf]  ;;  %426 = vst [vmem:[%s2305_s29 + $0x1e8] sm:$0xf] %v425_v58 }
  0x66   : > { %428 = vst [vmem:[%s2305_s29 + $0x1ec] sm:$0xf] %v427_v59  ;;  %430 = vst [vmem:[%s2305_s29 + $0x1f0] sm:$0xf] %v429_v60  ;;  %v431_v61 = vld [vmem:[%s2298_s28 + $0x3e8] sm:$0xf] }
  0x67   : > { %v433_v62 = vld [vmem:[%s2298_s28 + $0x3f0] sm:$0xf]  ;;  %v435_v63 = vld [vmem:[%s2298_s28 + $0x3f8] sm:$0xf]  ;;  %432 = vst [vmem:[%s2305_s29 + $0x1f4] sm:$0xf] %v431_v61 }
  0x68   : > { %434 = vst [vmem:[%s2305_s29 + $0x1f8] sm:$0xf] %v433_v62  ;;  %436 = vst [vmem:[%s2305_s29 + $0x1fc] sm:$0xf] %v435_v63  ;;  %v437_v0 = vld [vmem:[%s2298_s28 + $0x400] sm:$0xf] }
  0x69   : > { %v439_v1 = vld [vmem:[%s2298_s28 + $0x408] sm:$0xf]  ;;  %v441_v2 = vld [vmem:[%s2298_s28 + $0x410] sm:$0xf]  ;;  %438 = vst [vmem:[%s2305_s29 + $0x200] sm:$0xf] %v437_v0 }
  0x6a   : > { %440 = vst [vmem:[%s2305_s29 + $0x204] sm:$0xf] %v439_v1  ;;  %442 = vst [vmem:[%s2305_s29 + $0x208] sm:$0xf] %v441_v2  ;;  %v443_v3 = vld [vmem:[%s2298_s28 + $0x418] sm:$0xf] }
  0x6b   : > { %v445_v4 = vld [vmem:[%s2298_s28 + $0x420] sm:$0xf]  ;;  %v447_v5 = vld [vmem:[%s2298_s28 + $0x428] sm:$0xf]  ;;  %444 = vst [vmem:[%s2305_s29 + $0x20c] sm:$0xf] %v443_v3 }
  0x6c   : > { %446 = vst [vmem:[%s2305_s29 + $0x210] sm:$0xf] %v445_v4  ;;  %448 = vst [vmem:[%s2305_s29 + $0x214] sm:$0xf] %v447_v5  ;;  %v449_v6 = vld [vmem:[%s2298_s28 + $0x430] sm:$0xf] }
  0x6d   : > { %v451_v7 = vld [vmem:[%s2298_s28 + $0x438] sm:$0xf]  ;;  %v453_v8 = vld [vmem:[%s2298_s28 + $0x440] sm:$0xf]  ;;  %450 = vst [vmem:[%s2305_s29 + $0x218] sm:$0xf] %v449_v6 }
  0x6e   : > { %452 = vst [vmem:[%s2305_s29 + $0x21c] sm:$0xf] %v451_v7  ;;  %454 = vst [vmem:[%s2305_s29 + $0x220] sm:$0xf] %v453_v8  ;;  %v455_v9 = vld [vmem:[%s2298_s28 + $0x448] sm:$0xf] }
  0x6f   : > { %v457_v10 = vld [vmem:[%s2298_s28 + $0x450] sm:$0xf]  ;;  %v459_v11 = vld [vmem:[%s2298_s28 + $0x458] sm:$0xf]  ;;  %456 = vst [vmem:[%s2305_s29 + $0x224] sm:$0xf] %v455_v9 }
  0x70   : > { %458 = vst [vmem:[%s2305_s29 + $0x228] sm:$0xf] %v457_v10  ;;  %460 = vst [vmem:[%s2305_s29 + $0x22c] sm:$0xf] %v459_v11  ;;  %v461_v12 = vld [vmem:[%s2298_s28 + $0x460] sm:$0xf] }
  0x71   : > { %v463_v13 = vld [vmem:[%s2298_s28 + $0x468] sm:$0xf]  ;;  %v465_v14 = vld [vmem:[%s2298_s28 + $0x470] sm:$0xf]  ;;  %462 = vst [vmem:[%s2305_s29 + $0x230] sm:$0xf] %v461_v12 }
  0x72   : > { %464 = vst [vmem:[%s2305_s29 + $0x234] sm:$0xf] %v463_v13  ;;  %466 = vst [vmem:[%s2305_s29 + $0x238] sm:$0xf] %v465_v14  ;;  %v467_v15 = vld [vmem:[%s2298_s28 + $0x478] sm:$0xf] }
  0x73   : > { %468 = vst [vmem:[%s2305_s29 + $0x23c] sm:$0xf] %v467_v15 }
  0x74 PF: > { %p1845_p8 = scmp.ge.s32.totalorder %s2226_s16, 1  ;;  %p785_p9 = scmp.lt.s32.totalorder %s2226_s16, 3 }
  0x76   : > { %p786_p10 = pnand %p1845_p8, %p785_p9 }
  0x77   : > { %s792_s30 = sand.u32 (!%p786_p10), 1, %s2210_s12   ;;  %p830_p11 = scmp.lt.s32.totalorder (!%p786_p10), %s2218_s14, 1 }
  0x78   : > { %789 = sbr.rel (%p786_p10) target bundleno = 435 (0x1b3), region = 69  ;;  %s1846_s10 = sshll.u32 (!%p786_p10), %s792_s30, 3 }
  0x79   : > { %s2060_s4 = smul.u32 (!%p786_p10), 576, %s792_s30  ;;  %s822_s11 = scalar_lea.vmem (!%p786_p10), [#allocation3], %s1846_s10 }
  0x7b   : > { %s2601_s9 = scalar_lea.vmem (!%p786_p10), [#allocation2], %s2060_s4 }
  0x7d   : > { %v2136_v16 = vld [vmem:[%s2724_s0 + $0x4] ss:$36 sps:$4 sm:$0xff]   ;;  %v2141_v17 = vld [vmem:[%s2724_s0 + $0xc] ss:$36 sps:$4 sm:$0xff]   ;;  %v2103_v18 = vld [vmem:[%s2601_s9 + $0x78] sm:$0xff]   ;;  %vm2229_vm0 = vmmov 0  }
  0x7e   : > { %1506 = vmatprep.mubr.bf16.mxu0 %v2136_v16  ;;  %1547 = vmatprep.mubr.bf16.mxu1 %v2141_v17  ;;  %v2104_v19 = vld [vmem:[%s2601_s9 + $0x38] sm:$0xff]   ;;  %v2107_v22 = vld [vmem:[%s2601_s9 + $0x70] sm:$0xff]   ;;  %v2111_v26 = vld [vmem:[%s2601_s9 + $0x68] sm:$0xff]   ;;  %s831_s6 = scalar_select %p830_p11, %s2218_s14, 1 }
  0x7f   : > { %1942 = vmatprep.subr.bf16.mxu0 %v2103_v18  ;;  %v2105_v20 = vld [vmem:[%s2601_s9 + $0xf8] sm:$0xff]   ;;  %v2108_v23 = vld [vmem:[%s2601_s9 + $0x30] sm:$0xff]   ;;  %v2112_v27 = vld [vmem:[%s2601_s9 + $0x28] sm:$0xff]   ;;  %s1932_s18 = sshll.u32 (%p2285_p6), %s2218_s14, 2 }
  0x80   : > { %1943 = vmatpush3.bf16.msra.mxu0 %v2104_v19  ;;  %v2106_v21 = vld [vmem:[%s2601_s9 + $0xb8] sm:$0xff]   ;;  %1964 = vmatprep.subr.bf16.mxu1 %v2105_v20  ;;  %v2109_v24 = vld [vmem:[%s2601_s9 + $0xf0] sm:$0xff]   ;;  %v2113_v28 = vld [vmem:[%s2601_s9 + $0xe8] sm:$0xff]   ;;  %s1702_s23 = scalar_lea.vmem (%p2285_p6), %s2727_s3, %s1932_s18 }
  0x81   : > { %1965 = vmatpush3.bf16.msra.mxu1 %v2106_v21  ;;  %1944 = vmatprep.subr.bf16.mxu0 %v2107_v22  ;;  %v2110_v25 = vld [vmem:[%s2601_s9 + $0xb0] sm:$0xff]   ;;  %v2114_v29 = vld [vmem:[%s2601_s9 + $0xa8] sm:$0xff]   ;;  %v2115_v30 = vld [vmem:[%s2601_s9 + $0x60] sm:$0xff]   ;;  %v2228_v22 = vmov 0.0  }
  0x82   : > { %1966 = vmatprep.subr.bf16.mxu1 %v2109_v24  ;;  %v2116_v31 = vld [vmem:[%s2601_s9 + $0x20] sm:$0xff]   ;;  %v2119_v34 = vld [vmem:[%s2601_s9 + $0x58] sm:$0xff]   ;;  %v2123_v38 = vld [vmem:[%s2601_s9 + $0x50] sm:$0xff]  }
  0x83   : > { %v2117_v32 = vld [vmem:[%s2601_s9 + $0xe0] sm:$0xff]   ;;  %v2120_v35 = vld [vmem:[%s2601_s9 + $0x18] sm:$0xff]   ;;  %v2124_v39 = vld [vmem:[%s2601_s9 + $0x10] sm:$0xff]  }
  0x84   : > { %1945 = vmatpush3.bf16.msra.mxu0 %v2108_v23  ;;  %v2118_v33 = vld [vmem:[%s2601_s9 + $0xa0] sm:$0xff]   ;;  %v2121_v36 = vld [vmem:[%s2601_s9 + $0xd8] sm:$0xff]   ;;  %v2125_v40 = vld [vmem:[%s2601_s9 + $0xd0] sm:$0xff]  }
  0x85   : > { %1967 = vmatpush3.bf16.msra.mxu1 %v2110_v25  ;;  %1946 = vmatprep.subr.bf16.mxu0 %v2111_v26  ;;  %v2122_v37 = vld [vmem:[%s2601_s9 + $0x98] sm:$0xff]   ;;  %v2126_v41 = vld [vmem:[%s2601_s9 + $0x90] sm:$0xff]   ;;  %v2127_v42 = vld [vmem:[%s2601_s9 + $0x48] sm:$0xff]  }
  0x86   : > { %1968 = vmatprep.subr.bf16.mxu1 %v2113_v28  ;;  %v2128_v43 = vld [vmem:[%s2601_s9 + $0x8] sm:$0xff]   ;;  %v2131_v46 = vld [vmem:[%s2601_s9 + $0x40] sm:$0xff]   ;;  %v2174_v49 = vld [vmem:[%s2724_s0 + $0x14] ss:$36 sps:$4 sm:$0xff]  }
  0x87   : > { %v2129_v44 = vld [vmem:[%s2601_s9 + $0xc8] sm:$0xff]   ;;  %v2134_v47 = vld [vmem:[%s2724_s0] ss:$36 sps:$4 sm:$0xff]   ;;  %v2138_v53 = vld [vmem:[%s2601_s9 + $0x178] sm:$0xff]  }
  0x88   : > { %1947 = vmatpush3.bf16.msra.mxu0 %v2112_v27  ;;  %v2130_v45 = vld [vmem:[%s2601_s9 + $0x88] sm:$0xff]   ;;  %v2132_v48 = vld [vmem:[%s2601_s9] sm:$0xff]   ;;  %v2142_v54 = vld [vmem:[%s2601_s9 + $0x138] sm:$0xff]  }
  0x89   : > { %1969 = vmatpush3.bf16.msra.mxu1 %v2114_v29  ;;  %1948 = vmatprep.subr.bf16.mxu0 %v2115_v30  ;;  %v2133_v50 = vld [vmem:[%s2601_s9 + $0xc0] sm:$0xff]   ;;  %v2139_v51 = vld [vmem:[%s2724_s0 + $0x8] ss:$36 sps:$4 sm:$0xff]   ;;  %v2143_v55 = vld [vmem:[%s2601_s9 + $0x1f8] sm:$0xff]  }
  0x8a   : > { %1970 = vmatprep.subr.bf16.mxu1 %v2117_v32  ;;  %v2137_v52 = vld [vmem:[%s2601_s9 + $0x80] sm:$0xff]   ;;  %v2144_v56 = vld [vmem:[%s2601_s9 + $0x1b8] sm:$0xff]   ;;  %v2145_v57 = vld [vmem:[%s2601_s9 + $0x170] sm:$0xff]  }
  0x8b   : > { %v2146_v58 = vld [vmem:[%s2601_s9 + $0x130] sm:$0xff]   ;;  %v2149_v61 = vld [vmem:[%s2601_s9 + $0x168] sm:$0xff]   ;;  %v2153_v1 = vld [vmem:[%s2601_s9 + $0x160] sm:$0xff]  }
  0x8c   : > { %1949 = vmatpush3.bf16.msra.mxu0 %v2116_v31  ;;  %v2147_v59 = vld [vmem:[%s2601_s9 + $0x1f0] sm:$0xff]   ;;  %v2150_v62 = vld [vmem:[%s2601_s9 + $0x128] sm:$0xff]   ;;  %v2154_v2 = vld [vmem:[%s2601_s9 + $0x120] sm:$0xff]  }
  0x8d   : > { %1971 = vmatpush3.bf16.msra.mxu1 %v2118_v33  ;;  %1950 = vmatprep.subr.bf16.mxu0 %v2119_v34  ;;  %v2148_v60 = vld [vmem:[%s2601_s9 + $0x1b0] sm:$0xff]   ;;  %v2151_v63 = vld [vmem:[%s2601_s9 + $0x1e8] sm:$0xff]   ;;  %v2155_v3 = vld [vmem:[%s2601_s9 + $0x1e0] sm:$0xff]  }
  0x8e   : > { %1972 = vmatprep.subr.bf16.mxu1 %v2121_v36  ;;  %v2152_v0 = vld [vmem:[%s2601_s9 + $0x1a8] sm:$0xff]   ;;  %v2156_v4 = vld [vmem:[%s2601_s9 + $0x1a0] sm:$0xff]   ;;  %v2157_v5 = vld [vmem:[%s2601_s9 + $0x158] sm:$0xff]  }
  0x8f   : > { %v2158_v6 = vld [vmem:[%s2601_s9 + $0x118] sm:$0xff]   ;;  %v2161_v9 = vld [vmem:[%s2601_s9 + $0x150] sm:$0xff]   ;;  %v2165_v13 = vld [vmem:[%s2601_s9 + $0x148] sm:$0xff]  }
  0x90   : > { %1951 = vmatpush3.bf16.msra.mxu0 %v2120_v35  ;;  %v2159_v7 = vld [vmem:[%s2601_s9 + $0x1d8] sm:$0xff]   ;;  %v2162_v10 = vld [vmem:[%s2601_s9 + $0x110] sm:$0xff]   ;;  %v2166_v14 = vld [vmem:[%s2601_s9 + $0x108] sm:$0xff]  }
  0x91   : > { %1973 = vmatpush3.bf16.msra.mxu1 %v2122_v37  ;;  %1952 = vmatprep.subr.bf16.mxu0 %v2123_v38  ;;  %v2160_v8 = vld [vmem:[%s2601_s9 + $0x198] sm:$0xff]   ;;  %v2163_v11 = vld [vmem:[%s2601_s9 + $0x1d0] sm:$0xff]   ;;  %v2167_v15 = vld [vmem:[%s2601_s9 + $0x1c8] sm:$0xff]  }
  0x92   : > { %1974 = vmatprep.subr.bf16.mxu1 %v2125_v40  ;;  %v2164_v12 = vld [vmem:[%s2601_s9 + $0x190] sm:$0xff]   ;;  %v2168_v16 = vld [vmem:[%s2601_s9 + $0x188] sm:$0xff]   ;;  %v2169_v17 = vld [vmem:[%s2601_s9 + $0x140] sm:$0xff]  }
  0x93   : > { %v2172_v18 = vld [vmem:[%s2724_s0 + $0x10] ss:$36 sps:$4 sm:$0xff]   ;;  %v2170_v19 = vld [vmem:[%s2601_s9 + $0x100] sm:$0xff]   ;;  %v2176_v23 = vld [vmem:[%s2724_s0 + $0x18] ss:$36 sps:$4 sm:$0xff]  }
  0x94   : > { %1953 = vmatpush3.bf16.msra.mxu0 %v2124_v39  ;;  %v2171_v20 = vld [vmem:[%s2601_s9 + $0x1c0] sm:$0xff]   ;;  %v2179_v25 = vld [vmem:[%s2601_s9 + $0x238] sm:$0xff]   ;;  %v2180_v26 = vld [vmem:[%s2601_s9 + $0x230] sm:$0xff]  }
  0x95   : > { %1975 = vmatpush3.bf16.msra.mxu1 %v2126_v41  ;;  %1954 = vmatprep.subr.bf16.mxu0 %v2127_v42  ;;  %v2175_v21 = vld [vmem:[%s2601_s9 + $0x180] sm:$0xff]   ;;  %v2181_v27 = vld [vmem:[%s2601_s9 + $0x228] sm:$0xff]   ;;  %v2183_v29 = vld [vmem:[%s2601_s9 + $0x218] sm:$0xff]  }
  0x96   : > { %1976 = vmatprep.subr.bf16.mxu1 %v2129_v44  ;;  %v2178_v24 = vld [vmem:[%s2724_s0 + $0x1c] ss:$36 sps:$4 sm:$0xff]   ;;  %v2184_v30 = vld [vmem:[%s2601_s9 + $0x210] sm:$0xff]   ;;  %v2185_v31 = vld [vmem:[%s2601_s9 + $0x208] sm:$0xff]  }
  0x97   : > { %v2182_v28 = vld [vmem:[%s2601_s9 + $0x220] sm:$0xff]  }
  0x98   : > { %1955 = vmatpush3.bf16.msra.mxu0 %v2128_v43  ;;  %v2186_v32 = vld [vmem:[%s2601_s9 + $0x200] sm:$0xff]   ;;  %s832_s9 = scalar_lea.vmem %s2726_s2, %s831_s6 }
  0x99   : > { %1977 = vmatpush3.bf16.msra.mxu1 %v2130_v45  ;;  %1956 = vmatprep.subr.bf16.mxu0 %v2131_v46  ;;  %v2187_v33 = vld [vmem:[%s2724_s0 + $0x20] ss:$36 sps:$4 sm:$0xff]  }
  0x9a   : > { %1978 = vmatprep.subr.bf16.mxu1 %v2133_v50  ;;  %v1847_v46 = vld [vmem:[%s832_s9] ss:$0 sm:$0xff] }
  0x9c   : > { %1957 = vmatpush3.bf16.msra.mxu0 %v2132_v48 }
  0x9d   : > { %1979 = vmatpush3.bf16.msra.mxu1 %v2137_v52  ;;  %1986 = vmatprep.subr.bf16.mxu0 %v2138_v53 }
  0x9e   : > { %2008 = vmatprep.subr.bf16.mxu1 %v2143_v55 }
  0x9f   : > { %1507 = vmatmul.mubr.bf16.vlgmr.msra.gmra.mxu0 %v2134_v47 }
  0xa0   : > { %1987 = vmatpush3.bf16.msra.mxu0 %v2142_v54  ;;  %1588 = vmatprep.mubr.bf16.mxu0 %v2174_v49 }
  0xa1   : > { %1548 = vmatmul.mubr.bf16.vlgmr.msra.gmra.mxu1 %v2139_v51  ;;  %1988 = vmatprep.subr.bf16.mxu0 %v2145_v57 }
  0xa2   : > { %2009 = vmatpush3.bf16.msra.mxu1 %v2144_v56  ;;  %1629 = vmatprep.mubr.bf16.mxu1 %v2178_v24 }
  0xa3   : > { %2010 = vmatprep.subr.bf16.mxu1 %v2147_v59 }
  0xa4   : > { %1989 = vmatpush3.bf16.msra.mxu0 %v2146_v58 }
  0xa5   : > { %1990 = vmatprep.subr.bf16.mxu0 %v2149_v61 }
  0xa6   : > { %2011 = vmatpush3.bf16.msra.mxu1 %v2148_v60 }
  0xa7   : > { %2012 = vmatprep.subr.bf16.mxu1 %v2151_v63 }
  0xa8   : > { %1991 = vmatpush3.bf16.msra.mxu0 %v2150_v62 }
  0xa9   : > { %1992 = vmatprep.subr.bf16.mxu0 %v2153_v1 }
  0xaa   : > { %2013 = vmatpush3.bf16.msra.mxu1 %v2152_v0 }
  0xab   : > { %2014 = vmatprep.subr.bf16.mxu1 %v2155_v3 }
  0xac   : > { %1993 = vmatpush3.bf16.msra.mxu0 %v2154_v2 }
  0xad   : > { %1994 = vmatprep.subr.bf16.mxu0 %v2157_v5 }
  0xae   : > { %2015 = vmatpush3.bf16.msra.mxu1 %v2156_v4 }
  0xaf   : > { %2016 = vmatprep.subr.bf16.mxu1 %v2159_v7 }
  0xb0   : > { %1995 = vmatpush3.bf16.msra.mxu0 %v2158_v6 }
  0xb1   : > { %1996 = vmatprep.subr.bf16.mxu0 %v2161_v9 }
  0xb2   : > { %2017 = vmatpush3.bf16.msra.mxu1 %v2160_v8 }
  0xb3   : > { %2018 = vmatprep.subr.bf16.mxu1 %v2163_v11 }
  0xb4   : > { %1997 = vmatpush3.bf16.msra.mxu0 %v2162_v10 }
  0xb5   : > { %1998 = vmatprep.subr.bf16.mxu0 %v2165_v13 }
  0xb6   : > { %2019 = vmatpush3.bf16.msra.mxu1 %v2164_v12 }
  0xb7   : > { %2020 = vmatprep.subr.bf16.mxu1 %v2167_v15 }
  0xb8   : > { %1999 = vmatpush3.bf16.msra.mxu0 %v2166_v14 }
  0xb9   : > { %2000 = vmatprep.subr.bf16.mxu0 %v2169_v17 }
  0xba   : > { %2021 = vmatpush3.bf16.msra.mxu1 %v2168_v16 }
  0xbb   : > { %2022 = vmatprep.subr.bf16.mxu1 %v2171_v20 }
  0xbc   : > { %2001 = vmatpush3.bf16.msra.mxu0 %v2170_v19 }
  0xbd   : > { %2039 = vmatprep.subr.bf16.mxu0 %v2228_v22 }
  0xbe   : > { %2023 = vmatpush3.bf16.msra.mxu1 %v2175_v21 }
  0xbf   : > { %1589 = vmatmul.mubr.bf16.vlgmr.msra.gmra.mxu0 %v2172_v18 }
  0xc0   : > { %2055 = vmatprep.mubr.msk.bf16.mxu0 %vm2229_vm0, %v2228_v22  ;;  %2040 = vmatpush3.bf16.msra.mxu0 %v2179_v25 }
  0xc1   : > { %1630 = vmatmul.mubr.bf16.vlgmr.msra.gmra.mxu1 %v2176_v23  ;;  %2041 = vmatprep.subr.bf16.mxu0 %v2228_v22 }
  0xc4   : > { %2042 = vmatpush3.bf16.msra.mxu0 %v2180_v26 }
  0xc5   : > { %2043 = vmatprep.subr.bf16.mxu0 %v2228_v22 }
  0xc8   : > { %2044 = vmatpush3.bf16.msra.mxu0 %v2181_v27 }
  0xc9   : > { %2045 = vmatprep.subr.bf16.mxu0 %v2228_v22 }
  0xcc   : > { %2046 = vmatpush3.bf16.msra.mxu0 %v2182_v28 }
  0xcd   : > { %2047 = vmatprep.subr.bf16.mxu0 %v2228_v22 }
  0xd0   : > { %2048 = vmatpush3.bf16.msra.mxu0 %v2183_v29 }
  0xd1   : > { %2049 = vmatprep.subr.bf16.mxu0 %v2228_v22 }
  0xd4   : > { %2050 = vmatpush3.bf16.msra.mxu0 %v2184_v30 }
  0xd5   : > { %2051 = vmatprep.subr.bf16.mxu0 %v2228_v22 }
  0xd8   : > { %2052 = vmatpush3.bf16.msra.mxu0 %v2185_v31 }
  0xd9   : > { %2053 = vmatprep.subr.bf16.mxu0 %v2228_v22 }
  0xdc   : > { %2054 = vmatpush3.bf16.msra.mxu0 %v2186_v32 }
  0xdf   : > { %2056 = vmatmul.mubr.bf16.vlgmr.msra.gmra.mxu0 %v2187_v33 }
 0x15f   : > { %v1958_v34 = vpop.f32.mrf.mxu0 }
 0x161   : > { %v1959_v35 = vpop.f32.mrf.mxu0  ;;  %v1980_v36 = vpop.f32.mrf.mxu1 }
 0x162   : > { %v1960_v45 = vadd.f32 %v1959_v35, %v1958_v34 }
 0x163   : > { %v1961_v37 = vpop.f32.mrf.mxu0  ;;  %v1981_v38 = vpop.f32.mrf.mxu1 }
 0x164   : > { %v1509_v50 = vadd.f32 %v1960_v45, %v1847_v46  ;;  %v1982_v51 = vadd.f32 %v1981_v38, %v1980_v36 }
 0x165   : > { %v1962_v39 = vpop.f32.mrf.mxu0  ;;  %v1983_v40 = vpop.f32.mrf.mxu1 }
 0x166   : > { %v1963_v49 = vadd.f32 %v1962_v39, %v1961_v37  ;;  %v1550_v57 = vadd.f32 %v1982_v51, %v1509_v50 }
 0x167   : > { %v1984_v42 = vpop.f32.mrf.mxu1 }
 0x168   : > { %v1512_v54 = vadd.f32 %v1963_v49, %v1847_v46  ;;  %v1985_v55 = vadd.f32 %v1984_v42, %v1983_v40 }
 0x16a   : > { %v1553_v60 = vadd.f32 %v1985_v55, %v1512_v54 }
 0x17f   : > { %v2002_v41 = vpop.f32.mrf.mxu0 }
 0x181   : > { %v2003_v43 = vpop.f32.mrf.mxu0  ;;  %v2024_v44 = vpop.f32.mrf.mxu1 }
 0x182   : > { %v2004_v56 = vadd.f32 %v2003_v43, %v2002_v41 }
 0x183   : > { %v2005_v47 = vpop.f32.mrf.mxu0  ;;  %v2025_v48 = vpop.f32.mrf.mxu1 }
 0x184   : > { %v1591_v61 = vadd.f32 %v2004_v56, %v1550_v57  ;;  %v2026_v62 = vadd.f32 %v2025_v48, %v2024_v44 }
 0x185   : > { %v2006_v52 = vpop.f32.mrf.mxu0  ;;  %v2027_v53 = vpop.f32.mrf.mxu1 }
 0x186   : > { %v2007_v58 = vadd.f32 %v2006_v52, %v2005_v47  ;;  %v1632_v2 = vadd.f32 %v2026_v62, %v1591_v61 }
 0x187   : > { %v2028_v59 = vpop.f32.mrf.mxu1 }
 0x188   : > { %v1594_v63 = vadd.f32 %v2007_v58, %v1553_v60  ;;  %v2029_v0 = vadd.f32 %v2028_v59, %v2027_v53 }
 0x18a   : > { %v1635_v5 = vadd.f32 %v2029_v0, %v1594_v63 }
 0x19f   : > { %v1672_v1 = vpop.f32.mrf.mxu0 }
 0x1a0   : > { %v1673_v4 = vadd.f32 %v1672_v1, %v1632_v2 }
 0x1a1   : > { %v2057_v3 = vpop.f32.mrf.mxu0 }
 0x1a2   : > { %v1679_v9 = vmax.f32 %v1673_v4, 0.0 }
 0x1a3   : > { %v1675_v6 = vpop.f32.mrf.mxu0 }
 0x1a4   : > { %v1676_v7 = vadd.f32 %v1675_v6, %v1635_v5 }
 0x1a5   : > { %v2058_v8 = vpop.f32.mrf.mxu0 }
 0x1a6   : > { %v1680_v10 = vmax.f32 %v1676_v7, 0.0  ;;  %1697 = sbr.rel (!%p2285_p6) target bundleno = 435 (0x1b3), region = 77 }
 0x1a8   : > { %v1940_v11 = vpack.c.bf16 %v1680_v10, %v1679_v9 }
 0x1aa   : > { %1941 = vst [vmem:[%s822_s11] sm:$0xff] %v1940_v11  }
 0x1b1   : > { %v1719_v12 = vld [vmem:[%s822_s11] sm:$0xf]  ;;  %v1721_v13 = vld [vmem:[%s822_s11 + $0x4] sm:$0xf] }
 0x1b2   : > { %1720 = vst [vmem:[%s1702_s23] sm:$0xf] %v1719_v12  ;;  %1722 = vst [vmem:[%s1702_s23 + $0x8] sm:$0xf] %v1721_v13 }
 0x1b3 PF: > { %s13_s16 = sadd.s32 1, %s2226_s16   ;;  %s2729_s12 = smov %s2214_s13 }
 0x1b4   : > { %p10_p12 = scmp.ge.s32.totalorder %s13_s16, 4   ;;  %s2730_s13 = smov %s2290_s22 }
 0x1b5   : > { %s2731_s14 = smov %s2222_s15  ;;  %s2732_s15 = smov %s2734_s17 }
 0x1b6   :  { %12 = sbr.rel (!%p10_p12) target bundleno = 3 (0x3), region = 155 }

// kernel: model_forward.26
= control target key start
LH: loop header
LB: loop body
LE: loop exit
PB: predicated region body
PF: predicated region fallthrough
CT: control target
= control target key end

     0   :  { %s3862_s12 = smov 0   ;;  %s3864_s13 = smov 0   ;;  %s4723_s0 = inlined_call_operand.vmem [shape: bf16[16,2304], index: 0, kind: input, shape index: {}]   ;;  %s4724_s1 = inlined_call_operand.vmem [shape: bf16[2304,256], index: 1, kind: input, shape index: {}]   ;;  %s4725_s2 = inlined_call_operand.vmem [shape: f32[1,256], index: 2, kind: input, shape index: {}]   ;;  %s4726_s3 = inlined_call_operand.vmem [shape: bf16[16,256], index: 3, kind: output, shape index: {}]  }
   0x1   :  { %s3866_s14 = smov 0   ;;  %s3868_s15 = smov 0  }
   0x2   :  { %s3870_s16 = smov 0  }
   0x3 LB: > { %s22_s17 = sadd.s32 1, %s3836_s15  ;;  %s3207_s18 = sadd.s32 4294967295, %s3840_s16   ;;  %s3840_s16 = sphi %s3870_s16, %s13_s16   ;;  %s3836_s15 = sphi %s3868_s15, %s4731_s15   ;;  %s3832_s14 = sphi %s3866_s14, %s4730_s14   ;;  %s3828_s13 = sphi %s3864_s13, %s4729_s13   ;;  %s3824_s12 = sphi %s3862_s12, %s4728_s12  }
   0x4   : > { %p23_p0 = scmp.ge.s32.totalorder %s22_s17, 2  ;;  %p65_p1 = scmp.ne.s32.totalorder %s3828_s13, %s3824_s12 }
   0x5   : > { %p66_p2 = scmp.eq.s32.totalorder %s3840_s16, 0  ;;  %p123_p4 = scmp.eq.s32.totalorder %s3207_s18, 1 }
   0x6   : > { %s4733_s17 = smov (%p23_p0, %s22_s17), 0  ;;  %s58_s20 = sadd.s32 1, %s3828_s13 }
   0x7   : > { %p67_p3 = por %p66_p2, %p65_p1  ;;  %s55_s19 = ssub.s32 %s3836_s15, %s4733_s17 }
   0x8   : > { %p56_p5 = scmp.eq.s32.totalorder %s55_s19, 0  ;;  %p3897_p6 = por %p123_p4, %p65_p1 }
   0x9   : > { %p3211_p7 = scmp.ge.s32.totalorder %s3840_s16, 2 }
   0xa   : > { %s3902_s22 = scalar_select %p56_p5, %s3828_s13, %s58_s20  }
   0xb   : > { %155 = sbr.rel (%p3211_p7) target bundleno = 212 (0xd4), region = 20 }
  0x10   : > { %158 = sbr.rel (!%p67_p3) target bundleno = 212 (0xd4), region = 24  ;;  %s160_s23 = sand.u32 (%p67_p3), 1, %s3828_s13  }
  0x11   : > { %s3212_s24 = sshll.u32 (%p67_p3), %s3836_s15, 2  ;;  %s3589_s25 = smul.u32 (%p67_p3), 1152, %s160_s23 }
  0x12   : > { %s3910_s28 = scalar_lea.vmem (%p67_p3), %s4724_s1, %s3212_s24 }
  0x13   : > { %v181_v0 = vld [vmem:[%s3910_s28] sm:$0xf] (%p67_p3)  ;;  %v183_v1 = vld [vmem:[%s3910_s28 + $0x8] sm:$0xf] (%p67_p3)  ;;  %v185_v2 = vld [vmem:[%s3910_s28 + $0x10] sm:$0xf] (%p67_p3) }
  0x14   : > { %v187_v3 = vld [vmem:[%s3910_s28 + $0x18] sm:$0xf] (%p67_p3)  ;;  %v189_v4 = vld [vmem:[%s3910_s28 + $0x20] sm:$0xf] (%p67_p3)  ;;  %s3917_s29 = scalar_lea.vmem (%p67_p3), [#allocation2], %s3589_s25 }
  0x15   : > { %182 = vst [vmem:[%s3917_s29] sm:$0xf] %v181_v0  ;;  %184 = vst [vmem:[%s3917_s29 + $0x4] sm:$0xf] %v183_v1  ;;  %v191_v5 = vld [vmem:[%s3910_s28 + $0x28] sm:$0xf] }
  0x16   : > { %186 = vst [vmem:[%s3917_s29 + $0x8] sm:$0xf] %v185_v2  ;;  %188 = vst [vmem:[%s3917_s29 + $0xc] sm:$0xf] %v187_v3  ;;  %v193_v6 = vld [vmem:[%s3910_s28 + $0x30] sm:$0xf] }
  0x17   : > { %190 = vst [vmem:[%s3917_s29 + $0x10] sm:$0xf] %v189_v4  ;;  %v195_v7 = vld [vmem:[%s3910_s28 + $0x38] sm:$0xf]  ;;  %192 = vst [vmem:[%s3917_s29 + $0x14] sm:$0xf] %v191_v5 }
  0x18   : > { %194 = vst [vmem:[%s3917_s29 + $0x18] sm:$0xf] %v193_v6  ;;  %196 = vst [vmem:[%s3917_s29 + $0x1c] sm:$0xf] %v195_v7  ;;  %v197_v8 = vld [vmem:[%s3910_s28 + $0x40] sm:$0xf] }
  0x19   : > { %v199_v9 = vld [vmem:[%s3910_s28 + $0x48] sm:$0xf]  ;;  %v201_v10 = vld [vmem:[%s3910_s28 + $0x50] sm:$0xf]  ;;  %198 = vst [vmem:[%s3917_s29 + $0x20] sm:$0xf] %v197_v8 }
  0x1a   : > { %200 = vst [vmem:[%s3917_s29 + $0x24] sm:$0xf] %v199_v9  ;;  %202 = vst [vmem:[%s3917_s29 + $0x28] sm:$0xf] %v201_v10  ;;  %v203_v11 = vld [vmem:[%s3910_s28 + $0x58] sm:$0xf] }
  0x1b   : > { %v205_v12 = vld [vmem:[%s3910_s28 + $0x60] sm:$0xf]  ;;  %v207_v13 = vld [vmem:[%s3910_s28 + $0x68] sm:$0xf]  ;;  %204 = vst [vmem:[%s3917_s29 + $0x2c] sm:$0xf] %v203_v11 }
  0x1c   : > { %206 = vst [vmem:[%s3917_s29 + $0x30] sm:$0xf] %v205_v12  ;;  %208 = vst [vmem:[%s3917_s29 + $0x34] sm:$0xf] %v207_v13  ;;  %v209_v14 = vld [vmem:[%s3910_s28 + $0x70] sm:$0xf] }
  0x1d   : > { %v211_v15 = vld [vmem:[%s3910_s28 + $0x78] sm:$0xf]  ;;  %v213_v16 = vld [vmem:[%s3910_s28 + $0x80] sm:$0xf]  ;;  %210 = vst [vmem:[%s3917_s29 + $0x38] sm:$0xf] %v209_v14 }
  0x1e   : > { %212 = vst [vmem:[%s3917_s29 + $0x3c] sm:$0xf] %v211_v15  ;;  %214 = vst [vmem:[%s3917_s29 + $0x40] sm:$0xf] %v213_v16  ;;  %v215_v17 = vld [vmem:[%s3910_s28 + $0x88] sm:$0xf] }
  0x1f   : > { %v217_v18 = vld [vmem:[%s3910_s28 + $0x90] sm:$0xf]  ;;  %v219_v19 = vld [vmem:[%s3910_s28 + $0x98] sm:$0xf]  ;;  %216 = vst [vmem:[%s3917_s29 + $0x44] sm:$0xf] %v215_v17 }
  0x20   : > { %218 = vst [vmem:[%s3917_s29 + $0x48] sm:$0xf] %v217_v18  ;;  %220 = vst [vmem:[%s3917_s29 + $0x4c] sm:$0xf] %v219_v19  ;;  %v221_v20 = vld [vmem:[%s3910_s28 + $0xa0] sm:$0xf] }
  0x21   : > { %v223_v21 = vld [vmem:[%s3910_s28 + $0xa8] sm:$0xf]  ;;  %v225_v22 = vld [vmem:[%s3910_s28 + $0xb0] sm:$0xf]  ;;  %222 = vst [vmem:[%s3917_s29 + $0x50] sm:$0xf] %v221_v20 }
  0x22   : > { %224 = vst [vmem:[%s3917_s29 + $0x54] sm:$0xf] %v223_v21  ;;  %226 = vst [vmem:[%s3917_s29 + $0x58] sm:$0xf] %v225_v22  ;;  %v227_v23 = vld [vmem:[%s3910_s28 + $0xb8] sm:$0xf] }
  0x23   : > { %v229_v24 = vld [vmem:[%s3910_s28 + $0xc0] sm:$0xf]  ;;  %v231_v25 = vld [vmem:[%s3910_s28 + $0xc8] sm:$0xf]  ;;  %228 = vst [vmem:[%s3917_s29 + $0x5c] sm:$0xf] %v227_v23 }
  0x24   : > { %230 = vst [vmem:[%s3917_s29 + $0x60] sm:$0xf] %v229_v24  ;;  %232 = vst [vmem:[%s3917_s29 + $0x64] sm:$0xf] %v231_v25  ;;  %v233_v26 = vld [vmem:[%s3910_s28 + $0xd0] sm:$0xf] }
  0x25   : > { %v235_v27 = vld [vmem:[%s3910_s28 + $0xd8] sm:$0xf]  ;;  %v237_v28 = vld [vmem:[%s3910_s28 + $0xe0] sm:$0xf]  ;;  %234 = vst [vmem:[%s3917_s29 + $0x68] sm:$0xf] %v233_v26 }
  0x26   : > { %236 = vst [vmem:[%s3917_s29 + $0x6c] sm:$0xf] %v235_v27  ;;  %238 = vst [vmem:[%s3917_s29 + $0x70] sm:$0xf] %v237_v28  ;;  %v239_v29 = vld [vmem:[%s3910_s28 + $0xe8] sm:$0xf] }
  0x27   : > { %v241_v30 = vld [vmem:[%s3910_s28 + $0xf0] sm:$0xf]  ;;  %v243_v31 = vld [vmem:[%s3910_s28 + $0xf8] sm:$0xf]  ;;  %240 = vst [vmem:[%s3917_s29 + $0x74] sm:$0xf] %v239_v29 }
  0x28   : > { %242 = vst [vmem:[%s3917_s29 + $0x78] sm:$0xf] %v241_v30  ;;  %244 = vst [vmem:[%s3917_s29 + $0x7c] sm:$0xf] %v243_v31  ;;  %v245_v32 = vld [vmem:[%s3910_s28 + $0x100] sm:$0xf] }
  0x29   : > { %v247_v33 = vld [vmem:[%s3910_s28 + $0x108] sm:$0xf]  ;;  %v249_v34 = vld [vmem:[%s3910_s28 + $0x110] sm:$0xf]  ;;  %246 = vst [vmem:[%s3917_s29 + $0x80] sm:$0xf] %v245_v32 }
  0x2a   : > { %248 = vst [vmem:[%s3917_s29 + $0x84] sm:$0xf] %v247_v33  ;;  %250 = vst [vmem:[%s3917_s29 + $0x88] sm:$0xf] %v249_v34  ;;  %v251_v35 = vld [vmem:[%s3910_s28 + $0x118] sm:$0xf] }
  0x2b   : > { %v253_v36 = vld [vmem:[%s3910_s28 + $0x120] sm:$0xf]  ;;  %v255_v37 = vld [vmem:[%s3910_s28 + $0x128] sm:$0xf]  ;;  %252 = vst [vmem:[%s3917_s29 + $0x8c] sm:$0xf] %v251_v35 }
  0x2c   : > { %254 = vst [vmem:[%s3917_s29 + $0x90] sm:$0xf] %v253_v36  ;;  %256 = vst [vmem:[%s3917_s29 + $0x94] sm:$0xf] %v255_v37  ;;  %v257_v38 = vld [vmem:[%s3910_s28 + $0x130] sm:$0xf] }
  0x2d   : > { %v259_v39 = vld [vmem:[%s3910_s28 + $0x138] sm:$0xf]  ;;  %v261_v40 = vld [vmem:[%s3910_s28 + $0x140] sm:$0xf]  ;;  %258 = vst [vmem:[%s3917_s29 + $0x98] sm:$0xf] %v257_v38 }
  0x2e   : > { %260 = vst [vmem:[%s3917_s29 + $0x9c] sm:$0xf] %v259_v39  ;;  %262 = vst [vmem:[%s3917_s29 + $0xa0] sm:$0xf] %v261_v40  ;;  %v263_v41 = vld [vmem:[%s3910_s28 + $0x148] sm:$0xf] }
  0x2f   : > { %v265_v42 = vld [vmem:[%s3910_s28 + $0x150] sm:$0xf]  ;;  %v267_v43 = vld [vmem:[%s3910_s28 + $0x158] sm:$0xf]  ;;  %264 = vst [vmem:[%s3917_s29 + $0xa4] sm:$0xf] %v263_v41 }
  0x30   : > { %266 = vst [vmem:[%s3917_s29 + $0xa8] sm:$0xf] %v265_v42  ;;  %268 = vst [vmem:[%s3917_s29 + $0xac] sm:$0xf] %v267_v43  ;;  %v269_v44 = vld [vmem:[%s3910_s28 + $0x160] sm:$0xf] }
  0x31   : > { %v271_v45 = vld [vmem:[%s3910_s28 + $0x168] sm:$0xf]  ;;  %v273_v46 = vld [vmem:[%s3910_s28 + $0x170] sm:$0xf]  ;;  %270 = vst [vmem:[%s3917_s29 + $0xb0] sm:$0xf] %v269_v44 }
  0x32   : > { %272 = vst [vmem:[%s3917_s29 + $0xb4] sm:$0xf] %v271_v45  ;;  %274 = vst [vmem:[%s3917_s29 + $0xb8] sm:$0xf] %v273_v46  ;;  %v275_v47 = vld [vmem:[%s3910_s28 + $0x178] sm:$0xf] }
  0x33   : > { %v277_v48 = vld [vmem:[%s3910_s28 + $0x180] sm:$0xf]  ;;  %v279_v49 = vld [vmem:[%s3910_s28 + $0x188] sm:$0xf]  ;;  %276 = vst [vmem:[%s3917_s29 + $0xbc] sm:$0xf] %v275_v47 }
  0x34   : > { %278 = vst [vmem:[%s3917_s29 + $0xc0] sm:$0xf] %v277_v48  ;;  %280 = vst [vmem:[%s3917_s29 + $0xc4] sm:$0xf] %v279_v49  ;;  %v281_v50 = vld [vmem:[%s3910_s28 + $0x190] sm:$0xf] }
  0x35   : > { %v283_v51 = vld [vmem:[%s3910_s28 + $0x198] sm:$0xf]  ;;  %v285_v52 = vld [vmem:[%s3910_s28 + $0x1a0] sm:$0xf]  ;;  %282 = vst [vmem:[%s3917_s29 + $0xc8] sm:$0xf] %v281_v50 }
  0x36   : > { %284 = vst [vmem:[%s3917_s29 + $0xcc] sm:$0xf] %v283_v51  ;;  %286 = vst [vmem:[%s3917_s29 + $0xd0] sm:$0xf] %v285_v52  ;;  %v287_v53 = vld [vmem:[%s3910_s28 + $0x1a8] sm:$0xf] }
  0x37   : > { %v289_v54 = vld [vmem:[%s3910_s28 + $0x1b0] sm:$0xf]  ;;  %v291_v55 = vld [vmem:[%s3910_s28 + $0x1b8] sm:$0xf]  ;;  %288 = vst [vmem:[%s3917_s29 + $0xd4] sm:$0xf] %v287_v53 }
  0x38   : > { %290 = vst [vmem:[%s3917_s29 + $0xd8] sm:$0xf] %v289_v54  ;;  %292 = vst [vmem:[%s3917_s29 + $0xdc] sm:$0xf] %v291_v55  ;;  %v293_v56 = vld [vmem:[%s3910_s28 + $0x1c0] sm:$0xf] }
  0x39   : > { %v295_v57 = vld [vmem:[%s3910_s28 + $0x1c8] sm:$0xf]  ;;  %v297_v58 = vld [vmem:[%s3910_s28 + $0x1d0] sm:$0xf]  ;;  %294 = vst [vmem:[%s3917_s29 + $0xe0] sm:$0xf] %v293_v56 }
  0x3a   : > { %296 = vst [vmem:[%s3917_s29 + $0xe4] sm:$0xf] %v295_v57  ;;  %298 = vst [vmem:[%s3917_s29 + $0xe8] sm:$0xf] %v297_v58  ;;  %v299_v59 = vld [vmem:[%s3910_s28 + $0x1d8] sm:$0xf] }
  0x3b   : > { %v301_v60 = vld [vmem:[%s3910_s28 + $0x1e0] sm:$0xf]  ;;  %v303_v61 = vld [vmem:[%s3910_s28 + $0x1e8] sm:$0xf]  ;;  %300 = vst [vmem:[%s3917_s29 + $0xec] sm:$0xf] %v299_v59 }
  0x3c   : > { %302 = vst [vmem:[%s3917_s29 + $0xf0] sm:$0xf] %v301_v60  ;;  %304 = vst [vmem:[%s3917_s29 + $0xf4] sm:$0xf] %v303_v61  ;;  %v305_v62 = vld [vmem:[%s3910_s28 + $0x1f0] sm:$0xf] }
  0x3d   : > { %v307_v63 = vld [vmem:[%s3910_s28 + $0x1f8] sm:$0xf]  ;;  %v309_v0 = vld [vmem:[%s3910_s28 + $0x200] sm:$0xf]  ;;  %306 = vst [vmem:[%s3917_s29 + $0xf8] sm:$0xf] %v305_v62 }
  0x3e   : > { %308 = vst [vmem:[%s3917_s29 + $0xfc] sm:$0xf] %v307_v63  ;;  %310 = vst [vmem:[%s3917_s29 + $0x100] sm:$0xf] %v309_v0  ;;  %v311_v1 = vld [vmem:[%s3910_s28 + $0x208] sm:$0xf] }
  0x3f   : > { %v313_v2 = vld [vmem:[%s3910_s28 + $0x210] sm:$0xf]  ;;  %v315_v3 = vld [vmem:[%s3910_s28 + $0x218] sm:$0xf]  ;;  %312 = vst [vmem:[%s3917_s29 + $0x104] sm:$0xf] %v311_v1 }
  0x40   : > { %314 = vst [vmem:[%s3917_s29 + $0x108] sm:$0xf] %v313_v2  ;;  %316 = vst [vmem:[%s3917_s29 + $0x10c] sm:$0xf] %v315_v3  ;;  %v317_v4 = vld [vmem:[%s3910_s28 + $0x220] sm:$0xf] }
  0x41   : > { %v319_v5 = vld [vmem:[%s3910_s28 + $0x228] sm:$0xf]  ;;  %v321_v6 = vld [vmem:[%s3910_s28 + $0x230] sm:$0xf]  ;;  %318 = vst [vmem:[%s3917_s29 + $0x110] sm:$0xf] %v317_v4 }
  0x42   : > { %320 = vst [vmem:[%s3917_s29 + $0x114] sm:$0xf] %v319_v5  ;;  %322 = vst [vmem:[%s3917_s29 + $0x118] sm:$0xf] %v321_v6  ;;  %v323_v7 = vld [vmem:[%s3910_s28 + $0x238] sm:$0xf] }
  0x43   : > { %v325_v8 = vld [vmem:[%s3910_s28 + $0x240] sm:$0xf]  ;;  %v327_v9 = vld [vmem:[%s3910_s28 + $0x248] sm:$0xf]  ;;  %324 = vst [vmem:[%s3917_s29 + $0x11c] sm:$0xf] %v323_v7 }
  0x44   : > { %326 = vst [vmem:[%s3917_s29 + $0x120] sm:$0xf] %v325_v8  ;;  %328 = vst [vmem:[%s3917_s29 + $0x124] sm:$0xf] %v327_v9  ;;  %v329_v10 = vld [vmem:[%s3910_s28 + $0x250] sm:$0xf] }
  0x45   : > { %v331_v11 = vld [vmem:[%s3910_s28 + $0x258] sm:$0xf]  ;;  %v333_v12 = vld [vmem:[%s3910_s28 + $0x260] sm:$0xf]  ;;  %330 = vst [vmem:[%s3917_s29 + $0x128] sm:$0xf] %v329_v10 }
  0x46   : > { %332 = vst [vmem:[%s3917_s29 + $0x12c] sm:$0xf] %v331_v11  ;;  %334 = vst [vmem:[%s3917_s29 + $0x130] sm:$0xf] %v333_v12  ;;  %v335_v13 = vld [vmem:[%s3910_s28 + $0x268] sm:$0xf] }
  0x47   : > { %v337_v14 = vld [vmem:[%s3910_s28 + $0x270] sm:$0xf]  ;;  %v339_v15 = vld [vmem:[%s3910_s28 + $0x278] sm:$0xf]  ;;  %336 = vst [vmem:[%s3917_s29 + $0x134] sm:$0xf] %v335_v13 }
  0x48   : > { %338 = vst [vmem:[%s3917_s29 + $0x138] sm:$0xf] %v337_v14  ;;  %340 = vst [vmem:[%s3917_s29 + $0x13c] sm:$0xf] %v339_v15  ;;  %v341_v16 = vld [vmem:[%s3910_s28 + $0x280] sm:$0xf] }
  0x49   : > { %v343_v17 = vld [vmem:[%s3910_s28 + $0x288] sm:$0xf]  ;;  %v345_v18 = vld [vmem:[%s3910_s28 + $0x290] sm:$0xf]  ;;  %342 = vst [vmem:[%s3917_s29 + $0x140] sm:$0xf] %v341_v16 }
  0x4a   : > { %344 = vst [vmem:[%s3917_s29 + $0x144] sm:$0xf] %v343_v17  ;;  %346 = vst [vmem:[%s3917_s29 + $0x148] sm:$0xf] %v345_v18  ;;  %v347_v19 = vld [vmem:[%s3910_s28 + $0x298] sm:$0xf] }
  0x4b   : > { %v349_v20 = vld [vmem:[%s3910_s28 + $0x2a0] sm:$0xf]  ;;  %v351_v21 = vld [vmem:[%s3910_s28 + $0x2a8] sm:$0xf]  ;;  %348 = vst [vmem:[%s3917_s29 + $0x14c] sm:$0xf] %v347_v19 }
  0x4c   : > { %350 = vst [vmem:[%s3917_s29 + $0x150] sm:$0xf] %v349_v20  ;;  %352 = vst [vmem:[%s3917_s29 + $0x154] sm:$0xf] %v351_v21  ;;  %v353_v22 = vld [vmem:[%s3910_s28 + $0x2b0] sm:$0xf] }
  0x4d   : > { %v355_v23 = vld [vmem:[%s3910_s28 + $0x2b8] sm:$0xf]  ;;  %v357_v24 = vld [vmem:[%s3910_s28 + $0x2c0] sm:$0xf]  ;;  %354 = vst [vmem:[%s3917_s29 + $0x158] sm:$0xf] %v353_v22 }
  0x4e   : > { %356 = vst [vmem:[%s3917_s29 + $0x15c] sm:$0xf] %v355_v23  ;;  %358 = vst [vmem:[%s3917_s29 + $0x160] sm:$0xf] %v357_v24  ;;  %v359_v25 = vld [vmem:[%s3910_s28 + $0x2c8] sm:$0xf] }
  0x4f   : > { %v361_v26 = vld [vmem:[%s3910_s28 + $0x2d0] sm:$0xf]  ;;  %v363_v27 = vld [vmem:[%s3910_s28 + $0x2d8] sm:$0xf]  ;;  %360 = vst [vmem:[%s3917_s29 + $0x164] sm:$0xf] %v359_v25 }
  0x50   : > { %362 = vst [vmem:[%s3917_s29 + $0x168] sm:$0xf] %v361_v26  ;;  %364 = vst [vmem:[%s3917_s29 + $0x16c] sm:$0xf] %v363_v27  ;;  %v365_v28 = vld [vmem:[%s3910_s28 + $0x2e0] sm:$0xf] }
  0x51   : > { %v367_v29 = vld [vmem:[%s3910_s28 + $0x2e8] sm:$0xf]  ;;  %v369_v30 = vld [vmem:[%s3910_s28 + $0x2f0] sm:$0xf]  ;;  %366 = vst [vmem:[%s3917_s29 + $0x170] sm:$0xf] %v365_v28 }
  0x52   : > { %368 = vst [vmem:[%s3917_s29 + $0x174] sm:$0xf] %v367_v29  ;;  %370 = vst [vmem:[%s3917_s29 + $0x178] sm:$0xf] %v369_v30  ;;  %v371_v31 = vld [vmem:[%s3910_s28 + $0x2f8] sm:$0xf] }
  0x53   : > { %v373_v32 = vld [vmem:[%s3910_s28 + $0x300] sm:$0xf]  ;;  %v375_v33 = vld [vmem:[%s3910_s28 + $0x308] sm:$0xf]  ;;  %372 = vst [vmem:[%s3917_s29 + $0x17c] sm:$0xf] %v371_v31 }
  0x54   : > { %374 = vst [vmem:[%s3917_s29 + $0x180] sm:$0xf] %v373_v32  ;;  %376 = vst [vmem:[%s3917_s29 + $0x184] sm:$0xf] %v375_v33  ;;  %v377_v34 = vld [vmem:[%s3910_s28 + $0x310] sm:$0xf] }
  0x55   : > { %v379_v35 = vld [vmem:[%s3910_s28 + $0x318] sm:$0xf]  ;;  %v381_v36 = vld [vmem:[%s3910_s28 + $0x320] sm:$0xf]  ;;  %378 = vst [vmem:[%s3917_s29 + $0x188] sm:$0xf] %v377_v34 }
  0x56   : > { %380 = vst [vmem:[%s3917_s29 + $0x18c] sm:$0xf] %v379_v35  ;;  %382 = vst [vmem:[%s3917_s29 + $0x190] sm:$0xf] %v381_v36  ;;  %v383_v37 = vld [vmem:[%s3910_s28 + $0x328] sm:$0xf] }
  0x57   : > { %v385_v38 = vld [vmem:[%s3910_s28 + $0x330] sm:$0xf]  ;;  %v387_v39 = vld [vmem:[%s3910_s28 + $0x338] sm:$0xf]  ;;  %384 = vst [vmem:[%s3917_s29 + $0x194] sm:$0xf] %v383_v37 }
  0x58   : > { %386 = vst [vmem:[%s3917_s29 + $0x198] sm:$0xf] %v385_v38  ;;  %388 = vst [vmem:[%s3917_s29 + $0x19c] sm:$0xf] %v387_v39  ;;  %v389_v40 = vld [vmem:[%s3910_s28 + $0x340] sm:$0xf] }
  0x59   : > { %v391_v41 = vld [vmem:[%s3910_s28 + $0x348] sm:$0xf]  ;;  %v393_v42 = vld [vmem:[%s3910_s28 + $0x350] sm:$0xf]  ;;  %390 = vst [vmem:[%s3917_s29 + $0x1a0] sm:$0xf] %v389_v40 }
  0x5a   : > { %392 = vst [vmem:[%s3917_s29 + $0x1a4] sm:$0xf] %v391_v41  ;;  %394 = vst [vmem:[%s3917_s29 + $0x1a8] sm:$0xf] %v393_v42  ;;  %v395_v43 = vld [vmem:[%s3910_s28 + $0x358] sm:$0xf] }
  0x5b   : > { %v397_v44 = vld [vmem:[%s3910_s28 + $0x360] sm:$0xf]  ;;  %v399_v45 = vld [vmem:[%s3910_s28 + $0x368] sm:$0xf]  ;;  %396 = vst [vmem:[%s3917_s29 + $0x1ac] sm:$0xf] %v395_v43 }
  0x5c   : > { %398 = vst [vmem:[%s3917_s29 + $0x1b0] sm:$0xf] %v397_v44  ;;  %400 = vst [vmem:[%s3917_s29 + $0x1b4] sm:$0xf] %v399_v45  ;;  %v401_v46 = vld [vmem:[%s3910_s28 + $0x370] sm:$0xf] }
  0x5d   : > { %v403_v47 = vld [vmem:[%s3910_s28 + $0x378] sm:$0xf]  ;;  %v405_v48 = vld [vmem:[%s3910_s28 + $0x380] sm:$0xf]  ;;  %402 = vst [vmem:[%s3917_s29 + $0x1b8] sm:$0xf] %v401_v46 }
  0x5e   : > { %404 = vst [vmem:[%s3917_s29 + $0x1bc] sm:$0xf] %v403_v47  ;;  %406 = vst [vmem:[%s3917_s29 + $0x1c0] sm:$0xf] %v405_v48  ;;  %v407_v49 = vld [vmem:[%s3910_s28 + $0x388] sm:$0xf] }
  0x5f   : > { %v409_v50 = vld [vmem:[%s3910_s28 + $0x390] sm:$0xf]  ;;  %v411_v51 = vld [vmem:[%s3910_s28 + $0x398] sm:$0xf]  ;;  %408 = vst [vmem:[%s3917_s29 + $0x1c4] sm:$0xf] %v407_v49 }
  0x60   : > { %410 = vst [vmem:[%s3917_s29 + $0x1c8] sm:$0xf] %v409_v50  ;;  %412 = vst [vmem:[%s3917_s29 + $0x1cc] sm:$0xf] %v411_v51  ;;  %v413_v52 = vld [vmem:[%s3910_s28 + $0x3a0] sm:$0xf] }
  0x61   : > { %v415_v53 = vld [vmem:[%s3910_s28 + $0x3a8] sm:$0xf]  ;;  %v417_v54 = vld [vmem:[%s3910_s28 + $0x3b0] sm:$0xf]  ;;  %414 = vst [vmem:[%s3917_s29 + $0x1d0] sm:$0xf] %v413_v52 }
  0x62   : > { %416 = vst [vmem:[%s3917_s29 + $0x1d4] sm:$0xf] %v415_v53  ;;  %418 = vst [vmem:[%s3917_s29 + $0x1d8] sm:$0xf] %v417_v54  ;;  %v419_v55 = vld [vmem:[%s3910_s28 + $0x3b8] sm:$0xf] }
  0x63   : > { %v421_v56 = vld [vmem:[%s3910_s28 + $0x3c0] sm:$0xf]  ;;  %v423_v57 = vld [vmem:[%s3910_s28 + $0x3c8] sm:$0xf]  ;;  %420 = vst [vmem:[%s3917_s29 + $0x1dc] sm:$0xf] %v419_v55 }
  0x64   : > { %422 = vst [vmem:[%s3917_s29 + $0x1e0] sm:$0xf] %v421_v56  ;;  %424 = vst [vmem:[%s3917_s29 + $0x1e4] sm:$0xf] %v423_v57  ;;  %v425_v58 = vld [vmem:[%s3910_s28 + $0x3d0] sm:$0xf] }
  0x65   : > { %v427_v59 = vld [vmem:[%s3910_s28 + $0x3d8] sm:$0xf]  ;;  %v429_v60 = vld [vmem:[%s3910_s28 + $0x3e0] sm:$0xf]  ;;  %426 = vst [vmem:[%s3917_s29 + $0x1e8] sm:$0xf] %v425_v58 }
  0x66   : > { %428 = vst [vmem:[%s3917_s29 + $0x1ec] sm:$0xf] %v427_v59  ;;  %430 = vst [vmem:[%s3917_s29 + $0x1f0] sm:$0xf] %v429_v60  ;;  %v431_v61 = vld [vmem:[%s3910_s28 + $0x3e8] sm:$0xf] }
  0x67   : > { %v433_v62 = vld [vmem:[%s3910_s28 + $0x3f0] sm:$0xf]  ;;  %v435_v63 = vld [vmem:[%s3910_s28 + $0x3f8] sm:$0xf]  ;;  %432 = vst [vmem:[%s3917_s29 + $0x1f4] sm:$0xf] %v431_v61 }
  0x68   : > { %434 = vst [vmem:[%s3917_s29 + $0x1f8] sm:$0xf] %v433_v62  ;;  %436 = vst [vmem:[%s3917_s29 + $0x1fc] sm:$0xf] %v435_v63  ;;  %v437_v0 = vld [vmem:[%s3910_s28 + $0x400] sm:$0xf] }
  0x69   : > { %v439_v1 = vld [vmem:[%s3910_s28 + $0x408] sm:$0xf]  ;;  %v441_v2 = vld [vmem:[%s3910_s28 + $0x410] sm:$0xf]  ;;  %438 = vst [vmem:[%s3917_s29 + $0x200] sm:$0xf] %v437_v0 }
  0x6a   : > { %440 = vst [vmem:[%s3917_s29 + $0x204] sm:$0xf] %v439_v1  ;;  %442 = vst [vmem:[%s3917_s29 + $0x208] sm:$0xf] %v441_v2  ;;  %v443_v3 = vld [vmem:[%s3910_s28 + $0x418] sm:$0xf] }
  0x6b   : > { %v445_v4 = vld [vmem:[%s3910_s28 + $0x420] sm:$0xf]  ;;  %v447_v5 = vld [vmem:[%s3910_s28 + $0x428] sm:$0xf]  ;;  %444 = vst [vmem:[%s3917_s29 + $0x20c] sm:$0xf] %v443_v3 }
  0x6c   : > { %446 = vst [vmem:[%s3917_s29 + $0x210] sm:$0xf] %v445_v4  ;;  %448 = vst [vmem:[%s3917_s29 + $0x214] sm:$0xf] %v447_v5  ;;  %v449_v6 = vld [vmem:[%s3910_s28 + $0x430] sm:$0xf] }
  0x6d   : > { %v451_v7 = vld [vmem:[%s3910_s28 + $0x438] sm:$0xf]  ;;  %v453_v8 = vld [vmem:[%s3910_s28 + $0x440] sm:$0xf]  ;;  %450 = vst [vmem:[%s3917_s29 + $0x218] sm:$0xf] %v449_v6 }
  0x6e   : > { %452 = vst [vmem:[%s3917_s29 + $0x21c] sm:$0xf] %v451_v7  ;;  %454 = vst [vmem:[%s3917_s29 + $0x220] sm:$0xf] %v453_v8  ;;  %v455_v9 = vld [vmem:[%s3910_s28 + $0x448] sm:$0xf] }
  0x6f   : > { %v457_v10 = vld [vmem:[%s3910_s28 + $0x450] sm:$0xf]  ;;  %v459_v11 = vld [vmem:[%s3910_s28 + $0x458] sm:$0xf]  ;;  %456 = vst [vmem:[%s3917_s29 + $0x224] sm:$0xf] %v455_v9 }
  0x70   : > { %458 = vst [vmem:[%s3917_s29 + $0x228] sm:$0xf] %v457_v10  ;;  %460 = vst [vmem:[%s3917_s29 + $0x22c] sm:$0xf] %v459_v11  ;;  %v461_v12 = vld [vmem:[%s3910_s28 + $0x460] sm:$0xf] }
  0x71   : > { %v463_v13 = vld [vmem:[%s3910_s28 + $0x468] sm:$0xf]  ;;  %v465_v14 = vld [vmem:[%s3910_s28 + $0x470] sm:$0xf]  ;;  %462 = vst [vmem:[%s3917_s29 + $0x230] sm:$0xf] %v461_v12 }
  0x72   : > { %464 = vst [vmem:[%s3917_s29 + $0x234] sm:$0xf] %v463_v13  ;;  %466 = vst [vmem:[%s3917_s29 + $0x238] sm:$0xf] %v465_v14  ;;  %v467_v15 = vld [vmem:[%s3910_s28 + $0x478] sm:$0xf] }
  0x73   : > { %v469_v16 = vld [vmem:[%s3910_s28 + $0x480] sm:$0xf]  ;;  %v471_v17 = vld [vmem:[%s3910_s28 + $0x488] sm:$0xf]  ;;  %468 = vst [vmem:[%s3917_s29 + $0x23c] sm:$0xf] %v467_v15 }
  0x74   : > { %470 = vst [vmem:[%s3917_s29 + $0x240] sm:$0xf] %v469_v16  ;;  %472 = vst [vmem:[%s3917_s29 + $0x244] sm:$0xf] %v471_v17  ;;  %v473_v18 = vld [vmem:[%s3910_s28 + $0x490] sm:$0xf] }
  0x75   : > { %v475_v19 = vld [vmem:[%s3910_s28 + $0x498] sm:$0xf]  ;;  %v477_v20 = vld [vmem:[%s3910_s28 + $0x4a0] sm:$0xf]  ;;  %474 = vst [vmem:[%s3917_s29 + $0x248] sm:$0xf] %v473_v18 }
  0x76   : > { %476 = vst [vmem:[%s3917_s29 + $0x24c] sm:$0xf] %v475_v19  ;;  %478 = vst [vmem:[%s3917_s29 + $0x250] sm:$0xf] %v477_v20  ;;  %v479_v21 = vld [vmem:[%s3910_s28 + $0x4a8] sm:$0xf] }
  0x77   : > { %v481_v22 = vld [vmem:[%s3910_s28 + $0x4b0] sm:$0xf]  ;;  %v483_v23 = vld [vmem:[%s3910_s28 + $0x4b8] sm:$0xf]  ;;  %480 = vst [vmem:[%s3917_s29 + $0x254] sm:$0xf] %v479_v21 }
  0x78   : > { %482 = vst [vmem:[%s3917_s29 + $0x258] sm:$0xf] %v481_v22  ;;  %484 = vst [vmem:[%s3917_s29 + $0x25c] sm:$0xf] %v483_v23  ;;  %v485_v24 = vld [vmem:[%s3910_s28 + $0x4c0] sm:$0xf] }
  0x79   : > { %v487_v25 = vld [vmem:[%s3910_s28 + $0x4c8] sm:$0xf]  ;;  %v489_v26 = vld [vmem:[%s3910_s28 + $0x4d0] sm:$0xf]  ;;  %486 = vst [vmem:[%s3917_s29 + $0x260] sm:$0xf] %v485_v24 }
  0x7a   : > { %488 = vst [vmem:[%s3917_s29 + $0x264] sm:$0xf] %v487_v25  ;;  %490 = vst [vmem:[%s3917_s29 + $0x268] sm:$0xf] %v489_v26  ;;  %v491_v27 = vld [vmem:[%s3910_s28 + $0x4d8] sm:$0xf] }
  0x7b   : > { %v493_v28 = vld [vmem:[%s3910_s28 + $0x4e0] sm:$0xf]  ;;  %v495_v29 = vld [vmem:[%s3910_s28 + $0x4e8] sm:$0xf]  ;;  %492 = vst [vmem:[%s3917_s29 + $0x26c] sm:$0xf] %v491_v27 }
  0x7c   : > { %494 = vst [vmem:[%s3917_s29 + $0x270] sm:$0xf] %v493_v28  ;;  %496 = vst [vmem:[%s3917_s29 + $0x274] sm:$0xf] %v495_v29  ;;  %v497_v30 = vld [vmem:[%s3910_s28 + $0x4f0] sm:$0xf] }
  0x7d   : > { %v499_v31 = vld [vmem:[%s3910_s28 + $0x4f8] sm:$0xf]  ;;  %v501_v32 = vld [vmem:[%s3910_s28 + $0x500] sm:$0xf]  ;;  %498 = vst [vmem:[%s3917_s29 + $0x278] sm:$0xf] %v497_v30 }
  0x7e   : > { %500 = vst [vmem:[%s3917_s29 + $0x27c] sm:$0xf] %v499_v31  ;;  %502 = vst [vmem:[%s3917_s29 + $0x280] sm:$0xf] %v501_v32  ;;  %v503_v33 = vld [vmem:[%s3910_s28 + $0x508] sm:$0xf] }
  0x7f   : > { %v505_v34 = vld [vmem:[%s3910_s28 + $0x510] sm:$0xf]  ;;  %v507_v35 = vld [vmem:[%s3910_s28 + $0x518] sm:$0xf]  ;;  %504 = vst [vmem:[%s3917_s29 + $0x284] sm:$0xf] %v503_v33 }
  0x80   : > { %506 = vst [vmem:[%s3917_s29 + $0x288] sm:$0xf] %v505_v34  ;;  %508 = vst [vmem:[%s3917_s29 + $0x28c] sm:$0xf] %v507_v35  ;;  %v509_v36 = vld [vmem:[%s3910_s28 + $0x520] sm:$0xf] }
  0x81   : > { %v511_v37 = vld [vmem:[%s3910_s28 + $0x528] sm:$0xf]  ;;  %v513_v38 = vld [vmem:[%s3910_s28 + $0x530] sm:$0xf]  ;;  %510 = vst [vmem:[%s3917_s29 + $0x290] sm:$0xf] %v509_v36 }
  0x82   : > { %512 = vst [vmem:[%s3917_s29 + $0x294] sm:$0xf] %v511_v37  ;;  %514 = vst [vmem:[%s3917_s29 + $0x298] sm:$0xf] %v513_v38  ;;  %v515_v39 = vld [vmem:[%s3910_s28 + $0x538] sm:$0xf] }
  0x83   : > { %v517_v40 = vld [vmem:[%s3910_s28 + $0x540] sm:$0xf]  ;;  %v519_v41 = vld [vmem:[%s3910_s28 + $0x548] sm:$0xf]  ;;  %516 = vst [vmem:[%s3917_s29 + $0x29c] sm:$0xf] %v515_v39 }
  0x84   : > { %518 = vst [vmem:[%s3917_s29 + $0x2a0] sm:$0xf] %v517_v40  ;;  %520 = vst [vmem:[%s3917_s29 + $0x2a4] sm:$0xf] %v519_v41  ;;  %v521_v42 = vld [vmem:[%s3910_s28 + $0x550] sm:$0xf] }
  0x85   : > { %v523_v43 = vld [vmem:[%s3910_s28 + $0x558] sm:$0xf]  ;;  %v525_v44 = vld [vmem:[%s3910_s28 + $0x560] sm:$0xf]  ;;  %522 = vst [vmem:[%s3917_s29 + $0x2a8] sm:$0xf] %v521_v42 }
  0x86   : > { %524 = vst [vmem:[%s3917_s29 + $0x2ac] sm:$0xf] %v523_v43  ;;  %526 = vst [vmem:[%s3917_s29 + $0x2b0] sm:$0xf] %v525_v44  ;;  %v527_v45 = vld [vmem:[%s3910_s28 + $0x568] sm:$0xf] }
  0x87   : > { %v529_v46 = vld [vmem:[%s3910_s28 + $0x570] sm:$0xf]  ;;  %v531_v47 = vld [vmem:[%s3910_s28 + $0x578] sm:$0xf]  ;;  %528 = vst [vmem:[%s3917_s29 + $0x2b4] sm:$0xf] %v527_v45 }
  0x88   : > { %530 = vst [vmem:[%s3917_s29 + $0x2b8] sm:$0xf] %v529_v46  ;;  %532 = vst [vmem:[%s3917_s29 + $0x2bc] sm:$0xf] %v531_v47  ;;  %v533_v48 = vld [vmem:[%s3910_s28 + $0x580] sm:$0xf] }
  0x89   : > { %v535_v49 = vld [vmem:[%s3910_s28 + $0x588] sm:$0xf]  ;;  %v537_v50 = vld [vmem:[%s3910_s28 + $0x590] sm:$0xf]  ;;  %534 = vst [vmem:[%s3917_s29 + $0x2c0] sm:$0xf] %v533_v48 }
  0x8a   : > { %536 = vst [vmem:[%s3917_s29 + $0x2c4] sm:$0xf] %v535_v49  ;;  %538 = vst [vmem:[%s3917_s29 + $0x2c8] sm:$0xf] %v537_v50  ;;  %v539_v51 = vld [vmem:[%s3910_s28 + $0x598] sm:$0xf] }
  0x8b   : > { %v541_v52 = vld [vmem:[%s3910_s28 + $0x5a0] sm:$0xf]  ;;  %v543_v53 = vld [vmem:[%s3910_s28 + $0x5a8] sm:$0xf]  ;;  %540 = vst [vmem:[%s3917_s29 + $0x2cc] sm:$0xf] %v539_v51 }
  0x8c   : > { %542 = vst [vmem:[%s3917_s29 + $0x2d0] sm:$0xf] %v541_v52  ;;  %544 = vst [vmem:[%s3917_s29 + $0x2d4] sm:$0xf] %v543_v53  ;;  %v545_v54 = vld [vmem:[%s3910_s28 + $0x5b0] sm:$0xf] }
  0x8d   : > { %v547_v55 = vld [vmem:[%s3910_s28 + $0x5b8] sm:$0xf]  ;;  %v549_v56 = vld [vmem:[%s3910_s28 + $0x5c0] sm:$0xf]  ;;  %546 = vst [vmem:[%s3917_s29 + $0x2d8] sm:$0xf] %v545_v54 }
  0x8e   : > { %548 = vst [vmem:[%s3917_s29 + $0x2dc] sm:$0xf] %v547_v55  ;;  %550 = vst [vmem:[%s3917_s29 + $0x2e0] sm:$0xf] %v549_v56  ;;  %v551_v57 = vld [vmem:[%s3910_s28 + $0x5c8] sm:$0xf] }
  0x8f   : > { %v553_v58 = vld [vmem:[%s3910_s28 + $0x5d0] sm:$0xf]  ;;  %v555_v59 = vld [vmem:[%s3910_s28 + $0x5d8] sm:$0xf]  ;;  %552 = vst [vmem:[%s3917_s29 + $0x2e4] sm:$0xf] %v551_v57 }
  0x90   : > { %554 = vst [vmem:[%s3917_s29 + $0x2e8] sm:$0xf] %v553_v58  ;;  %556 = vst [vmem:[%s3917_s29 + $0x2ec] sm:$0xf] %v555_v59  ;;  %v557_v60 = vld [vmem:[%s3910_s28 + $0x5e0] sm:$0xf] }
  0x91   : > { %v559_v61 = vld [vmem:[%s3910_s28 + $0x5e8] sm:$0xf]  ;;  %v561_v62 = vld [vmem:[%s3910_s28 + $0x5f0] sm:$0xf]  ;;  %558 = vst [vmem:[%s3917_s29 + $0x2f0] sm:$0xf] %v557_v60 }
  0x92   : > { %560 = vst [vmem:[%s3917_s29 + $0x2f4] sm:$0xf] %v559_v61  ;;  %562 = vst [vmem:[%s3917_s29 + $0x2f8] sm:$0xf] %v561_v62  ;;  %v563_v63 = vld [vmem:[%s3910_s28 + $0x5f8] sm:$0xf] }
  0x93   : > { %v565_v0 = vld [vmem:[%s3910_s28 + $0x600] sm:$0xf]  ;;  %v567_v1 = vld [vmem:[%s3910_s28 + $0x608] sm:$0xf]  ;;  %564 = vst [vmem:[%s3917_s29 + $0x2fc] sm:$0xf] %v563_v63 }
  0x94   : > { %566 = vst [vmem:[%s3917_s29 + $0x300] sm:$0xf] %v565_v0  ;;  %568 = vst [vmem:[%s3917_s29 + $0x304] sm:$0xf] %v567_v1  ;;  %v569_v2 = vld [vmem:[%s3910_s28 + $0x610] sm:$0xf] }
  0x95   : > { %v571_v3 = vld [vmem:[%s3910_s28 + $0x618] sm:$0xf]  ;;  %v573_v4 = vld [vmem:[%s3910_s28 + $0x620] sm:$0xf]  ;;  %570 = vst [vmem:[%s3917_s29 + $0x308] sm:$0xf] %v569_v2 }
  0x96   : > { %572 = vst [vmem:[%s3917_s29 + $0x30c] sm:$0xf] %v571_v3  ;;  %574 = vst [vmem:[%s3917_s29 + $0x310] sm:$0xf] %v573_v4  ;;  %v575_v5 = vld [vmem:[%s3910_s28 + $0x628] sm:$0xf] }
  0x97   : > { %v577_v6 = vld [vmem:[%s3910_s28 + $0x630] sm:$0xf]  ;;  %v579_v7 = vld [vmem:[%s3910_s28 + $0x638] sm:$0xf]  ;;  %576 = vst [vmem:[%s3917_s29 + $0x314] sm:$0xf] %v575_v5 }
  0x98   : > { %578 = vst [vmem:[%s3917_s29 + $0x318] sm:$0xf] %v577_v6  ;;  %580 = vst [vmem:[%s3917_s29 + $0x31c] sm:$0xf] %v579_v7  ;;  %v581_v8 = vld [vmem:[%s3910_s28 + $0x640] sm:$0xf] }
  0x99   : > { %v583_v9 = vld [vmem:[%s3910_s28 + $0x648] sm:$0xf]  ;;  %v585_v10 = vld [vmem:[%s3910_s28 + $0x650] sm:$0xf]  ;;  %582 = vst [vmem:[%s3917_s29 + $0x320] sm:$0xf] %v581_v8 }
  0x9a   : > { %584 = vst [vmem:[%s3917_s29 + $0x324] sm:$0xf] %v583_v9  ;;  %586 = vst [vmem:[%s3917_s29 + $0x328] sm:$0xf] %v585_v10  ;;  %v587_v11 = vld [vmem:[%s3910_s28 + $0x658] sm:$0xf] }
  0x9b   : > { %v589_v12 = vld [vmem:[%s3910_s28 + $0x660] sm:$0xf]  ;;  %v591_v13 = vld [vmem:[%s3910_s28 + $0x668] sm:$0xf]  ;;  %588 = vst [vmem:[%s3917_s29 + $0x32c] sm:$0xf] %v587_v11 }
  0x9c   : > { %590 = vst [vmem:[%s3917_s29 + $0x330] sm:$0xf] %v589_v12  ;;  %592 = vst [vmem:[%s3917_s29 + $0x334] sm:$0xf] %v591_v13  ;;  %v593_v14 = vld [vmem:[%s3910_s28 + $0x670] sm:$0xf] }
  0x9d   : > { %v595_v15 = vld [vmem:[%s3910_s28 + $0x678] sm:$0xf]  ;;  %v597_v16 = vld [vmem:[%s3910_s28 + $0x680] sm:$0xf]  ;;  %594 = vst [vmem:[%s3917_s29 + $0x338] sm:$0xf] %v593_v14 }
  0x9e   : > { %596 = vst [vmem:[%s3917_s29 + $0x33c] sm:$0xf] %v595_v15  ;;  %598 = vst [vmem:[%s3917_s29 + $0x340] sm:$0xf] %v597_v16  ;;  %v599_v17 = vld [vmem:[%s3910_s28 + $0x688] sm:$0xf] }
  0x9f   : > { %v601_v18 = vld [vmem:[%s3910_s28 + $0x690] sm:$0xf]  ;;  %v603_v19 = vld [vmem:[%s3910_s28 + $0x698] sm:$0xf]  ;;  %600 = vst [vmem:[%s3917_s29 + $0x344] sm:$0xf] %v599_v17 }
  0xa0   : > { %602 = vst [vmem:[%s3917_s29 + $0x348] sm:$0xf] %v601_v18  ;;  %604 = vst [vmem:[%s3917_s29 + $0x34c] sm:$0xf] %v603_v19  ;;  %v605_v20 = vld [vmem:[%s3910_s28 + $0x6a0] sm:$0xf] }
  0xa1   : > { %v607_v21 = vld [vmem:[%s3910_s28 + $0x6a8] sm:$0xf]  ;;  %v609_v22 = vld [vmem:[%s3910_s28 + $0x6b0] sm:$0xf]  ;;  %606 = vst [vmem:[%s3917_s29 + $0x350] sm:$0xf] %v605_v20 }
  0xa2   : > { %608 = vst [vmem:[%s3917_s29 + $0x354] sm:$0xf] %v607_v21  ;;  %610 = vst [vmem:[%s3917_s29 + $0x358] sm:$0xf] %v609_v22  ;;  %v611_v23 = vld [vmem:[%s3910_s28 + $0x6b8] sm:$0xf] }
  0xa3   : > { %v613_v24 = vld [vmem:[%s3910_s28 + $0x6c0] sm:$0xf]  ;;  %v615_v25 = vld [vmem:[%s3910_s28 + $0x6c8] sm:$0xf]  ;;  %612 = vst [vmem:[%s3917_s29 + $0x35c] sm:$0xf] %v611_v23 }
  0xa4   : > { %614 = vst [vmem:[%s3917_s29 + $0x360] sm:$0xf] %v613_v24  ;;  %616 = vst [vmem:[%s3917_s29 + $0x364] sm:$0xf] %v615_v25  ;;  %v617_v26 = vld [vmem:[%s3910_s28 + $0x6d0] sm:$0xf] }
  0xa5   : > { %v619_v27 = vld [vmem:[%s3910_s28 + $0x6d8] sm:$0xf]  ;;  %v621_v28 = vld [vmem:[%s3910_s28 + $0x6e0] sm:$0xf]  ;;  %618 = vst [vmem:[%s3917_s29 + $0x368] sm:$0xf] %v617_v26 }
  0xa6   : > { %620 = vst [vmem:[%s3917_s29 + $0x36c] sm:$0xf] %v619_v27  ;;  %622 = vst [vmem:[%s3917_s29 + $0x370] sm:$0xf] %v621_v28  ;;  %v623_v29 = vld [vmem:[%s3910_s28 + $0x6e8] sm:$0xf] }
  0xa7   : > { %v625_v30 = vld [vmem:[%s3910_s28 + $0x6f0] sm:$0xf]  ;;  %v627_v31 = vld [vmem:[%s3910_s28 + $0x6f8] sm:$0xf]  ;;  %624 = vst [vmem:[%s3917_s29 + $0x374] sm:$0xf] %v623_v29 }
  0xa8   : > { %626 = vst [vmem:[%s3917_s29 + $0x378] sm:$0xf] %v625_v30  ;;  %628 = vst [vmem:[%s3917_s29 + $0x37c] sm:$0xf] %v627_v31  ;;  %v629_v32 = vld [vmem:[%s3910_s28 + $0x700] sm:$0xf] }
  0xa9   : > { %v631_v33 = vld [vmem:[%s3910_s28 + $0x708] sm:$0xf]  ;;  %v633_v34 = vld [vmem:[%s3910_s28 + $0x710] sm:$0xf]  ;;  %630 = vst [vmem:[%s3917_s29 + $0x380] sm:$0xf] %v629_v32 }
  0xaa   : > { %632 = vst [vmem:[%s3917_s29 + $0x384] sm:$0xf] %v631_v33  ;;  %634 = vst [vmem:[%s3917_s29 + $0x388] sm:$0xf] %v633_v34  ;;  %v635_v35 = vld [vmem:[%s3910_s28 + $0x718] sm:$0xf] }
  0xab   : > { %v637_v36 = vld [vmem:[%s3910_s28 + $0x720] sm:$0xf]  ;;  %v639_v37 = vld [vmem:[%s3910_s28 + $0x728] sm:$0xf]  ;;  %636 = vst [vmem:[%s3917_s29 + $0x38c] sm:$0xf] %v635_v35 }
  0xac   : > { %638 = vst [vmem:[%s3917_s29 + $0x390] sm:$0xf] %v637_v36  ;;  %640 = vst [vmem:[%s3917_s29 + $0x394] sm:$0xf] %v639_v37  ;;  %v641_v38 = vld [vmem:[%s3910_s28 + $0x730] sm:$0xf] }
  0xad   : > { %v643_v39 = vld [vmem:[%s3910_s28 + $0x738] sm:$0xf]  ;;  %v645_v40 = vld [vmem:[%s3910_s28 + $0x740] sm:$0xf]  ;;  %642 = vst [vmem:[%s3917_s29 + $0x398] sm:$0xf] %v641_v38 }
  0xae   : > { %644 = vst [vmem:[%s3917_s29 + $0x39c] sm:$0xf] %v643_v39  ;;  %646 = vst [vmem:[%s3917_s29 + $0x3a0] sm:$0xf] %v645_v40  ;;  %v647_v41 = vld [vmem:[%s3910_s28 + $0x748] sm:$0xf] }
  0xaf   : > { %v649_v42 = vld [vmem:[%s3910_s28 + $0x750] sm:$0xf]  ;;  %v651_v43 = vld [vmem:[%s3910_s28 + $0x758] sm:$0xf]  ;;  %648 = vst [vmem:[%s3917_s29 + $0x3a4] sm:$0xf] %v647_v41 }
  0xb0   : > { %650 = vst [vmem:[%s3917_s29 + $0x3a8] sm:$0xf] %v649_v42  ;;  %652 = vst [vmem:[%s3917_s29 + $0x3ac] sm:$0xf] %v651_v43  ;;  %v653_v44 = vld [vmem:[%s3910_s28 + $0x760] sm:$0xf] }
  0xb1   : > { %v655_v45 = vld [vmem:[%s3910_s28 + $0x768] sm:$0xf]  ;;  %v657_v46 = vld [vmem:[%s3910_s28 + $0x770] sm:$0xf]  ;;  %654 = vst [vmem:[%s3917_s29 + $0x3b0] sm:$0xf] %v653_v44 }
  0xb2   : > { %656 = vst [vmem:[%s3917_s29 + $0x3b4] sm:$0xf] %v655_v45  ;;  %658 = vst [vmem:[%s3917_s29 + $0x3b8] sm:$0xf] %v657_v46  ;;  %v659_v47 = vld [vmem:[%s3910_s28 + $0x778] sm:$0xf] }
  0xb3   : > { %v661_v48 = vld [vmem:[%s3910_s28 + $0x780] sm:$0xf]  ;;  %v663_v49 = vld [vmem:[%s3910_s28 + $0x788] sm:$0xf]  ;;  %660 = vst [vmem:[%s3917_s29 + $0x3bc] sm:$0xf] %v659_v47 }
  0xb4   : > { %662 = vst [vmem:[%s3917_s29 + $0x3c0] sm:$0xf] %v661_v48  ;;  %664 = vst [vmem:[%s3917_s29 + $0x3c4] sm:$0xf] %v663_v49  ;;  %v665_v50 = vld [vmem:[%s3910_s28 + $0x790] sm:$0xf] }
  0xb5   : > { %v667_v51 = vld [vmem:[%s3910_s28 + $0x798] sm:$0xf]  ;;  %v669_v52 = vld [vmem:[%s3910_s28 + $0x7a0] sm:$0xf]  ;;  %666 = vst [vmem:[%s3917_s29 + $0x3c8] sm:$0xf] %v665_v50 }
  0xb6   : > { %668 = vst [vmem:[%s3917_s29 + $0x3cc] sm:$0xf] %v667_v51  ;;  %670 = vst [vmem:[%s3917_s29 + $0x3d0] sm:$0xf] %v669_v52  ;;  %v671_v53 = vld [vmem:[%s3910_s28 + $0x7a8] sm:$0xf] }
  0xb7   : > { %v673_v54 = vld [vmem:[%s3910_s28 + $0x7b0] sm:$0xf]  ;;  %v675_v55 = vld [vmem:[%s3910_s28 + $0x7b8] sm:$0xf]  ;;  %672 = vst [vmem:[%s3917_s29 + $0x3d4] sm:$0xf] %v671_v53 }
  0xb8   : > { %674 = vst [vmem:[%s3917_s29 + $0x3d8] sm:$0xf] %v673_v54  ;;  %676 = vst [vmem:[%s3917_s29 + $0x3dc] sm:$0xf] %v675_v55  ;;  %v677_v56 = vld [vmem:[%s3910_s28 + $0x7c0] sm:$0xf] }
  0xb9   : > { %v679_v57 = vld [vmem:[%s3910_s28 + $0x7c8] sm:$0xf]  ;;  %v681_v58 = vld [vmem:[%s3910_s28 + $0x7d0] sm:$0xf]  ;;  %678 = vst [vmem:[%s3917_s29 + $0x3e0] sm:$0xf] %v677_v56 }
  0xba   : > { %680 = vst [vmem:[%s3917_s29 + $0x3e4] sm:$0xf] %v679_v57  ;;  %682 = vst [vmem:[%s3917_s29 + $0x3e8] sm:$0xf] %v681_v58  ;;  %v683_v59 = vld [vmem:[%s3910_s28 + $0x7d8] sm:$0xf] }
  0xbb   : > { %v685_v60 = vld [vmem:[%s3910_s28 + $0x7e0] sm:$0xf]  ;;  %v687_v61 = vld [vmem:[%s3910_s28 + $0x7e8] sm:$0xf]  ;;  %684 = vst [vmem:[%s3917_s29 + $0x3ec] sm:$0xf] %v683_v59 }
  0xbc   : > { %686 = vst [vmem:[%s3917_s29 + $0x3f0] sm:$0xf] %v685_v60  ;;  %688 = vst [vmem:[%s3917_s29 + $0x3f4] sm:$0xf] %v687_v61  ;;  %v689_v62 = vld [vmem:[%s3910_s28 + $0x7f0] sm:$0xf] }
  0xbd   : > { %v691_v63 = vld [vmem:[%s3910_s28 + $0x7f8] sm:$0xf]  ;;  %v693_v0 = vld [vmem:[%s3910_s28 + $0x800] sm:$0xf]  ;;  %690 = vst [vmem:[%s3917_s29 + $0x3f8] sm:$0xf] %v689_v62 }
  0xbe   : > { %692 = vst [vmem:[%s3917_s29 + $0x3fc] sm:$0xf] %v691_v63  ;;  %694 = vst [vmem:[%s3917_s29 + $0x400] sm:$0xf] %v693_v0  ;;  %v695_v1 = vld [vmem:[%s3910_s28 + $0x808] sm:$0xf] }
  0xbf   : > { %v697_v2 = vld [vmem:[%s3910_s28 + $0x810] sm:$0xf]  ;;  %v699_v3 = vld [vmem:[%s3910_s28 + $0x818] sm:$0xf]  ;;  %696 = vst [vmem:[%s3917_s29 + $0x404] sm:$0xf] %v695_v1 }
  0xc0   : > { %698 = vst [vmem:[%s3917_s29 + $0x408] sm:$0xf] %v697_v2  ;;  %700 = vst [vmem:[%s3917_s29 + $0x40c] sm:$0xf] %v699_v3  ;;  %v701_v4 = vld [vmem:[%s3910_s28 + $0x820] sm:$0xf] }
  0xc1   : > { %v703_v5 = vld [vmem:[%s3910_s28 + $0x828] sm:$0xf]  ;;  %v705_v6 = vld [vmem:[%s3910_s28 + $0x830] sm:$0xf]  ;;  %702 = vst [vmem:[%s3917_s29 + $0x410] sm:$0xf] %v701_v4 }
  0xc2   : > { %704 = vst [vmem:[%s3917_s29 + $0x414] sm:$0xf] %v703_v5  ;;  %706 = vst [vmem:[%s3917_s29 + $0x418] sm:$0xf] %v705_v6  ;;  %v707_v7 = vld [vmem:[%s3910_s28 + $0x838] sm:$0xf] }
  0xc3   : > { %v709_v8 = vld [vmem:[%s3910_s28 + $0x840] sm:$0xf]  ;;  %v711_v9 = vld [vmem:[%s3910_s28 + $0x848] sm:$0xf]  ;;  %708 = vst [vmem:[%s3917_s29 + $0x41c] sm:$0xf] %v707_v7 }
  0xc4   : > { %710 = vst [vmem:[%s3917_s29 + $0x420] sm:$0xf] %v709_v8  ;;  %712 = vst [vmem:[%s3917_s29 + $0x424] sm:$0xf] %v711_v9  ;;  %v713_v10 = vld [vmem:[%s3910_s28 + $0x850] sm:$0xf] }
  0xc5   : > { %v715_v11 = vld [vmem:[%s3910_s28 + $0x858] sm:$0xf]  ;;  %v717_v12 = vld [vmem:[%s3910_s28 + $0x860] sm:$0xf]  ;;  %714 = vst [vmem:[%s3917_s29 + $0x428] sm:$0xf] %v713_v10 }
  0xc6   : > { %716 = vst [vmem:[%s3917_s29 + $0x42c] sm:$0xf] %v715_v11  ;;  %718 = vst [vmem:[%s3917_s29 + $0x430] sm:$0xf] %v717_v12  ;;  %v719_v13 = vld [vmem:[%s3910_s28 + $0x868] sm:$0xf] }
  0xc7   : > { %v721_v14 = vld [vmem:[%s3910_s28 + $0x870] sm:$0xf]  ;;  %v723_v15 = vld [vmem:[%s3910_s28 + $0x878] sm:$0xf]  ;;  %720 = vst [vmem:[%s3917_s29 + $0x434] sm:$0xf] %v719_v13 }
  0xc8   : > { %722 = vst [vmem:[%s3917_s29 + $0x438] sm:$0xf] %v721_v14  ;;  %724 = vst [vmem:[%s3917_s29 + $0x43c] sm:$0xf] %v723_v15  ;;  %v725_v16 = vld [vmem:[%s3910_s28 + $0x880] sm:$0xf] }
  0xc9   : > { %v727_v17 = vld [vmem:[%s3910_s28 + $0x888] sm:$0xf]  ;;  %v729_v18 = vld [vmem:[%s3910_s28 + $0x890] sm:$0xf]  ;;  %726 = vst [vmem:[%s3917_s29 + $0x440] sm:$0xf] %v725_v16 }
  0xca   : > { %728 = vst [vmem:[%s3917_s29 + $0x444] sm:$0xf] %v727_v17  ;;  %730 = vst [vmem:[%s3917_s29 + $0x448] sm:$0xf] %v729_v18  ;;  %v731_v19 = vld [vmem:[%s3910_s28 + $0x898] sm:$0xf] }
  0xcb   : > { %v733_v20 = vld [vmem:[%s3910_s28 + $0x8a0] sm:$0xf]  ;;  %v735_v21 = vld [vmem:[%s3910_s28 + $0x8a8] sm:$0xf]  ;;  %732 = vst [vmem:[%s3917_s29 + $0x44c] sm:$0xf] %v731_v19 }
  0xcc   : > { %734 = vst [vmem:[%s3917_s29 + $0x450] sm:$0xf] %v733_v20  ;;  %736 = vst [vmem:[%s3917_s29 + $0x454] sm:$0xf] %v735_v21  ;;  %v737_v22 = vld [vmem:[%s3910_s28 + $0x8b0] sm:$0xf] }
  0xcd   : > { %v739_v23 = vld [vmem:[%s3910_s28 + $0x8b8] sm:$0xf]  ;;  %v741_v24 = vld [vmem:[%s3910_s28 + $0x8c0] sm:$0xf]  ;;  %738 = vst [vmem:[%s3917_s29 + $0x458] sm:$0xf] %v737_v22 }
  0xce   : > { %740 = vst [vmem:[%s3917_s29 + $0x45c] sm:$0xf] %v739_v23  ;;  %742 = vst [vmem:[%s3917_s29 + $0x460] sm:$0xf] %v741_v24  ;;  %v743_v25 = vld [vmem:[%s3910_s28 + $0x8c8] sm:$0xf] }
  0xcf   : > { %v745_v26 = vld [vmem:[%s3910_s28 + $0x8d0] sm:$0xf]  ;;  %v747_v27 = vld [vmem:[%s3910_s28 + $0x8d8] sm:$0xf]  ;;  %744 = vst [vmem:[%s3917_s29 + $0x464] sm:$0xf] %v743_v25 }
  0xd0   : > { %746 = vst [vmem:[%s3917_s29 + $0x468] sm:$0xf] %v745_v26  ;;  %748 = vst [vmem:[%s3917_s29 + $0x46c] sm:$0xf] %v747_v27  ;;  %v749_v28 = vld [vmem:[%s3910_s28 + $0x8e0] sm:$0xf] }
  0xd1   : > { %v751_v29 = vld [vmem:[%s3910_s28 + $0x8e8] sm:$0xf]  ;;  %v753_v30 = vld [vmem:[%s3910_s28 + $0x8f0] sm:$0xf]  ;;  %750 = vst [vmem:[%s3917_s29 + $0x470] sm:$0xf] %v749_v28 }
  0xd2   : > { %752 = vst [vmem:[%s3917_s29 + $0x474] sm:$0xf] %v751_v29  ;;  %754 = vst [vmem:[%s3917_s29 + $0x478] sm:$0xf] %v753_v30  ;;  %v755_v31 = vld [vmem:[%s3910_s28 + $0x8f8] sm:$0xf] }
  0xd3   : > { %756 = vst [vmem:[%s3917_s29 + $0x47c] sm:$0xf] %v755_v31 }
  0xd4 PF: > { %p3213_p8 = scmp.ge.s32.totalorder %s3840_s16, 1  ;;  %p1361_p9 = scmp.lt.s32.totalorder %s3840_s16, 3 }
  0xd6   : > { %p1362_p10 = pnand %p3213_p8, %p1361_p9 }
  0xd7   : > { %s1368_s30 = sand.u32 (!%p1362_p10), 1, %s3824_s12   ;;  %p1406_p11 = scmp.lt.s32.totalorder (!%p1362_p10), %s3832_s14, 1 }
  0xd8   : > { %1365 = sbr.rel (%p1362_p10) target bundleno = 598 (0x256), region = 69  ;;  %s3214_s11 = sshll.u32 (!%p1362_p10), %s1368_s30, 3 }
  0xd9   : > { %s3590_s4 = smul.u32 (!%p1362_p10), 1152, %s1368_s30  ;;  %s1398_s18 = scalar_lea.vmem (!%p1362_p10), [#allocation3], %s3214_s11 }
  0xdb   : > { %s4501_s9 = scalar_lea.vmem (!%p1362_p10), [#allocation2], %s3590_s4 }
  0xdd   : > { %v3664_v32 = vld [vmem:[%s4723_s0 + $0x4] ss:$72 sps:$4 sm:$0xff]   ;;  %v3631_v34 = vld [vmem:[%s4501_s9 + $0x78] sm:$0xff]   ;;  %v3635_v38 = vld [vmem:[%s4501_s9 + $0x70] sm:$0xff]   ;;  %s3381_s19 = sshll.u32 (%p3897_p6), %s3832_s14, 2 }
  0xde   : > { %v3669_v33 = vld [vmem:[%s4723_s0 + $0xc] ss:$72 sps:$4 sm:$0xff]   ;;  %2710 = vmatprep.mubr.bf16.mxu0 %v3664_v32  ;;  %v3632_v35 = vld [vmem:[%s4501_s9 + $0x38] sm:$0xff]   ;;  %3391 = vmatprep.subr.bf16.mxu0 %v3631_v34  ;;  %v3643_v46 = vld [vmem:[%s4501_s9 + $0x60] sm:$0xff]   ;;  %s3070_s24 = scalar_lea.vmem (%p3897_p6), %s4726_s3, %s3381_s19 }
  0xdf   : > { %2751 = vmatprep.mubr.bf16.mxu1 %v3669_v33  ;;  %v3633_v36 = vld [vmem:[%s4501_s9 + $0xf8] sm:$0xff]   ;;  %3392 = vmatpush3.bf16.msra.mxu0 %v3632_v35  ;;  %v3636_v39 = vld [vmem:[%s4501_s9 + $0x30] sm:$0xff]   ;;  %v3639_v42 = vld [vmem:[%s4501_s9 + $0x68] sm:$0xff]  }
  0xe0   : > { %v3634_v37 = vld [vmem:[%s4501_s9 + $0xb8] sm:$0xff]   ;;  %3413 = vmatprep.subr.bf16.mxu1 %v3633_v36  ;;  %3393 = vmatprep.subr.bf16.mxu0 %v3635_v38  ;;  %v3637_v40 = vld [vmem:[%s4501_s9 + $0xf0] sm:$0xff]   ;;  %v3640_v43 = vld [vmem:[%s4501_s9 + $0x28] sm:$0xff]  }
  0xe1   : > { %3414 = vmatpush3.bf16.msra.mxu1 %v3634_v37  ;;  %v3638_v41 = vld [vmem:[%s4501_s9 + $0xb0] sm:$0xff]   ;;  %v3641_v44 = vld [vmem:[%s4501_s9 + $0xe8] sm:$0xff]   ;;  %v3644_v47 = vld [vmem:[%s4501_s9 + $0x20] sm:$0xff]  }
  0xe2   : > { %3415 = vmatprep.subr.bf16.mxu1 %v3637_v40  ;;  %v3642_v45 = vld [vmem:[%s4501_s9 + $0xa8] sm:$0xff]   ;;  %v3645_v48 = vld [vmem:[%s4501_s9 + $0xe0] sm:$0xff]   ;;  %v3647_v50 = vld [vmem:[%s4501_s9 + $0x58] sm:$0xff]  }
  0xe3   : > { %3394 = vmatpush3.bf16.msra.mxu0 %v3636_v39  ;;  %v3646_v49 = vld [vmem:[%s4501_s9 + $0xa0] sm:$0xff]   ;;  %v3648_v51 = vld [vmem:[%s4501_s9 + $0x18] sm:$0xff]   ;;  %v3651_v54 = vld [vmem:[%s4501_s9 + $0x50] sm:$0xff]  }
  0xe4   : > { %3395 = vmatprep.subr.bf16.mxu0 %v3639_v42  ;;  %v3649_v52 = vld [vmem:[%s4501_s9 + $0xd8] sm:$0xff]   ;;  %v3652_v55 = vld [vmem:[%s4501_s9 + $0x10] sm:$0xff]   ;;  %v3655_v58 = vld [vmem:[%s4501_s9 + $0x48] sm:$0xff]  }
  0xe5   : > { %3416 = vmatpush3.bf16.msra.mxu1 %v3638_v41  ;;  %v3650_v53 = vld [vmem:[%s4501_s9 + $0x98] sm:$0xff]   ;;  %v3653_v56 = vld [vmem:[%s4501_s9 + $0xd0] sm:$0xff]   ;;  %v3656_v59 = vld [vmem:[%s4501_s9 + $0x8] sm:$0xff]  }
  0xe6   : > { %3417 = vmatprep.subr.bf16.mxu1 %v3641_v44  ;;  %v3654_v57 = vld [vmem:[%s4501_s9 + $0x90] sm:$0xff]   ;;  %v3657_v60 = vld [vmem:[%s4501_s9 + $0xc8] sm:$0xff]   ;;  %v3659_v62 = vld [vmem:[%s4501_s9 + $0x40] sm:$0xff]  }
  0xe7   : > { %3396 = vmatpush3.bf16.msra.mxu0 %v3640_v43  ;;  %v3658_v61 = vld [vmem:[%s4501_s9 + $0x88] sm:$0xff]   ;;  %v3660_v0 = vld [vmem:[%s4501_s9] sm:$0xff]   ;;  %v3702_v1 = vld [vmem:[%s4723_s0 + $0x14] ss:$72 sps:$4 sm:$0xff]  }
  0xe8   : > { %3397 = vmatprep.subr.bf16.mxu0 %v3643_v46  ;;  %v3662_v63 = vld [vmem:[%s4723_s0] ss:$72 sps:$4 sm:$0xff]   ;;  %v3666_v5 = vld [vmem:[%s4501_s9 + $0x178] sm:$0xff]   ;;  %v3673_v9 = vld [vmem:[%s4501_s9 + $0x170] sm:$0xff]  }
  0xe9   : > { %3418 = vmatpush3.bf16.msra.mxu1 %v3642_v45  ;;  %v3661_v2 = vld [vmem:[%s4501_s9 + $0xc0] sm:$0xff]   ;;  %v3667_v3 = vld [vmem:[%s4723_s0 + $0x8] ss:$72 sps:$4 sm:$0xff]   ;;  %v3670_v6 = vld [vmem:[%s4501_s9 + $0x138] sm:$0xff]  }
  0xea   : > { %3419 = vmatprep.subr.bf16.mxu1 %v3645_v48  ;;  %v3665_v4 = vld [vmem:[%s4501_s9 + $0x80] sm:$0xff]   ;;  %v3671_v7 = vld [vmem:[%s4501_s9 + $0x1f8] sm:$0xff]   ;;  %v3674_v10 = vld [vmem:[%s4501_s9 + $0x130] sm:$0xff]  }
  0xeb   : > { %3398 = vmatpush3.bf16.msra.mxu0 %v3644_v47  ;;  %v3672_v8 = vld [vmem:[%s4501_s9 + $0x1b8] sm:$0xff]   ;;  %v3675_v11 = vld [vmem:[%s4501_s9 + $0x1f0] sm:$0xff]   ;;  %v3677_v13 = vld [vmem:[%s4501_s9 + $0x168] sm:$0xff]  }
  0xec   : > { %3399 = vmatprep.subr.bf16.mxu0 %v3647_v50  ;;  %v3676_v12 = vld [vmem:[%s4501_s9 + $0x1b0] sm:$0xff]   ;;  %v3678_v14 = vld [vmem:[%s4501_s9 + $0x128] sm:$0xff]   ;;  %v3681_v17 = vld [vmem:[%s4501_s9 + $0x160] sm:$0xff]  }
  0xed   : > { %3420 = vmatpush3.bf16.msra.mxu1 %v3646_v49  ;;  %v3679_v15 = vld [vmem:[%s4501_s9 + $0x1e8] sm:$0xff]   ;;  %v3682_v18 = vld [vmem:[%s4501_s9 + $0x120] sm:$0xff]   ;;  %v3685_v21 = vld [vmem:[%s4501_s9 + $0x158] sm:$0xff]  }
  0xee   : > { %3421 = vmatprep.subr.bf16.mxu1 %v3649_v52  ;;  %v3680_v16 = vld [vmem:[%s4501_s9 + $0x1a8] sm:$0xff]   ;;  %v3683_v19 = vld [vmem:[%s4501_s9 + $0x1e0] sm:$0xff]   ;;  %v3686_v22 = vld [vmem:[%s4501_s9 + $0x118] sm:$0xff]  }
  0xef   : > { %3400 = vmatpush3.bf16.msra.mxu0 %v3648_v51  ;;  %v3684_v20 = vld [vmem:[%s4501_s9 + $0x1a0] sm:$0xff]   ;;  %v3687_v23 = vld [vmem:[%s4501_s9 + $0x1d8] sm:$0xff]   ;;  %v3689_v25 = vld [vmem:[%s4501_s9 + $0x150] sm:$0xff]  }
  0xf0   : > { %3401 = vmatprep.subr.bf16.mxu0 %v3651_v54  ;;  %v3688_v24 = vld [vmem:[%s4501_s9 + $0x198] sm:$0xff]   ;;  %v3690_v26 = vld [vmem:[%s4501_s9 + $0x110] sm:$0xff]   ;;  %v3693_v29 = vld [vmem:[%s4501_s9 + $0x148] sm:$0xff]  }
  0xf1   : > { %3422 = vmatpush3.bf16.msra.mxu1 %v3650_v53  ;;  %v3691_v27 = vld [vmem:[%s4501_s9 + $0x1d0] sm:$0xff]   ;;  %v3694_v30 = vld [vmem:[%s4501_s9 + $0x108] sm:$0xff]   ;;  %v3697_v33 = vld [vmem:[%s4501_s9 + $0x140] sm:$0xff]  }
  0xf2   : > { %3423 = vmatprep.subr.bf16.mxu1 %v3653_v56  ;;  %v3692_v28 = vld [vmem:[%s4501_s9 + $0x190] sm:$0xff]   ;;  %v3695_v31 = vld [vmem:[%s4501_s9 + $0x1c8] sm:$0xff]   ;;  %v3698_v35 = vld [vmem:[%s4501_s9 + $0x100] sm:$0xff]  }
  0xf3   : > { %3402 = vmatpush3.bf16.msra.mxu0 %v3652_v55  ;;  %v3696_v32 = vld [vmem:[%s4501_s9 + $0x188] sm:$0xff]   ;;  %v3700_v34 = vld [vmem:[%s4723_s0 + $0x10] ss:$72 sps:$4 sm:$0xff]   ;;  %v3699_v36 = vld [vmem:[%s4501_s9 + $0x1c0] sm:$0xff]  }
  0xf4   : > { %3403 = vmatprep.subr.bf16.mxu0 %v3655_v58  ;;  %v3703_v37 = vld [vmem:[%s4501_s9 + $0x180] sm:$0xff]   ;;  %v3704_v38 = vld [vmem:[%s4501_s9 + $0x278] sm:$0xff]   ;;  %v3711_v44 = vld [vmem:[%s4501_s9 + $0x270] sm:$0xff]  }
  0xf5   : > { %3424 = vmatpush3.bf16.msra.mxu1 %v3654_v57  ;;  %v3705_v39 = vld [vmem:[%s4723_s0 + $0x18] ss:$72 sps:$4 sm:$0xff]   ;;  %v3707_v40 = vld [vmem:[%s4723_s0 + $0x1c] ss:$72 sps:$4 sm:$0xff]   ;;  %v3712_v45 = vld [vmem:[%s4501_s9 + $0x230] sm:$0xff]  }
  0xf6   : > { %3425 = vmatprep.subr.bf16.mxu1 %v3657_v60  ;;  %v3708_v41 = vld [vmem:[%s4501_s9 + $0x238] sm:$0xff]   ;;  %v3713_v46 = vld [vmem:[%s4501_s9 + $0x2f0] sm:$0xff]   ;;  %v3715_v48 = vld [vmem:[%s4501_s9 + $0x268] sm:$0xff]  }
  0xf7   : > { %3404 = vmatpush3.bf16.msra.mxu0 %v3656_v59  ;;  %v3709_v42 = vld [vmem:[%s4501_s9 + $0x2f8] sm:$0xff]   ;;  %v3714_v47 = vld [vmem:[%s4501_s9 + $0x2b0] sm:$0xff]   ;;  %v3716_v49 = vld [vmem:[%s4501_s9 + $0x228] sm:$0xff]  }
  0xf8   : > { %3405 = vmatprep.subr.bf16.mxu0 %v3659_v62  ;;  %v3710_v43 = vld [vmem:[%s4501_s9 + $0x2b8] sm:$0xff]   ;;  %v3717_v50 = vld [vmem:[%s4501_s9 + $0x2e8] sm:$0xff]   ;;  %v3719_v52 = vld [vmem:[%s4501_s9 + $0x260] sm:$0xff]  }
  0xf9   : > { %3426 = vmatpush3.bf16.msra.mxu1 %v3658_v61  ;;  %v3718_v51 = vld [vmem:[%s4501_s9 + $0x2a8] sm:$0xff]   ;;  %v3720_v53 = vld [vmem:[%s4501_s9 + $0x220] sm:$0xff]   ;;  %v3723_v56 = vld [vmem:[%s4501_s9 + $0x258] sm:$0xff]  }
  0xfa   : > { %3427 = vmatprep.subr.bf16.mxu1 %v3661_v2  ;;  %v3721_v54 = vld [vmem:[%s4501_s9 + $0x2e0] sm:$0xff]   ;;  %v3724_v57 = vld [vmem:[%s4501_s9 + $0x218] sm:$0xff]   ;;  %v3727_v60 = vld [vmem:[%s4501_s9 + $0x250] sm:$0xff]  }
  0xfb   : > { %3406 = vmatpush3.bf16.msra.mxu0 %v3660_v0  ;;  %v3722_v55 = vld [vmem:[%s4501_s9 + $0x2a0] sm:$0xff]   ;;  %v3725_v58 = vld [vmem:[%s4501_s9 + $0x2d8] sm:$0xff]   ;;  %v3728_v61 = vld [vmem:[%s4501_s9 + $0x210] sm:$0xff]  }
  0xfc   : > { %3435 = vmatprep.subr.bf16.mxu0 %v3666_v5  ;;  %v3726_v59 = vld [vmem:[%s4501_s9 + $0x298] sm:$0xff]   ;;  %v3729_v62 = vld [vmem:[%s4501_s9 + $0x2d0] sm:$0xff]   ;;  %v3731_v0 = vld [vmem:[%s4501_s9 + $0x248] sm:$0xff]  }
  0xfd   : > { %3428 = vmatpush3.bf16.msra.mxu1 %v3665_v4  ;;  %v3733_v2 = vld [vmem:[%s4501_s9 + $0x2c8] sm:$0xff]   ;;  %v3735_v4 = vld [vmem:[%s4501_s9 + $0x240] sm:$0xff]  }
  0xfe   : > { %2711 = vmatmul.mubr.bf16.vlgmr.msra.gmra.mxu0 %v3662_v63  ;;  %3457 = vmatprep.subr.bf16.mxu1 %v3671_v7  ;;  %v3730_v63 = vld [vmem:[%s4501_s9 + $0x290] sm:$0xff]   ;;  %v3736_v5 = vld [vmem:[%s4501_s9 + $0x200] sm:$0xff]  }
  0xff   : > { %3436 = vmatpush3.bf16.msra.mxu0 %v3670_v6  ;;  %2792 = vmatprep.mubr.bf16.mxu0 %v3702_v1  ;;  %v3732_v1 = vld [vmem:[%s4501_s9 + $0x208] sm:$0xff]   ;;  %v3737_v6 = vld [vmem:[%s4501_s9 + $0x2c0] sm:$0xff]  }
 0x100   : > { %2752 = vmatmul.mubr.bf16.vlgmr.msra.gmra.mxu1 %v3667_v3  ;;  %3437 = vmatprep.subr.bf16.mxu0 %v3673_v9  ;;  %v3734_v3 = vld [vmem:[%s4501_s9 + $0x288] sm:$0xff]   ;;  %v3741_v9 = vld [vmem:[%s4501_s9 + $0x280] sm:$0xff]  }
 0x101   : > { %3458 = vmatpush3.bf16.msra.mxu1 %v3672_v8  ;;  %2833 = vmatprep.mubr.bf16.mxu1 %v3707_v40  ;;  %v3738_v7 = vld [vmem:[%s4723_s0 + $0x20] ss:$72 sps:$4 sm:$0xff]   ;;  %v3740_v8 = vld [vmem:[%s4723_s0 + $0x24] ss:$72 sps:$4 sm:$0xff]  }
 0x102   : > { %3459 = vmatprep.subr.bf16.mxu1 %v3675_v11  ;;  %v3743_v11 = vld [vmem:[%s4723_s0 + $0x28] ss:$72 sps:$4 sm:$0xff]   ;;  %v3773_v40 = vld [vmem:[%s4501_s9 + $0x340] sm:$0xff]  }
 0x103   : > { %3438 = vmatpush3.bf16.msra.mxu0 %v3674_v10  ;;  %v3742_v10 = vld [vmem:[%s4501_s9 + $0x378] sm:$0xff]  }
 0x104   : > { %3439 = vmatprep.subr.bf16.mxu0 %v3677_v13  ;;  %v3746_v13 = vld [vmem:[%s4501_s9 + $0x338] sm:$0xff]  }
 0x105   : > { %3460 = vmatpush3.bf16.msra.mxu1 %v3676_v12  ;;  %v3745_v12 = vld [vmem:[%s4723_s0 + $0x2c] ss:$72 sps:$4 sm:$0xff]  }
 0x106   : > { %3461 = vmatprep.subr.bf16.mxu1 %v3679_v15  ;;  %v3748_v15 = vld [vmem:[%s4501_s9 + $0x3b8] sm:$0xff]  }
 0x107   : > { %3440 = vmatpush3.bf16.msra.mxu0 %v3678_v14  ;;  %v3747_v14 = vld [vmem:[%s4501_s9 + $0x3f8] sm:$0xff]  }
 0x108   : > { %3441 = vmatprep.subr.bf16.mxu0 %v3681_v17  ;;  %v3750_v17 = vld [vmem:[%s4501_s9 + $0x330] sm:$0xff]  }
 0x109   : > { %3462 = vmatpush3.bf16.msra.mxu1 %v3680_v16  ;;  %v3749_v16 = vld [vmem:[%s4501_s9 + $0x370] sm:$0xff]  }
 0x10a   : > { %3463 = vmatprep.subr.bf16.mxu1 %v3683_v19  ;;  %v3752_v19 = vld [vmem:[%s4501_s9 + $0x3b0] sm:$0xff]  }
 0x10b   : > { %3442 = vmatpush3.bf16.msra.mxu0 %v3682_v18  ;;  %v3751_v18 = vld [vmem:[%s4501_s9 + $0x3f0] sm:$0xff]  }
 0x10c   : > { %3443 = vmatprep.subr.bf16.mxu0 %v3685_v21  ;;  %v3754_v21 = vld [vmem:[%s4501_s9 + $0x328] sm:$0xff]  }
 0x10d   : > { %3464 = vmatpush3.bf16.msra.mxu1 %v3684_v20  ;;  %v3753_v20 = vld [vmem:[%s4501_s9 + $0x368] sm:$0xff]  }
 0x10e   : > { %3465 = vmatprep.subr.bf16.mxu1 %v3687_v23  ;;  %v3756_v23 = vld [vmem:[%s4501_s9 + $0x3a8] sm:$0xff]  }
 0x10f   : > { %3444 = vmatpush3.bf16.msra.mxu0 %v3686_v22  ;;  %v3755_v22 = vld [vmem:[%s4501_s9 + $0x3e8] sm:$0xff]  }
 0x110   : > { %3445 = vmatprep.subr.bf16.mxu0 %v3689_v25  ;;  %v3758_v25 = vld [vmem:[%s4501_s9 + $0x320] sm:$0xff]  }
 0x111   : > { %3466 = vmatpush3.bf16.msra.mxu1 %v3688_v24  ;;  %v3757_v24 = vld [vmem:[%s4501_s9 + $0x360] sm:$0xff]  }
 0x112   : > { %3467 = vmatprep.subr.bf16.mxu1 %v3691_v27  ;;  %v3760_v27 = vld [vmem:[%s4501_s9 + $0x3a0] sm:$0xff]  }
 0x113   : > { %3446 = vmatpush3.bf16.msra.mxu0 %v3690_v26  ;;  %v3759_v26 = vld [vmem:[%s4501_s9 + $0x3e0] sm:$0xff]  }
 0x114   : > { %3447 = vmatprep.subr.bf16.mxu0 %v3693_v29  ;;  %v3762_v29 = vld [vmem:[%s4501_s9 + $0x318] sm:$0xff]  }
 0x115   : > { %3468 = vmatpush3.bf16.msra.mxu1 %v3692_v28  ;;  %v3761_v28 = vld [vmem:[%s4501_s9 + $0x358] sm:$0xff]  }
 0x116   : > { %3469 = vmatprep.subr.bf16.mxu1 %v3695_v31  ;;  %v3764_v31 = vld [vmem:[%s4501_s9 + $0x398] sm:$0xff]  }
 0x117   : > { %3448 = vmatpush3.bf16.msra.mxu0 %v3694_v30  ;;  %v3763_v30 = vld [vmem:[%s4501_s9 + $0x3d8] sm:$0xff]  }
 0x118   : > { %3449 = vmatprep.subr.bf16.mxu0 %v3697_v33  ;;  %v3766_v33 = vld [vmem:[%s4501_s9 + $0x310] sm:$0xff]  }
 0x119   : > { %3470 = vmatpush3.bf16.msra.mxu1 %v3696_v32  ;;  %v3765_v32 = vld [vmem:[%s4501_s9 + $0x350] sm:$0xff]  }
 0x11a   : > { %3471 = vmatprep.subr.bf16.mxu1 %v3699_v36  ;;  %v3769_v36 = vld [vmem:[%s4501_s9 + $0x348] sm:$0xff]  }
 0x11b   : > { %3450 = vmatpush3.bf16.msra.mxu0 %v3698_v35  ;;  %v3768_v35 = vld [vmem:[%s4501_s9 + $0x390] sm:$0xff]  }
 0x11c   : > { %3479 = vmatprep.subr.bf16.mxu0 %v3704_v38  ;;  %v3771_v38 = vld [vmem:[%s4501_s9 + $0x3c8] sm:$0xff]  }
 0x11d   : > { %3472 = vmatpush3.bf16.msra.mxu1 %v3703_v37  ;;  %v3770_v37 = vld [vmem:[%s4501_s9 + $0x308] sm:$0xff]  }
 0x11e   : > { %2793 = vmatmul.mubr.bf16.vlgmr.msra.gmra.mxu0 %v3700_v34  ;;  %3501 = vmatprep.subr.bf16.mxu1 %v3709_v42  ;;  %v3767_v34 = vld [vmem:[%s4501_s9 + $0x3d0] sm:$0xff]   ;;  %v3775_v42 = vld [vmem:[%s4501_s9 + $0x3c0] sm:$0xff]  }
 0x11f   : > { %3480 = vmatpush3.bf16.msra.mxu0 %v3708_v41  ;;  %2874 = vmatprep.mubr.bf16.mxu0 %v3740_v8  ;;  %v3774_v41 = vld [vmem:[%s4501_s9 + $0x300] sm:$0xff]  }
 0x120   : > { %2834 = vmatmul.mubr.bf16.vlgmr.msra.gmra.mxu1 %v3705_v39  ;;  %3481 = vmatprep.subr.bf16.mxu0 %v3711_v44  ;;  %v3772_v39 = vld [vmem:[%s4501_s9 + $0x388] sm:$0xff]   ;;  %v3778_v44 = vld [vmem:[%s4723_s0 + $0x34] ss:$72 sps:$4 sm:$0xff]  }
 0x121   : > { %3502 = vmatpush3.bf16.msra.mxu1 %v3710_v43  ;;  %2915 = vmatprep.mubr.bf16.mxu1 %v3745_v12  ;;  %v3776_v43 = vld [vmem:[%s4723_s0 + $0x30] ss:$72 sps:$4 sm:$0xff]  }
 0x122   : > { %3503 = vmatprep.subr.bf16.mxu1 %v3713_v46  ;;  %v3780_v46 = vld [vmem:[%s4501_s9 + $0x478] sm:$0xff]  }
 0x123   : > { %3482 = vmatpush3.bf16.msra.mxu0 %v3712_v45  ;;  %v3779_v45 = vld [vmem:[%s4501_s9 + $0x380] sm:$0xff]  }
 0x124   : > { %3483 = vmatprep.subr.bf16.mxu0 %v3715_v48  ;;  %v3783_v48 = vld [vmem:[%s4723_s0 + $0x3c] ss:$72 sps:$4 sm:$0xff]  }
 0x125   : > { %3504 = vmatpush3.bf16.msra.mxu1 %v3714_v47  ;;  %v3781_v47 = vld [vmem:[%s4723_s0 + $0x38] ss:$72 sps:$4 sm:$0xff]  }
 0x126   : > { %3505 = vmatprep.subr.bf16.mxu1 %v3717_v50  ;;  %v3785_v50 = vld [vmem:[%s4501_s9 + $0x470] sm:$0xff]  }
 0x127   : > { %3484 = vmatpush3.bf16.msra.mxu0 %v3716_v49  ;;  %v3784_v49 = vld [vmem:[%s4501_s9 + $0x438] sm:$0xff]  }
 0x128   : > { %3485 = vmatprep.subr.bf16.mxu0 %v3719_v52  ;;  %v3787_v52 = vld [vmem:[%s4501_s9 + $0x468] sm:$0xff]  }
 0x129   : > { %3506 = vmatpush3.bf16.msra.mxu1 %v3718_v51  ;;  %v3786_v51 = vld [vmem:[%s4501_s9 + $0x430] sm:$0xff]  }
 0x12a   : > { %3507 = vmatprep.subr.bf16.mxu1 %v3721_v54  ;;  %v3789_v54 = vld [vmem:[%s4501_s9 + $0x460] sm:$0xff]  }
 0x12b   : > { %3486 = vmatpush3.bf16.msra.mxu0 %v3720_v53  ;;  %v3788_v53 = vld [vmem:[%s4501_s9 + $0x428] sm:$0xff]  }
 0x12c   : > { %3487 = vmatprep.subr.bf16.mxu0 %v3723_v56  ;;  %v3791_v56 = vld [vmem:[%s4501_s9 + $0x458] sm:$0xff]  }
 0x12d   : > { %3508 = vmatpush3.bf16.msra.mxu1 %v3722_v55  ;;  %v3790_v55 = vld [vmem:[%s4501_s9 + $0x420] sm:$0xff]  }
 0x12e   : > { %3509 = vmatprep.subr.bf16.mxu1 %v3725_v58  ;;  %v3793_v58 = vld [vmem:[%s4501_s9 + $0x450] sm:$0xff]  }
 0x12f   : > { %3488 = vmatpush3.bf16.msra.mxu0 %v3724_v57  ;;  %v3792_v57 = vld [vmem:[%s4501_s9 + $0x418] sm:$0xff]  }
 0x130   : > { %3489 = vmatprep.subr.bf16.mxu0 %v3727_v60  ;;  %v3794_v60 = vld [vmem:[%s4501_s9 + $0x410] sm:$0xff]  }
 0x131   : > { %3510 = vmatpush3.bf16.msra.mxu1 %v3726_v59  ;;  %v3801_v59 = vld [vmem:[%s4723_s0 + $0x44] ss:$72 sps:$4 sm:$0xff]  }
 0x132   : > { %3511 = vmatprep.subr.bf16.mxu1 %v3729_v62  ;;  %v3796_v62 = vld [vmem:[%s4501_s9 + $0x408] sm:$0xff]  }
 0x133   : > { %3490 = vmatpush3.bf16.msra.mxu0 %v3728_v61  ;;  %v3795_v61 = vld [vmem:[%s4501_s9 + $0x448] sm:$0xff]  }
 0x134   : > { %3491 = vmatprep.subr.bf16.mxu0 %v3731_v0  ;;  %v3798_v0 = vld [vmem:[%s4501_s9 + $0x400] sm:$0xff]  }
 0x135   : > { %3512 = vmatpush3.bf16.msra.mxu1 %v3730_v63  ;;  %v3797_v63 = vld [vmem:[%s4501_s9 + $0x440] sm:$0xff]   ;;  %s1407_s9 = scalar_select %p1406_p11, %s3832_s14, 1 }
 0x136   : > { %3513 = vmatprep.subr.bf16.mxu1 %v3733_v2 }
 0x137   : > { %3492 = vmatpush3.bf16.msra.mxu0 %v3732_v1  ;;  %v3799_v1 = vld [vmem:[%s4723_s0 + $0x40] ss:$72 sps:$4 sm:$0xff]   ;;  %s1408_s10 = scalar_lea.vmem %s4725_s2, %s1407_s9 }
 0x138   : > { %3493 = vmatprep.subr.bf16.mxu0 %v3735_v4 }
 0x139   : > { %3514 = vmatpush3.bf16.msra.mxu1 %v3734_v3 }
 0x13a   : > { %3515 = vmatprep.subr.bf16.mxu1 %v3737_v6 }
 0x13b   : > { %3494 = vmatpush3.bf16.msra.mxu0 %v3736_v5 }
 0x13c   : > { %3523 = vmatprep.subr.bf16.mxu0 %v3742_v10 }
 0x13d   : > { %3516 = vmatpush3.bf16.msra.mxu1 %v3741_v9 }
 0x13e   : > { %2875 = vmatmul.mubr.bf16.vlgmr.msra.gmra.mxu0 %v3738_v7  ;;  %3545 = vmatprep.subr.bf16.mxu1 %v3747_v14 }
 0x13f   : > { %3524 = vmatpush3.bf16.msra.mxu0 %v3746_v13  ;;  %2956 = vmatprep.mubr.bf16.mxu0 %v3778_v44 }
 0x140   : > { %2916 = vmatmul.mubr.bf16.vlgmr.msra.gmra.mxu1 %v3743_v11  ;;  %3525 = vmatprep.subr.bf16.mxu0 %v3749_v16 }
 0x141   : > { %3546 = vmatpush3.bf16.msra.mxu1 %v3748_v15  ;;  %2997 = vmatprep.mubr.bf16.mxu1 %v3783_v48 }
 0x142   : > { %3547 = vmatprep.subr.bf16.mxu1 %v3751_v18 }
 0x143   : > { %3526 = vmatpush3.bf16.msra.mxu0 %v3750_v17 }
 0x144   : > { %3527 = vmatprep.subr.bf16.mxu0 %v3753_v20 }
 0x145   : > { %3548 = vmatpush3.bf16.msra.mxu1 %v3752_v19 }
 0x146   : > { %3549 = vmatprep.subr.bf16.mxu1 %v3755_v22 }
 0x147   : > { %3528 = vmatpush3.bf16.msra.mxu0 %v3754_v21 }
 0x148   : > { %3529 = vmatprep.subr.bf16.mxu0 %v3757_v24  ;;  %v3215_v24 = vld [vmem:[%s1408_s10] ss:$0 sm:$0xff] }
 0x149   : > { %3550 = vmatpush3.bf16.msra.mxu1 %v3756_v23 }
 0x14a   : > { %3551 = vmatprep.subr.bf16.mxu1 %v3759_v26 }
 0x14b   : > { %3530 = vmatpush3.bf16.msra.mxu0 %v3758_v25 }
 0x14c   : > { %3531 = vmatprep.subr.bf16.mxu0 %v3761_v28 }
 0x14d   : > { %3552 = vmatpush3.bf16.msra.mxu1 %v3760_v27 }
 0x14e   : > { %3553 = vmatprep.subr.bf16.mxu1 %v3763_v30 }
 0x14f   : > { %3532 = vmatpush3.bf16.msra.mxu0 %v3762_v29 }
 0x150   : > { %3533 = vmatprep.subr.bf16.mxu0 %v3765_v32 }
 0x151   : > { %3554 = vmatpush3.bf16.msra.mxu1 %v3764_v31 }
 0x152   : > { %3555 = vmatprep.subr.bf16.mxu1 %v3767_v34 }
 0x153   : > { %3534 = vmatpush3.bf16.msra.mxu0 %v3766_v33 }
 0x154   : > { %3535 = vmatprep.subr.bf16.mxu0 %v3769_v36 }
 0x155   : > { %3556 = vmatpush3.bf16.msra.mxu1 %v3768_v35 }
 0x156   : > { %3557 = vmatprep.subr.bf16.mxu1 %v3771_v38 }
 0x157   : > { %3536 = vmatpush3.bf16.msra.mxu0 %v3770_v37 }
 0x158   : > { %3537 = vmatprep.subr.bf16.mxu0 %v3773_v40 }
 0x159   : > { %3558 = vmatpush3.bf16.msra.mxu1 %v3772_v39 }
 0x15a   : > { %3559 = vmatprep.subr.bf16.mxu1 %v3775_v42 }
 0x15b   : > { %3538 = vmatpush3.bf16.msra.mxu0 %v3774_v41 }
 0x15c   : > { %3567 = vmatprep.subr.bf16.mxu0 %v3780_v46 }
 0x15d   : > { %3560 = vmatpush3.bf16.msra.mxu1 %v3779_v45 }
 0x15e   : > { %2957 = vmatmul.mubr.bf16.vlgmr.msra.gmra.mxu0 %v3776_v43 }
 0x15f   : > { %3568 = vmatpush3.bf16.msra.mxu0 %v3784_v49  ;;  %3038 = vmatprep.mubr.bf16.mxu0 %v3801_v59 }
 0x160   : > { %2998 = vmatmul.mubr.bf16.vlgmr.msra.gmra.mxu1 %v3781_v47  ;;  %3569 = vmatprep.subr.bf16.mxu0 %v3785_v50 }
 0x163   : > { %3570 = vmatpush3.bf16.msra.mxu0 %v3786_v51 }
 0x164   : > { %3571 = vmatprep.subr.bf16.mxu0 %v3787_v52 }
 0x167   : > { %3572 = vmatpush3.bf16.msra.mxu0 %v3788_v53 }
 0x168   : > { %3573 = vmatprep.subr.bf16.mxu0 %v3789_v54 }
 0x16b   : > { %3574 = vmatpush3.bf16.msra.mxu0 %v3790_v55 }
 0x16c   : > { %3575 = vmatprep.subr.bf16.mxu0 %v3791_v56 }
 0x16f   : > { %3576 = vmatpush3.bf16.msra.mxu0 %v3792_v57 }
 0x170   : > { %3577 = vmatprep.subr.bf16.mxu0 %v3793_v58 }
 0x173   : > { %3578 = vmatpush3.bf16.msra.mxu0 %v3794_v60 }
 0x174   : > { %3579 = vmatprep.subr.bf16.mxu0 %v3795_v61 }
 0x177   : > { %3580 = vmatpush3.bf16.msra.mxu0 %v3796_v62 }
 0x178   : > { %3581 = vmatprep.subr.bf16.mxu0 %v3797_v63 }
 0x17b   : > { %3582 = vmatpush3.bf16.msra.mxu0 %v3798_v0 }
 0x17e   : > { %3039 = vmatmul.mubr.bf16.vlgmr.msra.gmra.mxu0 %v3799_v1 }
 0x1be   : > { %v3407_v2 = vpop.f32.mrf.mxu0 }
 0x1c0   : > { %v3408_v3 = vpop.f32.mrf.mxu0  ;;  %v3429_v4 = vpop.f32.mrf.mxu1 }
 0x1c1   : > { %v3409_v23 = vadd.f32 %v3408_v3, %v3407_v2 }
 0x1c2   : > { %v3410_v5 = vpop.f32.mrf.mxu0  ;;  %v3430_v6 = vpop.f32.mrf.mxu1 }
 0x1c3   : > { %v2713_v28 = vadd.f32 %v3409_v23, %v3215_v24  ;;  %v3431_v29 = vadd.f32 %v3430_v6, %v3429_v4 }
 0x1c4   : > { %v3411_v7 = vpop.f32.mrf.mxu0  ;;  %v3432_v8 = vpop.f32.mrf.mxu1 }
 0x1c5   : > { %v3412_v25 = vadd.f32 %v3411_v7, %v3410_v5  ;;  %v2754_v35 = vadd.f32 %v3431_v29, %v2713_v28 }
 0x1c6   : > { %v3433_v10 = vpop.f32.mrf.mxu1 }
 0x1c7   : > { %v2716_v31 = vadd.f32 %v3412_v25, %v3215_v24  ;;  %v3434_v32 = vadd.f32 %v3433_v10, %v3432_v8 }
 0x1c9   : > { %v2757_v39 = vadd.f32 %v3434_v32, %v2716_v31 }
 0x1de   : > { %v3451_v9 = vpop.f32.mrf.mxu0 }
 0x1e0   : > { %v3452_v11 = vpop.f32.mrf.mxu0  ;;  %v3473_v12 = vpop.f32.mrf.mxu1 }
 0x1e1   : > { %v3453_v33 = vadd.f32 %v3452_v11, %v3451_v9 }
 0x1e2   : > { %v3454_v13 = vpop.f32.mrf.mxu0  ;;  %v3474_v14 = vpop.f32.mrf.mxu1 }
 0x1e3   : > { %v2795_v40 = vadd.f32 %v3453_v33, %v2754_v35  ;;  %v3475_v41 = vadd.f32 %v3474_v14, %v3473_v12 }
 0x1e4   : > { %v3455_v15 = vpop.f32.mrf.mxu0  ;;  %v3476_v16 = vpop.f32.mrf.mxu1 }
 0x1e5   : > { %v3456_v36 = vadd.f32 %v3455_v15, %v3454_v13  ;;  %v2836_v47 = vadd.f32 %v3475_v41, %v2795_v40 }
 0x1e6   : > { %v3477_v18 = vpop.f32.mrf.mxu1 }
 0x1e7   : > { %v2798_v42 = vadd.f32 %v3456_v36, %v2757_v39  ;;  %v3478_v43 = vadd.f32 %v3477_v18, %v3476_v16 }
 0x1e9   : > { %v2839_v49 = vadd.f32 %v3478_v43, %v2798_v42 }
 0x1fe   : > { %v3495_v17 = vpop.f32.mrf.mxu0 }
 0x200   : > { %v3496_v19 = vpop.f32.mrf.mxu0  ;;  %v3517_v20 = vpop.f32.mrf.mxu1 }
 0x201   : > { %v3497_v44 = vadd.f32 %v3496_v19, %v3495_v17 }
 0x202   : > { %v3498_v21 = vpop.f32.mrf.mxu0  ;;  %v3518_v22 = vpop.f32.mrf.mxu1 }
 0x203   : > { %v2877_v50 = vadd.f32 %v3497_v44, %v2836_v47  ;;  %v3519_v51 = vadd.f32 %v3518_v22, %v3517_v20 }
 0x204   : > { %v3499_v26 = vpop.f32.mrf.mxu0  ;;  %v3520_v27 = vpop.f32.mrf.mxu1 }
 0x205   : > { %v3500_v48 = vadd.f32 %v3499_v26, %v3498_v21  ;;  %v2918_v57 = vadd.f32 %v3519_v51, %v2877_v50 }
 0x206   : > { %v3521_v34 = vpop.f32.mrf.mxu1 }
 0x207   : > { %v2880_v54 = vadd.f32 %v3500_v48, %v2839_v49  ;;  %v3522_v55 = vadd.f32 %v3521_v34, %v3520_v27 }
 0x209   : > { %v2921_v61 = vadd.f32 %v3522_v55, %v2880_v54 }
 0x21e   : > { %v3539_v30 = vpop.f32.mrf.mxu0 }
 0x220   : > { %v3540_v37 = vpop.f32.mrf.mxu0  ;;  %v3561_v38 = vpop.f32.mrf.mxu1 }
 0x221   : > { %v3541_v56 = vadd.f32 %v3540_v37, %v3539_v30 }
 0x222   : > { %v3542_v45 = vpop.f32.mrf.mxu0  ;;  %v3562_v46 = vpop.f32.mrf.mxu1 }
 0x223   : > { %v2959_v62 = vadd.f32 %v3541_v56, %v2918_v57  ;;  %v3563_v63 = vadd.f32 %v3562_v46, %v3561_v38 }
 0x224   : > { %v3543_v52 = vpop.f32.mrf.mxu0  ;;  %v3564_v53 = vpop.f32.mrf.mxu1 }
 0x225   : > { %v3544_v58 = vadd.f32 %v3543_v52, %v3542_v45  ;;  %v3000_v5 = vadd.f32 %v3563_v63, %v2959_v62 }
 0x226   : > { %v3565_v59 = vpop.f32.mrf.mxu1 }
 0x227   : > { %v2962_v1 = vadd.f32 %v3544_v58, %v2921_v61  ;;  %v3566_v2 = vadd.f32 %v3565_v59, %v3564_v53 }
 0x229   : > { %v3003_v7 = vadd.f32 %v3566_v2, %v2962_v1 }
 0x23e   : > { %v3583_v60 = vpop.f32.mrf.mxu0 }
 0x240   : > { %v3584_v0 = vpop.f32.mrf.mxu0 }
 0x241   : > { %v3585_v3 = vadd.f32 %v3584_v0, %v3583_v60 }
 0x242   : > { %v3586_v4 = vpop.f32.mrf.mxu0 }
 0x243   : > { %v3041_v8 = vadd.f32 %v3585_v3, %v3000_v5 }
 0x244   : > { %v3587_v6 = vpop.f32.mrf.mxu0 }
 0x245   : > { %v3588_v9 = vadd.f32 %v3587_v6, %v3586_v4  ;;  %v3047_v11 = vmax.f32 %v3041_v8, 0.0 }
 0x247   : > { %v3044_v10 = vadd.f32 %v3588_v9, %v3003_v7 }
 0x249   : > { %v3048_v12 = vmax.f32 %v3044_v10, 0.0  ;;  %3065 = sbr.rel (!%p3897_p6) target bundleno = 598 (0x256), region = 77 }
 0x24b   : > { %v3389_v13 = vpack.c.bf16 %v3048_v12, %v3047_v11 }
 0x24d   : > { %3390 = vst [vmem:[%s1398_s18] sm:$0xff] %v3389_v13  }
 0x254   : > { %v3087_v14 = vld [vmem:[%s1398_s18] sm:$0xf]  ;;  %v3089_v15 = vld [vmem:[%s1398_s18 + $0x4] sm:$0xf] }
 0x255   : > { %3088 = vst [vmem:[%s3070_s24] sm:$0xf] %v3087_v14  ;;  %3090 = vst [vmem:[%s3070_s24 + $0x8] sm:$0xf] %v3089_v15 }
 0x256 PF: > { %s13_s16 = sadd.s32 1, %s3840_s16   ;;  %s4728_s12 = smov %s3828_s13 }
 0x257   : > { %p10_p12 = scmp.ge.s32.totalorder %s13_s16, 4   ;;  %s4729_s13 = smov %s3902_s22 }
 0x258   : > { %s4730_s14 = smov %s3836_s15  ;;  %s4731_s15 = smov %s4733_s17 }
 0x259   :  { %12 = sbr.rel (!%p10_p12) target bundleno = 3 (0x3), region = 155 }

// kernel: model_forward.25
= control target key start
LH: loop header
LB: loop body
LE: loop exit
PB: predicated region body
PF: predicated region fallthrough
CT: control target
= control target key end

     0   :  { %s4274_s18 = smov 0   ;;  %s4276_s19 = smov 0   ;;  %s5180_s0 = inlined_call_operand.vmem [shape: bf16[16,2304], index: 0, kind: input, shape index: {}]   ;;  %s5181_s1 = inlined_call_operand.vmem [shape: bf16[2304,256], index: 1, kind: input, shape index: {}]   ;;  %s5182_s2 = inlined_call_operand.vmem [shape: f32[1,256], index: 2, kind: input, shape index: {}]   ;;  %s5183_s3 = inlined_call_operand.vmem [shape: bf16[16,128], index: 3, kind: input, shape index: {}]   ;;  %s5184_s4 = inlined_call_operand.vmem [shape: bf16[128,256], index: 4, kind: input, shape index: {}]   ;;  %s5185_s5 = inlined_call_operand.vmem [shape: bf16[16,256], index: 5, kind: output, shape index: {}]  }
   0x1   :  { %s4278_s20 = smov 0   ;;  %s4280_s21 = smov 0  }
   0x2   :  { %s4282_s22 = smov 0  }
   0x3 LB: > { %s24_s23 = sadd.s32 1, %s4236_s21  ;;  %s3554_s24 = sadd.s32 4294967295, %s4240_s22   ;;  %s4240_s22 = sphi %s4282_s22, %s15_s22   ;;  %s4236_s21 = sphi %s4280_s21, %s5191_s21   ;;  %s4232_s20 = sphi %s4278_s20, %s5190_s20   ;;  %s4228_s19 = sphi %s4276_s19, %s5189_s19   ;;  %s4224_s18 = sphi %s4274_s18, %s5188_s18  }
   0x4   : > { %p25_p0 = scmp.ge.s32.totalorder %s24_s23, 2  ;;  %p67_p1 = scmp.ne.s32.totalorder %s4228_s19, %s4224_s18 }
   0x5   : > { %p68_p2 = scmp.eq.s32.totalorder %s4240_s22, 0  ;;  %p177_p4 = scmp.eq.s32.totalorder %s3554_s24, 1 }
   0x6   : > { %s5193_s23 = smov (%p25_p0, %s24_s23), 0  ;;  %s60_s27 = sadd.s32 1, %s4228_s19 }
   0x7   : > { %p4306_p3 = por %p68_p2, %p67_p1  ;;  %s57_s26 = ssub.s32 %s4236_s21, %s5193_s23 }
   0x8   : > { %p58_p5 = scmp.eq.s32.totalorder %s57_s26, 0  ;;  %p4313_p6 = por %p177_p4, %p67_p1 }
   0x9   : > { %p3559_p7 = scmp.ge.s32.totalorder %s4240_s22, 2 }
   0xa   : > { %s4318_s29 = scalar_select %p58_p5, %s4228_s19, %s60_s27  }
   0xb   : > { %218 = sbr.rel (%p3559_p7) target bundleno = 226 (0xe2), region = 24 }
  0x10   : > { %221 = sbr.rel (!%p4306_p3) target bundleno = 212 (0xd4), region = 28  ;;  %s223_s30 = sand.u32 (%p4306_p3), 1, %s4228_s19  }
  0x11   : > { %s3560_s6 = sshll.u32 (%p4306_p3), %s4236_s21, 2  ;;  %s3978_s7 = smul.u32 (%p4306_p3), 1152, %s223_s30 }
  0x12   : > { %s4328_s10 = scalar_lea.vmem (%p4306_p3), %s5181_s1, %s3560_s6 }
  0x13   : > { %v244_v0 = vld [vmem:[%s4328_s10] sm:$0xf] (%p4306_p3)  ;;  %v246_v1 = vld [vmem:[%s4328_s10 + $0x8] sm:$0xf] (%p4306_p3)  ;;  %v248_v2 = vld [vmem:[%s4328_s10 + $0x10] sm:$0xf] (%p4306_p3) }
  0x14   : > { %v250_v3 = vld [vmem:[%s4328_s10 + $0x18] sm:$0xf] (%p4306_p3)  ;;  %v252_v4 = vld [vmem:[%s4328_s10 + $0x20] sm:$0xf] (%p4306_p3)  ;;  %s4335_s11 = scalar_lea.vmem (%p4306_p3), [#allocation2], %s3978_s7 }
  0x15   : > { %245 = vst [vmem:[%s4335_s11] sm:$0xf] %v244_v0  ;;  %247 = vst [vmem:[%s4335_s11 + $0x4] sm:$0xf] %v246_v1  ;;  %v254_v5 = vld [vmem:[%s4328_s10 + $0x28] sm:$0xf] }
  0x16   : > { %249 = vst [vmem:[%s4335_s11 + $0x8] sm:$0xf] %v248_v2  ;;  %251 = vst [vmem:[%s4335_s11 + $0xc] sm:$0xf] %v250_v3  ;;  %v256_v6 = vld [vmem:[%s4328_s10 + $0x30] sm:$0xf] }
  0x17   : > { %253 = vst [vmem:[%s4335_s11 + $0x10] sm:$0xf] %v252_v4  ;;  %v258_v7 = vld [vmem:[%s4328_s10 + $0x38] sm:$0xf]  ;;  %255 = vst [vmem:[%s4335_s11 + $0x14] sm:$0xf] %v254_v5 }
  0x18   : > { %257 = vst [vmem:[%s4335_s11 + $0x18] sm:$0xf] %v256_v6  ;;  %259 = vst [vmem:[%s4335_s11 + $0x1c] sm:$0xf] %v258_v7  ;;  %v260_v8 = vld [vmem:[%s4328_s10 + $0x40] sm:$0xf] }
  0x19   : > { %v262_v9 = vld [vmem:[%s4328_s10 + $0x48] sm:$0xf]  ;;  %v264_v10 = vld [vmem:[%s4328_s10 + $0x50] sm:$0xf]  ;;  %261 = vst [vmem:[%s4335_s11 + $0x20] sm:$0xf] %v260_v8 }
  0x1a   : > { %263 = vst [vmem:[%s4335_s11 + $0x24] sm:$0xf] %v262_v9  ;;  %265 = vst [vmem:[%s4335_s11 + $0x28] sm:$0xf] %v264_v10  ;;  %v266_v11 = vld [vmem:[%s4328_s10 + $0x58] sm:$0xf] }
  0x1b   : > { %v268_v12 = vld [vmem:[%s4328_s10 + $0x60] sm:$0xf]  ;;  %v270_v13 = vld [vmem:[%s4328_s10 + $0x68] sm:$0xf]  ;;  %267 = vst [vmem:[%s4335_s11 + $0x2c] sm:$0xf] %v266_v11 }
  0x1c   : > { %269 = vst [vmem:[%s4335_s11 + $0x30] sm:$0xf] %v268_v12  ;;  %271 = vst [vmem:[%s4335_s11 + $0x34] sm:$0xf] %v270_v13  ;;  %v272_v14 = vld [vmem:[%s4328_s10 + $0x70] sm:$0xf] }
  0x1d   : > { %v274_v15 = vld [vmem:[%s4328_s10 + $0x78] sm:$0xf]  ;;  %v276_v16 = vld [vmem:[%s4328_s10 + $0x80] sm:$0xf]  ;;  %273 = vst [vmem:[%s4335_s11 + $0x38] sm:$0xf] %v272_v14 }
  0x1e   : > { %275 = vst [vmem:[%s4335_s11 + $0x3c] sm:$0xf] %v274_v15  ;;  %277 = vst [vmem:[%s4335_s11 + $0x40] sm:$0xf] %v276_v16  ;;  %v278_v17 = vld [vmem:[%s4328_s10 + $0x88] sm:$0xf] }
  0x1f   : > { %v280_v18 = vld [vmem:[%s4328_s10 + $0x90] sm:$0xf]  ;;  %v282_v19 = vld [vmem:[%s4328_s10 + $0x98] sm:$0xf]  ;;  %279 = vst [vmem:[%s4335_s11 + $0x44] sm:$0xf] %v278_v17 }
  0x20   : > { %281 = vst [vmem:[%s4335_s11 + $0x48] sm:$0xf] %v280_v18  ;;  %283 = vst [vmem:[%s4335_s11 + $0x4c] sm:$0xf] %v282_v19  ;;  %v284_v20 = vld [vmem:[%s4328_s10 + $0xa0] sm:$0xf] }
  0x21   : > { %v286_v21 = vld [vmem:[%s4328_s10 + $0xa8] sm:$0xf]  ;;  %v288_v22 = vld [vmem:[%s4328_s10 + $0xb0] sm:$0xf]  ;;  %285 = vst [vmem:[%s4335_s11 + $0x50] sm:$0xf] %v284_v20 }
  0x22   : > { %287 = vst [vmem:[%s4335_s11 + $0x54] sm:$0xf] %v286_v21  ;;  %289 = vst [vmem:[%s4335_s11 + $0x58] sm:$0xf] %v288_v22  ;;  %v290_v23 = vld [vmem:[%s4328_s10 + $0xb8] sm:$0xf] }
  0x23   : > { %v292_v24 = vld [vmem:[%s4328_s10 + $0xc0] sm:$0xf]  ;;  %v294_v25 = vld [vmem:[%s4328_s10 + $0xc8] sm:$0xf]  ;;  %291 = vst [vmem:[%s4335_s11 + $0x5c] sm:$0xf] %v290_v23 }
  0x24   : > { %293 = vst [vmem:[%s4335_s11 + $0x60] sm:$0xf] %v292_v24  ;;  %295 = vst [vmem:[%s4335_s11 + $0x64] sm:$0xf] %v294_v25  ;;  %v296_v26 = vld [vmem:[%s4328_s10 + $0xd0] sm:$0xf] }
  0x25   : > { %v298_v27 = vld [vmem:[%s4328_s10 + $0xd8] sm:$0xf]  ;;  %v300_v28 = vld [vmem:[%s4328_s10 + $0xe0] sm:$0xf]  ;;  %297 = vst [vmem:[%s4335_s11 + $0x68] sm:$0xf] %v296_v26 }
  0x26   : > { %299 = vst [vmem:[%s4335_s11 + $0x6c] sm:$0xf] %v298_v27  ;;  %301 = vst [vmem:[%s4335_s11 + $0x70] sm:$0xf] %v300_v28  ;;  %v302_v29 = vld [vmem:[%s4328_s10 + $0xe8] sm:$0xf] }
  0x27   : > { %v304_v30 = vld [vmem:[%s4328_s10 + $0xf0] sm:$0xf]  ;;  %v306_v31 = vld [vmem:[%s4328_s10 + $0xf8] sm:$0xf]  ;;  %303 = vst [vmem:[%s4335_s11 + $0x74] sm:$0xf] %v302_v29 }
  0x28   : > { %305 = vst [vmem:[%s4335_s11 + $0x78] sm:$0xf] %v304_v30  ;;  %307 = vst [vmem:[%s4335_s11 + $0x7c] sm:$0xf] %v306_v31  ;;  %v308_v32 = vld [vmem:[%s4328_s10 + $0x100] sm:$0xf] }
  0x29   : > { %v310_v33 = vld [vmem:[%s4328_s10 + $0x108] sm:$0xf]  ;;  %v312_v34 = vld [vmem:[%s4328_s10 + $0x110] sm:$0xf]  ;;  %309 = vst [vmem:[%s4335_s11 + $0x80] sm:$0xf] %v308_v32 }
  0x2a   : > { %311 = vst [vmem:[%s4335_s11 + $0x84] sm:$0xf] %v310_v33  ;;  %313 = vst [vmem:[%s4335_s11 + $0x88] sm:$0xf] %v312_v34  ;;  %v314_v35 = vld [vmem:[%s4328_s10 + $0x118] sm:$0xf] }
  0x2b   : > { %v316_v36 = vld [vmem:[%s4328_s10 + $0x120] sm:$0xf]  ;;  %v318_v37 = vld [vmem:[%s4328_s10 + $0x128] sm:$0xf]  ;;  %315 = vst [vmem:[%s4335_s11 + $0x8c] sm:$0xf] %v314_v35 }
  0x2c   : > { %317 = vst [vmem:[%s4335_s11 + $0x90] sm:$0xf] %v316_v36  ;;  %319 = vst [vmem:[%s4335_s11 + $0x94] sm:$0xf] %v318_v37  ;;  %v320_v38 = vld [vmem:[%s4328_s10 + $0x130] sm:$0xf] }
  0x2d   : > { %v322_v39 = vld [vmem:[%s4328_s10 + $0x138] sm:$0xf]  ;;  %v324_v40 = vld [vmem:[%s4328_s10 + $0x140] sm:$0xf]  ;;  %321 = vst [vmem:[%s4335_s11 + $0x98] sm:$0xf] %v320_v38 }
  0x2e   : > { %323 = vst [vmem:[%s4335_s11 + $0x9c] sm:$0xf] %v322_v39  ;;  %325 = vst [vmem:[%s4335_s11 + $0xa0] sm:$0xf] %v324_v40  ;;  %v326_v41 = vld [vmem:[%s4328_s10 + $0x148] sm:$0xf] }
  0x2f   : > { %v328_v42 = vld [vmem:[%s4328_s10 + $0x150] sm:$0xf]  ;;  %v330_v43 = vld [vmem:[%s4328_s10 + $0x158] sm:$0xf]  ;;  %327 = vst [vmem:[%s4335_s11 + $0xa4] sm:$0xf] %v326_v41 }
  0x30   : > { %329 = vst [vmem:[%s4335_s11 + $0xa8] sm:$0xf] %v328_v42  ;;  %331 = vst [vmem:[%s4335_s11 + $0xac] sm:$0xf] %v330_v43  ;;  %v332_v44 = vld [vmem:[%s4328_s10 + $0x160] sm:$0xf] }
  0x31   : > { %v334_v45 = vld [vmem:[%s4328_s10 + $0x168] sm:$0xf]  ;;  %v336_v46 = vld [vmem:[%s4328_s10 + $0x170] sm:$0xf]  ;;  %333 = vst [vmem:[%s4335_s11 + $0xb0] sm:$0xf] %v332_v44 }
  0x32   : > { %335 = vst [vmem:[%s4335_s11 + $0xb4] sm:$0xf] %v334_v45  ;;  %337 = vst [vmem:[%s4335_s11 + $0xb8] sm:$0xf] %v336_v46  ;;  %v338_v47 = vld [vmem:[%s4328_s10 + $0x178] sm:$0xf] }
  0x33   : > { %v340_v48 = vld [vmem:[%s4328_s10 + $0x180] sm:$0xf]  ;;  %v342_v49 = vld [vmem:[%s4328_s10 + $0x188] sm:$0xf]  ;;  %339 = vst [vmem:[%s4335_s11 + $0xbc] sm:$0xf] %v338_v47 }
  0x34   : > { %341 = vst [vmem:[%s4335_s11 + $0xc0] sm:$0xf] %v340_v48  ;;  %343 = vst [vmem:[%s4335_s11 + $0xc4] sm:$0xf] %v342_v49  ;;  %v344_v50 = vld [vmem:[%s4328_s10 + $0x190] sm:$0xf] }
  0x35   : > { %v346_v51 = vld [vmem:[%s4328_s10 + $0x198] sm:$0xf]  ;;  %v348_v52 = vld [vmem:[%s4328_s10 + $0x1a0] sm:$0xf]  ;;  %345 = vst [vmem:[%s4335_s11 + $0xc8] sm:$0xf] %v344_v50 }
  0x36   : > { %347 = vst [vmem:[%s4335_s11 + $0xcc] sm:$0xf] %v346_v51  ;;  %349 = vst [vmem:[%s4335_s11 + $0xd0] sm:$0xf] %v348_v52  ;;  %v350_v53 = vld [vmem:[%s4328_s10 + $0x1a8] sm:$0xf] }
  0x37   : > { %v352_v54 = vld [vmem:[%s4328_s10 + $0x1b0] sm:$0xf]  ;;  %v354_v55 = vld [vmem:[%s4328_s10 + $0x1b8] sm:$0xf]  ;;  %351 = vst [vmem:[%s4335_s11 + $0xd4] sm:$0xf] %v350_v53 }
  0x38   : > { %353 = vst [vmem:[%s4335_s11 + $0xd8] sm:$0xf] %v352_v54  ;;  %355 = vst [vmem:[%s4335_s11 + $0xdc] sm:$0xf] %v354_v55  ;;  %v356_v56 = vld [vmem:[%s4328_s10 + $0x1c0] sm:$0xf] }
  0x39   : > { %v358_v57 = vld [vmem:[%s4328_s10 + $0x1c8] sm:$0xf]  ;;  %v360_v58 = vld [vmem:[%s4328_s10 + $0x1d0] sm:$0xf]  ;;  %357 = vst [vmem:[%s4335_s11 + $0xe0] sm:$0xf] %v356_v56 }
  0x3a   : > { %359 = vst [vmem:[%s4335_s11 + $0xe4] sm:$0xf] %v358_v57  ;;  %361 = vst [vmem:[%s4335_s11 + $0xe8] sm:$0xf] %v360_v58  ;;  %v362_v59 = vld [vmem:[%s4328_s10 + $0x1d8] sm:$0xf] }
  0x3b   : > { %v364_v60 = vld [vmem:[%s4328_s10 + $0x1e0] sm:$0xf]  ;;  %v366_v61 = vld [vmem:[%s4328_s10 + $0x1e8] sm:$0xf]  ;;  %363 = vst [vmem:[%s4335_s11 + $0xec] sm:$0xf] %v362_v59 }
  0x3c   : > { %365 = vst [vmem:[%s4335_s11 + $0xf0] sm:$0xf] %v364_v60  ;;  %367 = vst [vmem:[%s4335_s11 + $0xf4] sm:$0xf] %v366_v61  ;;  %v368_v62 = vld [vmem:[%s4328_s10 + $0x1f0] sm:$0xf] }
  0x3d   : > { %v370_v63 = vld [vmem:[%s4328_s10 + $0x1f8] sm:$0xf]  ;;  %v372_v0 = vld [vmem:[%s4328_s10 + $0x200] sm:$0xf]  ;;  %369 = vst [vmem:[%s4335_s11 + $0xf8] sm:$0xf] %v368_v62 }
  0x3e   : > { %371 = vst [vmem:[%s4335_s11 + $0xfc] sm:$0xf] %v370_v63  ;;  %373 = vst [vmem:[%s4335_s11 + $0x100] sm:$0xf] %v372_v0  ;;  %v374_v1 = vld [vmem:[%s4328_s10 + $0x208] sm:$0xf] }
  0x3f   : > { %v376_v2 = vld [vmem:[%s4328_s10 + $0x210] sm:$0xf]  ;;  %v378_v3 = vld [vmem:[%s4328_s10 + $0x218] sm:$0xf]  ;;  %375 = vst [vmem:[%s4335_s11 + $0x104] sm:$0xf] %v374_v1 }
  0x40   : > { %377 = vst [vmem:[%s4335_s11 + $0x108] sm:$0xf] %v376_v2  ;;  %379 = vst [vmem:[%s4335_s11 + $0x10c] sm:$0xf] %v378_v3  ;;  %v380_v4 = vld [vmem:[%s4328_s10 + $0x220] sm:$0xf] }
  0x41   : > { %v382_v5 = vld [vmem:[%s4328_s10 + $0x228] sm:$0xf]  ;;  %v384_v6 = vld [vmem:[%s4328_s10 + $0x230] sm:$0xf]  ;;  %381 = vst [vmem:[%s4335_s11 + $0x110] sm:$0xf] %v380_v4 }
  0x42   : > { %383 = vst [vmem:[%s4335_s11 + $0x114] sm:$0xf] %v382_v5  ;;  %385 = vst [vmem:[%s4335_s11 + $0x118] sm:$0xf] %v384_v6  ;;  %v386_v7 = vld [vmem:[%s4328_s10 + $0x238] sm:$0xf] }
  0x43   : > { %v388_v8 = vld [vmem:[%s4328_s10 + $0x240] sm:$0xf]  ;;  %v390_v9 = vld [vmem:[%s4328_s10 + $0x248] sm:$0xf]  ;;  %387 = vst [vmem:[%s4335_s11 + $0x11c] sm:$0xf] %v386_v7 }
  0x44   : > { %389 = vst [vmem:[%s4335_s11 + $0x120] sm:$0xf] %v388_v8  ;;  %391 = vst [vmem:[%s4335_s11 + $0x124] sm:$0xf] %v390_v9  ;;  %v392_v10 = vld [vmem:[%s4328_s10 + $0x250] sm:$0xf] }
  0x45   : > { %v394_v11 = vld [vmem:[%s4328_s10 + $0x258] sm:$0xf]  ;;  %v396_v12 = vld [vmem:[%s4328_s10 + $0x260] sm:$0xf]  ;;  %393 = vst [vmem:[%s4335_s11 + $0x128] sm:$0xf] %v392_v10 }
  0x46   : > { %395 = vst [vmem:[%s4335_s11 + $0x12c] sm:$0xf] %v394_v11  ;;  %397 = vst [vmem:[%s4335_s11 + $0x130] sm:$0xf] %v396_v12  ;;  %v398_v13 = vld [vmem:[%s4328_s10 + $0x268] sm:$0xf] }
  0x47   : > { %v400_v14 = vld [vmem:[%s4328_s10 + $0x270] sm:$0xf]  ;;  %v402_v15 = vld [vmem:[%s4328_s10 + $0x278] sm:$0xf]  ;;  %399 = vst [vmem:[%s4335_s11 + $0x134] sm:$0xf] %v398_v13 }
  0x48   : > { %401 = vst [vmem:[%s4335_s11 + $0x138] sm:$0xf] %v400_v14  ;;  %403 = vst [vmem:[%s4335_s11 + $0x13c] sm:$0xf] %v402_v15  ;;  %v404_v16 = vld [vmem:[%s4328_s10 + $0x280] sm:$0xf] }
  0x49   : > { %v406_v17 = vld [vmem:[%s4328_s10 + $0x288] sm:$0xf]  ;;  %v408_v18 = vld [vmem:[%s4328_s10 + $0x290] sm:$0xf]  ;;  %405 = vst [vmem:[%s4335_s11 + $0x140] sm:$0xf] %v404_v16 }
  0x4a   : > { %407 = vst [vmem:[%s4335_s11 + $0x144] sm:$0xf] %v406_v17  ;;  %409 = vst [vmem:[%s4335_s11 + $0x148] sm:$0xf] %v408_v18  ;;  %v410_v19 = vld [vmem:[%s4328_s10 + $0x298] sm:$0xf] }
  0x4b   : > { %v412_v20 = vld [vmem:[%s4328_s10 + $0x2a0] sm:$0xf]  ;;  %v414_v21 = vld [vmem:[%s4328_s10 + $0x2a8] sm:$0xf]  ;;  %411 = vst [vmem:[%s4335_s11 + $0x14c] sm:$0xf] %v410_v19 }
  0x4c   : > { %413 = vst [vmem:[%s4335_s11 + $0x150] sm:$0xf] %v412_v20  ;;  %415 = vst [vmem:[%s4335_s11 + $0x154] sm:$0xf] %v414_v21  ;;  %v416_v22 = vld [vmem:[%s4328_s10 + $0x2b0] sm:$0xf] }
  0x4d   : > { %v418_v23 = vld [vmem:[%s4328_s10 + $0x2b8] sm:$0xf]  ;;  %v420_v24 = vld [vmem:[%s4328_s10 + $0x2c0] sm:$0xf]  ;;  %417 = vst [vmem:[%s4335_s11 + $0x158] sm:$0xf] %v416_v22 }
  0x4e   : > { %419 = vst [vmem:[%s4335_s11 + $0x15c] sm:$0xf] %v418_v23  ;;  %421 = vst [vmem:[%s4335_s11 + $0x160] sm:$0xf] %v420_v24  ;;  %v422_v25 = vld [vmem:[%s4328_s10 + $0x2c8] sm:$0xf] }
  0x4f   : > { %v424_v26 = vld [vmem:[%s4328_s10 + $0x2d0] sm:$0xf]  ;;  %v426_v27 = vld [vmem:[%s4328_s10 + $0x2d8] sm:$0xf]  ;;  %423 = vst [vmem:[%s4335_s11 + $0x164] sm:$0xf] %v422_v25 }
  0x50   : > { %425 = vst [vmem:[%s4335_s11 + $0x168] sm:$0xf] %v424_v26  ;;  %427 = vst [vmem:[%s4335_s11 + $0x16c] sm:$0xf] %v426_v27  ;;  %v428_v28 = vld [vmem:[%s4328_s10 + $0x2e0] sm:$0xf] }
  0x51   : > { %v430_v29 = vld [vmem:[%s4328_s10 + $0x2e8] sm:$0xf]  ;;  %v432_v30 = vld [vmem:[%s4328_s10 + $0x2f0] sm:$0xf]  ;;  %429 = vst [vmem:[%s4335_s11 + $0x170] sm:$0xf] %v428_v28 }
  0x52   : > { %431 = vst [vmem:[%s4335_s11 + $0x174] sm:$0xf] %v430_v29  ;;  %433 = vst [vmem:[%s4335_s11 + $0x178] sm:$0xf] %v432_v30  ;;  %v434_v31 = vld [vmem:[%s4328_s10 + $0x2f8] sm:$0xf] }
  0x53   : > { %v436_v32 = vld [vmem:[%s4328_s10 + $0x300] sm:$0xf]  ;;  %v438_v33 = vld [vmem:[%s4328_s10 + $0x308] sm:$0xf]  ;;  %435 = vst [vmem:[%s4335_s11 + $0x17c] sm:$0xf] %v434_v31 }
  0x54   : > { %437 = vst [vmem:[%s4335_s11 + $0x180] sm:$0xf] %v436_v32  ;;  %439 = vst [vmem:[%s4335_s11 + $0x184] sm:$0xf] %v438_v33  ;;  %v440_v34 = vld [vmem:[%s4328_s10 + $0x310] sm:$0xf] }
  0x55   : > { %v442_v35 = vld [vmem:[%s4328_s10 + $0x318] sm:$0xf]  ;;  %v444_v36 = vld [vmem:[%s4328_s10 + $0x320] sm:$0xf]  ;;  %441 = vst [vmem:[%s4335_s11 + $0x188] sm:$0xf] %v440_v34 }
  0x56   : > { %443 = vst [vmem:[%s4335_s11 + $0x18c] sm:$0xf] %v442_v35  ;;  %445 = vst [vmem:[%s4335_s11 + $0x190] sm:$0xf] %v444_v36  ;;  %v446_v37 = vld [vmem:[%s4328_s10 + $0x328] sm:$0xf] }
  0x57   : > { %v448_v38 = vld [vmem:[%s4328_s10 + $0x330] sm:$0xf]  ;;  %v450_v39 = vld [vmem:[%s4328_s10 + $0x338] sm:$0xf]  ;;  %447 = vst [vmem:[%s4335_s11 + $0x194] sm:$0xf] %v446_v37 }
  0x58   : > { %449 = vst [vmem:[%s4335_s11 + $0x198] sm:$0xf] %v448_v38  ;;  %451 = vst [vmem:[%s4335_s11 + $0x19c] sm:$0xf] %v450_v39  ;;  %v452_v40 = vld [vmem:[%s4328_s10 + $0x340] sm:$0xf] }
  0x59   : > { %v454_v41 = vld [vmem:[%s4328_s10 + $0x348] sm:$0xf]  ;;  %v456_v42 = vld [vmem:[%s4328_s10 + $0x350] sm:$0xf]  ;;  %453 = vst [vmem:[%s4335_s11 + $0x1a0] sm:$0xf] %v452_v40 }
  0x5a   : > { %455 = vst [vmem:[%s4335_s11 + $0x1a4] sm:$0xf] %v454_v41  ;;  %457 = vst [vmem:[%s4335_s11 + $0x1a8] sm:$0xf] %v456_v42  ;;  %v458_v43 = vld [vmem:[%s4328_s10 + $0x358] sm:$0xf] }
  0x5b   : > { %v460_v44 = vld [vmem:[%s4328_s10 + $0x360] sm:$0xf]  ;;  %v462_v45 = vld [vmem:[%s4328_s10 + $0x368] sm:$0xf]  ;;  %459 = vst [vmem:[%s4335_s11 + $0x1ac] sm:$0xf] %v458_v43 }
  0x5c   : > { %461 = vst [vmem:[%s4335_s11 + $0x1b0] sm:$0xf] %v460_v44  ;;  %463 = vst [vmem:[%s4335_s11 + $0x1b4] sm:$0xf] %v462_v45  ;;  %v464_v46 = vld [vmem:[%s4328_s10 + $0x370] sm:$0xf] }
  0x5d   : > { %v466_v47 = vld [vmem:[%s4328_s10 + $0x378] sm:$0xf]  ;;  %v468_v48 = vld [vmem:[%s4328_s10 + $0x380] sm:$0xf]  ;;  %465 = vst [vmem:[%s4335_s11 + $0x1b8] sm:$0xf] %v464_v46 }
  0x5e   : > { %467 = vst [vmem:[%s4335_s11 + $0x1bc] sm:$0xf] %v466_v47  ;;  %469 = vst [vmem:[%s4335_s11 + $0x1c0] sm:$0xf] %v468_v48  ;;  %v470_v49 = vld [vmem:[%s4328_s10 + $0x388] sm:$0xf] }
  0x5f   : > { %v472_v50 = vld [vmem:[%s4328_s10 + $0x390] sm:$0xf]  ;;  %v474_v51 = vld [vmem:[%s4328_s10 + $0x398] sm:$0xf]  ;;  %471 = vst [vmem:[%s4335_s11 + $0x1c4] sm:$0xf] %v470_v49 }
  0x60   : > { %473 = vst [vmem:[%s4335_s11 + $0x1c8] sm:$0xf] %v472_v50  ;;  %475 = vst [vmem:[%s4335_s11 + $0x1cc] sm:$0xf] %v474_v51  ;;  %v476_v52 = vld [vmem:[%s4328_s10 + $0x3a0] sm:$0xf] }
  0x61   : > { %v478_v53 = vld [vmem:[%s4328_s10 + $0x3a8] sm:$0xf]  ;;  %v480_v54 = vld [vmem:[%s4328_s10 + $0x3b0] sm:$0xf]  ;;  %477 = vst [vmem:[%s4335_s11 + $0x1d0] sm:$0xf] %v476_v52 }
  0x62   : > { %479 = vst [vmem:[%s4335_s11 + $0x1d4] sm:$0xf] %v478_v53  ;;  %481 = vst [vmem:[%s4335_s11 + $0x1d8] sm:$0xf] %v480_v54  ;;  %v482_v55 = vld [vmem:[%s4328_s10 + $0x3b8] sm:$0xf] }
  0x63   : > { %v484_v56 = vld [vmem:[%s4328_s10 + $0x3c0] sm:$0xf]  ;;  %v486_v57 = vld [vmem:[%s4328_s10 + $0x3c8] sm:$0xf]  ;;  %483 = vst [vmem:[%s4335_s11 + $0x1dc] sm:$0xf] %v482_v55 }
  0x64   : > { %485 = vst [vmem:[%s4335_s11 + $0x1e0] sm:$0xf] %v484_v56  ;;  %487 = vst [vmem:[%s4335_s11 + $0x1e4] sm:$0xf] %v486_v57  ;;  %v488_v58 = vld [vmem:[%s4328_s10 + $0x3d0] sm:$0xf] }
  0x65   : > { %v490_v59 = vld [vmem:[%s4328_s10 + $0x3d8] sm:$0xf]  ;;  %v492_v60 = vld [vmem:[%s4328_s10 + $0x3e0] sm:$0xf]  ;;  %489 = vst [vmem:[%s4335_s11 + $0x1e8] sm:$0xf] %v488_v58 }
  0x66   : > { %491 = vst [vmem:[%s4335_s11 + $0x1ec] sm:$0xf] %v490_v59  ;;  %493 = vst [vmem:[%s4335_s11 + $0x1f0] sm:$0xf] %v492_v60  ;;  %v494_v61 = vld [vmem:[%s4328_s10 + $0x3e8] sm:$0xf] }
  0x67   : > { %v496_v62 = vld [vmem:[%s4328_s10 + $0x3f0] sm:$0xf]  ;;  %v498_v63 = vld [vmem:[%s4328_s10 + $0x3f8] sm:$0xf]  ;;  %495 = vst [vmem:[%s4335_s11 + $0x1f4] sm:$0xf] %v494_v61 }
  0x68   : > { %497 = vst [vmem:[%s4335_s11 + $0x1f8] sm:$0xf] %v496_v62  ;;  %499 = vst [vmem:[%s4335_s11 + $0x1fc] sm:$0xf] %v498_v63  ;;  %v500_v0 = vld [vmem:[%s4328_s10 + $0x400] sm:$0xf] }
  0x69   : > { %v502_v1 = vld [vmem:[%s4328_s10 + $0x408] sm:$0xf]  ;;  %v504_v2 = vld [vmem:[%s4328_s10 + $0x410] sm:$0xf]  ;;  %501 = vst [vmem:[%s4335_s11 + $0x200] sm:$0xf] %v500_v0 }
  0x6a   : > { %503 = vst [vmem:[%s4335_s11 + $0x204] sm:$0xf] %v502_v1  ;;  %505 = vst [vmem:[%s4335_s11 + $0x208] sm:$0xf] %v504_v2  ;;  %v506_v3 = vld [vmem:[%s4328_s10 + $0x418] sm:$0xf] }
  0x6b   : > { %v508_v4 = vld [vmem:[%s4328_s10 + $0x420] sm:$0xf]  ;;  %v510_v5 = vld [vmem:[%s4328_s10 + $0x428] sm:$0xf]  ;;  %507 = vst [vmem:[%s4335_s11 + $0x20c] sm:$0xf] %v506_v3 }
  0x6c   : > { %509 = vst [vmem:[%s4335_s11 + $0x210] sm:$0xf] %v508_v4  ;;  %511 = vst [vmem:[%s4335_s11 + $0x214] sm:$0xf] %v510_v5  ;;  %v512_v6 = vld [vmem:[%s4328_s10 + $0x430] sm:$0xf] }
  0x6d   : > { %v514_v7 = vld [vmem:[%s4328_s10 + $0x438] sm:$0xf]  ;;  %v516_v8 = vld [vmem:[%s4328_s10 + $0x440] sm:$0xf]  ;;  %513 = vst [vmem:[%s4335_s11 + $0x218] sm:$0xf] %v512_v6 }
  0x6e   : > { %515 = vst [vmem:[%s4335_s11 + $0x21c] sm:$0xf] %v514_v7  ;;  %517 = vst [vmem:[%s4335_s11 + $0x220] sm:$0xf] %v516_v8  ;;  %v518_v9 = vld [vmem:[%s4328_s10 + $0x448] sm:$0xf] }
  0x6f   : > { %v520_v10 = vld [vmem:[%s4328_s10 + $0x450] sm:$0xf]  ;;  %v522_v11 = vld [vmem:[%s4328_s10 + $0x458] sm:$0xf]  ;;  %519 = vst [vmem:[%s4335_s11 + $0x224] sm:$0xf] %v518_v9 }
  0x70   : > { %521 = vst [vmem:[%s4335_s11 + $0x228] sm:$0xf] %v520_v10  ;;  %523 = vst [vmem:[%s4335_s11 + $0x22c] sm:$0xf] %v522_v11  ;;  %v524_v12 = vld [vmem:[%s4328_s10 + $0x460] sm:$0xf] }
  0x71   : > { %v526_v13 = vld [vmem:[%s4328_s10 + $0x468] sm:$0xf]  ;;  %v528_v14 = vld [vmem:[%s4328_s10 + $0x470] sm:$0xf]  ;;  %525 = vst [vmem:[%s4335_s11 + $0x230] sm:$0xf] %v524_v12 }
  0x72   : > { %527 = vst [vmem:[%s4335_s11 + $0x234] sm:$0xf] %v526_v13  ;;  %529 = vst [vmem:[%s4335_s11 + $0x238] sm:$0xf] %v528_v14  ;;  %v530_v15 = vld [vmem:[%s4328_s10 + $0x478] sm:$0xf] }
  0x73   : > { %v532_v16 = vld [vmem:[%s4328_s10 + $0x480] sm:$0xf]  ;;  %v534_v17 = vld [vmem:[%s4328_s10 + $0x488] sm:$0xf]  ;;  %531 = vst [vmem:[%s4335_s11 + $0x23c] sm:$0xf] %v530_v15 }
  0x74   : > { %533 = vst [vmem:[%s4335_s11 + $0x240] sm:$0xf] %v532_v16  ;;  %535 = vst [vmem:[%s4335_s11 + $0x244] sm:$0xf] %v534_v17  ;;  %v536_v18 = vld [vmem:[%s4328_s10 + $0x490] sm:$0xf] }
  0x75   : > { %v538_v19 = vld [vmem:[%s4328_s10 + $0x498] sm:$0xf]  ;;  %v540_v20 = vld [vmem:[%s4328_s10 + $0x4a0] sm:$0xf]  ;;  %537 = vst [vmem:[%s4335_s11 + $0x248] sm:$0xf] %v536_v18 }
  0x76   : > { %539 = vst [vmem:[%s4335_s11 + $0x24c] sm:$0xf] %v538_v19  ;;  %541 = vst [vmem:[%s4335_s11 + $0x250] sm:$0xf] %v540_v20  ;;  %v542_v21 = vld [vmem:[%s4328_s10 + $0x4a8] sm:$0xf] }
  0x77   : > { %v544_v22 = vld [vmem:[%s4328_s10 + $0x4b0] sm:$0xf]  ;;  %v546_v23 = vld [vmem:[%s4328_s10 + $0x4b8] sm:$0xf]  ;;  %543 = vst [vmem:[%s4335_s11 + $0x254] sm:$0xf] %v542_v21 }
  0x78   : > { %545 = vst [vmem:[%s4335_s11 + $0x258] sm:$0xf] %v544_v22  ;;  %547 = vst [vmem:[%s4335_s11 + $0x25c] sm:$0xf] %v546_v23  ;;  %v548_v24 = vld [vmem:[%s4328_s10 + $0x4c0] sm:$0xf] }
  0x79   : > { %v550_v25 = vld [vmem:[%s4328_s10 + $0x4c8] sm:$0xf]  ;;  %v552_v26 = vld [vmem:[%s4328_s10 + $0x4d0] sm:$0xf]  ;;  %549 = vst [vmem:[%s4335_s11 + $0x260] sm:$0xf] %v548_v24 }
  0x7a   : > { %551 = vst [vmem:[%s4335_s11 + $0x264] sm:$0xf] %v550_v25  ;;  %553 = vst [vmem:[%s4335_s11 + $0x268] sm:$0xf] %v552_v26  ;;  %v554_v27 = vld [vmem:[%s4328_s10 + $0x4d8] sm:$0xf] }
  0x7b   : > { %v556_v28 = vld [vmem:[%s4328_s10 + $0x4e0] sm:$0xf]  ;;  %v558_v29 = vld [vmem:[%s4328_s10 + $0x4e8] sm:$0xf]  ;;  %555 = vst [vmem:[%s4335_s11 + $0x26c] sm:$0xf] %v554_v27 }
  0x7c   : > { %557 = vst [vmem:[%s4335_s11 + $0x270] sm:$0xf] %v556_v28  ;;  %559 = vst [vmem:[%s4335_s11 + $0x274] sm:$0xf] %v558_v29  ;;  %v560_v30 = vld [vmem:[%s4328_s10 + $0x4f0] sm:$0xf] }
  0x7d   : > { %v562_v31 = vld [vmem:[%s4328_s10 + $0x4f8] sm:$0xf]  ;;  %v564_v32 = vld [vmem:[%s4328_s10 + $0x500] sm:$0xf]  ;;  %561 = vst [vmem:[%s4335_s11 + $0x278] sm:$0xf] %v560_v30 }
  0x7e   : > { %563 = vst [vmem:[%s4335_s11 + $0x27c] sm:$0xf] %v562_v31  ;;  %565 = vst [vmem:[%s4335_s11 + $0x280] sm:$0xf] %v564_v32  ;;  %v566_v33 = vld [vmem:[%s4328_s10 + $0x508] sm:$0xf] }
  0x7f   : > { %v568_v34 = vld [vmem:[%s4328_s10 + $0x510] sm:$0xf]  ;;  %v570_v35 = vld [vmem:[%s4328_s10 + $0x518] sm:$0xf]  ;;  %567 = vst [vmem:[%s4335_s11 + $0x284] sm:$0xf] %v566_v33 }
  0x80   : > { %569 = vst [vmem:[%s4335_s11 + $0x288] sm:$0xf] %v568_v34  ;;  %571 = vst [vmem:[%s4335_s11 + $0x28c] sm:$0xf] %v570_v35  ;;  %v572_v36 = vld [vmem:[%s4328_s10 + $0x520] sm:$0xf] }
  0x81   : > { %v574_v37 = vld [vmem:[%s4328_s10 + $0x528] sm:$0xf]  ;;  %v576_v38 = vld [vmem:[%s4328_s10 + $0x530] sm:$0xf]  ;;  %573 = vst [vmem:[%s4335_s11 + $0x290] sm:$0xf] %v572_v36 }
  0x82   : > { %575 = vst [vmem:[%s4335_s11 + $0x294] sm:$0xf] %v574_v37  ;;  %577 = vst [vmem:[%s4335_s11 + $0x298] sm:$0xf] %v576_v38  ;;  %v578_v39 = vld [vmem:[%s4328_s10 + $0x538] sm:$0xf] }
  0x83   : > { %v580_v40 = vld [vmem:[%s4328_s10 + $0x540] sm:$0xf]  ;;  %v582_v41 = vld [vmem:[%s4328_s10 + $0x548] sm:$0xf]  ;;  %579 = vst [vmem:[%s4335_s11 + $0x29c] sm:$0xf] %v578_v39 }
  0x84   : > { %581 = vst [vmem:[%s4335_s11 + $0x2a0] sm:$0xf] %v580_v40  ;;  %583 = vst [vmem:[%s4335_s11 + $0x2a4] sm:$0xf] %v582_v41  ;;  %v584_v42 = vld [vmem:[%s4328_s10 + $0x550] sm:$0xf] }
  0x85   : > { %v586_v43 = vld [vmem:[%s4328_s10 + $0x558] sm:$0xf]  ;;  %v588_v44 = vld [vmem:[%s4328_s10 + $0x560] sm:$0xf]  ;;  %585 = vst [vmem:[%s4335_s11 + $0x2a8] sm:$0xf] %v584_v42 }
  0x86   : > { %587 = vst [vmem:[%s4335_s11 + $0x2ac] sm:$0xf] %v586_v43  ;;  %589 = vst [vmem:[%s4335_s11 + $0x2b0] sm:$0xf] %v588_v44  ;;  %v590_v45 = vld [vmem:[%s4328_s10 + $0x568] sm:$0xf] }
  0x87   : > { %v592_v46 = vld [vmem:[%s4328_s10 + $0x570] sm:$0xf]  ;;  %v594_v47 = vld [vmem:[%s4328_s10 + $0x578] sm:$0xf]  ;;  %591 = vst [vmem:[%s4335_s11 + $0x2b4] sm:$0xf] %v590_v45 }
  0x88   : > { %593 = vst [vmem:[%s4335_s11 + $0x2b8] sm:$0xf] %v592_v46  ;;  %595 = vst [vmem:[%s4335_s11 + $0x2bc] sm:$0xf] %v594_v47  ;;  %v596_v48 = vld [vmem:[%s4328_s10 + $0x580] sm:$0xf] }
  0x89   : > { %v598_v49 = vld [vmem:[%s4328_s10 + $0x588] sm:$0xf]  ;;  %v600_v50 = vld [vmem:[%s4328_s10 + $0x590] sm:$0xf]  ;;  %597 = vst [vmem:[%s4335_s11 + $0x2c0] sm:$0xf] %v596_v48 }
  0x8a   : > { %599 = vst [vmem:[%s4335_s11 + $0x2c4] sm:$0xf] %v598_v49  ;;  %601 = vst [vmem:[%s4335_s11 + $0x2c8] sm:$0xf] %v600_v50  ;;  %v602_v51 = vld [vmem:[%s4328_s10 + $0x598] sm:$0xf] }
  0x8b   : > { %v604_v52 = vld [vmem:[%s4328_s10 + $0x5a0] sm:$0xf]  ;;  %v606_v53 = vld [vmem:[%s4328_s10 + $0x5a8] sm:$0xf]  ;;  %603 = vst [vmem:[%s4335_s11 + $0x2cc] sm:$0xf] %v602_v51 }
  0x8c   : > { %605 = vst [vmem:[%s4335_s11 + $0x2d0] sm:$0xf] %v604_v52  ;;  %607 = vst [vmem:[%s4335_s11 + $0x2d4] sm:$0xf] %v606_v53  ;;  %v608_v54 = vld [vmem:[%s4328_s10 + $0x5b0] sm:$0xf] }
  0x8d   : > { %v610_v55 = vld [vmem:[%s4328_s10 + $0x5b8] sm:$0xf]  ;;  %v612_v56 = vld [vmem:[%s4328_s10 + $0x5c0] sm:$0xf]  ;;  %609 = vst [vmem:[%s4335_s11 + $0x2d8] sm:$0xf] %v608_v54 }
  0x8e   : > { %611 = vst [vmem:[%s4335_s11 + $0x2dc] sm:$0xf] %v610_v55  ;;  %613 = vst [vmem:[%s4335_s11 + $0x2e0] sm:$0xf] %v612_v56  ;;  %v614_v57 = vld [vmem:[%s4328_s10 + $0x5c8] sm:$0xf] }
  0x8f   : > { %v616_v58 = vld [vmem:[%s4328_s10 + $0x5d0] sm:$0xf]  ;;  %v618_v59 = vld [vmem:[%s4328_s10 + $0x5d8] sm:$0xf]  ;;  %615 = vst [vmem:[%s4335_s11 + $0x2e4] sm:$0xf] %v614_v57 }
  0x90   : > { %617 = vst [vmem:[%s4335_s11 + $0x2e8] sm:$0xf] %v616_v58  ;;  %619 = vst [vmem:[%s4335_s11 + $0x2ec] sm:$0xf] %v618_v59  ;;  %v620_v60 = vld [vmem:[%s4328_s10 + $0x5e0] sm:$0xf] }
  0x91   : > { %v622_v61 = vld [vmem:[%s4328_s10 + $0x5e8] sm:$0xf]  ;;  %v624_v62 = vld [vmem:[%s4328_s10 + $0x5f0] sm:$0xf]  ;;  %621 = vst [vmem:[%s4335_s11 + $0x2f0] sm:$0xf] %v620_v60 }
  0x92   : > { %623 = vst [vmem:[%s4335_s11 + $0x2f4] sm:$0xf] %v622_v61  ;;  %625 = vst [vmem:[%s4335_s11 + $0x2f8] sm:$0xf] %v624_v62  ;;  %v626_v63 = vld [vmem:[%s4328_s10 + $0x5f8] sm:$0xf] }
  0x93   : > { %v628_v0 = vld [vmem:[%s4328_s10 + $0x600] sm:$0xf]  ;;  %v630_v1 = vld [vmem:[%s4328_s10 + $0x608] sm:$0xf]  ;;  %627 = vst [vmem:[%s4335_s11 + $0x2fc] sm:$0xf] %v626_v63 }
  0x94   : > { %629 = vst [vmem:[%s4335_s11 + $0x300] sm:$0xf] %v628_v0  ;;  %631 = vst [vmem:[%s4335_s11 + $0x304] sm:$0xf] %v630_v1  ;;  %v632_v2 = vld [vmem:[%s4328_s10 + $0x610] sm:$0xf] }
  0x95   : > { %v634_v3 = vld [vmem:[%s4328_s10 + $0x618] sm:$0xf]  ;;  %v636_v4 = vld [vmem:[%s4328_s10 + $0x620] sm:$0xf]  ;;  %633 = vst [vmem:[%s4335_s11 + $0x308] sm:$0xf] %v632_v2 }
  0x96   : > { %635 = vst [vmem:[%s4335_s11 + $0x30c] sm:$0xf] %v634_v3  ;;  %637 = vst [vmem:[%s4335_s11 + $0x310] sm:$0xf] %v636_v4  ;;  %v638_v5 = vld [vmem:[%s4328_s10 + $0x628] sm:$0xf] }
  0x97   : > { %v640_v6 = vld [vmem:[%s4328_s10 + $0x630] sm:$0xf]  ;;  %v642_v7 = vld [vmem:[%s4328_s10 + $0x638] sm:$0xf]  ;;  %639 = vst [vmem:[%s4335_s11 + $0x314] sm:$0xf] %v638_v5 }
  0x98   : > { %641 = vst [vmem:[%s4335_s11 + $0x318] sm:$0xf] %v640_v6  ;;  %643 = vst [vmem:[%s4335_s11 + $0x31c] sm:$0xf] %v642_v7  ;;  %v644_v8 = vld [vmem:[%s4328_s10 + $0x640] sm:$0xf] }
  0x99   : > { %v646_v9 = vld [vmem:[%s4328_s10 + $0x648] sm:$0xf]  ;;  %v648_v10 = vld [vmem:[%s4328_s10 + $0x650] sm:$0xf]  ;;  %645 = vst [vmem:[%s4335_s11 + $0x320] sm:$0xf] %v644_v8 }
  0x9a   : > { %647 = vst [vmem:[%s4335_s11 + $0x324] sm:$0xf] %v646_v9  ;;  %649 = vst [vmem:[%s4335_s11 + $0x328] sm:$0xf] %v648_v10  ;;  %v650_v11 = vld [vmem:[%s4328_s10 + $0x658] sm:$0xf] }
  0x9b   : > { %v652_v12 = vld [vmem:[%s4328_s10 + $0x660] sm:$0xf]  ;;  %v654_v13 = vld [vmem:[%s4328_s10 + $0x668] sm:$0xf]  ;;  %651 = vst [vmem:[%s4335_s11 + $0x32c] sm:$0xf] %v650_v11 }
  0x9c   : > { %653 = vst [vmem:[%s4335_s11 + $0x330] sm:$0xf] %v652_v12  ;;  %655 = vst [vmem:[%s4335_s11 + $0x334] sm:$0xf] %v654_v13  ;;  %v656_v14 = vld [vmem:[%s4328_s10 + $0x670] sm:$0xf] }
  0x9d   : > { %v658_v15 = vld [vmem:[%s4328_s10 + $0x678] sm:$0xf]  ;;  %v660_v16 = vld [vmem:[%s4328_s10 + $0x680] sm:$0xf]  ;;  %657 = vst [vmem:[%s4335_s11 + $0x338] sm:$0xf] %v656_v14 }
  0x9e   : > { %659 = vst [vmem:[%s4335_s11 + $0x33c] sm:$0xf] %v658_v15  ;;  %661 = vst [vmem:[%s4335_s11 + $0x340] sm:$0xf] %v660_v16  ;;  %v662_v17 = vld [vmem:[%s4328_s10 + $0x688] sm:$0xf] }
  0x9f   : > { %v664_v18 = vld [vmem:[%s4328_s10 + $0x690] sm:$0xf]  ;;  %v666_v19 = vld [vmem:[%s4328_s10 + $0x698] sm:$0xf]  ;;  %663 = vst [vmem:[%s4335_s11 + $0x344] sm:$0xf] %v662_v17 }
  0xa0   : > { %665 = vst [vmem:[%s4335_s11 + $0x348] sm:$0xf] %v664_v18  ;;  %667 = vst [vmem:[%s4335_s11 + $0x34c] sm:$0xf] %v666_v19  ;;  %v668_v20 = vld [vmem:[%s4328_s10 + $0x6a0] sm:$0xf] }
  0xa1   : > { %v670_v21 = vld [vmem:[%s4328_s10 + $0x6a8] sm:$0xf]  ;;  %v672_v22 = vld [vmem:[%s4328_s10 + $0x6b0] sm:$0xf]  ;;  %669 = vst [vmem:[%s4335_s11 + $0x350] sm:$0xf] %v668_v20 }
  0xa2   : > { %671 = vst [vmem:[%s4335_s11 + $0x354] sm:$0xf] %v670_v21  ;;  %673 = vst [vmem:[%s4335_s11 + $0x358] sm:$0xf] %v672_v22  ;;  %v674_v23 = vld [vmem:[%s4328_s10 + $0x6b8] sm:$0xf] }
  0xa3   : > { %v676_v24 = vld [vmem:[%s4328_s10 + $0x6c0] sm:$0xf]  ;;  %v678_v25 = vld [vmem:[%s4328_s10 + $0x6c8] sm:$0xf]  ;;  %675 = vst [vmem:[%s4335_s11 + $0x35c] sm:$0xf] %v674_v23 }
  0xa4   : > { %677 = vst [vmem:[%s4335_s11 + $0x360] sm:$0xf] %v676_v24  ;;  %679 = vst [vmem:[%s4335_s11 + $0x364] sm:$0xf] %v678_v25  ;;  %v680_v26 = vld [vmem:[%s4328_s10 + $0x6d0] sm:$0xf] }
  0xa5   : > { %v682_v27 = vld [vmem:[%s4328_s10 + $0x6d8] sm:$0xf]  ;;  %v684_v28 = vld [vmem:[%s4328_s10 + $0x6e0] sm:$0xf]  ;;  %681 = vst [vmem:[%s4335_s11 + $0x368] sm:$0xf] %v680_v26 }
  0xa6   : > { %683 = vst [vmem:[%s4335_s11 + $0x36c] sm:$0xf] %v682_v27  ;;  %685 = vst [vmem:[%s4335_s11 + $0x370] sm:$0xf] %v684_v28  ;;  %v686_v29 = vld [vmem:[%s4328_s10 + $0x6e8] sm:$0xf] }
  0xa7   : > { %v688_v30 = vld [vmem:[%s4328_s10 + $0x6f0] sm:$0xf]  ;;  %v690_v31 = vld [vmem:[%s4328_s10 + $0x6f8] sm:$0xf]  ;;  %687 = vst [vmem:[%s4335_s11 + $0x374] sm:$0xf] %v686_v29 }
  0xa8   : > { %689 = vst [vmem:[%s4335_s11 + $0x378] sm:$0xf] %v688_v30  ;;  %691 = vst [vmem:[%s4335_s11 + $0x37c] sm:$0xf] %v690_v31  ;;  %v692_v32 = vld [vmem:[%s4328_s10 + $0x700] sm:$0xf] }
  0xa9   : > { %v694_v33 = vld [vmem:[%s4328_s10 + $0x708] sm:$0xf]  ;;  %v696_v34 = vld [vmem:[%s4328_s10 + $0x710] sm:$0xf]  ;;  %693 = vst [vmem:[%s4335_s11 + $0x380] sm:$0xf] %v692_v32 }
  0xaa   : > { %695 = vst [vmem:[%s4335_s11 + $0x384] sm:$0xf] %v694_v33  ;;  %697 = vst [vmem:[%s4335_s11 + $0x388] sm:$0xf] %v696_v34  ;;  %v698_v35 = vld [vmem:[%s4328_s10 + $0x718] sm:$0xf] }
  0xab   : > { %v700_v36 = vld [vmem:[%s4328_s10 + $0x720] sm:$0xf]  ;;  %v702_v37 = vld [vmem:[%s4328_s10 + $0x728] sm:$0xf]  ;;  %699 = vst [vmem:[%s4335_s11 + $0x38c] sm:$0xf] %v698_v35 }
  0xac   : > { %701 = vst [vmem:[%s4335_s11 + $0x390] sm:$0xf] %v700_v36  ;;  %703 = vst [vmem:[%s4335_s11 + $0x394] sm:$0xf] %v702_v37  ;;  %v704_v38 = vld [vmem:[%s4328_s10 + $0x730] sm:$0xf] }
  0xad   : > { %v706_v39 = vld [vmem:[%s4328_s10 + $0x738] sm:$0xf]  ;;  %v708_v40 = vld [vmem:[%s4328_s10 + $0x740] sm:$0xf]  ;;  %705 = vst [vmem:[%s4335_s11 + $0x398] sm:$0xf] %v704_v38 }
  0xae   : > { %707 = vst [vmem:[%s4335_s11 + $0x39c] sm:$0xf] %v706_v39  ;;  %709 = vst [vmem:[%s4335_s11 + $0x3a0] sm:$0xf] %v708_v40  ;;  %v710_v41 = vld [vmem:[%s4328_s10 + $0x748] sm:$0xf] }
  0xaf   : > { %v712_v42 = vld [vmem:[%s4328_s10 + $0x750] sm:$0xf]  ;;  %v714_v43 = vld [vmem:[%s4328_s10 + $0x758] sm:$0xf]  ;;  %711 = vst [vmem:[%s4335_s11 + $0x3a4] sm:$0xf] %v710_v41 }
  0xb0   : > { %713 = vst [vmem:[%s4335_s11 + $0x3a8] sm:$0xf] %v712_v42  ;;  %715 = vst [vmem:[%s4335_s11 + $0x3ac] sm:$0xf] %v714_v43  ;;  %v716_v44 = vld [vmem:[%s4328_s10 + $0x760] sm:$0xf] }
  0xb1   : > { %v718_v45 = vld [vmem:[%s4328_s10 + $0x768] sm:$0xf]  ;;  %v720_v46 = vld [vmem:[%s4328_s10 + $0x770] sm:$0xf]  ;;  %717 = vst [vmem:[%s4335_s11 + $0x3b0] sm:$0xf] %v716_v44 }
  0xb2   : > { %719 = vst [vmem:[%s4335_s11 + $0x3b4] sm:$0xf] %v718_v45  ;;  %721 = vst [vmem:[%s4335_s11 + $0x3b8] sm:$0xf] %v720_v46  ;;  %v722_v47 = vld [vmem:[%s4328_s10 + $0x778] sm:$0xf] }
  0xb3   : > { %v724_v48 = vld [vmem:[%s4328_s10 + $0x780] sm:$0xf]  ;;  %v726_v49 = vld [vmem:[%s4328_s10 + $0x788] sm:$0xf]  ;;  %723 = vst [vmem:[%s4335_s11 + $0x3bc] sm:$0xf] %v722_v47 }
  0xb4   : > { %725 = vst [vmem:[%s4335_s11 + $0x3c0] sm:$0xf] %v724_v48  ;;  %727 = vst [vmem:[%s4335_s11 + $0x3c4] sm:$0xf] %v726_v49  ;;  %v728_v50 = vld [vmem:[%s4328_s10 + $0x790] sm:$0xf] }
  0xb5   : > { %v730_v51 = vld [vmem:[%s4328_s10 + $0x798] sm:$0xf]  ;;  %v732_v52 = vld [vmem:[%s4328_s10 + $0x7a0] sm:$0xf]  ;;  %729 = vst [vmem:[%s4335_s11 + $0x3c8] sm:$0xf] %v728_v50 }
  0xb6   : > { %731 = vst [vmem:[%s4335_s11 + $0x3cc] sm:$0xf] %v730_v51  ;;  %733 = vst [vmem:[%s4335_s11 + $0x3d0] sm:$0xf] %v732_v52  ;;  %v734_v53 = vld [vmem:[%s4328_s10 + $0x7a8] sm:$0xf] }
  0xb7   : > { %v736_v54 = vld [vmem:[%s4328_s10 + $0x7b0] sm:$0xf]  ;;  %v738_v55 = vld [vmem:[%s4328_s10 + $0x7b8] sm:$0xf]  ;;  %735 = vst [vmem:[%s4335_s11 + $0x3d4] sm:$0xf] %v734_v53 }
  0xb8   : > { %737 = vst [vmem:[%s4335_s11 + $0x3d8] sm:$0xf] %v736_v54  ;;  %739 = vst [vmem:[%s4335_s11 + $0x3dc] sm:$0xf] %v738_v55  ;;  %v740_v56 = vld [vmem:[%s4328_s10 + $0x7c0] sm:$0xf] }
  0xb9   : > { %v742_v57 = vld [vmem:[%s4328_s10 + $0x7c8] sm:$0xf]  ;;  %v744_v58 = vld [vmem:[%s4328_s10 + $0x7d0] sm:$0xf]  ;;  %741 = vst [vmem:[%s4335_s11 + $0x3e0] sm:$0xf] %v740_v56 }
  0xba   : > { %743 = vst [vmem:[%s4335_s11 + $0x3e4] sm:$0xf] %v742_v57  ;;  %745 = vst [vmem:[%s4335_s11 + $0x3e8] sm:$0xf] %v744_v58  ;;  %v746_v59 = vld [vmem:[%s4328_s10 + $0x7d8] sm:$0xf] }
  0xbb   : > { %v748_v60 = vld [vmem:[%s4328_s10 + $0x7e0] sm:$0xf]  ;;  %v750_v61 = vld [vmem:[%s4328_s10 + $0x7e8] sm:$0xf]  ;;  %747 = vst [vmem:[%s4335_s11 + $0x3ec] sm:$0xf] %v746_v59 }
  0xbc   : > { %749 = vst [vmem:[%s4335_s11 + $0x3f0] sm:$0xf] %v748_v60  ;;  %751 = vst [vmem:[%s4335_s11 + $0x3f4] sm:$0xf] %v750_v61  ;;  %v752_v62 = vld [vmem:[%s4328_s10 + $0x7f0] sm:$0xf] }
  0xbd   : > { %v754_v63 = vld [vmem:[%s4328_s10 + $0x7f8] sm:$0xf]  ;;  %v756_v0 = vld [vmem:[%s4328_s10 + $0x800] sm:$0xf]  ;;  %753 = vst [vmem:[%s4335_s11 + $0x3f8] sm:$0xf] %v752_v62 }
  0xbe   : > { %755 = vst [vmem:[%s4335_s11 + $0x3fc] sm:$0xf] %v754_v63  ;;  %757 = vst [vmem:[%s4335_s11 + $0x400] sm:$0xf] %v756_v0  ;;  %v758_v1 = vld [vmem:[%s4328_s10 + $0x808] sm:$0xf] }
  0xbf   : > { %v760_v2 = vld [vmem:[%s4328_s10 + $0x810] sm:$0xf]  ;;  %v762_v3 = vld [vmem:[%s4328_s10 + $0x818] sm:$0xf]  ;;  %759 = vst [vmem:[%s4335_s11 + $0x404] sm:$0xf] %v758_v1 }
  0xc0   : > { %761 = vst [vmem:[%s4335_s11 + $0x408] sm:$0xf] %v760_v2  ;;  %763 = vst [vmem:[%s4335_s11 + $0x40c] sm:$0xf] %v762_v3  ;;  %v764_v4 = vld [vmem:[%s4328_s10 + $0x820] sm:$0xf] }
  0xc1   : > { %v766_v5 = vld [vmem:[%s4328_s10 + $0x828] sm:$0xf]  ;;  %v768_v6 = vld [vmem:[%s4328_s10 + $0x830] sm:$0xf]  ;;  %765 = vst [vmem:[%s4335_s11 + $0x410] sm:$0xf] %v764_v4 }
  0xc2   : > { %767 = vst [vmem:[%s4335_s11 + $0x414] sm:$0xf] %v766_v5  ;;  %769 = vst [vmem:[%s4335_s11 + $0x418] sm:$0xf] %v768_v6  ;;  %v770_v7 = vld [vmem:[%s4328_s10 + $0x838] sm:$0xf] }
  0xc3   : > { %v772_v8 = vld [vmem:[%s4328_s10 + $0x840] sm:$0xf]  ;;  %v774_v9 = vld [vmem:[%s4328_s10 + $0x848] sm:$0xf]  ;;  %771 = vst [vmem:[%s4335_s11 + $0x41c] sm:$0xf] %v770_v7 }
  0xc4   : > { %773 = vst [vmem:[%s4335_s11 + $0x420] sm:$0xf] %v772_v8  ;;  %775 = vst [vmem:[%s4335_s11 + $0x424] sm:$0xf] %v774_v9  ;;  %v776_v10 = vld [vmem:[%s4328_s10 + $0x850] sm:$0xf] }
  0xc5   : > { %v778_v11 = vld [vmem:[%s4328_s10 + $0x858] sm:$0xf]  ;;  %v780_v12 = vld [vmem:[%s4328_s10 + $0x860] sm:$0xf]  ;;  %777 = vst [vmem:[%s4335_s11 + $0x428] sm:$0xf] %v776_v10 }
  0xc6   : > { %779 = vst [vmem:[%s4335_s11 + $0x42c] sm:$0xf] %v778_v11  ;;  %781 = vst [vmem:[%s4335_s11 + $0x430] sm:$0xf] %v780_v12  ;;  %v782_v13 = vld [vmem:[%s4328_s10 + $0x868] sm:$0xf] }
  0xc7   : > { %v784_v14 = vld [vmem:[%s4328_s10 + $0x870] sm:$0xf]  ;;  %v786_v15 = vld [vmem:[%s4328_s10 + $0x878] sm:$0xf]  ;;  %783 = vst [vmem:[%s4335_s11 + $0x434] sm:$0xf] %v782_v13 }
  0xc8   : > { %785 = vst [vmem:[%s4335_s11 + $0x438] sm:$0xf] %v784_v14  ;;  %787 = vst [vmem:[%s4335_s11 + $0x43c] sm:$0xf] %v786_v15  ;;  %v788_v16 = vld [vmem:[%s4328_s10 + $0x880] sm:$0xf] }
  0xc9   : > { %v790_v17 = vld [vmem:[%s4328_s10 + $0x888] sm:$0xf]  ;;  %v792_v18 = vld [vmem:[%s4328_s10 + $0x890] sm:$0xf]  ;;  %789 = vst [vmem:[%s4335_s11 + $0x440] sm:$0xf] %v788_v16 }
  0xca   : > { %791 = vst [vmem:[%s4335_s11 + $0x444] sm:$0xf] %v790_v17  ;;  %793 = vst [vmem:[%s4335_s11 + $0x448] sm:$0xf] %v792_v18  ;;  %v794_v19 = vld [vmem:[%s4328_s10 + $0x898] sm:$0xf] }
  0xcb   : > { %v796_v20 = vld [vmem:[%s4328_s10 + $0x8a0] sm:$0xf]  ;;  %v798_v21 = vld [vmem:[%s4328_s10 + $0x8a8] sm:$0xf]  ;;  %795 = vst [vmem:[%s4335_s11 + $0x44c] sm:$0xf] %v794_v19 }
  0xcc   : > { %797 = vst [vmem:[%s4335_s11 + $0x450] sm:$0xf] %v796_v20  ;;  %799 = vst [vmem:[%s4335_s11 + $0x454] sm:$0xf] %v798_v21  ;;  %v800_v22 = vld [vmem:[%s4328_s10 + $0x8b0] sm:$0xf] }
  0xcd   : > { %v802_v23 = vld [vmem:[%s4328_s10 + $0x8b8] sm:$0xf]  ;;  %v804_v24 = vld [vmem:[%s4328_s10 + $0x8c0] sm:$0xf]  ;;  %801 = vst [vmem:[%s4335_s11 + $0x458] sm:$0xf] %v800_v22 }
  0xce   : > { %803 = vst [vmem:[%s4335_s11 + $0x45c] sm:$0xf] %v802_v23  ;;  %805 = vst [vmem:[%s4335_s11 + $0x460] sm:$0xf] %v804_v24  ;;  %v806_v25 = vld [vmem:[%s4328_s10 + $0x8c8] sm:$0xf] }
  0xcf   : > { %v808_v26 = vld [vmem:[%s4328_s10 + $0x8d0] sm:$0xf]  ;;  %v810_v27 = vld [vmem:[%s4328_s10 + $0x8d8] sm:$0xf]  ;;  %807 = vst [vmem:[%s4335_s11 + $0x464] sm:$0xf] %v806_v25 }
  0xd0   : > { %809 = vst [vmem:[%s4335_s11 + $0x468] sm:$0xf] %v808_v26  ;;  %811 = vst [vmem:[%s4335_s11 + $0x46c] sm:$0xf] %v810_v27  ;;  %v812_v28 = vld [vmem:[%s4328_s10 + $0x8e0] sm:$0xf] }
  0xd1   : > { %v814_v29 = vld [vmem:[%s4328_s10 + $0x8e8] sm:$0xf]  ;;  %v816_v30 = vld [vmem:[%s4328_s10 + $0x8f0] sm:$0xf]  ;;  %813 = vst [vmem:[%s4335_s11 + $0x470] sm:$0xf] %v812_v28 }
  0xd2   : > { %815 = vst [vmem:[%s4335_s11 + $0x474] sm:$0xf] %v814_v29  ;;  %817 = vst [vmem:[%s4335_s11 + $0x478] sm:$0xf] %v816_v30  ;;  %v818_v31 = vld [vmem:[%s4328_s10 + $0x8f8] sm:$0xf] }
  0xd3   : > { %819 = vst [vmem:[%s4335_s11 + $0x47c] sm:$0xf] %v818_v31 }
  0xd4 PF: > { %1425 = sbr.rel (!%p4306_p3) target bundleno = 226 (0xe2), region = 73  ;;  %s1427_s12 = sand.u32 (%p4306_p3), 1, %s4228_s19  }
  0xd5   : > { %s3562_s13 = sshll.u32 (%p4306_p3), %s4236_s21, 2  ;;  %s3561_s14 = sshll.u32 (%p4306_p3), %s1427_s12, 6 }
  0xd6   : > { %s4915_s17 = scalar_lea.vmem (%p4306_p3), %s5184_s4, %s3562_s13  ;;  %s1429_s24 = scalar_lea.vmem (%p4306_p3), [#allocation3], %s3561_s14 }
  0xd7   : > { %v1448_v32 = vld [vmem:[%s4915_s17] sm:$0xf] (%p4306_p3)  ;;  %v1450_v33 = vld [vmem:[%s4915_s17 + $0x8] sm:$0xf] (%p4306_p3)  ;;  %v1452_v34 = vld [vmem:[%s4915_s17 + $0x10] sm:$0xf] (%p4306_p3) }
  0xd8   : > { %1449 = vst [vmem:[%s1429_s24] sm:$0xf] (%p4306_p3), %v1448_v32  ;;  %1451 = vst [vmem:[%s1429_s24 + $0x4] sm:$0xf] (%p4306_p3), %v1450_v33  ;;  %v1454_v35 = vld [vmem:[%s4915_s17 + $0x18] sm:$0xf] (%p4306_p3) }
  0xd9   : > { %v1456_v36 = vld [vmem:[%s4915_s17 + $0x20] sm:$0xf]  ;;  %1453 = vst [vmem:[%s1429_s24 + $0x8] sm:$0xf] %v1452_v34  ;;  %1455 = vst [vmem:[%s1429_s24 + $0xc] sm:$0xf] %v1454_v35 }
  0xda   : > { %1457 = vst [vmem:[%s1429_s24 + $0x10] sm:$0xf] %v1456_v36  ;;  %v1458_v37 = vld [vmem:[%s4915_s17 + $0x28] sm:$0xf]  ;;  %v1460_v38 = vld [vmem:[%s4915_s17 + $0x30] sm:$0xf] }
  0xdb   : > { %v1462_v39 = vld [vmem:[%s4915_s17 + $0x38] sm:$0xf]  ;;  %1459 = vst [vmem:[%s1429_s24 + $0x14] sm:$0xf] %v1458_v37  ;;  %1461 = vst [vmem:[%s1429_s24 + $0x18] sm:$0xf] %v1460_v38 }
  0xdc   : > { %1463 = vst [vmem:[%s1429_s24 + $0x1c] sm:$0xf] %v1462_v39  ;;  %v1464_v40 = vld [vmem:[%s4915_s17 + $0x40] sm:$0xf]  ;;  %v1466_v41 = vld [vmem:[%s4915_s17 + $0x48] sm:$0xf] }
  0xdd   : > { %v1468_v42 = vld [vmem:[%s4915_s17 + $0x50] sm:$0xf]  ;;  %1465 = vst [vmem:[%s1429_s24 + $0x20] sm:$0xf] %v1464_v40  ;;  %1467 = vst [vmem:[%s1429_s24 + $0x24] sm:$0xf] %v1466_v41 }
  0xde   : > { %1469 = vst [vmem:[%s1429_s24 + $0x28] sm:$0xf] %v1468_v42  ;;  %v1470_v43 = vld [vmem:[%s4915_s17 + $0x58] sm:$0xf]  ;;  %v1472_v44 = vld [vmem:[%s4915_s17 + $0x60] sm:$0xf] }
  0xdf   : > { %v1474_v45 = vld [vmem:[%s4915_s17 + $0x68] sm:$0xf]  ;;  %1471 = vst [vmem:[%s1429_s24 + $0x2c] sm:$0xf] %v1470_v43  ;;  %1473 = vst [vmem:[%s1429_s24 + $0x30] sm:$0xf] %v1472_v44 }
  0xe0   : > { %1475 = vst [vmem:[%s1429_s24 + $0x34] sm:$0xf] %v1474_v45  ;;  %v1476_v46 = vld [vmem:[%s4915_s17 + $0x70] sm:$0xf]  ;;  %v1478_v47 = vld [vmem:[%s4915_s17 + $0x78] sm:$0xf] }
  0xe1   : > { %1477 = vst [vmem:[%s1429_s24 + $0x38] sm:$0xf] %v1476_v46  ;;  %1479 = vst [vmem:[%s1429_s24 + $0x3c] sm:$0xf] %v1478_v47 }
  0xe2 PF: > { %p3563_p8 = scmp.ge.s32.totalorder %s4240_s22, 1  ;;  %p1534_p9 = scmp.lt.s32.totalorder %s4240_s22, 3 }
  0xe4   : > { %p1535_p10 = pnand %p3563_p8, %p1534_p9 }
  0xe5   : > { %s4936_s25 = sand.u32 (!%p1535_p10), 1, %s4224_s18   ;;  %p1599_p11 = scmp.lt.s32.totalorder (!%p1535_p10), %s4232_s20, 1 }
  0xe6   : > { %1538 = sbr.rel (%p1535_p10) target bundleno = 616 (0x268), region = 114  ;;  %s3564_s27 = sshll.u32 (!%p1535_p10), %s4936_s25, 6 }
  0xe7   : > { %s3979_s26 = smul.u32 (!%p1535_p10), 1152, %s4936_s25  ;;  %s4943_s7 = scalar_lea.vmem (!%p1535_p10), [#allocation3], %s3564_s27 }
  0xe8   : > { %s3565_s15 = sshll.u32 (!%p1535_p10), %s4936_s25, 3 }
  0xe9   : > { %s4946_s18 = scalar_lea.vmem (!%p1535_p10), [#allocation2], %s3979_s26  ;;  %s1591_s16 = scalar_lea.vmem (!%p1535_p10), [#allocation4], %s3565_s15 }
  0xeb   : > { %v4242_v48 = vmov 0.0   ;;  %vm4243_vm0 = vmmov 0   ;;  %v4050_v49 = vld [vmem:[%s5180_s0 + $0x4] ss:$72 sps:$4 sm:$0xff]   ;;  %v4022_v50 = vld [vmem:[%s4943_s7 + $0x38] sm:$0xff]   ;;  %v4025_v53 = vld [vmem:[%s4943_s7 + $0x30] sm:$0xff]  }
  0xec   : > { %3958 = vmatprep.subr.bf16.mxu0 %v4242_v48  ;;  %3974 = vmatprep.mubr.msk.bf16.mxu0 %vm4243_vm0, %v4242_v48  ;;  %v4023_v51 = vld [vmem:[%s4946_s18 + $0x78] sm:$0xff]   ;;  %v4026_v54 = vld [vmem:[%s4946_s18 + $0x70] sm:$0xff]   ;;  %v4028_v56 = vld [vmem:[%s4943_s7 + $0x28] sm:$0xff]   ;;  %s3741_s17 = sshll.u32 (%p4313_p6), %s4232_s20, 2 }
  0xed   : > { %3015 = vmatprep.mubr.bf16.mxu1 %v4050_v49  ;;  %3959 = vmatpush3.bf16.msra.mxu0 %v4022_v50  ;;  %v4024_v52 = vld [vmem:[%s4946_s18 + $0x38] sm:$0xff]   ;;  %v4027_v55 = vld [vmem:[%s4946_s18 + $0x30] sm:$0xff]   ;;  %v4029_v57 = vld [vmem:[%s4946_s18 + $0x68] sm:$0xff]   ;;  %s3384_s27 = scalar_lea.vmem (%p4313_p6), %s5185_s5, %s3741_s17 }
  0xee   : > { %3760 = vmatprep.subr.bf16.mxu1 %v4023_v51  ;;  %3960 = vmatprep.subr.bf16.mxu0 %v4242_v48  ;;  %v4030_v58 = vld [vmem:[%s4946_s18 + $0x28] sm:$0xff]   ;;  %v4031_v59 = vld [vmem:[%s4943_s7 + $0x20] sm:$0xff]   ;;  %v4035_v62 = vld [vmem:[%s4946_s18 + $0x58] sm:$0xff]  }
  0xef   : > { %3761 = vmatpush3.bf16.msra.mxu1 %v4024_v52  ;;  %v4032_v60 = vld [vmem:[%s4946_s18 + $0x60] sm:$0xff]   ;;  %v4034_v63 = vld [vmem:[%s4943_s7 + $0x18] sm:$0xff]   ;;  %v4038_v1 = vld [vmem:[%s4946_s18 + $0x50] sm:$0xff]  }
  0xf0   : > { %3762 = vmatprep.subr.bf16.mxu1 %v4026_v54  ;;  %v4033_v61 = vld [vmem:[%s4946_s18 + $0x20] sm:$0xff]   ;;  %v4036_v0 = vld [vmem:[%s4946_s18 + $0x18] sm:$0xff]   ;;  %v4037_v2 = vld [vmem:[%s4943_s7 + $0x10] sm:$0xff]  }
  0xf1   : > { %3961 = vmatpush3.bf16.msra.mxu0 %v4025_v53  ;;  %v4039_v3 = vld [vmem:[%s4946_s18 + $0x10] sm:$0xff]   ;;  %v4041_v4 = vld [vmem:[%s4946_s18 + $0x48] sm:$0xff]   ;;  %v4043_v7 = vld [vmem:[%s4943_s7] sm:$0xff]  }
  0xf2   : > { %3962 = vmatprep.subr.bf16.mxu0 %v4242_v48  ;;  %v4040_v5 = vld [vmem:[%s4943_s7 + $0x8] sm:$0xff]   ;;  %v4044_v8 = vld [vmem:[%s4946_s18 + $0x40] sm:$0xff]   ;;  %v4047_v11 = vld [vmem:[%s4946_s18 + $0xf8] sm:$0xff]  }
  0xf3   : > { %3763 = vmatpush3.bf16.msra.mxu1 %v4027_v55  ;;  %v4042_v6 = vld [vmem:[%s4946_s18 + $0x8] sm:$0xff]   ;;  %v4045_v9 = vld [vmem:[%s4946_s18] sm:$0xff]   ;;  %v4051_v12 = vld [vmem:[%s4946_s18 + $0xb8] sm:$0xff]  }
  0xf4   : > { %3764 = vmatprep.subr.bf16.mxu1 %v4029_v57  ;;  %v4046_v10 = vld [vmem:[%s5183_s3] sm:$0xff]   ;;  %v4052_v14 = vld [vmem:[%s4946_s18 + $0x178] sm:$0xff]   ;;  %v4054_v16 = vld [vmem:[%s4946_s18 + $0xf0] sm:$0xff]  }
  0xf5   : > { %3963 = vmatpush3.bf16.msra.mxu0 %v4028_v56  ;;  %v4048_v13 = vld [vmem:[%s5180_s0] ss:$72 sps:$4 sm:$0xff]   ;;  %v4053_v15 = vld [vmem:[%s4946_s18 + $0x138] sm:$0xff]   ;;  %v4055_v17 = vld [vmem:[%s4946_s18 + $0xb0] sm:$0xff]  }
  0xf6   : > { %3964 = vmatprep.subr.bf16.mxu0 %v4242_v48  ;;  %v4056_v18 = vld [vmem:[%s4946_s18 + $0x170] sm:$0xff]   ;;  %v4058_v20 = vld [vmem:[%s4946_s18 + $0xe8] sm:$0xff]   ;;  %v4062_v24 = vld [vmem:[%s4946_s18 + $0xe0] sm:$0xff]  }
  0xf7   : > { %3765 = vmatpush3.bf16.msra.mxu1 %v4030_v58  ;;  %v4057_v19 = vld [vmem:[%s4946_s18 + $0x130] sm:$0xff]   ;;  %v4059_v21 = vld [vmem:[%s4946_s18 + $0xa8] sm:$0xff]   ;;  %v4063_v25 = vld [vmem:[%s4946_s18 + $0xa0] sm:$0xff]  }
  0xf8   : > { %3766 = vmatprep.subr.bf16.mxu1 %v4032_v60  ;;  %v4060_v22 = vld [vmem:[%s4946_s18 + $0x168] sm:$0xff]   ;;  %v4064_v26 = vld [vmem:[%s4946_s18 + $0x160] sm:$0xff]   ;;  %v4066_v28 = vld [vmem:[%s4946_s18 + $0xd8] sm:$0xff]  }
  0xf9   : > { %3965 = vmatpush3.bf16.msra.mxu0 %v4031_v59  ;;  %v4061_v23 = vld [vmem:[%s4946_s18 + $0x128] sm:$0xff]   ;;  %v4065_v27 = vld [vmem:[%s4946_s18 + $0x120] sm:$0xff]   ;;  %v4067_v29 = vld [vmem:[%s4946_s18 + $0x98] sm:$0xff]  }
  0xfa   : > { %3966 = vmatprep.subr.bf16.mxu0 %v4242_v48  ;;  %v4068_v30 = vld [vmem:[%s4946_s18 + $0x158] sm:$0xff]   ;;  %v4070_v32 = vld [vmem:[%s4946_s18 + $0xd0] sm:$0xff]   ;;  %v4074_v36 = vld [vmem:[%s4946_s18 + $0xc8] sm:$0xff]  }
  0xfb   : > { %3767 = vmatpush3.bf16.msra.mxu1 %v4033_v61  ;;  %v4069_v31 = vld [vmem:[%s4946_s18 + $0x118] sm:$0xff]   ;;  %v4071_v33 = vld [vmem:[%s4946_s18 + $0x90] sm:$0xff]   ;;  %v4075_v37 = vld [vmem:[%s4946_s18 + $0x88] sm:$0xff]  }
  0xfc   : > { %3768 = vmatprep.subr.bf16.mxu1 %v4035_v62  ;;  %v4072_v34 = vld [vmem:[%s4946_s18 + $0x150] sm:$0xff]   ;;  %v4076_v38 = vld [vmem:[%s4946_s18 + $0x148] sm:$0xff]   ;;  %v4078_v40 = vld [vmem:[%s4946_s18 + $0xc0] sm:$0xff]  }
  0xfd   : > { %3967 = vmatpush3.bf16.msra.mxu0 %v4034_v63  ;;  %v4073_v35 = vld [vmem:[%s4946_s18 + $0x110] sm:$0xff]   ;;  %v4077_v39 = vld [vmem:[%s4946_s18 + $0x108] sm:$0xff]   ;;  %v4079_v42 = vld [vmem:[%s4946_s18 + $0x80] sm:$0xff]  }
  0xfe   : > { %3968 = vmatprep.subr.bf16.mxu0 %v4242_v48  ;;  %v4083_v41 = vld [vmem:[%s5180_s0 + $0xc] ss:$72 sps:$4 sm:$0xff]   ;;  %v4080_v43 = vld [vmem:[%s4946_s18 + $0x140] sm:$0xff]   ;;  %v4085_v44 = vld [vmem:[%s4946_s18 + $0x1f8] sm:$0xff]  }
  0xff   : > { %3769 = vmatpush3.bf16.msra.mxu1 %v4036_v0  ;;  %v4081_v45 = vld [vmem:[%s5180_s0 + $0x8] ss:$72 sps:$4 sm:$0xff]   ;;  %v4088_v46 = vld [vmem:[%s5180_s0 + $0x14] ss:$72 sps:$4 sm:$0xff]   ;;  %v4084_v47 = vld [vmem:[%s4946_s18 + $0x100] sm:$0xff]  }
 0x100   : > { %3770 = vmatprep.subr.bf16.mxu1 %v4038_v1  ;;  %v4090_v49 = vld [vmem:[%s4946_s18 + $0x278] sm:$0xff]   ;;  %v4092_v51 = vld [vmem:[%s4946_s18 + $0x1f0] sm:$0xff]   ;;  %v4096_v55 = vld [vmem:[%s4946_s18 + $0x1e8] sm:$0xff]  }
 0x101   : > { %3969 = vmatpush3.bf16.msra.mxu0 %v4037_v2  ;;  %v4089_v50 = vld [vmem:[%s4946_s18 + $0x1b8] sm:$0xff]   ;;  %v4094_v53 = vld [vmem:[%s4946_s18 + $0x270] sm:$0xff]   ;;  %v4098_v57 = vld [vmem:[%s4946_s18 + $0x268] sm:$0xff]  }
 0x102   : > { %3970 = vmatprep.subr.bf16.mxu0 %v4242_v48  ;;  %v4091_v52 = vld [vmem:[%s4946_s18 + $0x238] sm:$0xff]   ;;  %v4093_v54 = vld [vmem:[%s4946_s18 + $0x1b0] sm:$0xff]   ;;  %v4097_v58 = vld [vmem:[%s4946_s18 + $0x1a8] sm:$0xff]  }
 0x103   : > { %3771 = vmatpush3.bf16.msra.mxu1 %v4039_v3  ;;  %v4095_v56 = vld [vmem:[%s4946_s18 + $0x230] sm:$0xff]   ;;  %v4100_v59 = vld [vmem:[%s4946_s18 + $0x1e0] sm:$0xff]   ;;  %v4099_v60 = vld [vmem:[%s4946_s18 + $0x228] sm:$0xff]  }
 0x104   : > { %3772 = vmatprep.subr.bf16.mxu1 %v4041_v4  ;;  %v4102_v61 = vld [vmem:[%s4946_s18 + $0x260] sm:$0xff]   ;;  %v4104_v63 = vld [vmem:[%s4946_s18 + $0x1d8] sm:$0xff]   ;;  %v4108_v3 = vld [vmem:[%s4946_s18 + $0x1d0] sm:$0xff]  }
 0x105   : > { %3971 = vmatpush3.bf16.msra.mxu0 %v4040_v5  ;;  %v4101_v62 = vld [vmem:[%s4946_s18 + $0x1a0] sm:$0xff]   ;;  %v4106_v1 = vld [vmem:[%s4946_s18 + $0x258] sm:$0xff]   ;;  %v4110_v5 = vld [vmem:[%s4946_s18 + $0x250] sm:$0xff]  }
 0x106   : > { %3972 = vmatprep.subr.bf16.mxu0 %v4242_v48  ;;  %v4086_v48 = vld [vmem:[%s5180_s0 + $0x10] ss:$72 sps:$4 sm:$0xff]   ;;  %v4103_v0 = vld [vmem:[%s4946_s18 + $0x220] sm:$0xff]  }
 0x107   : > { %3773 = vmatpush3.bf16.msra.mxu1 %v4042_v6  ;;  %v4105_v2 = vld [vmem:[%s4946_s18 + $0x198] sm:$0xff]   ;;  %v4109_v6 = vld [vmem:[%s4946_s18 + $0x190] sm:$0xff]  }
 0x108   : > { %3774 = vmatprep.subr.bf16.mxu1 %v4044_v8  ;;  %v4107_v4 = vld [vmem:[%s4946_s18 + $0x218] sm:$0xff]   ;;  %v4111_v8 = vld [vmem:[%s4946_s18 + $0x210] sm:$0xff]  }
 0x109   : > { %3973 = vmatpush3.bf16.msra.mxu0 %v4043_v7  ;;  %v4112_v7 = vld [vmem:[%s4946_s18 + $0x1c8] sm:$0xff]  }
 0x10a   : > { %3782 = vmatprep.subr.bf16.mxu0 %v4047_v11  ;;  %v4116_v11 = vld [vmem:[%s4946_s18 + $0x1c0] sm:$0xff]  }
 0x10b   : > { %3775 = vmatpush3.bf16.msra.mxu1 %v4045_v9  ;;  %v4114_v9 = vld [vmem:[%s4946_s18 + $0x248] sm:$0xff]  }
 0x10c   : > { %3975 = vmatmul.mubr.bf16.vlgmr.msra.gmra.mxu0 %v4046_v10  ;;  %3804 = vmatprep.subr.bf16.mxu1 %v4052_v14  ;;  %v4113_v10 = vld [vmem:[%s4946_s18 + $0x188] sm:$0xff]   ;;  %v4117_v14 = vld [vmem:[%s4946_s18 + $0x180] sm:$0xff]  }
 0x10d   : > { %3783 = vmatpush3.bf16.msra.mxu0 %v4051_v12  ;;  %3056 = vmatprep.mubr.bf16.mxu0 %v4083_v41  ;;  %v4115_v12 = vld [vmem:[%s4946_s18 + $0x208] sm:$0xff]   ;;  %v4147_v41 = vld [vmem:[%s4946_s18 + $0x290] sm:$0xff]  }
 0x10e   : > { %3016 = vmatmul.mubr.bf16.vlgmr.msra.gmra.mxu1 %v4048_v13  ;;  %3784 = vmatprep.subr.bf16.mxu0 %v4054_v16  ;;  %v4118_v13 = vld [vmem:[%s4946_s18 + $0x240] sm:$0xff]  }
 0x10f   : > { %3805 = vmatpush3.bf16.msra.mxu1 %v4053_v15  ;;  %3097 = vmatprep.mubr.bf16.mxu1 %v4088_v46  ;;  %v4121_v15 = vld [vmem:[%s5180_s0 + $0x1c] ss:$72 sps:$4 sm:$0xff]   ;;  %v4119_v16 = vld [vmem:[%s5180_s0 + $0x18] ss:$72 sps:$4 sm:$0xff]   ;;  %v4152_v46 = vld [vmem:[%s4946_s18 + $0x348] sm:$0xff]  }
 0x110   : > { %3806 = vmatprep.subr.bf16.mxu1 %v4056_v18  ;;  %v4123_v18 = vld [vmem:[%s4946_s18 + $0x2f8] sm:$0xff]  }
 0x111   : > { %3785 = vmatpush3.bf16.msra.mxu0 %v4055_v17  ;;  %v4122_v17 = vld [vmem:[%s4946_s18 + $0x200] sm:$0xff]  }
 0x112   : > { %3786 = vmatprep.subr.bf16.mxu0 %v4058_v20  ;;  %v4126_v20 = vld [vmem:[%s5180_s0 + $0x24] ss:$72 sps:$4 sm:$0xff]  }
 0x113   : > { %3807 = vmatpush3.bf16.msra.mxu1 %v4057_v19  ;;  %v4124_v19 = vld [vmem:[%s5180_s0 + $0x20] ss:$72 sps:$4 sm:$0xff]  }
 0x114   : > { %3808 = vmatprep.subr.bf16.mxu1 %v4060_v22  ;;  %v4128_v22 = vld [vmem:[%s4946_s18 + $0x378] sm:$0xff]  }
 0x115   : > { %3787 = vmatpush3.bf16.msra.mxu0 %v4059_v21  ;;  %v4127_v21 = vld [vmem:[%s4946_s18 + $0x2b8] sm:$0xff]  }
 0x116   : > { %3788 = vmatprep.subr.bf16.mxu0 %v4062_v24  ;;  %v4130_v24 = vld [vmem:[%s4946_s18 + $0x2f0] sm:$0xff]  }
 0x117   : > { %3809 = vmatpush3.bf16.msra.mxu1 %v4061_v23  ;;  %v4129_v23 = vld [vmem:[%s4946_s18 + $0x338] sm:$0xff]  }
 0x118   : > { %3810 = vmatprep.subr.bf16.mxu1 %v4064_v26  ;;  %v4132_v26 = vld [vmem:[%s4946_s18 + $0x370] sm:$0xff]  }
 0x119   : > { %3789 = vmatpush3.bf16.msra.mxu0 %v4063_v25  ;;  %v4131_v25 = vld [vmem:[%s4946_s18 + $0x2b0] sm:$0xff]  }
 0x11a   : > { %3790 = vmatprep.subr.bf16.mxu0 %v4066_v28  ;;  %v4134_v28 = vld [vmem:[%s4946_s18 + $0x2e8] sm:$0xff]  }
 0x11b   : > { %3811 = vmatpush3.bf16.msra.mxu1 %v4065_v27  ;;  %v4133_v27 = vld [vmem:[%s4946_s18 + $0x330] sm:$0xff]  }
 0x11c   : > { %3812 = vmatprep.subr.bf16.mxu1 %v4068_v30  ;;  %v4136_v30 = vld [vmem:[%s4946_s18 + $0x368] sm:$0xff]  }
 0x11d   : > { %3791 = vmatpush3.bf16.msra.mxu0 %v4067_v29  ;;  %v4135_v29 = vld [vmem:[%s4946_s18 + $0x2a8] sm:$0xff]  }
 0x11e   : > { %3792 = vmatprep.subr.bf16.mxu0 %v4070_v32  ;;  %v4138_v32 = vld [vmem:[%s4946_s18 + $0x2e0] sm:$0xff]  }
 0x11f   : > { %3813 = vmatpush3.bf16.msra.mxu1 %v4069_v31  ;;  %v4137_v31 = vld [vmem:[%s4946_s18 + $0x328] sm:$0xff]  }
 0x120   : > { %3814 = vmatprep.subr.bf16.mxu1 %v4072_v34  ;;  %v4140_v34 = vld [vmem:[%s4946_s18 + $0x360] sm:$0xff]  }
 0x121   : > { %3793 = vmatpush3.bf16.msra.mxu0 %v4071_v33  ;;  %v4139_v33 = vld [vmem:[%s4946_s18 + $0x2a0] sm:$0xff]  }
 0x122   : > { %3794 = vmatprep.subr.bf16.mxu0 %v4074_v36  ;;  %v4142_v36 = vld [vmem:[%s4946_s18 + $0x2d8] sm:$0xff]  }
 0x123   : > { %3815 = vmatpush3.bf16.msra.mxu1 %v4073_v35  ;;  %v4141_v35 = vld [vmem:[%s4946_s18 + $0x320] sm:$0xff]  }
 0x124   : > { %3816 = vmatprep.subr.bf16.mxu1 %v4076_v38  ;;  %v4144_v38 = vld [vmem:[%s4946_s18 + $0x358] sm:$0xff]  }
 0x125   : > { %3795 = vmatpush3.bf16.msra.mxu0 %v4075_v37  ;;  %v4143_v37 = vld [vmem:[%s4946_s18 + $0x298] sm:$0xff]  }
 0x126   : > { %3796 = vmatprep.subr.bf16.mxu0 %v4078_v40  ;;  %v4146_v40 = vld [vmem:[%s4946_s18 + $0x2d0] sm:$0xff]  }
 0x127   : > { %3817 = vmatpush3.bf16.msra.mxu1 %v4077_v39  ;;  %v4145_v39 = vld [vmem:[%s4946_s18 + $0x318] sm:$0xff]  }
 0x128   : > { %3818 = vmatprep.subr.bf16.mxu1 %v4080_v43  ;;  %v4149_v43 = vld [vmem:[%s4946_s18 + $0x310] sm:$0xff]  }
 0x129   : > { %3797 = vmatpush3.bf16.msra.mxu0 %v4079_v42  ;;  %v4148_v42 = vld [vmem:[%s4946_s18 + $0x350] sm:$0xff]  }
 0x12a   : > { %3826 = vmatprep.subr.bf16.mxu0 %v4085_v44  ;;  %v4150_v44 = vld [vmem:[%s4946_s18 + $0x2c8] sm:$0xff]  }
 0x12b   : > { %3819 = vmatpush3.bf16.msra.mxu1 %v4084_v47  ;;  %v4153_v47 = vld [vmem:[%s4946_s18 + $0x308] sm:$0xff]  }
 0x12c   : > { %3057 = vmatmul.mubr.bf16.vlgmr.msra.gmra.mxu0 %v4081_v45  ;;  %3848 = vmatprep.subr.bf16.mxu1 %v4090_v49  ;;  %v4151_v45 = vld [vmem:[%s4946_s18 + $0x288] sm:$0xff]   ;;  %v4155_v49 = vld [vmem:[%s4946_s18 + $0x280] sm:$0xff]  }
 0x12d   : > { %3827 = vmatpush3.bf16.msra.mxu0 %v4089_v50  ;;  %3138 = vmatprep.mubr.bf16.mxu0 %v4121_v15  ;;  %v4156_v50 = vld [vmem:[%s4946_s18 + $0x340] sm:$0xff]   ;;  %v4187_v15 = vld [vmem:[%s4946_s18 + $0x410] sm:$0xff]  }
 0x12e   : > { %3098 = vmatmul.mubr.bf16.vlgmr.msra.gmra.mxu1 %v4086_v48  ;;  %3828 = vmatprep.subr.bf16.mxu0 %v4092_v51  ;;  %v4154_v48 = vld [vmem:[%s4946_s18 + $0x2c0] sm:$0xff]   ;;  %v4157_v51 = vld [vmem:[%s5180_s0 + $0x28] ss:$72 sps:$4 sm:$0xff]  }
 0x12f   : > { %3849 = vmatpush3.bf16.msra.mxu1 %v4091_v52  ;;  %3179 = vmatprep.mubr.bf16.mxu1 %v4126_v20  ;;  %v4159_v52 = vld [vmem:[%s5180_s0 + $0x2c] ss:$72 sps:$4 sm:$0xff]   ;;  %v4192_v20 = vld [vmem:[%s4946_s18 + $0x3c0] sm:$0xff]  }
 0x130   : > { %3850 = vmatprep.subr.bf16.mxu1 %v4094_v53  ;;  %v4160_v53 = vld [vmem:[%s4946_s18 + $0x300] sm:$0xff]  }
 0x131   : > { %3829 = vmatpush3.bf16.msra.mxu0 %v4093_v54  ;;  %v4161_v54 = vld [vmem:[%s4946_s18 + $0x3f8] sm:$0xff]  }
 0x132   : > { %3830 = vmatprep.subr.bf16.mxu0 %v4096_v55  ;;  %v4162_v55 = vld [vmem:[%s5180_s0 + $0x30] ss:$72 sps:$4 sm:$0xff]  }
 0x133   : > { %3851 = vmatpush3.bf16.msra.mxu1 %v4095_v56  ;;  %v4164_v56 = vld [vmem:[%s5180_s0 + $0x34] ss:$72 sps:$4 sm:$0xff]  }
 0x134   : > { %3852 = vmatprep.subr.bf16.mxu1 %v4098_v57  ;;  %v4165_v57 = vld [vmem:[%s4946_s18 + $0x3b8] sm:$0xff]  }
 0x135   : > { %3831 = vmatpush3.bf16.msra.mxu0 %v4097_v58  ;;  %v4166_v58 = vld [vmem:[%s4946_s18 + $0x478] sm:$0xff]  }
 0x136   : > { %3832 = vmatprep.subr.bf16.mxu0 %v4100_v59  ;;  %v4167_v59 = vld [vmem:[%s4946_s18 + $0x438] sm:$0xff]  }
 0x137   : > { %3853 = vmatpush3.bf16.msra.mxu1 %v4099_v60  ;;  %v4168_v60 = vld [vmem:[%s4946_s18 + $0x3f0] sm:$0xff]  }
 0x138   : > { %3854 = vmatprep.subr.bf16.mxu1 %v4102_v61  ;;  %v4169_v61 = vld [vmem:[%s4946_s18 + $0x3b0] sm:$0xff]  }
 0x139   : > { %3833 = vmatpush3.bf16.msra.mxu0 %v4101_v62  ;;  %v4170_v62 = vld [vmem:[%s4946_s18 + $0x470] sm:$0xff]  }
 0x13a   : > { %3834 = vmatprep.subr.bf16.mxu0 %v4104_v63  ;;  %v4171_v63 = vld [vmem:[%s4946_s18 + $0x430] sm:$0xff]  }
 0x13b   : > { %3855 = vmatpush3.bf16.msra.mxu1 %v4103_v0  ;;  %v4172_v0 = vld [vmem:[%s4946_s18 + $0x3e8] sm:$0xff]  }
 0x13c   : > { %3856 = vmatprep.subr.bf16.mxu1 %v4106_v1  ;;  %v4173_v1 = vld [vmem:[%s4946_s18 + $0x3a8] sm:$0xff]  }
 0x13d   : > { %3835 = vmatpush3.bf16.msra.mxu0 %v4105_v2  ;;  %v4174_v2 = vld [vmem:[%s4946_s18 + $0x468] sm:$0xff]  }
 0x13e   : > { %3836 = vmatprep.subr.bf16.mxu0 %v4108_v3  ;;  %v4175_v3 = vld [vmem:[%s4946_s18 + $0x428] sm:$0xff]  }
 0x13f   : > { %3857 = vmatpush3.bf16.msra.mxu1 %v4107_v4  ;;  %v4176_v4 = vld [vmem:[%s4946_s18 + $0x3e0] sm:$0xff]  }
 0x140   : > { %3858 = vmatprep.subr.bf16.mxu1 %v4110_v5  ;;  %v4177_v5 = vld [vmem:[%s4946_s18 + $0x3a0] sm:$0xff]  }
 0x141   : > { %3837 = vmatpush3.bf16.msra.mxu0 %v4109_v6  ;;  %v4178_v6 = vld [vmem:[%s4946_s18 + $0x460] sm:$0xff]  }
 0x142   : > { %3838 = vmatprep.subr.bf16.mxu0 %v4112_v7  ;;  %v4179_v7 = vld [vmem:[%s4946_s18 + $0x420] sm:$0xff]  }
 0x143   : > { %3859 = vmatpush3.bf16.msra.mxu1 %v4111_v8  ;;  %v4180_v8 = vld [vmem:[%s4946_s18 + $0x3d8] sm:$0xff]  }
 0x144   : > { %3860 = vmatprep.subr.bf16.mxu1 %v4114_v9  ;;  %v4181_v9 = vld [vmem:[%s4946_s18 + $0x398] sm:$0xff]  }
 0x145   : > { %3839 = vmatpush3.bf16.msra.mxu0 %v4113_v10  ;;  %v4182_v10 = vld [vmem:[%s4946_s18 + $0x458] sm:$0xff]  }
 0x146   : > { %3840 = vmatprep.subr.bf16.mxu0 %v4116_v11  ;;  %v4183_v11 = vld [vmem:[%s4946_s18 + $0x418] sm:$0xff]  }
 0x147   : > { %3861 = vmatpush3.bf16.msra.mxu1 %v4115_v12  ;;  %v4184_v12 = vld [vmem:[%s4946_s18 + $0x3d0] sm:$0xff]  }
 0x148   : > { %3862 = vmatprep.subr.bf16.mxu1 %v4118_v13  ;;  %v4185_v13 = vld [vmem:[%s4946_s18 + $0x390] sm:$0xff]  }
 0x149   : > { %3841 = vmatpush3.bf16.msra.mxu0 %v4117_v14  ;;  %v4186_v14 = vld [vmem:[%s4946_s18 + $0x450] sm:$0xff]  }
 0x14a   : > { %3870 = vmatprep.subr.bf16.mxu0 %v4123_v18  ;;  %v4190_v18 = vld [vmem:[%s4946_s18 + $0x448] sm:$0xff]  }
 0x14b   : > { %3863 = vmatpush3.bf16.msra.mxu1 %v4122_v17  ;;  %v4189_v17 = vld [vmem:[%s4946_s18 + $0x388] sm:$0xff]  }
 0x14c   : > { %3139 = vmatmul.mubr.bf16.vlgmr.msra.gmra.mxu0 %v4119_v16  ;;  %3892 = vmatprep.subr.bf16.mxu1 %v4128_v22  ;;  %v4188_v16 = vld [vmem:[%s4946_s18 + $0x3c8] sm:$0xff]   ;;  %v4194_v22 = vld [vmem:[%s4946_s18 + $0x440] sm:$0xff]  }
 0x14d   : > { %3871 = vmatpush3.bf16.msra.mxu0 %v4127_v21  ;;  %3220 = vmatprep.mubr.bf16.mxu0 %v4159_v52  ;;  %v4193_v21 = vld [vmem:[%s4946_s18 + $0x380] sm:$0xff]  }
 0x14e   : > { %3180 = vmatmul.mubr.bf16.vlgmr.msra.gmra.mxu1 %v4124_v19  ;;  %3872 = vmatprep.subr.bf16.mxu0 %v4130_v24  ;;  %v4191_v19 = vld [vmem:[%s4946_s18 + $0x408] sm:$0xff]   ;;  %v4197_v24 = vld [vmem:[%s5180_s0 + $0x3c] ss:$72 sps:$4 sm:$0xff]  }
 0x14f   : > { %3893 = vmatpush3.bf16.msra.mxu1 %v4129_v23  ;;  %3261 = vmatprep.mubr.bf16.mxu1 %v4164_v56  ;;  %v4195_v23 = vld [vmem:[%s5180_s0 + $0x38] ss:$72 sps:$4 sm:$0xff]  }
 0x150   : > { %3894 = vmatprep.subr.bf16.mxu1 %v4132_v26  ;;  %v4199_v26 = vld [vmem:[%s5180_s0 + $0x40] ss:$72 sps:$4 sm:$0xff]  }
 0x151   : > { %3873 = vmatpush3.bf16.msra.mxu0 %v4131_v25  ;;  %v4198_v25 = vld [vmem:[%s4946_s18 + $0x400] sm:$0xff]   ;;  %s1600_s18 = scalar_select %p1599_p11, %s4232_s20, 1 }
 0x152   : > { %3874 = vmatprep.subr.bf16.mxu0 %v4134_v28 }
 0x153   : > { %3895 = vmatpush3.bf16.msra.mxu1 %v4133_v27  ;;  %v4201_v27 = vld [vmem:[%s5180_s0 + $0x44] ss:$72 sps:$4 sm:$0xff]   ;;  %s1601_s14 = scalar_lea.vmem %s5182_s2, %s1600_s18 }
 0x154   : > { %3896 = vmatprep.subr.bf16.mxu1 %v4136_v30 }
 0x155   : > { %3875 = vmatpush3.bf16.msra.mxu0 %v4135_v29 }
 0x156   : > { %3876 = vmatprep.subr.bf16.mxu0 %v4138_v32 }
 0x157   : > { %3897 = vmatpush3.bf16.msra.mxu1 %v4137_v31 }
 0x158   : > { %3898 = vmatprep.subr.bf16.mxu1 %v4140_v34 }
 0x159   : > { %3877 = vmatpush3.bf16.msra.mxu0 %v4139_v33 }
 0x15a   : > { %3878 = vmatprep.subr.bf16.mxu0 %v4142_v36 }
 0x15b   : > { %3899 = vmatpush3.bf16.msra.mxu1 %v4141_v35 }
 0x15c   : > { %3900 = vmatprep.subr.bf16.mxu1 %v4144_v38 }
 0x15d   : > { %3879 = vmatpush3.bf16.msra.mxu0 %v4143_v37 }
 0x15e   : > { %3880 = vmatprep.subr.bf16.mxu0 %v4146_v40 }
 0x15f   : > { %3901 = vmatpush3.bf16.msra.mxu1 %v4145_v39 }
 0x160   : > { %3902 = vmatprep.subr.bf16.mxu1 %v4148_v42 }
 0x161   : > { %3881 = vmatpush3.bf16.msra.mxu0 %v4147_v41 }
 0x162   : > { %3882 = vmatprep.subr.bf16.mxu0 %v4150_v44 }
 0x163   : > { %3903 = vmatpush3.bf16.msra.mxu1 %v4149_v43 }
 0x164   : > { %3904 = vmatprep.subr.bf16.mxu1 %v4152_v46 }
 0x165   : > { %3883 = vmatpush3.bf16.msra.mxu0 %v4151_v45 }
 0x166   : > { %3884 = vmatprep.subr.bf16.mxu0 %v4154_v48 }
 0x167   : > { %3905 = vmatpush3.bf16.msra.mxu1 %v4153_v47 }
 0x168   : > { %3906 = vmatprep.subr.bf16.mxu1 %v4156_v50 }
 0x169   : > { %3885 = vmatpush3.bf16.msra.mxu0 %v4155_v49 }
 0x16a   : > { %3914 = vmatprep.subr.bf16.mxu0 %v4161_v54 }
 0x16b   : > { %3907 = vmatpush3.bf16.msra.mxu1 %v4160_v53 }
 0x16c   : > { %3221 = vmatmul.mubr.bf16.vlgmr.msra.gmra.mxu0 %v4157_v51  ;;  %3936 = vmatprep.subr.bf16.mxu1 %v4166_v58 }
 0x16d   : > { %3915 = vmatpush3.bf16.msra.mxu0 %v4165_v57  ;;  %3302 = vmatprep.mubr.bf16.mxu0 %v4197_v24 }
 0x16e   : > { %3262 = vmatmul.mubr.bf16.vlgmr.msra.gmra.mxu1 %v4162_v55  ;;  %3916 = vmatprep.subr.bf16.mxu0 %v4168_v60 }
 0x16f   : > { %3937 = vmatpush3.bf16.msra.mxu1 %v4167_v59  ;;  %3343 = vmatprep.mubr.bf16.mxu1 %v4201_v27 }
 0x170   : > { %3938 = vmatprep.subr.bf16.mxu1 %v4170_v62 }
 0x171   : > { %3917 = vmatpush3.bf16.msra.mxu0 %v4169_v61 }
 0x172   : > { %3918 = vmatprep.subr.bf16.mxu0 %v4172_v0 }
 0x173   : > { %3939 = vmatpush3.bf16.msra.mxu1 %v4171_v63 }
 0x174   : > { %3940 = vmatprep.subr.bf16.mxu1 %v4174_v2 }
 0x175   : > { %3919 = vmatpush3.bf16.msra.mxu0 %v4173_v1 }
 0x176   : > { %3920 = vmatprep.subr.bf16.mxu0 %v4176_v4 }
 0x177   : > { %3941 = vmatpush3.bf16.msra.mxu1 %v4175_v3 }
 0x178   : > { %3942 = vmatprep.subr.bf16.mxu1 %v4178_v6 }
 0x179   : > { %3921 = vmatpush3.bf16.msra.mxu0 %v4177_v5 }
 0x17a   : > { %3922 = vmatprep.subr.bf16.mxu0 %v4180_v8 }
 0x17b   : > { %3943 = vmatpush3.bf16.msra.mxu1 %v4179_v7 }
 0x17c   : > { %3944 = vmatprep.subr.bf16.mxu1 %v4182_v10 }
 0x17d   : > { %3923 = vmatpush3.bf16.msra.mxu0 %v4181_v9 }
 0x17e   : > { %3924 = vmatprep.subr.bf16.mxu0 %v4184_v12 }
 0x17f   : > { %3945 = vmatpush3.bf16.msra.mxu1 %v4183_v11 }
 0x180   : > { %3946 = vmatprep.subr.bf16.mxu1 %v4186_v14 }
 0x181   : > { %3925 = vmatpush3.bf16.msra.mxu0 %v4185_v13 }
 0x182   : > { %3926 = vmatprep.subr.bf16.mxu0 %v4188_v16 }
 0x183   : > { %3947 = vmatpush3.bf16.msra.mxu1 %v4187_v15 }
 0x184   : > { %3948 = vmatprep.subr.bf16.mxu1 %v4190_v18 }
 0x185   : > { %3927 = vmatpush3.bf16.msra.mxu0 %v4189_v17 }
 0x186   : > { %3928 = vmatprep.subr.bf16.mxu0 %v4192_v20 }
 0x187   : > { %3949 = vmatpush3.bf16.msra.mxu1 %v4191_v19 }
 0x188   : > { %3950 = vmatprep.subr.bf16.mxu1 %v4194_v22 }
 0x189   : > { %3929 = vmatpush3.bf16.msra.mxu0 %v4193_v21 }
 0x18b   : > { %3951 = vmatpush3.bf16.msra.mxu1 %v4198_v25 }
 0x18c   : > { %3303 = vmatmul.mubr.bf16.vlgmr.msra.gmra.mxu0 %v4195_v23 }
 0x18e   : > { %3344 = vmatmul.mubr.bf16.vlgmr.msra.gmra.mxu1 %v4199_v26 }
 0x1cc   : > { %v2022_v28 = vpop.f32.mrf.mxu0 }
 0x1ce   : > { %v3976_v29 = vpop.f32.mrf.mxu0  ;;  %v3776_v32 = vpop.f32.mrf.mxu1 }
 0x1d0   : > { %v2025_v30 = vpop.f32.mrf.mxu0  ;;  %v3777_v33 = vpop.f32.mrf.mxu1 }
 0x1d1   : > { %v3778_v49 = vadd.f32 %v3777_v33, %v3776_v32 }
 0x1d2   : > { %v3977_v31 = vpop.f32.mrf.mxu0  ;;  %v3779_v34 = vpop.f32.mrf.mxu1 }
 0x1d3   : > { %v3018_v54 = vadd.f32 %v3778_v49, %v2022_v28 }
 0x1d4   : > { %v3780_v36 = vpop.f32.mrf.mxu1 }
 0x1d5   : > { %v3781_v55 = vadd.f32 %v3780_v36, %v3779_v34  ;;  %v3737_v36 = vld [vmem:[%s1601_s14] ss:$0 sm:$0xff] }
 0x1d7   : > { %v3021_v62 = vadd.f32 %v3781_v55, %v2025_v30 }
 0x1ec   : > { %v3798_v35 = vpop.f32.mrf.mxu0 }
 0x1ee   : > { %v3799_v37 = vpop.f32.mrf.mxu0  ;;  %v3820_v38 = vpop.f32.mrf.mxu1 }
 0x1ef   : > { %v3800_v52 = vadd.f32 %v3799_v37, %v3798_v35 }
 0x1f0   : > { %v3801_v39 = vpop.f32.mrf.mxu0  ;;  %v3821_v40 = vpop.f32.mrf.mxu1 }
 0x1f1   : > { %v3059_v57 = vadd.f32 %v3800_v52, %v3018_v54  ;;  %v3822_v58 = vadd.f32 %v3821_v40, %v3820_v38 }
 0x1f2   : > { %v3802_v41 = vpop.f32.mrf.mxu0  ;;  %v3823_v42 = vpop.f32.mrf.mxu1 }
 0x1f3   : > { %v3803_v59 = vadd.f32 %v3802_v41, %v3801_v39  ;;  %v3100_v0 = vadd.f32 %v3822_v58, %v3059_v57 }
 0x1f4   : > { %v3824_v44 = vpop.f32.mrf.mxu1 }
 0x1f5   : > { %v3062_v1 = vadd.f32 %v3803_v59, %v3021_v62  ;;  %v3825_v2 = vadd.f32 %v3824_v44, %v3823_v42 }
 0x1f7   : > { %v3103_v8 = vadd.f32 %v3825_v2, %v3062_v1 }
 0x20c   : > { %v3842_v43 = vpop.f32.mrf.mxu0 }
 0x20e   : > { %v3843_v45 = vpop.f32.mrf.mxu0  ;;  %v3864_v46 = vpop.f32.mrf.mxu1 }
 0x20f   : > { %v3844_v63 = vadd.f32 %v3843_v45, %v3842_v43 }
 0x210   : > { %v3845_v47 = vpop.f32.mrf.mxu0  ;;  %v3865_v48 = vpop.f32.mrf.mxu1 }
 0x211   : > { %v3141_v5 = vadd.f32 %v3844_v63, %v3100_v0  ;;  %v3866_v6 = vadd.f32 %v3865_v48, %v3864_v46 }
 0x212   : > { %v3846_v50 = vpop.f32.mrf.mxu0  ;;  %v3867_v51 = vpop.f32.mrf.mxu1 }
 0x213   : > { %v3847_v7 = vadd.f32 %v3846_v50, %v3845_v47  ;;  %v3182_v12 = vadd.f32 %v3866_v6, %v3141_v5 }
 0x214   : > { %v3868_v56 = vpop.f32.mrf.mxu1 }
 0x215   : > { %v3144_v13 = vadd.f32 %v3847_v7, %v3103_v8  ;;  %v3869_v14 = vadd.f32 %v3868_v56, %v3867_v51 }
 0x217   : > { %v3185_v20 = vadd.f32 %v3869_v14, %v3144_v13 }
 0x22c   : > { %v3886_v53 = vpop.f32.mrf.mxu0 }
 0x22e   : > { %v3887_v60 = vpop.f32.mrf.mxu0  ;;  %v3908_v61 = vpop.f32.mrf.mxu1 }
 0x22f   : > { %v3888_v9 = vadd.f32 %v3887_v60, %v3886_v53 }
 0x230   : > { %v3889_v3 = vpop.f32.mrf.mxu0  ;;  %v3909_v4 = vpop.f32.mrf.mxu1 }
 0x231   : > { %v3223_v15 = vadd.f32 %v3888_v9, %v3182_v12  ;;  %v3910_v16 = vadd.f32 %v3909_v4, %v3908_v61 }
 0x232   : > { %v3890_v10 = vpop.f32.mrf.mxu0  ;;  %v3911_v11 = vpop.f32.mrf.mxu1 }
 0x233   : > { %v3891_v17 = vadd.f32 %v3890_v10, %v3889_v3  ;;  %v3264_v22 = vadd.f32 %v3910_v16, %v3223_v15 }
 0x234   : > { %v3912_v18 = vpop.f32.mrf.mxu1 }
 0x235   : > { %v3226_v23 = vadd.f32 %v3891_v17, %v3185_v20  ;;  %v3913_v24 = vadd.f32 %v3912_v18, %v3911_v11 }
 0x237   : > { %v3267_v32 = vadd.f32 %v3913_v24, %v3226_v23 }
 0x24c   : > { %v3930_v19 = vpop.f32.mrf.mxu0 }
 0x24e   : > { %v3931_v21 = vpop.f32.mrf.mxu0  ;;  %v3952_v26 = vpop.f32.mrf.mxu1 }
 0x24f   : > { %v3932_v25 = vadd.f32 %v3931_v21, %v3930_v19 }
 0x250   : > { %v3933_v27 = vpop.f32.mrf.mxu0  ;;  %v3953_v29 = vpop.f32.mrf.mxu1 }
 0x251   : > { %v3305_v28 = vadd.f32 %v3932_v25, %v3264_v22  ;;  %v3954_v30 = vadd.f32 %v3953_v29, %v3952_v26 }
 0x252   : > { %v3934_v31 = vpop.f32.mrf.mxu0  ;;  %v3955_v34 = vpop.f32.mrf.mxu1 }
 0x253   : > { %v3935_v33 = vadd.f32 %v3934_v31, %v3933_v27  ;;  %v3346_v35 = vadd.f32 %v3954_v30, %v3305_v28 }
 0x254   : > { %v3956_v38 = vpop.f32.mrf.mxu1 }
 0x255   : > { %v3308_v37 = vadd.f32 %v3935_v33, %v3267_v32  ;;  %v3957_v39 = vadd.f32 %v3956_v38, %v3955_v34  ;;  %v3359_v40 = vadd.f32 %v3737_v36, %v3346_v35 }
 0x257   : > { %v3349_v41 = vadd.f32 %v3957_v39, %v3308_v37  ;;  %v3361_v43 = vmax.f32 %v3359_v40, 0.0 }
 0x259   : > { %v3360_v42 = vadd.f32 %v3737_v36, %v3349_v41 }
 0x25b   : > { %v3362_v44 = vmax.f32 %v3360_v42, 0.0  ;;  %3379 = sbr.rel (!%p4313_p6) target bundleno = 616 (0x268), region = 126 }
 0x25d   : > { %v3749_v45 = vpack.c.bf16 %v3362_v44, %v3361_v43 }
 0x25f   : > { %3750 = vst [vmem:[%s1591_s16] sm:$0xff] %v3749_v45  }
 0x266   : > { %v3401_v46 = vld [vmem:[%s1591_s16] sm:$0xf]  ;;  %v3403_v47 = vld [vmem:[%s1591_s16 + $0x4] sm:$0xf] }
 0x267   : > { %3402 = vst [vmem:[%s3384_s27] sm:$0xf] %v3401_v46  ;;  %3404 = vst [vmem:[%s3384_s27 + $0x8] sm:$0xf] %v3403_v47 }
 0x268 PF: > { %s15_s22 = sadd.s32 1, %s4240_s22   ;;  %s5188_s18 = smov %s4228_s19 }
 0x269   : > { %p12_p12 = scmp.ge.s32.totalorder %s15_s22, 4   ;;  %s5189_s19 = smov %s4318_s29 }
 0x26a   : > { %s5190_s20 = smov %s4236_s21  ;;  %s5191_s21 = smov %s5193_s23 }
 0x26b   :  { %14 = sbr.rel (!%p12_p12) target bundleno = 3 (0x3), region = 215 }

// kernel: model_forward.27
= control target key start
LH: loop header
LB: loop body
LE: loop exit
PB: predicated region body
PF: predicated region fallthrough
CT: control target
= control target key end

     0   :  { %s4000_s15 = smov 0   ;;  %s4002_s16 = smov 0   ;;  %s4874_s0 = inlined_call_operand.vmem [shape: bf16[16,2304], index: 0, kind: input, shape index: {}]   ;;  %s4875_s1 = inlined_call_operand.vmem [shape: bf16[2304,256], index: 1, kind: input, shape index: {}]   ;;  %s4876_s2 = inlined_call_operand.vmem [shape: f32[1,256], index: 2, kind: input, shape index: {}]   ;;  %s4877_s3 = inlined_call_operand.vmem [shape: bf16[16,256], index: 3, kind: input, shape index: {}]   ;;  %s4878_s4 = inlined_call_operand.vmem [shape: bf16[16,256], index: 4, kind: output, shape index: {}]  }
   0x1   :  { %s4004_s17 = smov 0   ;;  %s4006_s18 = smov 0  }
   0x2   :  { %s4008_s19 = smov 0  }
   0x3 LB: > { %s23_s20 = sadd.s32 1, %s3969_s18  ;;  %s3333_s21 = sadd.s32 4294967295, %s3973_s19   ;;  %s3973_s19 = sphi %s4008_s19, %s14_s19   ;;  %s3969_s18 = sphi %s4006_s18, %s4884_s18   ;;  %s3965_s17 = sphi %s4004_s17, %s4883_s17   ;;  %s3961_s16 = sphi %s4002_s16, %s4882_s16   ;;  %s3957_s15 = sphi %s4000_s15, %s4881_s15  }
   0x4   : > { %p24_p0 = scmp.ge.s32.totalorder %s23_s20, 2  ;;  %p66_p1 = scmp.ne.s32.totalorder %s3961_s16, %s3957_s15 }
   0x5   : > { %p67_p2 = scmp.eq.s32.totalorder %s3973_s19, 0  ;;  %p152_p4 = scmp.eq.s32.totalorder %s3333_s21, 1 }
   0x6   : > { %s4886_s20 = smov (%p24_p0, %s23_s20), 0  ;;  %s59_s24 = sadd.s32 1, %s3961_s16 }
   0x7   : > { %p4032_p3 = por %p67_p2, %p66_p1  ;;  %s56_s23 = ssub.s32 %s3969_s18, %s4886_s20 }
   0x8   : > { %p57_p5 = scmp.eq.s32.totalorder %s56_s23, 0  ;;  %p4039_p6 = por %p152_p4, %p66_p1 }
   0x9   : > { %p3337_p7 = scmp.ge.s32.totalorder %s3973_s19, 2 }
   0xa   : > { %s4044_s26 = scalar_select %p57_p5, %s3961_s16, %s59_s24  }
   0xb   : > { %184 = sbr.rel (%p3337_p7) target bundleno = 217 (0xd9), region = 20 }
  0x10   : > { %187 = sbr.rel (!%p4032_p3) target bundleno = 212 (0xd4), region = 24  ;;  %s189_s27 = sand.u32 (%p4032_p3), 1, %s3961_s16  }
  0x11   : > { %s3338_s28 = sshll.u32 (%p4032_p3), %s3969_s18, 2  ;;  %s3722_s29 = smul.u32 (%p4032_p3), 1152, %s189_s27 }
  0x12   : > { %s4054_s6 = scalar_lea.vmem (%p4032_p3), %s4875_s1, %s3338_s28 }
  0x13   : > { %v210_v0 = vld [vmem:[%s4054_s6] sm:$0xf] (%p4032_p3)  ;;  %v212_v1 = vld [vmem:[%s4054_s6 + $0x8] sm:$0xf] (%p4032_p3)  ;;  %v214_v2 = vld [vmem:[%s4054_s6 + $0x10] sm:$0xf] (%p4032_p3) }
  0x14   : > { %v216_v3 = vld [vmem:[%s4054_s6 + $0x18] sm:$0xf] (%p4032_p3)  ;;  %v218_v4 = vld [vmem:[%s4054_s6 + $0x20] sm:$0xf] (%p4032_p3)  ;;  %s4061_s7 = scalar_lea.vmem (%p4032_p3), [#allocation2], %s3722_s29 }
  0x15   : > { %211 = vst [vmem:[%s4061_s7] sm:$0xf] %v210_v0  ;;  %213 = vst [vmem:[%s4061_s7 + $0x4] sm:$0xf] %v212_v1  ;;  %v220_v5 = vld [vmem:[%s4054_s6 + $0x28] sm:$0xf] }
  0x16   : > { %215 = vst [vmem:[%s4061_s7 + $0x8] sm:$0xf] %v214_v2  ;;  %217 = vst [vmem:[%s4061_s7 + $0xc] sm:$0xf] %v216_v3  ;;  %v222_v6 = vld [vmem:[%s4054_s6 + $0x30] sm:$0xf] }
  0x17   : > { %219 = vst [vmem:[%s4061_s7 + $0x10] sm:$0xf] %v218_v4  ;;  %v224_v7 = vld [vmem:[%s4054_s6 + $0x38] sm:$0xf]  ;;  %221 = vst [vmem:[%s4061_s7 + $0x14] sm:$0xf] %v220_v5 }
  0x18   : > { %223 = vst [vmem:[%s4061_s7 + $0x18] sm:$0xf] %v222_v6  ;;  %225 = vst [vmem:[%s4061_s7 + $0x1c] sm:$0xf] %v224_v7  ;;  %v226_v8 = vld [vmem:[%s4054_s6 + $0x40] sm:$0xf] }
  0x19   : > { %v228_v9 = vld [vmem:[%s4054_s6 + $0x48] sm:$0xf]  ;;  %v230_v10 = vld [vmem:[%s4054_s6 + $0x50] sm:$0xf]  ;;  %227 = vst [vmem:[%s4061_s7 + $0x20] sm:$0xf] %v226_v8 }
  0x1a   : > { %229 = vst [vmem:[%s4061_s7 + $0x24] sm:$0xf] %v228_v9  ;;  %231 = vst [vmem:[%s4061_s7 + $0x28] sm:$0xf] %v230_v10  ;;  %v232_v11 = vld [vmem:[%s4054_s6 + $0x58] sm:$0xf] }
  0x1b   : > { %v234_v12 = vld [vmem:[%s4054_s6 + $0x60] sm:$0xf]  ;;  %v236_v13 = vld [vmem:[%s4054_s6 + $0x68] sm:$0xf]  ;;  %233 = vst [vmem:[%s4061_s7 + $0x2c] sm:$0xf] %v232_v11 }
  0x1c   : > { %235 = vst [vmem:[%s4061_s7 + $0x30] sm:$0xf] %v234_v12  ;;  %237 = vst [vmem:[%s4061_s7 + $0x34] sm:$0xf] %v236_v13  ;;  %v238_v14 = vld [vmem:[%s4054_s6 + $0x70] sm:$0xf] }
  0x1d   : > { %v240_v15 = vld [vmem:[%s4054_s6 + $0x78] sm:$0xf]  ;;  %v242_v16 = vld [vmem:[%s4054_s6 + $0x80] sm:$0xf]  ;;  %239 = vst [vmem:[%s4061_s7 + $0x38] sm:$0xf] %v238_v14 }
  0x1e   : > { %241 = vst [vmem:[%s4061_s7 + $0x3c] sm:$0xf] %v240_v15  ;;  %243 = vst [vmem:[%s4061_s7 + $0x40] sm:$0xf] %v242_v16  ;;  %v244_v17 = vld [vmem:[%s4054_s6 + $0x88] sm:$0xf] }
  0x1f   : > { %v246_v18 = vld [vmem:[%s4054_s6 + $0x90] sm:$0xf]  ;;  %v248_v19 = vld [vmem:[%s4054_s6 + $0x98] sm:$0xf]  ;;  %245 = vst [vmem:[%s4061_s7 + $0x44] sm:$0xf] %v244_v17 }
  0x20   : > { %247 = vst [vmem:[%s4061_s7 + $0x48] sm:$0xf] %v246_v18  ;;  %249 = vst [vmem:[%s4061_s7 + $0x4c] sm:$0xf] %v248_v19  ;;  %v250_v20 = vld [vmem:[%s4054_s6 + $0xa0] sm:$0xf] }
  0x21   : > { %v252_v21 = vld [vmem:[%s4054_s6 + $0xa8] sm:$0xf]  ;;  %v254_v22 = vld [vmem:[%s4054_s6 + $0xb0] sm:$0xf]  ;;  %251 = vst [vmem:[%s4061_s7 + $0x50] sm:$0xf] %v250_v20 }
  0x22   : > { %253 = vst [vmem:[%s4061_s7 + $0x54] sm:$0xf] %v252_v21  ;;  %255 = vst [vmem:[%s4061_s7 + $0x58] sm:$0xf] %v254_v22  ;;  %v256_v23 = vld [vmem:[%s4054_s6 + $0xb8] sm:$0xf] }
  0x23   : > { %v258_v24 = vld [vmem:[%s4054_s6 + $0xc0] sm:$0xf]  ;;  %v260_v25 = vld [vmem:[%s4054_s6 + $0xc8] sm:$0xf]  ;;  %257 = vst [vmem:[%s4061_s7 + $0x5c] sm:$0xf] %v256_v23 }
  0x24   : > { %259 = vst [vmem:[%s4061_s7 + $0x60] sm:$0xf] %v258_v24  ;;  %261 = vst [vmem:[%s4061_s7 + $0x64] sm:$0xf] %v260_v25  ;;  %v262_v26 = vld [vmem:[%s4054_s6 + $0xd0] sm:$0xf] }
  0x25   : > { %v264_v27 = vld [vmem:[%s4054_s6 + $0xd8] sm:$0xf]  ;;  %v266_v28 = vld [vmem:[%s4054_s6 + $0xe0] sm:$0xf]  ;;  %263 = vst [vmem:[%s4061_s7 + $0x68] sm:$0xf] %v262_v26 }
  0x26   : > { %265 = vst [vmem:[%s4061_s7 + $0x6c] sm:$0xf] %v264_v27  ;;  %267 = vst [vmem:[%s4061_s7 + $0x70] sm:$0xf] %v266_v28  ;;  %v268_v29 = vld [vmem:[%s4054_s6 + $0xe8] sm:$0xf] }
  0x27   : > { %v270_v30 = vld [vmem:[%s4054_s6 + $0xf0] sm:$0xf]  ;;  %v272_v31 = vld [vmem:[%s4054_s6 + $0xf8] sm:$0xf]  ;;  %269 = vst [vmem:[%s4061_s7 + $0x74] sm:$0xf] %v268_v29 }
  0x28   : > { %271 = vst [vmem:[%s4061_s7 + $0x78] sm:$0xf] %v270_v30  ;;  %273 = vst [vmem:[%s4061_s7 + $0x7c] sm:$0xf] %v272_v31  ;;  %v274_v32 = vld [vmem:[%s4054_s6 + $0x100] sm:$0xf] }
  0x29   : > { %v276_v33 = vld [vmem:[%s4054_s6 + $0x108] sm:$0xf]  ;;  %v278_v34 = vld [vmem:[%s4054_s6 + $0x110] sm:$0xf]  ;;  %275 = vst [vmem:[%s4061_s7 + $0x80] sm:$0xf] %v274_v32 }
  0x2a   : > { %277 = vst [vmem:[%s4061_s7 + $0x84] sm:$0xf] %v276_v33  ;;  %279 = vst [vmem:[%s4061_s7 + $0x88] sm:$0xf] %v278_v34  ;;  %v280_v35 = vld [vmem:[%s4054_s6 + $0x118] sm:$0xf] }
  0x2b   : > { %v282_v36 = vld [vmem:[%s4054_s6 + $0x120] sm:$0xf]  ;;  %v284_v37 = vld [vmem:[%s4054_s6 + $0x128] sm:$0xf]  ;;  %281 = vst [vmem:[%s4061_s7 + $0x8c] sm:$0xf] %v280_v35 }
  0x2c   : > { %283 = vst [vmem:[%s4061_s7 + $0x90] sm:$0xf] %v282_v36  ;;  %285 = vst [vmem:[%s4061_s7 + $0x94] sm:$0xf] %v284_v37  ;;  %v286_v38 = vld [vmem:[%s4054_s6 + $0x130] sm:$0xf] }
  0x2d   : > { %v288_v39 = vld [vmem:[%s4054_s6 + $0x138] sm:$0xf]  ;;  %v290_v40 = vld [vmem:[%s4054_s6 + $0x140] sm:$0xf]  ;;  %287 = vst [vmem:[%s4061_s7 + $0x98] sm:$0xf] %v286_v38 }
  0x2e   : > { %289 = vst [vmem:[%s4061_s7 + $0x9c] sm:$0xf] %v288_v39  ;;  %291 = vst [vmem:[%s4061_s7 + $0xa0] sm:$0xf] %v290_v40  ;;  %v292_v41 = vld [vmem:[%s4054_s6 + $0x148] sm:$0xf] }
  0x2f   : > { %v294_v42 = vld [vmem:[%s4054_s6 + $0x150] sm:$0xf]  ;;  %v296_v43 = vld [vmem:[%s4054_s6 + $0x158] sm:$0xf]  ;;  %293 = vst [vmem:[%s4061_s7 + $0xa4] sm:$0xf] %v292_v41 }
  0x30   : > { %295 = vst [vmem:[%s4061_s7 + $0xa8] sm:$0xf] %v294_v42  ;;  %297 = vst [vmem:[%s4061_s7 + $0xac] sm:$0xf] %v296_v43  ;;  %v298_v44 = vld [vmem:[%s4054_s6 + $0x160] sm:$0xf] }
  0x31   : > { %v300_v45 = vld [vmem:[%s4054_s6 + $0x168] sm:$0xf]  ;;  %v302_v46 = vld [vmem:[%s4054_s6 + $0x170] sm:$0xf]  ;;  %299 = vst [vmem:[%s4061_s7 + $0xb0] sm:$0xf] %v298_v44 }
  0x32   : > { %301 = vst [vmem:[%s4061_s7 + $0xb4] sm:$0xf] %v300_v45  ;;  %303 = vst [vmem:[%s4061_s7 + $0xb8] sm:$0xf] %v302_v46  ;;  %v304_v47 = vld [vmem:[%s4054_s6 + $0x178] sm:$0xf] }
  0x33   : > { %v306_v48 = vld [vmem:[%s4054_s6 + $0x180] sm:$0xf]  ;;  %v308_v49 = vld [vmem:[%s4054_s6 + $0x188] sm:$0xf]  ;;  %305 = vst [vmem:[%s4061_s7 + $0xbc] sm:$0xf] %v304_v47 }
  0x34   : > { %307 = vst [vmem:[%s4061_s7 + $0xc0] sm:$0xf] %v306_v48  ;;  %309 = vst [vmem:[%s4061_s7 + $0xc4] sm:$0xf] %v308_v49  ;;  %v310_v50 = vld [vmem:[%s4054_s6 + $0x190] sm:$0xf] }
  0x35   : > { %v312_v51 = vld [vmem:[%s4054_s6 + $0x198] sm:$0xf]  ;;  %v314_v52 = vld [vmem:[%s4054_s6 + $0x1a0] sm:$0xf]  ;;  %311 = vst [vmem:[%s4061_s7 + $0xc8] sm:$0xf] %v310_v50 }
  0x36   : > { %313 = vst [vmem:[%s4061_s7 + $0xcc] sm:$0xf] %v312_v51  ;;  %315 = vst [vmem:[%s4061_s7 + $0xd0] sm:$0xf] %v314_v52  ;;  %v316_v53 = vld [vmem:[%s4054_s6 + $0x1a8] sm:$0xf] }
  0x37   : > { %v318_v54 = vld [vmem:[%s4054_s6 + $0x1b0] sm:$0xf]  ;;  %v320_v55 = vld [vmem:[%s4054_s6 + $0x1b8] sm:$0xf]  ;;  %317 = vst [vmem:[%s4061_s7 + $0xd4] sm:$0xf] %v316_v53 }
  0x38   : > { %319 = vst [vmem:[%s4061_s7 + $0xd8] sm:$0xf] %v318_v54  ;;  %321 = vst [vmem:[%s4061_s7 + $0xdc] sm:$0xf] %v320_v55  ;;  %v322_v56 = vld [vmem:[%s4054_s6 + $0x1c0] sm:$0xf] }
  0x39   : > { %v324_v57 = vld [vmem:[%s4054_s6 + $0x1c8] sm:$0xf]  ;;  %v326_v58 = vld [vmem:[%s4054_s6 + $0x1d0] sm:$0xf]  ;;  %323 = vst [vmem:[%s4061_s7 + $0xe0] sm:$0xf] %v322_v56 }
  0x3a   : > { %325 = vst [vmem:[%s4061_s7 + $0xe4] sm:$0xf] %v324_v57  ;;  %327 = vst [vmem:[%s4061_s7 + $0xe8] sm:$0xf] %v326_v58  ;;  %v328_v59 = vld [vmem:[%s4054_s6 + $0x1d8] sm:$0xf] }
  0x3b   : > { %v330_v60 = vld [vmem:[%s4054_s6 + $0x1e0] sm:$0xf]  ;;  %v332_v61 = vld [vmem:[%s4054_s6 + $0x1e8] sm:$0xf]  ;;  %329 = vst [vmem:[%s4061_s7 + $0xec] sm:$0xf] %v328_v59 }
  0x3c   : > { %331 = vst [vmem:[%s4061_s7 + $0xf0] sm:$0xf] %v330_v60  ;;  %333 = vst [vmem:[%s4061_s7 + $0xf4] sm:$0xf] %v332_v61  ;;  %v334_v62 = vld [vmem:[%s4054_s6 + $0x1f0] sm:$0xf] }
  0x3d   : > { %v336_v63 = vld [vmem:[%s4054_s6 + $0x1f8] sm:$0xf]  ;;  %v338_v0 = vld [vmem:[%s4054_s6 + $0x200] sm:$0xf]  ;;  %335 = vst [vmem:[%s4061_s7 + $0xf8] sm:$0xf] %v334_v62 }
  0x3e   : > { %337 = vst [vmem:[%s4061_s7 + $0xfc] sm:$0xf] %v336_v63  ;;  %339 = vst [vmem:[%s4061_s7 + $0x100] sm:$0xf] %v338_v0  ;;  %v340_v1 = vld [vmem:[%s4054_s6 + $0x208] sm:$0xf] }
  0x3f   : > { %v342_v2 = vld [vmem:[%s4054_s6 + $0x210] sm:$0xf]  ;;  %v344_v3 = vld [vmem:[%s4054_s6 + $0x218] sm:$0xf]  ;;  %341 = vst [vmem:[%s4061_s7 + $0x104] sm:$0xf] %v340_v1 }
  0x40   : > { %343 = vst [vmem:[%s4061_s7 + $0x108] sm:$0xf] %v342_v2  ;;  %345 = vst [vmem:[%s4061_s7 + $0x10c] sm:$0xf] %v344_v3  ;;  %v346_v4 = vld [vmem:[%s4054_s6 + $0x220] sm:$0xf] }
  0x41   : > { %v348_v5 = vld [vmem:[%s4054_s6 + $0x228] sm:$0xf]  ;;  %v350_v6 = vld [vmem:[%s4054_s6 + $0x230] sm:$0xf]  ;;  %347 = vst [vmem:[%s4061_s7 + $0x110] sm:$0xf] %v346_v4 }
  0x42   : > { %349 = vst [vmem:[%s4061_s7 + $0x114] sm:$0xf] %v348_v5  ;;  %351 = vst [vmem:[%s4061_s7 + $0x118] sm:$0xf] %v350_v6  ;;  %v352_v7 = vld [vmem:[%s4054_s6 + $0x238] sm:$0xf] }
  0x43   : > { %v354_v8 = vld [vmem:[%s4054_s6 + $0x240] sm:$0xf]  ;;  %v356_v9 = vld [vmem:[%s4054_s6 + $0x248] sm:$0xf]  ;;  %353 = vst [vmem:[%s4061_s7 + $0x11c] sm:$0xf] %v352_v7 }
  0x44   : > { %355 = vst [vmem:[%s4061_s7 + $0x120] sm:$0xf] %v354_v8  ;;  %357 = vst [vmem:[%s4061_s7 + $0x124] sm:$0xf] %v356_v9  ;;  %v358_v10 = vld [vmem:[%s4054_s6 + $0x250] sm:$0xf] }
  0x45   : > { %v360_v11 = vld [vmem:[%s4054_s6 + $0x258] sm:$0xf]  ;;  %v362_v12 = vld [vmem:[%s4054_s6 + $0x260] sm:$0xf]  ;;  %359 = vst [vmem:[%s4061_s7 + $0x128] sm:$0xf] %v358_v10 }
  0x46   : > { %361 = vst [vmem:[%s4061_s7 + $0x12c] sm:$0xf] %v360_v11  ;;  %363 = vst [vmem:[%s4061_s7 + $0x130] sm:$0xf] %v362_v12  ;;  %v364_v13 = vld [vmem:[%s4054_s6 + $0x268] sm:$0xf] }
  0x47   : > { %v366_v14 = vld [vmem:[%s4054_s6 + $0x270] sm:$0xf]  ;;  %v368_v15 = vld [vmem:[%s4054_s6 + $0x278] sm:$0xf]  ;;  %365 = vst [vmem:[%s4061_s7 + $0x134] sm:$0xf] %v364_v13 }
  0x48   : > { %367 = vst [vmem:[%s4061_s7 + $0x138] sm:$0xf] %v366_v14  ;;  %369 = vst [vmem:[%s4061_s7 + $0x13c] sm:$0xf] %v368_v15  ;;  %v370_v16 = vld [vmem:[%s4054_s6 + $0x280] sm:$0xf] }
  0x49   : > { %v372_v17 = vld [vmem:[%s4054_s6 + $0x288] sm:$0xf]  ;;  %v374_v18 = vld [vmem:[%s4054_s6 + $0x290] sm:$0xf]  ;;  %371 = vst [vmem:[%s4061_s7 + $0x140] sm:$0xf] %v370_v16 }
  0x4a   : > { %373 = vst [vmem:[%s4061_s7 + $0x144] sm:$0xf] %v372_v17  ;;  %375 = vst [vmem:[%s4061_s7 + $0x148] sm:$0xf] %v374_v18  ;;  %v376_v19 = vld [vmem:[%s4054_s6 + $0x298] sm:$0xf] }
  0x4b   : > { %v378_v20 = vld [vmem:[%s4054_s6 + $0x2a0] sm:$0xf]  ;;  %v380_v21 = vld [vmem:[%s4054_s6 + $0x2a8] sm:$0xf]  ;;  %377 = vst [vmem:[%s4061_s7 + $0x14c] sm:$0xf] %v376_v19 }
  0x4c   : > { %379 = vst [vmem:[%s4061_s7 + $0x150] sm:$0xf] %v378_v20  ;;  %381 = vst [vmem:[%s4061_s7 + $0x154] sm:$0xf] %v380_v21  ;;  %v382_v22 = vld [vmem:[%s4054_s6 + $0x2b0] sm:$0xf] }
  0x4d   : > { %v384_v23 = vld [vmem:[%s4054_s6 + $0x2b8] sm:$0xf]  ;;  %v386_v24 = vld [vmem:[%s4054_s6 + $0x2c0] sm:$0xf]  ;;  %383 = vst [vmem:[%s4061_s7 + $0x158] sm:$0xf] %v382_v22 }
  0x4e   : > { %385 = vst [vmem:[%s4061_s7 + $0x15c] sm:$0xf] %v384_v23  ;;  %387 = vst [vmem:[%s4061_s7 + $0x160] sm:$0xf] %v386_v24  ;;  %v388_v25 = vld [vmem:[%s4054_s6 + $0x2c8] sm:$0xf] }
  0x4f   : > { %v390_v26 = vld [vmem:[%s4054_s6 + $0x2d0] sm:$0xf]  ;;  %v392_v27 = vld [vmem:[%s4054_s6 + $0x2d8] sm:$0xf]  ;;  %389 = vst [vmem:[%s4061_s7 + $0x164] sm:$0xf] %v388_v25 }
  0x50   : > { %391 = vst [vmem:[%s4061_s7 + $0x168] sm:$0xf] %v390_v26  ;;  %393 = vst [vmem:[%s4061_s7 + $0x16c] sm:$0xf] %v392_v27  ;;  %v394_v28 = vld [vmem:[%s4054_s6 + $0x2e0] sm:$0xf] }
  0x51   : > { %v396_v29 = vld [vmem:[%s4054_s6 + $0x2e8] sm:$0xf]  ;;  %v398_v30 = vld [vmem:[%s4054_s6 + $0x2f0] sm:$0xf]  ;;  %395 = vst [vmem:[%s4061_s7 + $0x170] sm:$0xf] %v394_v28 }
  0x52   : > { %397 = vst [vmem:[%s4061_s7 + $0x174] sm:$0xf] %v396_v29  ;;  %399 = vst [vmem:[%s4061_s7 + $0x178] sm:$0xf] %v398_v30  ;;  %v400_v31 = vld [vmem:[%s4054_s6 + $0x2f8] sm:$0xf] }
  0x53   : > { %v402_v32 = vld [vmem:[%s4054_s6 + $0x300] sm:$0xf]  ;;  %v404_v33 = vld [vmem:[%s4054_s6 + $0x308] sm:$0xf]  ;;  %401 = vst [vmem:[%s4061_s7 + $0x17c] sm:$0xf] %v400_v31 }
  0x54   : > { %403 = vst [vmem:[%s4061_s7 + $0x180] sm:$0xf] %v402_v32  ;;  %405 = vst [vmem:[%s4061_s7 + $0x184] sm:$0xf] %v404_v33  ;;  %v406_v34 = vld [vmem:[%s4054_s6 + $0x310] sm:$0xf] }
  0x55   : > { %v408_v35 = vld [vmem:[%s4054_s6 + $0x318] sm:$0xf]  ;;  %v410_v36 = vld [vmem:[%s4054_s6 + $0x320] sm:$0xf]  ;;  %407 = vst [vmem:[%s4061_s7 + $0x188] sm:$0xf] %v406_v34 }
  0x56   : > { %409 = vst [vmem:[%s4061_s7 + $0x18c] sm:$0xf] %v408_v35  ;;  %411 = vst [vmem:[%s4061_s7 + $0x190] sm:$0xf] %v410_v36  ;;  %v412_v37 = vld [vmem:[%s4054_s6 + $0x328] sm:$0xf] }
  0x57   : > { %v414_v38 = vld [vmem:[%s4054_s6 + $0x330] sm:$0xf]  ;;  %v416_v39 = vld [vmem:[%s4054_s6 + $0x338] sm:$0xf]  ;;  %413 = vst [vmem:[%s4061_s7 + $0x194] sm:$0xf] %v412_v37 }
  0x58   : > { %415 = vst [vmem:[%s4061_s7 + $0x198] sm:$0xf] %v414_v38  ;;  %417 = vst [vmem:[%s4061_s7 + $0x19c] sm:$0xf] %v416_v39  ;;  %v418_v40 = vld [vmem:[%s4054_s6 + $0x340] sm:$0xf] }
  0x59   : > { %v420_v41 = vld [vmem:[%s4054_s6 + $0x348] sm:$0xf]  ;;  %v422_v42 = vld [vmem:[%s4054_s6 + $0x350] sm:$0xf]  ;;  %419 = vst [vmem:[%s4061_s7 + $0x1a0] sm:$0xf] %v418_v40 }
  0x5a   : > { %421 = vst [vmem:[%s4061_s7 + $0x1a4] sm:$0xf] %v420_v41  ;;  %423 = vst [vmem:[%s4061_s7 + $0x1a8] sm:$0xf] %v422_v42  ;;  %v424_v43 = vld [vmem:[%s4054_s6 + $0x358] sm:$0xf] }
  0x5b   : > { %v426_v44 = vld [vmem:[%s4054_s6 + $0x360] sm:$0xf]  ;;  %v428_v45 = vld [vmem:[%s4054_s6 + $0x368] sm:$0xf]  ;;  %425 = vst [vmem:[%s4061_s7 + $0x1ac] sm:$0xf] %v424_v43 }
  0x5c   : > { %427 = vst [vmem:[%s4061_s7 + $0x1b0] sm:$0xf] %v426_v44  ;;  %429 = vst [vmem:[%s4061_s7 + $0x1b4] sm:$0xf] %v428_v45  ;;  %v430_v46 = vld [vmem:[%s4054_s6 + $0x370] sm:$0xf] }
  0x5d   : > { %v432_v47 = vld [vmem:[%s4054_s6 + $0x378] sm:$0xf]  ;;  %v434_v48 = vld [vmem:[%s4054_s6 + $0x380] sm:$0xf]  ;;  %431 = vst [vmem:[%s4061_s7 + $0x1b8] sm:$0xf] %v430_v46 }
  0x5e   : > { %433 = vst [vmem:[%s4061_s7 + $0x1bc] sm:$0xf] %v432_v47  ;;  %435 = vst [vmem:[%s4061_s7 + $0x1c0] sm:$0xf] %v434_v48  ;;  %v436_v49 = vld [vmem:[%s4054_s6 + $0x388] sm:$0xf] }
  0x5f   : > { %v438_v50 = vld [vmem:[%s4054_s6 + $0x390] sm:$0xf]  ;;  %v440_v51 = vld [vmem:[%s4054_s6 + $0x398] sm:$0xf]  ;;  %437 = vst [vmem:[%s4061_s7 + $0x1c4] sm:$0xf] %v436_v49 }
  0x60   : > { %439 = vst [vmem:[%s4061_s7 + $0x1c8] sm:$0xf] %v438_v50  ;;  %441 = vst [vmem:[%s4061_s7 + $0x1cc] sm:$0xf] %v440_v51  ;;  %v442_v52 = vld [vmem:[%s4054_s6 + $0x3a0] sm:$0xf] }
  0x61   : > { %v444_v53 = vld [vmem:[%s4054_s6 + $0x3a8] sm:$0xf]  ;;  %v446_v54 = vld [vmem:[%s4054_s6 + $0x3b0] sm:$0xf]  ;;  %443 = vst [vmem:[%s4061_s7 + $0x1d0] sm:$0xf] %v442_v52 }
  0x62   : > { %445 = vst [vmem:[%s4061_s7 + $0x1d4] sm:$0xf] %v444_v53  ;;  %447 = vst [vmem:[%s4061_s7 + $0x1d8] sm:$0xf] %v446_v54  ;;  %v448_v55 = vld [vmem:[%s4054_s6 + $0x3b8] sm:$0xf] }
  0x63   : > { %v450_v56 = vld [vmem:[%s4054_s6 + $0x3c0] sm:$0xf]  ;;  %v452_v57 = vld [vmem:[%s4054_s6 + $0x3c8] sm:$0xf]  ;;  %449 = vst [vmem:[%s4061_s7 + $0x1dc] sm:$0xf] %v448_v55 }
  0x64   : > { %451 = vst [vmem:[%s4061_s7 + $0x1e0] sm:$0xf] %v450_v56  ;;  %453 = vst [vmem:[%s4061_s7 + $0x1e4] sm:$0xf] %v452_v57  ;;  %v454_v58 = vld [vmem:[%s4054_s6 + $0x3d0] sm:$0xf] }
  0x65   : > { %v456_v59 = vld [vmem:[%s4054_s6 + $0x3d8] sm:$0xf]  ;;  %v458_v60 = vld [vmem:[%s4054_s6 + $0x3e0] sm:$0xf]  ;;  %455 = vst [vmem:[%s4061_s7 + $0x1e8] sm:$0xf] %v454_v58 }
  0x66   : > { %457 = vst [vmem:[%s4061_s7 + $0x1ec] sm:$0xf] %v456_v59  ;;  %459 = vst [vmem:[%s4061_s7 + $0x1f0] sm:$0xf] %v458_v60  ;;  %v460_v61 = vld [vmem:[%s4054_s6 + $0x3e8] sm:$0xf] }
  0x67   : > { %v462_v62 = vld [vmem:[%s4054_s6 + $0x3f0] sm:$0xf]  ;;  %v464_v63 = vld [vmem:[%s4054_s6 + $0x3f8] sm:$0xf]  ;;  %461 = vst [vmem:[%s4061_s7 + $0x1f4] sm:$0xf] %v460_v61 }
  0x68   : > { %463 = vst [vmem:[%s4061_s7 + $0x1f8] sm:$0xf] %v462_v62  ;;  %465 = vst [vmem:[%s4061_s7 + $0x1fc] sm:$0xf] %v464_v63  ;;  %v466_v0 = vld [vmem:[%s4054_s6 + $0x400] sm:$0xf] }
  0x69   : > { %v468_v1 = vld [vmem:[%s4054_s6 + $0x408] sm:$0xf]  ;;  %v470_v2 = vld [vmem:[%s4054_s6 + $0x410] sm:$0xf]  ;;  %467 = vst [vmem:[%s4061_s7 + $0x200] sm:$0xf] %v466_v0 }
  0x6a   : > { %469 = vst [vmem:[%s4061_s7 + $0x204] sm:$0xf] %v468_v1  ;;  %471 = vst [vmem:[%s4061_s7 + $0x208] sm:$0xf] %v470_v2  ;;  %v472_v3 = vld [vmem:[%s4054_s6 + $0x418] sm:$0xf] }
  0x6b   : > { %v474_v4 = vld [vmem:[%s4054_s6 + $0x420] sm:$0xf]  ;;  %v476_v5 = vld [vmem:[%s4054_s6 + $0x428] sm:$0xf]  ;;  %473 = vst [vmem:[%s4061_s7 + $0x20c] sm:$0xf] %v472_v3 }
  0x6c   : > { %475 = vst [vmem:[%s4061_s7 + $0x210] sm:$0xf] %v474_v4  ;;  %477 = vst [vmem:[%s4061_s7 + $0x214] sm:$0xf] %v476_v5  ;;  %v478_v6 = vld [vmem:[%s4054_s6 + $0x430] sm:$0xf] }
  0x6d   : > { %v480_v7 = vld [vmem:[%s4054_s6 + $0x438] sm:$0xf]  ;;  %v482_v8 = vld [vmem:[%s4054_s6 + $0x440] sm:$0xf]  ;;  %479 = vst [vmem:[%s4061_s7 + $0x218] sm:$0xf] %v478_v6 }
  0x6e   : > { %481 = vst [vmem:[%s4061_s7 + $0x21c] sm:$0xf] %v480_v7  ;;  %483 = vst [vmem:[%s4061_s7 + $0x220] sm:$0xf] %v482_v8  ;;  %v484_v9 = vld [vmem:[%s4054_s6 + $0x448] sm:$0xf] }
  0x6f   : > { %v486_v10 = vld [vmem:[%s4054_s6 + $0x450] sm:$0xf]  ;;  %v488_v11 = vld [vmem:[%s4054_s6 + $0x458] sm:$0xf]  ;;  %485 = vst [vmem:[%s4061_s7 + $0x224] sm:$0xf] %v484_v9 }
  0x70   : > { %487 = vst [vmem:[%s4061_s7 + $0x228] sm:$0xf] %v486_v10  ;;  %489 = vst [vmem:[%s4061_s7 + $0x22c] sm:$0xf] %v488_v11  ;;  %v490_v12 = vld [vmem:[%s4054_s6 + $0x460] sm:$0xf] }
  0x71   : > { %v492_v13 = vld [vmem:[%s4054_s6 + $0x468] sm:$0xf]  ;;  %v494_v14 = vld [vmem:[%s4054_s6 + $0x470] sm:$0xf]  ;;  %491 = vst [vmem:[%s4061_s7 + $0x230] sm:$0xf] %v490_v12 }
  0x72   : > { %493 = vst [vmem:[%s4061_s7 + $0x234] sm:$0xf] %v492_v13  ;;  %495 = vst [vmem:[%s4061_s7 + $0x238] sm:$0xf] %v494_v14  ;;  %v496_v15 = vld [vmem:[%s4054_s6 + $0x478] sm:$0xf] }
  0x73   : > { %v498_v16 = vld [vmem:[%s4054_s6 + $0x480] sm:$0xf]  ;;  %v500_v17 = vld [vmem:[%s4054_s6 + $0x488] sm:$0xf]  ;;  %497 = vst [vmem:[%s4061_s7 + $0x23c] sm:$0xf] %v496_v15 }
  0x74   : > { %499 = vst [vmem:[%s4061_s7 + $0x240] sm:$0xf] %v498_v16  ;;  %501 = vst [vmem:[%s4061_s7 + $0x244] sm:$0xf] %v500_v17  ;;  %v502_v18 = vld [vmem:[%s4054_s6 + $0x490] sm:$0xf] }
  0x75   : > { %v504_v19 = vld [vmem:[%s4054_s6 + $0x498] sm:$0xf]  ;;  %v506_v20 = vld [vmem:[%s4054_s6 + $0x4a0] sm:$0xf]  ;;  %503 = vst [vmem:[%s4061_s7 + $0x248] sm:$0xf] %v502_v18 }
  0x76   : > { %505 = vst [vmem:[%s4061_s7 + $0x24c] sm:$0xf] %v504_v19  ;;  %507 = vst [vmem:[%s4061_s7 + $0x250] sm:$0xf] %v506_v20  ;;  %v508_v21 = vld [vmem:[%s4054_s6 + $0x4a8] sm:$0xf] }
  0x77   : > { %v510_v22 = vld [vmem:[%s4054_s6 + $0x4b0] sm:$0xf]  ;;  %v512_v23 = vld [vmem:[%s4054_s6 + $0x4b8] sm:$0xf]  ;;  %509 = vst [vmem:[%s4061_s7 + $0x254] sm:$0xf] %v508_v21 }
  0x78   : > { %511 = vst [vmem:[%s4061_s7 + $0x258] sm:$0xf] %v510_v22  ;;  %513 = vst [vmem:[%s4061_s7 + $0x25c] sm:$0xf] %v512_v23  ;;  %v514_v24 = vld [vmem:[%s4054_s6 + $0x4c0] sm:$0xf] }
  0x79   : > { %v516_v25 = vld [vmem:[%s4054_s6 + $0x4c8] sm:$0xf]  ;;  %v518_v26 = vld [vmem:[%s4054_s6 + $0x4d0] sm:$0xf]  ;;  %515 = vst [vmem:[%s4061_s7 + $0x260] sm:$0xf] %v514_v24 }
  0x7a   : > { %517 = vst [vmem:[%s4061_s7 + $0x264] sm:$0xf] %v516_v25  ;;  %519 = vst [vmem:[%s4061_s7 + $0x268] sm:$0xf] %v518_v26  ;;  %v520_v27 = vld [vmem:[%s4054_s6 + $0x4d8] sm:$0xf] }
  0x7b   : > { %v522_v28 = vld [vmem:[%s4054_s6 + $0x4e0] sm:$0xf]  ;;  %v524_v29 = vld [vmem:[%s4054_s6 + $0x4e8] sm:$0xf]  ;;  %521 = vst [vmem:[%s4061_s7 + $0x26c] sm:$0xf] %v520_v27 }
  0x7c   : > { %523 = vst [vmem:[%s4061_s7 + $0x270] sm:$0xf] %v522_v28  ;;  %525 = vst [vmem:[%s4061_s7 + $0x274] sm:$0xf] %v524_v29  ;;  %v526_v30 = vld [vmem:[%s4054_s6 + $0x4f0] sm:$0xf] }
  0x7d   : > { %v528_v31 = vld [vmem:[%s4054_s6 + $0x4f8] sm:$0xf]  ;;  %v530_v32 = vld [vmem:[%s4054_s6 + $0x500] sm:$0xf]  ;;  %527 = vst [vmem:[%s4061_s7 + $0x278] sm:$0xf] %v526_v30 }
  0x7e   : > { %529 = vst [vmem:[%s4061_s7 + $0x27c] sm:$0xf] %v528_v31  ;;  %531 = vst [vmem:[%s4061_s7 + $0x280] sm:$0xf] %v530_v32  ;;  %v532_v33 = vld [vmem:[%s4054_s6 + $0x508] sm:$0xf] }
  0x7f   : > { %v534_v34 = vld [vmem:[%s4054_s6 + $0x510] sm:$0xf]  ;;  %v536_v35 = vld [vmem:[%s4054_s6 + $0x518] sm:$0xf]  ;;  %533 = vst [vmem:[%s4061_s7 + $0x284] sm:$0xf] %v532_v33 }
  0x80   : > { %535 = vst [vmem:[%s4061_s7 + $0x288] sm:$0xf] %v534_v34  ;;  %537 = vst [vmem:[%s4061_s7 + $0x28c] sm:$0xf] %v536_v35  ;;  %v538_v36 = vld [vmem:[%s4054_s6 + $0x520] sm:$0xf] }
  0x81   : > { %v540_v37 = vld [vmem:[%s4054_s6 + $0x528] sm:$0xf]  ;;  %v542_v38 = vld [vmem:[%s4054_s6 + $0x530] sm:$0xf]  ;;  %539 = vst [vmem:[%s4061_s7 + $0x290] sm:$0xf] %v538_v36 }
  0x82   : > { %541 = vst [vmem:[%s4061_s7 + $0x294] sm:$0xf] %v540_v37  ;;  %543 = vst [vmem:[%s4061_s7 + $0x298] sm:$0xf] %v542_v38  ;;  %v544_v39 = vld [vmem:[%s4054_s6 + $0x538] sm:$0xf] }
  0x83   : > { %v546_v40 = vld [vmem:[%s4054_s6 + $0x540] sm:$0xf]  ;;  %v548_v41 = vld [vmem:[%s4054_s6 + $0x548] sm:$0xf]  ;;  %545 = vst [vmem:[%s4061_s7 + $0x29c] sm:$0xf] %v544_v39 }
  0x84   : > { %547 = vst [vmem:[%s4061_s7 + $0x2a0] sm:$0xf] %v546_v40  ;;  %549 = vst [vmem:[%s4061_s7 + $0x2a4] sm:$0xf] %v548_v41  ;;  %v550_v42 = vld [vmem:[%s4054_s6 + $0x550] sm:$0xf] }
  0x85   : > { %v552_v43 = vld [vmem:[%s4054_s6 + $0x558] sm:$0xf]  ;;  %v554_v44 = vld [vmem:[%s4054_s6 + $0x560] sm:$0xf]  ;;  %551 = vst [vmem:[%s4061_s7 + $0x2a8] sm:$0xf] %v550_v42 }
  0x86   : > { %553 = vst [vmem:[%s4061_s7 + $0x2ac] sm:$0xf] %v552_v43  ;;  %555 = vst [vmem:[%s4061_s7 + $0x2b0] sm:$0xf] %v554_v44  ;;  %v556_v45 = vld [vmem:[%s4054_s6 + $0x568] sm:$0xf] }
  0x87   : > { %v558_v46 = vld [vmem:[%s4054_s6 + $0x570] sm:$0xf]  ;;  %v560_v47 = vld [vmem:[%s4054_s6 + $0x578] sm:$0xf]  ;;  %557 = vst [vmem:[%s4061_s7 + $0x2b4] sm:$0xf] %v556_v45 }
  0x88   : > { %559 = vst [vmem:[%s4061_s7 + $0x2b8] sm:$0xf] %v558_v46  ;;  %561 = vst [vmem:[%s4061_s7 + $0x2bc] sm:$0xf] %v560_v47  ;;  %v562_v48 = vld [vmem:[%s4054_s6 + $0x580] sm:$0xf] }
  0x89   : > { %v564_v49 = vld [vmem:[%s4054_s6 + $0x588] sm:$0xf]  ;;  %v566_v50 = vld [vmem:[%s4054_s6 + $0x590] sm:$0xf]  ;;  %563 = vst [vmem:[%s4061_s7 + $0x2c0] sm:$0xf] %v562_v48 }
  0x8a   : > { %565 = vst [vmem:[%s4061_s7 + $0x2c4] sm:$0xf] %v564_v49  ;;  %567 = vst [vmem:[%s4061_s7 + $0x2c8] sm:$0xf] %v566_v50  ;;  %v568_v51 = vld [vmem:[%s4054_s6 + $0x598] sm:$0xf] }
  0x8b   : > { %v570_v52 = vld [vmem:[%s4054_s6 + $0x5a0] sm:$0xf]  ;;  %v572_v53 = vld [vmem:[%s4054_s6 + $0x5a8] sm:$0xf]  ;;  %569 = vst [vmem:[%s4061_s7 + $0x2cc] sm:$0xf] %v568_v51 }
  0x8c   : > { %571 = vst [vmem:[%s4061_s7 + $0x2d0] sm:$0xf] %v570_v52  ;;  %573 = vst [vmem:[%s4061_s7 + $0x2d4] sm:$0xf] %v572_v53  ;;  %v574_v54 = vld [vmem:[%s4054_s6 + $0x5b0] sm:$0xf] }
  0x8d   : > { %v576_v55 = vld [vmem:[%s4054_s6 + $0x5b8] sm:$0xf]  ;;  %v578_v56 = vld [vmem:[%s4054_s6 + $0x5c0] sm:$0xf]  ;;  %575 = vst [vmem:[%s4061_s7 + $0x2d8] sm:$0xf] %v574_v54 }
  0x8e   : > { %577 = vst [vmem:[%s4061_s7 + $0x2dc] sm:$0xf] %v576_v55  ;;  %579 = vst [vmem:[%s4061_s7 + $0x2e0] sm:$0xf] %v578_v56  ;;  %v580_v57 = vld [vmem:[%s4054_s6 + $0x5c8] sm:$0xf] }
  0x8f   : > { %v582_v58 = vld [vmem:[%s4054_s6 + $0x5d0] sm:$0xf]  ;;  %v584_v59 = vld [vmem:[%s4054_s6 + $0x5d8] sm:$0xf]  ;;  %581 = vst [vmem:[%s4061_s7 + $0x2e4] sm:$0xf] %v580_v57 }
  0x90   : > { %583 = vst [vmem:[%s4061_s7 + $0x2e8] sm:$0xf] %v582_v58  ;;  %585 = vst [vmem:[%s4061_s7 + $0x2ec] sm:$0xf] %v584_v59  ;;  %v586_v60 = vld [vmem:[%s4054_s6 + $0x5e0] sm:$0xf] }
  0x91   : > { %v588_v61 = vld [vmem:[%s4054_s6 + $0x5e8] sm:$0xf]  ;;  %v590_v62 = vld [vmem:[%s4054_s6 + $0x5f0] sm:$0xf]  ;;  %587 = vst [vmem:[%s4061_s7 + $0x2f0] sm:$0xf] %v586_v60 }
  0x92   : > { %589 = vst [vmem:[%s4061_s7 + $0x2f4] sm:$0xf] %v588_v61  ;;  %591 = vst [vmem:[%s4061_s7 + $0x2f8] sm:$0xf] %v590_v62  ;;  %v592_v63 = vld [vmem:[%s4054_s6 + $0x5f8] sm:$0xf] }
  0x93   : > { %v594_v0 = vld [vmem:[%s4054_s6 + $0x600] sm:$0xf]  ;;  %v596_v1 = vld [vmem:[%s4054_s6 + $0x608] sm:$0xf]  ;;  %593 = vst [vmem:[%s4061_s7 + $0x2fc] sm:$0xf] %v592_v63 }
  0x94   : > { %595 = vst [vmem:[%s4061_s7 + $0x300] sm:$0xf] %v594_v0  ;;  %597 = vst [vmem:[%s4061_s7 + $0x304] sm:$0xf] %v596_v1  ;;  %v598_v2 = vld [vmem:[%s4054_s6 + $0x610] sm:$0xf] }
  0x95   : > { %v600_v3 = vld [vmem:[%s4054_s6 + $0x618] sm:$0xf]  ;;  %v602_v4 = vld [vmem:[%s4054_s6 + $0x620] sm:$0xf]  ;;  %599 = vst [vmem:[%s4061_s7 + $0x308] sm:$0xf] %v598_v2 }
  0x96   : > { %601 = vst [vmem:[%s4061_s7 + $0x30c] sm:$0xf] %v600_v3  ;;  %603 = vst [vmem:[%s4061_s7 + $0x310] sm:$0xf] %v602_v4  ;;  %v604_v5 = vld [vmem:[%s4054_s6 + $0x628] sm:$0xf] }
  0x97   : > { %v606_v6 = vld [vmem:[%s4054_s6 + $0x630] sm:$0xf]  ;;  %v608_v7 = vld [vmem:[%s4054_s6 + $0x638] sm:$0xf]  ;;  %605 = vst [vmem:[%s4061_s7 + $0x314] sm:$0xf] %v604_v5 }
  0x98   : > { %607 = vst [vmem:[%s4061_s7 + $0x318] sm:$0xf] %v606_v6  ;;  %609 = vst [vmem:[%s4061_s7 + $0x31c] sm:$0xf] %v608_v7  ;;  %v610_v8 = vld [vmem:[%s4054_s6 + $0x640] sm:$0xf] }
  0x99   : > { %v612_v9 = vld [vmem:[%s4054_s6 + $0x648] sm:$0xf]  ;;  %v614_v10 = vld [vmem:[%s4054_s6 + $0x650] sm:$0xf]  ;;  %611 = vst [vmem:[%s4061_s7 + $0x320] sm:$0xf] %v610_v8 }
  0x9a   : > { %613 = vst [vmem:[%s4061_s7 + $0x324] sm:$0xf] %v612_v9  ;;  %615 = vst [vmem:[%s4061_s7 + $0x328] sm:$0xf] %v614_v10  ;;  %v616_v11 = vld [vmem:[%s4054_s6 + $0x658] sm:$0xf] }
  0x9b   : > { %v618_v12 = vld [vmem:[%s4054_s6 + $0x660] sm:$0xf]  ;;  %v620_v13 = vld [vmem:[%s4054_s6 + $0x668] sm:$0xf]  ;;  %617 = vst [vmem:[%s4061_s7 + $0x32c] sm:$0xf] %v616_v11 }
  0x9c   : > { %619 = vst [vmem:[%s4061_s7 + $0x330] sm:$0xf] %v618_v12  ;;  %621 = vst [vmem:[%s4061_s7 + $0x334] sm:$0xf] %v620_v13  ;;  %v622_v14 = vld [vmem:[%s4054_s6 + $0x670] sm:$0xf] }
  0x9d   : > { %v624_v15 = vld [vmem:[%s4054_s6 + $0x678] sm:$0xf]  ;;  %v626_v16 = vld [vmem:[%s4054_s6 + $0x680] sm:$0xf]  ;;  %623 = vst [vmem:[%s4061_s7 + $0x338] sm:$0xf] %v622_v14 }
  0x9e   : > { %625 = vst [vmem:[%s4061_s7 + $0x33c] sm:$0xf] %v624_v15  ;;  %627 = vst [vmem:[%s4061_s7 + $0x340] sm:$0xf] %v626_v16  ;;  %v628_v17 = vld [vmem:[%s4054_s6 + $0x688] sm:$0xf] }
  0x9f   : > { %v630_v18 = vld [vmem:[%s4054_s6 + $0x690] sm:$0xf]  ;;  %v632_v19 = vld [vmem:[%s4054_s6 + $0x698] sm:$0xf]  ;;  %629 = vst [vmem:[%s4061_s7 + $0x344] sm:$0xf] %v628_v17 }
  0xa0   : > { %631 = vst [vmem:[%s4061_s7 + $0x348] sm:$0xf] %v630_v18  ;;  %633 = vst [vmem:[%s4061_s7 + $0x34c] sm:$0xf] %v632_v19  ;;  %v634_v20 = vld [vmem:[%s4054_s6 + $0x6a0] sm:$0xf] }
  0xa1   : > { %v636_v21 = vld [vmem:[%s4054_s6 + $0x6a8] sm:$0xf]  ;;  %v638_v22 = vld [vmem:[%s4054_s6 + $0x6b0] sm:$0xf]  ;;  %635 = vst [vmem:[%s4061_s7 + $0x350] sm:$0xf] %v634_v20 }
  0xa2   : > { %637 = vst [vmem:[%s4061_s7 + $0x354] sm:$0xf] %v636_v21  ;;  %639 = vst [vmem:[%s4061_s7 + $0x358] sm:$0xf] %v638_v22  ;;  %v640_v23 = vld [vmem:[%s4054_s6 + $0x6b8] sm:$0xf] }
  0xa3   : > { %v642_v24 = vld [vmem:[%s4054_s6 + $0x6c0] sm:$0xf]  ;;  %v644_v25 = vld [vmem:[%s4054_s6 + $0x6c8] sm:$0xf]  ;;  %641 = vst [vmem:[%s4061_s7 + $0x35c] sm:$0xf] %v640_v23 }
  0xa4   : > { %643 = vst [vmem:[%s4061_s7 + $0x360] sm:$0xf] %v642_v24  ;;  %645 = vst [vmem:[%s4061_s7 + $0x364] sm:$0xf] %v644_v25  ;;  %v646_v26 = vld [vmem:[%s4054_s6 + $0x6d0] sm:$0xf] }
  0xa5   : > { %v648_v27 = vld [vmem:[%s4054_s6 + $0x6d8] sm:$0xf]  ;;  %v650_v28 = vld [vmem:[%s4054_s6 + $0x6e0] sm:$0xf]  ;;  %647 = vst [vmem:[%s4061_s7 + $0x368] sm:$0xf] %v646_v26 }
  0xa6   : > { %649 = vst [vmem:[%s4061_s7 + $0x36c] sm:$0xf] %v648_v27  ;;  %651 = vst [vmem:[%s4061_s7 + $0x370] sm:$0xf] %v650_v28  ;;  %v652_v29 = vld [vmem:[%s4054_s6 + $0x6e8] sm:$0xf] }
  0xa7   : > { %v654_v30 = vld [vmem:[%s4054_s6 + $0x6f0] sm:$0xf]  ;;  %v656_v31 = vld [vmem:[%s4054_s6 + $0x6f8] sm:$0xf]  ;;  %653 = vst [vmem:[%s4061_s7 + $0x374] sm:$0xf] %v652_v29 }
  0xa8   : > { %655 = vst [vmem:[%s4061_s7 + $0x378] sm:$0xf] %v654_v30  ;;  %657 = vst [vmem:[%s4061_s7 + $0x37c] sm:$0xf] %v656_v31  ;;  %v658_v32 = vld [vmem:[%s4054_s6 + $0x700] sm:$0xf] }
  0xa9   : > { %v660_v33 = vld [vmem:[%s4054_s6 + $0x708] sm:$0xf]  ;;  %v662_v34 = vld [vmem:[%s4054_s6 + $0x710] sm:$0xf]  ;;  %659 = vst [vmem:[%s4061_s7 + $0x380] sm:$0xf] %v658_v32 }
  0xaa   : > { %661 = vst [vmem:[%s4061_s7 + $0x384] sm:$0xf] %v660_v33  ;;  %663 = vst [vmem:[%s4061_s7 + $0x388] sm:$0xf] %v662_v34  ;;  %v664_v35 = vld [vmem:[%s4054_s6 + $0x718] sm:$0xf] }
  0xab   : > { %v666_v36 = vld [vmem:[%s4054_s6 + $0x720] sm:$0xf]  ;;  %v668_v37 = vld [vmem:[%s4054_s6 + $0x728] sm:$0xf]  ;;  %665 = vst [vmem:[%s4061_s7 + $0x38c] sm:$0xf] %v664_v35 }
  0xac   : > { %667 = vst [vmem:[%s4061_s7 + $0x390] sm:$0xf] %v666_v36  ;;  %669 = vst [vmem:[%s4061_s7 + $0x394] sm:$0xf] %v668_v37  ;;  %v670_v38 = vld [vmem:[%s4054_s6 + $0x730] sm:$0xf] }
  0xad   : > { %v672_v39 = vld [vmem:[%s4054_s6 + $0x738] sm:$0xf]  ;;  %v674_v40 = vld [vmem:[%s4054_s6 + $0x740] sm:$0xf]  ;;  %671 = vst [vmem:[%s4061_s7 + $0x398] sm:$0xf] %v670_v38 }
  0xae   : > { %673 = vst [vmem:[%s4061_s7 + $0x39c] sm:$0xf] %v672_v39  ;;  %675 = vst [vmem:[%s4061_s7 + $0x3a0] sm:$0xf] %v674_v40  ;;  %v676_v41 = vld [vmem:[%s4054_s6 + $0x748] sm:$0xf] }
  0xaf   : > { %v678_v42 = vld [vmem:[%s4054_s6 + $0x750] sm:$0xf]  ;;  %v680_v43 = vld [vmem:[%s4054_s6 + $0x758] sm:$0xf]  ;;  %677 = vst [vmem:[%s4061_s7 + $0x3a4] sm:$0xf] %v676_v41 }
  0xb0   : > { %679 = vst [vmem:[%s4061_s7 + $0x3a8] sm:$0xf] %v678_v42  ;;  %681 = vst [vmem:[%s4061_s7 + $0x3ac] sm:$0xf] %v680_v43  ;;  %v682_v44 = vld [vmem:[%s4054_s6 + $0x760] sm:$0xf] }
  0xb1   : > { %v684_v45 = vld [vmem:[%s4054_s6 + $0x768] sm:$0xf]  ;;  %v686_v46 = vld [vmem:[%s4054_s6 + $0x770] sm:$0xf]  ;;  %683 = vst [vmem:[%s4061_s7 + $0x3b0] sm:$0xf] %v682_v44 }
  0xb2   : > { %685 = vst [vmem:[%s4061_s7 + $0x3b4] sm:$0xf] %v684_v45  ;;  %687 = vst [vmem:[%s4061_s7 + $0x3b8] sm:$0xf] %v686_v46  ;;  %v688_v47 = vld [vmem:[%s4054_s6 + $0x778] sm:$0xf] }
  0xb3   : > { %v690_v48 = vld [vmem:[%s4054_s6 + $0x780] sm:$0xf]  ;;  %v692_v49 = vld [vmem:[%s4054_s6 + $0x788] sm:$0xf]  ;;  %689 = vst [vmem:[%s4061_s7 + $0x3bc] sm:$0xf] %v688_v47 }
  0xb4   : > { %691 = vst [vmem:[%s4061_s7 + $0x3c0] sm:$0xf] %v690_v48  ;;  %693 = vst [vmem:[%s4061_s7 + $0x3c4] sm:$0xf] %v692_v49  ;;  %v694_v50 = vld [vmem:[%s4054_s6 + $0x790] sm:$0xf] }
  0xb5   : > { %v696_v51 = vld [vmem:[%s4054_s6 + $0x798] sm:$0xf]  ;;  %v698_v52 = vld [vmem:[%s4054_s6 + $0x7a0] sm:$0xf]  ;;  %695 = vst [vmem:[%s4061_s7 + $0x3c8] sm:$0xf] %v694_v50 }
  0xb6   : > { %697 = vst [vmem:[%s4061_s7 + $0x3cc] sm:$0xf] %v696_v51  ;;  %699 = vst [vmem:[%s4061_s7 + $0x3d0] sm:$0xf] %v698_v52  ;;  %v700_v53 = vld [vmem:[%s4054_s6 + $0x7a8] sm:$0xf] }
  0xb7   : > { %v702_v54 = vld [vmem:[%s4054_s6 + $0x7b0] sm:$0xf]  ;;  %v704_v55 = vld [vmem:[%s4054_s6 + $0x7b8] sm:$0xf]  ;;  %701 = vst [vmem:[%s4061_s7 + $0x3d4] sm:$0xf] %v700_v53 }
  0xb8   : > { %703 = vst [vmem:[%s4061_s7 + $0x3d8] sm:$0xf] %v702_v54  ;;  %705 = vst [vmem:[%s4061_s7 + $0x3dc] sm:$0xf] %v704_v55  ;;  %v706_v56 = vld [vmem:[%s4054_s6 + $0x7c0] sm:$0xf] }
  0xb9   : > { %v708_v57 = vld [vmem:[%s4054_s6 + $0x7c8] sm:$0xf]  ;;  %v710_v58 = vld [vmem:[%s4054_s6 + $0x7d0] sm:$0xf]  ;;  %707 = vst [vmem:[%s4061_s7 + $0x3e0] sm:$0xf] %v706_v56 }
  0xba   : > { %709 = vst [vmem:[%s4061_s7 + $0x3e4] sm:$0xf] %v708_v57  ;;  %711 = vst [vmem:[%s4061_s7 + $0x3e8] sm:$0xf] %v710_v58  ;;  %v712_v59 = vld [vmem:[%s4054_s6 + $0x7d8] sm:$0xf] }
  0xbb   : > { %v714_v60 = vld [vmem:[%s4054_s6 + $0x7e0] sm:$0xf]  ;;  %v716_v61 = vld [vmem:[%s4054_s6 + $0x7e8] sm:$0xf]  ;;  %713 = vst [vmem:[%s4061_s7 + $0x3ec] sm:$0xf] %v712_v59 }
  0xbc   : > { %715 = vst [vmem:[%s4061_s7 + $0x3f0] sm:$0xf] %v714_v60  ;;  %717 = vst [vmem:[%s4061_s7 + $0x3f4] sm:$0xf] %v716_v61  ;;  %v718_v62 = vld [vmem:[%s4054_s6 + $0x7f0] sm:$0xf] }
  0xbd   : > { %v720_v63 = vld [vmem:[%s4054_s6 + $0x7f8] sm:$0xf]  ;;  %v722_v0 = vld [vmem:[%s4054_s6 + $0x800] sm:$0xf]  ;;  %719 = vst [vmem:[%s4061_s7 + $0x3f8] sm:$0xf] %v718_v62 }
  0xbe   : > { %721 = vst [vmem:[%s4061_s7 + $0x3fc] sm:$0xf] %v720_v63  ;;  %723 = vst [vmem:[%s4061_s7 + $0x400] sm:$0xf] %v722_v0  ;;  %v724_v1 = vld [vmem:[%s4054_s6 + $0x808] sm:$0xf] }
  0xbf   : > { %v726_v2 = vld [vmem:[%s4054_s6 + $0x810] sm:$0xf]  ;;  %v728_v3 = vld [vmem:[%s4054_s6 + $0x818] sm:$0xf]  ;;  %725 = vst [vmem:[%s4061_s7 + $0x404] sm:$0xf] %v724_v1 }
  0xc0   : > { %727 = vst [vmem:[%s4061_s7 + $0x408] sm:$0xf] %v726_v2  ;;  %729 = vst [vmem:[%s4061_s7 + $0x40c] sm:$0xf] %v728_v3  ;;  %v730_v4 = vld [vmem:[%s4054_s6 + $0x820] sm:$0xf] }
  0xc1   : > { %v732_v5 = vld [vmem:[%s4054_s6 + $0x828] sm:$0xf]  ;;  %v734_v6 = vld [vmem:[%s4054_s6 + $0x830] sm:$0xf]  ;;  %731 = vst [vmem:[%s4061_s7 + $0x410] sm:$0xf] %v730_v4 }
  0xc2   : > { %733 = vst [vmem:[%s4061_s7 + $0x414] sm:$0xf] %v732_v5  ;;  %735 = vst [vmem:[%s4061_s7 + $0x418] sm:$0xf] %v734_v6  ;;  %v736_v7 = vld [vmem:[%s4054_s6 + $0x838] sm:$0xf] }
  0xc3   : > { %v738_v8 = vld [vmem:[%s4054_s6 + $0x840] sm:$0xf]  ;;  %v740_v9 = vld [vmem:[%s4054_s6 + $0x848] sm:$0xf]  ;;  %737 = vst [vmem:[%s4061_s7 + $0x41c] sm:$0xf] %v736_v7 }
  0xc4   : > { %739 = vst [vmem:[%s4061_s7 + $0x420] sm:$0xf] %v738_v8  ;;  %741 = vst [vmem:[%s4061_s7 + $0x424] sm:$0xf] %v740_v9  ;;  %v742_v10 = vld [vmem:[%s4054_s6 + $0x850] sm:$0xf] }
  0xc5   : > { %v744_v11 = vld [vmem:[%s4054_s6 + $0x858] sm:$0xf]  ;;  %v746_v12 = vld [vmem:[%s4054_s6 + $0x860] sm:$0xf]  ;;  %743 = vst [vmem:[%s4061_s7 + $0x428] sm:$0xf] %v742_v10 }
  0xc6   : > { %745 = vst [vmem:[%s4061_s7 + $0x42c] sm:$0xf] %v744_v11  ;;  %747 = vst [vmem:[%s4061_s7 + $0x430] sm:$0xf] %v746_v12  ;;  %v748_v13 = vld [vmem:[%s4054_s6 + $0x868] sm:$0xf] }
  0xc7   : > { %v750_v14 = vld [vmem:[%s4054_s6 + $0x870] sm:$0xf]  ;;  %v752_v15 = vld [vmem:[%s4054_s6 + $0x878] sm:$0xf]  ;;  %749 = vst [vmem:[%s4061_s7 + $0x434] sm:$0xf] %v748_v13 }
  0xc8   : > { %751 = vst [vmem:[%s4061_s7 + $0x438] sm:$0xf] %v750_v14  ;;  %753 = vst [vmem:[%s4061_s7 + $0x43c] sm:$0xf] %v752_v15  ;;  %v754_v16 = vld [vmem:[%s4054_s6 + $0x880] sm:$0xf] }
  0xc9   : > { %v756_v17 = vld [vmem:[%s4054_s6 + $0x888] sm:$0xf]  ;;  %v758_v18 = vld [vmem:[%s4054_s6 + $0x890] sm:$0xf]  ;;  %755 = vst [vmem:[%s4061_s7 + $0x440] sm:$0xf] %v754_v16 }
  0xca   : > { %757 = vst [vmem:[%s4061_s7 + $0x444] sm:$0xf] %v756_v17  ;;  %759 = vst [vmem:[%s4061_s7 + $0x448] sm:$0xf] %v758_v18  ;;  %v760_v19 = vld [vmem:[%s4054_s6 + $0x898] sm:$0xf] }
  0xcb   : > { %v762_v20 = vld [vmem:[%s4054_s6 + $0x8a0] sm:$0xf]  ;;  %v764_v21 = vld [vmem:[%s4054_s6 + $0x8a8] sm:$0xf]  ;;  %761 = vst [vmem:[%s4061_s7 + $0x44c] sm:$0xf] %v760_v19 }
  0xcc   : > { %763 = vst [vmem:[%s4061_s7 + $0x450] sm:$0xf] %v762_v20  ;;  %765 = vst [vmem:[%s4061_s7 + $0x454] sm:$0xf] %v764_v21  ;;  %v766_v22 = vld [vmem:[%s4054_s6 + $0x8b0] sm:$0xf] }
  0xcd   : > { %v768_v23 = vld [vmem:[%s4054_s6 + $0x8b8] sm:$0xf]  ;;  %v770_v24 = vld [vmem:[%s4054_s6 + $0x8c0] sm:$0xf]  ;;  %767 = vst [vmem:[%s4061_s7 + $0x458] sm:$0xf] %v766_v22 }
  0xce   : > { %769 = vst [vmem:[%s4061_s7 + $0x45c] sm:$0xf] %v768_v23  ;;  %771 = vst [vmem:[%s4061_s7 + $0x460] sm:$0xf] %v770_v24  ;;  %v772_v25 = vld [vmem:[%s4054_s6 + $0x8c8] sm:$0xf] }
  0xcf   : > { %v774_v26 = vld [vmem:[%s4054_s6 + $0x8d0] sm:$0xf]  ;;  %v776_v27 = vld [vmem:[%s4054_s6 + $0x8d8] sm:$0xf]  ;;  %773 = vst [vmem:[%s4061_s7 + $0x464] sm:$0xf] %v772_v25 }
  0xd0   : > { %775 = vst [vmem:[%s4061_s7 + $0x468] sm:$0xf] %v774_v26  ;;  %777 = vst [vmem:[%s4061_s7 + $0x46c] sm:$0xf] %v776_v27  ;;  %v778_v28 = vld [vmem:[%s4054_s6 + $0x8e0] sm:$0xf] }
  0xd1   : > { %v780_v29 = vld [vmem:[%s4054_s6 + $0x8e8] sm:$0xf]  ;;  %v782_v30 = vld [vmem:[%s4054_s6 + $0x8f0] sm:$0xf]  ;;  %779 = vst [vmem:[%s4061_s7 + $0x470] sm:$0xf] %v778_v28 }
  0xd2   : > { %781 = vst [vmem:[%s4061_s7 + $0x474] sm:$0xf] %v780_v29  ;;  %783 = vst [vmem:[%s4061_s7 + $0x478] sm:$0xf] %v782_v30  ;;  %v784_v31 = vld [vmem:[%s4054_s6 + $0x8f8] sm:$0xf] }
  0xd3   : > { %785 = vst [vmem:[%s4061_s7 + $0x47c] sm:$0xf] %v784_v31 }
  0xd4 PF: > { %1391 = sbr.rel (!%p4032_p3) target bundleno = 217 (0xd9), region = 69  ;;  %s1393_s8 = sand.u32 (%p4032_p3), 1, %s3961_s16  }
  0xd5   : > { %s3340_s9 = sshll.u32 (%p4032_p3), %s3969_s18, 2  ;;  %s3339_s10 = sshll.u32 (%p4032_p3), %s1393_s8, 3 }
  0xd6   : > { %s1400_s13 = scalar_lea.vmem (%p4032_p3), %s4877_s3, %s3340_s9  ;;  %s1395_s14 = scalar_lea.vmem (%p4032_p3), [#allocation3], %s3339_s10 }
  0xd7   : > { %v1417_v32 = vld [vmem:[%s1400_s13] sm:$0xf] (%p4032_p3)  ;;  %v1419_v33 = vld [vmem:[%s1400_s13 + $0x8] sm:$0xf] (%p4032_p3) }
  0xd8   : > { %1418 = vst [vmem:[%s1395_s14] sm:$0xf] (%p4032_p3), %v1417_v32  ;;  %1420 = vst [vmem:[%s1395_s14 + $0x4] sm:$0xf] (%p4032_p3), %v1419_v33 }
  0xd9 PF: > { %p3341_p8 = scmp.ge.s32.totalorder %s3973_s19, 1  ;;  %p1447_p9 = scmp.lt.s32.totalorder %s3973_s19, 3 }
  0xdb   : > { %p1448_p10 = pnand %p3341_p8, %p1447_p9 }
  0xdc   : > { %s1454_s21 = sand.u32 (!%p1448_p10), 1, %s3957_s15   ;;  %p1505_p11 = scmp.lt.s32.totalorder (!%p1448_p10), %s3965_s17, 1 }
  0xdd   : > { %1451 = sbr.rel (%p1448_p10) target bundleno = 605 (0x25d), region = 110  ;;  %s3342_s7 = sshll.u32 (!%p1448_p10), %s1454_s21, 3 }
  0xde   : > { %s3723_s22 = smul.u32 (!%p1448_p10), 1152, %s1454_s21  ;;  %s1463_s8 = scalar_lea.vmem (!%p1448_p10), [#allocation3], %s3342_s7 }
  0xdf   : > { %s1497_s15 = scalar_lea.vmem (!%p1448_p10), [#allocation4], %s3342_s7 }
  0xe0   : > { %s4652_s29 = scalar_lea.vmem (!%p1448_p10), [#allocation2], %s3723_s22 }
  0xe2   : > { %v3797_v34 = vld [vmem:[%s4874_s0 + $0x4] ss:$72 sps:$4 sm:$0xff]   ;;  %v3764_v36 = vld [vmem:[%s4652_s29 + $0x78] sm:$0xff]   ;;  %v3768_v40 = vld [vmem:[%s4652_s29 + $0x70] sm:$0xff]   ;;  %s3510_s21 = sshll.u32 (%p4039_p6), %s3965_s17, 2 }
  0xe3   : > { %v3802_v35 = vld [vmem:[%s4874_s0 + $0xc] ss:$72 sps:$4 sm:$0xff]   ;;  %2810 = vmatprep.mubr.bf16.mxu0 %v3797_v34  ;;  %v3765_v37 = vld [vmem:[%s4652_s29 + $0x38] sm:$0xff]   ;;  %3524 = vmatprep.subr.bf16.mxu0 %v3764_v36  ;;  %v3776_v48 = vld [vmem:[%s4652_s29 + $0x60] sm:$0xff]   ;;  %s3176_s11 = scalar_lea.vmem (%p4039_p6), %s4878_s4, %s3510_s21 }
  0xe4   : > { %2851 = vmatprep.mubr.bf16.mxu1 %v3802_v35  ;;  %v3766_v38 = vld [vmem:[%s4652_s29 + $0xf8] sm:$0xff]   ;;  %3525 = vmatpush3.bf16.msra.mxu0 %v3765_v37  ;;  %v3769_v41 = vld [vmem:[%s4652_s29 + $0x30] sm:$0xff]   ;;  %v3772_v44 = vld [vmem:[%s4652_s29 + $0x68] sm:$0xff]  }
  0xe5   : > { %v3767_v39 = vld [vmem:[%s4652_s29 + $0xb8] sm:$0xff]   ;;  %3546 = vmatprep.subr.bf16.mxu1 %v3766_v38  ;;  %3526 = vmatprep.subr.bf16.mxu0 %v3768_v40  ;;  %v3770_v42 = vld [vmem:[%s4652_s29 + $0xf0] sm:$0xff]   ;;  %v3773_v45 = vld [vmem:[%s4652_s29 + $0x28] sm:$0xff]  }
  0xe6   : > { %3547 = vmatpush3.bf16.msra.mxu1 %v3767_v39  ;;  %v3771_v43 = vld [vmem:[%s4652_s29 + $0xb0] sm:$0xff]   ;;  %v3774_v46 = vld [vmem:[%s4652_s29 + $0xe8] sm:$0xff]   ;;  %v3777_v49 = vld [vmem:[%s4652_s29 + $0x20] sm:$0xff]  }
  0xe7   : > { %3548 = vmatprep.subr.bf16.mxu1 %v3770_v42  ;;  %v3775_v47 = vld [vmem:[%s4652_s29 + $0xa8] sm:$0xff]   ;;  %v3778_v50 = vld [vmem:[%s4652_s29 + $0xe0] sm:$0xff]   ;;  %v3780_v52 = vld [vmem:[%s4652_s29 + $0x58] sm:$0xff]  }
  0xe8   : > { %3527 = vmatpush3.bf16.msra.mxu0 %v3769_v41  ;;  %v3779_v51 = vld [vmem:[%s4652_s29 + $0xa0] sm:$0xff]   ;;  %v3781_v53 = vld [vmem:[%s4652_s29 + $0x18] sm:$0xff]   ;;  %v3784_v56 = vld [vmem:[%s4652_s29 + $0x50] sm:$0xff]  }
  0xe9   : > { %3528 = vmatprep.subr.bf16.mxu0 %v3772_v44  ;;  %v3782_v54 = vld [vmem:[%s4652_s29 + $0xd8] sm:$0xff]   ;;  %v3785_v57 = vld [vmem:[%s4652_s29 + $0x10] sm:$0xff]   ;;  %v3788_v60 = vld [vmem:[%s4652_s29 + $0x48] sm:$0xff]  }
  0xea   : > { %3549 = vmatpush3.bf16.msra.mxu1 %v3771_v43  ;;  %v3783_v55 = vld [vmem:[%s4652_s29 + $0x98] sm:$0xff]   ;;  %v3786_v58 = vld [vmem:[%s4652_s29 + $0xd0] sm:$0xff]   ;;  %v3789_v61 = vld [vmem:[%s4652_s29 + $0x8] sm:$0xff]  }
  0xeb   : > { %3550 = vmatprep.subr.bf16.mxu1 %v3774_v46  ;;  %v3787_v59 = vld [vmem:[%s4652_s29 + $0x90] sm:$0xff]   ;;  %v3790_v62 = vld [vmem:[%s4652_s29 + $0xc8] sm:$0xff]   ;;  %v3792_v0 = vld [vmem:[%s4652_s29 + $0x40] sm:$0xff]  }
  0xec   : > { %3529 = vmatpush3.bf16.msra.mxu0 %v3773_v45  ;;  %v3791_v63 = vld [vmem:[%s4652_s29 + $0x88] sm:$0xff]   ;;  %v3793_v2 = vld [vmem:[%s4652_s29] sm:$0xff]   ;;  %v3835_v3 = vld [vmem:[%s4874_s0 + $0x14] ss:$72 sps:$4 sm:$0xff]  }
  0xed   : > { %3530 = vmatprep.subr.bf16.mxu0 %v3776_v48  ;;  %v3795_v1 = vld [vmem:[%s4874_s0] ss:$72 sps:$4 sm:$0xff]   ;;  %v3799_v7 = vld [vmem:[%s4652_s29 + $0x178] sm:$0xff]   ;;  %v3806_v11 = vld [vmem:[%s4652_s29 + $0x170] sm:$0xff]  }
  0xee   : > { %3551 = vmatpush3.bf16.msra.mxu1 %v3775_v47  ;;  %v3794_v4 = vld [vmem:[%s4652_s29 + $0xc0] sm:$0xff]   ;;  %v3800_v5 = vld [vmem:[%s4874_s0 + $0x8] ss:$72 sps:$4 sm:$0xff]   ;;  %v3803_v8 = vld [vmem:[%s4652_s29 + $0x138] sm:$0xff]  }
  0xef   : > { %3552 = vmatprep.subr.bf16.mxu1 %v3778_v50  ;;  %v3798_v6 = vld [vmem:[%s4652_s29 + $0x80] sm:$0xff]   ;;  %v3804_v9 = vld [vmem:[%s4652_s29 + $0x1f8] sm:$0xff]   ;;  %v3807_v12 = vld [vmem:[%s4652_s29 + $0x130] sm:$0xff]  }
  0xf0   : > { %3531 = vmatpush3.bf16.msra.mxu0 %v3777_v49  ;;  %v3805_v10 = vld [vmem:[%s4652_s29 + $0x1b8] sm:$0xff]   ;;  %v3808_v13 = vld [vmem:[%s4652_s29 + $0x1f0] sm:$0xff]   ;;  %v3810_v15 = vld [vmem:[%s4652_s29 + $0x168] sm:$0xff]  }
  0xf1   : > { %3532 = vmatprep.subr.bf16.mxu0 %v3780_v52  ;;  %v3809_v14 = vld [vmem:[%s4652_s29 + $0x1b0] sm:$0xff]   ;;  %v3811_v16 = vld [vmem:[%s4652_s29 + $0x128] sm:$0xff]   ;;  %v3814_v19 = vld [vmem:[%s4652_s29 + $0x160] sm:$0xff]  }
  0xf2   : > { %3553 = vmatpush3.bf16.msra.mxu1 %v3779_v51  ;;  %v3812_v17 = vld [vmem:[%s4652_s29 + $0x1e8] sm:$0xff]   ;;  %v3815_v20 = vld [vmem:[%s4652_s29 + $0x120] sm:$0xff]   ;;  %v3818_v23 = vld [vmem:[%s4652_s29 + $0x158] sm:$0xff]  }
  0xf3   : > { %3554 = vmatprep.subr.bf16.mxu1 %v3782_v54  ;;  %v3813_v18 = vld [vmem:[%s4652_s29 + $0x1a8] sm:$0xff]   ;;  %v3816_v21 = vld [vmem:[%s4652_s29 + $0x1e0] sm:$0xff]   ;;  %v3819_v24 = vld [vmem:[%s4652_s29 + $0x118] sm:$0xff]  }
  0xf4   : > { %3533 = vmatpush3.bf16.msra.mxu0 %v3781_v53  ;;  %v3817_v22 = vld [vmem:[%s4652_s29 + $0x1a0] sm:$0xff]   ;;  %v3820_v25 = vld [vmem:[%s4652_s29 + $0x1d8] sm:$0xff]   ;;  %v3822_v27 = vld [vmem:[%s4652_s29 + $0x150] sm:$0xff]  }
  0xf5   : > { %3534 = vmatprep.subr.bf16.mxu0 %v3784_v56  ;;  %v3821_v26 = vld [vmem:[%s4652_s29 + $0x198] sm:$0xff]   ;;  %v3823_v28 = vld [vmem:[%s4652_s29 + $0x110] sm:$0xff]   ;;  %v3826_v31 = vld [vmem:[%s4652_s29 + $0x148] sm:$0xff]  }
  0xf6   : > { %3555 = vmatpush3.bf16.msra.mxu1 %v3783_v55  ;;  %v3824_v29 = vld [vmem:[%s4652_s29 + $0x1d0] sm:$0xff]   ;;  %v3827_v32 = vld [vmem:[%s4652_s29 + $0x108] sm:$0xff]   ;;  %v3830_v35 = vld [vmem:[%s4652_s29 + $0x140] sm:$0xff]  }
  0xf7   : > { %3556 = vmatprep.subr.bf16.mxu1 %v3786_v58  ;;  %v3825_v30 = vld [vmem:[%s4652_s29 + $0x190] sm:$0xff]   ;;  %v3828_v33 = vld [vmem:[%s4652_s29 + $0x1c8] sm:$0xff]   ;;  %v3831_v37 = vld [vmem:[%s4652_s29 + $0x100] sm:$0xff]  }
  0xf8   : > { %3535 = vmatpush3.bf16.msra.mxu0 %v3785_v57  ;;  %v3829_v34 = vld [vmem:[%s4652_s29 + $0x188] sm:$0xff]   ;;  %v3833_v36 = vld [vmem:[%s4874_s0 + $0x10] ss:$72 sps:$4 sm:$0xff]   ;;  %v3832_v38 = vld [vmem:[%s4652_s29 + $0x1c0] sm:$0xff]  }
  0xf9   : > { %3536 = vmatprep.subr.bf16.mxu0 %v3788_v60  ;;  %v3836_v39 = vld [vmem:[%s4652_s29 + $0x180] sm:$0xff]   ;;  %v3837_v40 = vld [vmem:[%s4652_s29 + $0x278] sm:$0xff]   ;;  %v3844_v46 = vld [vmem:[%s4652_s29 + $0x270] sm:$0xff]  }
  0xfa   : > { %3557 = vmatpush3.bf16.msra.mxu1 %v3787_v59  ;;  %v3838_v41 = vld [vmem:[%s4874_s0 + $0x18] ss:$72 sps:$4 sm:$0xff]   ;;  %v3840_v42 = vld [vmem:[%s4874_s0 + $0x1c] ss:$72 sps:$4 sm:$0xff]   ;;  %v3845_v47 = vld [vmem:[%s4652_s29 + $0x230] sm:$0xff]  }
  0xfb   : > { %3558 = vmatprep.subr.bf16.mxu1 %v3790_v62  ;;  %v3841_v43 = vld [vmem:[%s4652_s29 + $0x238] sm:$0xff]   ;;  %v3846_v48 = vld [vmem:[%s4652_s29 + $0x2f0] sm:$0xff]   ;;  %v3848_v50 = vld [vmem:[%s4652_s29 + $0x268] sm:$0xff]  }
  0xfc   : > { %3537 = vmatpush3.bf16.msra.mxu0 %v3789_v61  ;;  %v3842_v44 = vld [vmem:[%s4652_s29 + $0x2f8] sm:$0xff]   ;;  %v3847_v49 = vld [vmem:[%s4652_s29 + $0x2b0] sm:$0xff]   ;;  %v3849_v51 = vld [vmem:[%s4652_s29 + $0x228] sm:$0xff]  }
  0xfd   : > { %3538 = vmatprep.subr.bf16.mxu0 %v3792_v0  ;;  %v3843_v45 = vld [vmem:[%s4652_s29 + $0x2b8] sm:$0xff]   ;;  %v3850_v52 = vld [vmem:[%s4652_s29 + $0x2e8] sm:$0xff]   ;;  %v3852_v54 = vld [vmem:[%s4652_s29 + $0x260] sm:$0xff]  }
  0xfe   : > { %3559 = vmatpush3.bf16.msra.mxu1 %v3791_v63  ;;  %v3851_v53 = vld [vmem:[%s4652_s29 + $0x2a8] sm:$0xff]   ;;  %v3853_v55 = vld [vmem:[%s4652_s29 + $0x220] sm:$0xff]   ;;  %v3856_v58 = vld [vmem:[%s4652_s29 + $0x258] sm:$0xff]  }
  0xff   : > { %3560 = vmatprep.subr.bf16.mxu1 %v3794_v4  ;;  %v3854_v56 = vld [vmem:[%s4652_s29 + $0x2e0] sm:$0xff]   ;;  %v3857_v59 = vld [vmem:[%s4652_s29 + $0x218] sm:$0xff]   ;;  %v3860_v62 = vld [vmem:[%s4652_s29 + $0x250] sm:$0xff]  }
 0x100   : > { %3539 = vmatpush3.bf16.msra.mxu0 %v3793_v2  ;;  %v3855_v57 = vld [vmem:[%s4652_s29 + $0x2a0] sm:$0xff]   ;;  %v3858_v60 = vld [vmem:[%s4652_s29 + $0x2d8] sm:$0xff]   ;;  %v3861_v63 = vld [vmem:[%s4652_s29 + $0x210] sm:$0xff]  }
 0x101   : > { %3568 = vmatprep.subr.bf16.mxu0 %v3799_v7  ;;  %v3859_v61 = vld [vmem:[%s4652_s29 + $0x298] sm:$0xff]   ;;  %v3862_v0 = vld [vmem:[%s4652_s29 + $0x2d0] sm:$0xff]   ;;  %v3864_v2 = vld [vmem:[%s4652_s29 + $0x248] sm:$0xff]  }
 0x102   : > { %3561 = vmatpush3.bf16.msra.mxu1 %v3798_v6  ;;  %v3866_v4 = vld [vmem:[%s4652_s29 + $0x2c8] sm:$0xff]   ;;  %v3868_v6 = vld [vmem:[%s4652_s29 + $0x240] sm:$0xff]  }
 0x103   : > { %2811 = vmatmul.mubr.bf16.vlgmr.msra.gmra.mxu0 %v3795_v1  ;;  %3590 = vmatprep.subr.bf16.mxu1 %v3804_v9  ;;  %v3863_v1 = vld [vmem:[%s4652_s29 + $0x290] sm:$0xff]   ;;  %v3869_v7 = vld [vmem:[%s4652_s29 + $0x200] sm:$0xff]  }
 0x104   : > { %3569 = vmatpush3.bf16.msra.mxu0 %v3803_v8  ;;  %2892 = vmatprep.mubr.bf16.mxu0 %v3835_v3  ;;  %v3865_v3 = vld [vmem:[%s4652_s29 + $0x208] sm:$0xff]   ;;  %v3870_v8 = vld [vmem:[%s4652_s29 + $0x2c0] sm:$0xff]  }
 0x105   : > { %2852 = vmatmul.mubr.bf16.vlgmr.msra.gmra.mxu1 %v3800_v5  ;;  %3570 = vmatprep.subr.bf16.mxu0 %v3806_v11  ;;  %v3867_v5 = vld [vmem:[%s4652_s29 + $0x288] sm:$0xff]   ;;  %v3874_v11 = vld [vmem:[%s4652_s29 + $0x280] sm:$0xff]  }
 0x106   : > { %3591 = vmatpush3.bf16.msra.mxu1 %v3805_v10  ;;  %2933 = vmatprep.mubr.bf16.mxu1 %v3840_v42  ;;  %v3871_v9 = vld [vmem:[%s4874_s0 + $0x20] ss:$72 sps:$4 sm:$0xff]   ;;  %v3873_v10 = vld [vmem:[%s4874_s0 + $0x24] ss:$72 sps:$4 sm:$0xff]  }
 0x107   : > { %3592 = vmatprep.subr.bf16.mxu1 %v3808_v13  ;;  %v3876_v13 = vld [vmem:[%s4874_s0 + $0x28] ss:$72 sps:$4 sm:$0xff]   ;;  %v3906_v42 = vld [vmem:[%s4652_s29 + $0x340] sm:$0xff]  }
 0x108   : > { %3571 = vmatpush3.bf16.msra.mxu0 %v3807_v12  ;;  %v3875_v12 = vld [vmem:[%s4652_s29 + $0x378] sm:$0xff]  }
 0x109   : > { %3572 = vmatprep.subr.bf16.mxu0 %v3810_v15  ;;  %v3879_v15 = vld [vmem:[%s4652_s29 + $0x338] sm:$0xff]  }
 0x10a   : > { %3593 = vmatpush3.bf16.msra.mxu1 %v3809_v14  ;;  %v3878_v14 = vld [vmem:[%s4874_s0 + $0x2c] ss:$72 sps:$4 sm:$0xff]  }
 0x10b   : > { %3594 = vmatprep.subr.bf16.mxu1 %v3812_v17  ;;  %v3881_v17 = vld [vmem:[%s4652_s29 + $0x3b8] sm:$0xff]  }
 0x10c   : > { %3573 = vmatpush3.bf16.msra.mxu0 %v3811_v16  ;;  %v3880_v16 = vld [vmem:[%s4652_s29 + $0x3f8] sm:$0xff]  }
 0x10d   : > { %3574 = vmatprep.subr.bf16.mxu0 %v3814_v19  ;;  %v3883_v19 = vld [vmem:[%s4652_s29 + $0x330] sm:$0xff]  }
 0x10e   : > { %3595 = vmatpush3.bf16.msra.mxu1 %v3813_v18  ;;  %v3882_v18 = vld [vmem:[%s4652_s29 + $0x370] sm:$0xff]  }
 0x10f   : > { %3596 = vmatprep.subr.bf16.mxu1 %v3816_v21  ;;  %v3885_v21 = vld [vmem:[%s4652_s29 + $0x3b0] sm:$0xff]  }
 0x110   : > { %3575 = vmatpush3.bf16.msra.mxu0 %v3815_v20  ;;  %v3884_v20 = vld [vmem:[%s4652_s29 + $0x3f0] sm:$0xff]  }
 0x111   : > { %3576 = vmatprep.subr.bf16.mxu0 %v3818_v23  ;;  %v3887_v23 = vld [vmem:[%s4652_s29 + $0x328] sm:$0xff]  }
 0x112   : > { %3597 = vmatpush3.bf16.msra.mxu1 %v3817_v22  ;;  %v3886_v22 = vld [vmem:[%s4652_s29 + $0x368] sm:$0xff]  }
 0x113   : > { %3598 = vmatprep.subr.bf16.mxu1 %v3820_v25  ;;  %v3889_v25 = vld [vmem:[%s4652_s29 + $0x3a8] sm:$0xff]  }
 0x114   : > { %3577 = vmatpush3.bf16.msra.mxu0 %v3819_v24  ;;  %v3888_v24 = vld [vmem:[%s4652_s29 + $0x3e8] sm:$0xff]  }
 0x115   : > { %3578 = vmatprep.subr.bf16.mxu0 %v3822_v27  ;;  %v3891_v27 = vld [vmem:[%s4652_s29 + $0x320] sm:$0xff]  }
 0x116   : > { %3599 = vmatpush3.bf16.msra.mxu1 %v3821_v26  ;;  %v3890_v26 = vld [vmem:[%s4652_s29 + $0x360] sm:$0xff]  }
 0x117   : > { %3600 = vmatprep.subr.bf16.mxu1 %v3824_v29  ;;  %v3893_v29 = vld [vmem:[%s4652_s29 + $0x3a0] sm:$0xff]  }
 0x118   : > { %3579 = vmatpush3.bf16.msra.mxu0 %v3823_v28  ;;  %v3892_v28 = vld [vmem:[%s4652_s29 + $0x3e0] sm:$0xff]  }
 0x119   : > { %3580 = vmatprep.subr.bf16.mxu0 %v3826_v31  ;;  %v3895_v31 = vld [vmem:[%s4652_s29 + $0x318] sm:$0xff]  }
 0x11a   : > { %3601 = vmatpush3.bf16.msra.mxu1 %v3825_v30  ;;  %v3894_v30 = vld [vmem:[%s4652_s29 + $0x358] sm:$0xff]  }
 0x11b   : > { %3602 = vmatprep.subr.bf16.mxu1 %v3828_v33  ;;  %v3897_v33 = vld [vmem:[%s4652_s29 + $0x398] sm:$0xff]  }
 0x11c   : > { %3581 = vmatpush3.bf16.msra.mxu0 %v3827_v32  ;;  %v3896_v32 = vld [vmem:[%s4652_s29 + $0x3d8] sm:$0xff]  }
 0x11d   : > { %3582 = vmatprep.subr.bf16.mxu0 %v3830_v35  ;;  %v3899_v35 = vld [vmem:[%s4652_s29 + $0x310] sm:$0xff]  }
 0x11e   : > { %3603 = vmatpush3.bf16.msra.mxu1 %v3829_v34  ;;  %v3898_v34 = vld [vmem:[%s4652_s29 + $0x350] sm:$0xff]  }
 0x11f   : > { %3604 = vmatprep.subr.bf16.mxu1 %v3832_v38  ;;  %v3902_v38 = vld [vmem:[%s4652_s29 + $0x348] sm:$0xff]  }
 0x120   : > { %3583 = vmatpush3.bf16.msra.mxu0 %v3831_v37  ;;  %v3901_v37 = vld [vmem:[%s4652_s29 + $0x390] sm:$0xff]  }
 0x121   : > { %3612 = vmatprep.subr.bf16.mxu0 %v3837_v40  ;;  %v3904_v40 = vld [vmem:[%s4652_s29 + $0x3c8] sm:$0xff]  }
 0x122   : > { %3605 = vmatpush3.bf16.msra.mxu1 %v3836_v39  ;;  %v3903_v39 = vld [vmem:[%s4652_s29 + $0x308] sm:$0xff]  }
 0x123   : > { %2893 = vmatmul.mubr.bf16.vlgmr.msra.gmra.mxu0 %v3833_v36  ;;  %3634 = vmatprep.subr.bf16.mxu1 %v3842_v44  ;;  %v3900_v36 = vld [vmem:[%s4652_s29 + $0x3d0] sm:$0xff]   ;;  %v3908_v44 = vld [vmem:[%s4652_s29 + $0x3c0] sm:$0xff]  }
 0x124   : > { %3613 = vmatpush3.bf16.msra.mxu0 %v3841_v43  ;;  %2974 = vmatprep.mubr.bf16.mxu0 %v3873_v10  ;;  %v3907_v43 = vld [vmem:[%s4652_s29 + $0x300] sm:$0xff]  }
 0x125   : > { %2934 = vmatmul.mubr.bf16.vlgmr.msra.gmra.mxu1 %v3838_v41  ;;  %3614 = vmatprep.subr.bf16.mxu0 %v3844_v46  ;;  %v3905_v41 = vld [vmem:[%s4652_s29 + $0x388] sm:$0xff]   ;;  %v3911_v46 = vld [vmem:[%s4874_s0 + $0x34] ss:$72 sps:$4 sm:$0xff]  }
 0x126   : > { %3635 = vmatpush3.bf16.msra.mxu1 %v3843_v45  ;;  %3015 = vmatprep.mubr.bf16.mxu1 %v3878_v14  ;;  %v3909_v45 = vld [vmem:[%s4874_s0 + $0x30] ss:$72 sps:$4 sm:$0xff]  }
 0x127   : > { %3636 = vmatprep.subr.bf16.mxu1 %v3846_v48  ;;  %v3913_v48 = vld [vmem:[%s4652_s29 + $0x478] sm:$0xff]  }
 0x128   : > { %3615 = vmatpush3.bf16.msra.mxu0 %v3845_v47  ;;  %v3912_v47 = vld [vmem:[%s4652_s29 + $0x380] sm:$0xff]  }
 0x129   : > { %3616 = vmatprep.subr.bf16.mxu0 %v3848_v50  ;;  %v3916_v50 = vld [vmem:[%s4874_s0 + $0x3c] ss:$72 sps:$4 sm:$0xff]  }
 0x12a   : > { %3637 = vmatpush3.bf16.msra.mxu1 %v3847_v49  ;;  %v3914_v49 = vld [vmem:[%s4874_s0 + $0x38] ss:$72 sps:$4 sm:$0xff]  }
 0x12b   : > { %3638 = vmatprep.subr.bf16.mxu1 %v3850_v52  ;;  %v3918_v52 = vld [vmem:[%s4652_s29 + $0x470] sm:$0xff]  }
 0x12c   : > { %3617 = vmatpush3.bf16.msra.mxu0 %v3849_v51  ;;  %v3917_v51 = vld [vmem:[%s4652_s29 + $0x438] sm:$0xff]  }
 0x12d   : > { %3618 = vmatprep.subr.bf16.mxu0 %v3852_v54  ;;  %v3920_v54 = vld [vmem:[%s4652_s29 + $0x468] sm:$0xff]  }
 0x12e   : > { %3639 = vmatpush3.bf16.msra.mxu1 %v3851_v53  ;;  %v3919_v53 = vld [vmem:[%s4652_s29 + $0x430] sm:$0xff]  }
 0x12f   : > { %3640 = vmatprep.subr.bf16.mxu1 %v3854_v56  ;;  %v3922_v56 = vld [vmem:[%s4652_s29 + $0x460] sm:$0xff]  }
 0x130   : > { %3619 = vmatpush3.bf16.msra.mxu0 %v3853_v55  ;;  %v3921_v55 = vld [vmem:[%s4652_s29 + $0x428] sm:$0xff]  }
 0x131   : > { %3620 = vmatprep.subr.bf16.mxu0 %v3856_v58  ;;  %v3924_v58 = vld [vmem:[%s4652_s29 + $0x458] sm:$0xff]  }
 0x132   : > { %3641 = vmatpush3.bf16.msra.mxu1 %v3855_v57  ;;  %v3923_v57 = vld [vmem:[%s4652_s29 + $0x420] sm:$0xff]  }
 0x133   : > { %3642 = vmatprep.subr.bf16.mxu1 %v3858_v60  ;;  %v3926_v60 = vld [vmem:[%s4652_s29 + $0x450] sm:$0xff]  }
 0x134   : > { %3621 = vmatpush3.bf16.msra.mxu0 %v3857_v59  ;;  %v3925_v59 = vld [vmem:[%s4652_s29 + $0x418] sm:$0xff]  }
 0x135   : > { %3622 = vmatprep.subr.bf16.mxu0 %v3860_v62  ;;  %v3927_v62 = vld [vmem:[%s4652_s29 + $0x410] sm:$0xff]  }
 0x136   : > { %3643 = vmatpush3.bf16.msra.mxu1 %v3859_v61  ;;  %v3934_v61 = vld [vmem:[%s4874_s0 + $0x44] ss:$72 sps:$4 sm:$0xff]  }
 0x137   : > { %3644 = vmatprep.subr.bf16.mxu1 %v3862_v0  ;;  %v3929_v0 = vld [vmem:[%s4652_s29 + $0x408] sm:$0xff]  }
 0x138   : > { %3623 = vmatpush3.bf16.msra.mxu0 %v3861_v63  ;;  %v3928_v63 = vld [vmem:[%s4652_s29 + $0x448] sm:$0xff]  }
 0x139   : > { %3624 = vmatprep.subr.bf16.mxu0 %v3864_v2  ;;  %v3931_v2 = vld [vmem:[%s4652_s29 + $0x400] sm:$0xff]  }
 0x13a   : > { %3645 = vmatpush3.bf16.msra.mxu1 %v3863_v1  ;;  %v3930_v1 = vld [vmem:[%s4652_s29 + $0x440] sm:$0xff]   ;;  %s1506_s29 = scalar_select %p1505_p11, %s3965_s17, 1 }
 0x13b   : > { %3646 = vmatprep.subr.bf16.mxu1 %v3866_v4 }
 0x13c   : > { %3625 = vmatpush3.bf16.msra.mxu0 %v3865_v3  ;;  %v3932_v3 = vld [vmem:[%s4874_s0 + $0x40] ss:$72 sps:$4 sm:$0xff]   ;;  %s1507_s6 = scalar_lea.vmem %s4876_s2, %s1506_s29 }
 0x13d   : > { %3626 = vmatprep.subr.bf16.mxu0 %v3868_v6 }
 0x13e   : > { %3647 = vmatpush3.bf16.msra.mxu1 %v3867_v5 }
 0x13f   : > { %3648 = vmatprep.subr.bf16.mxu1 %v3870_v8 }
 0x140   : > { %3627 = vmatpush3.bf16.msra.mxu0 %v3869_v7 }
 0x141   : > { %3656 = vmatprep.subr.bf16.mxu0 %v3875_v12 }
 0x142   : > { %3649 = vmatpush3.bf16.msra.mxu1 %v3874_v11 }
 0x143   : > { %2975 = vmatmul.mubr.bf16.vlgmr.msra.gmra.mxu0 %v3871_v9  ;;  %3678 = vmatprep.subr.bf16.mxu1 %v3880_v16 }
 0x144   : > { %3657 = vmatpush3.bf16.msra.mxu0 %v3879_v15  ;;  %3056 = vmatprep.mubr.bf16.mxu0 %v3911_v46 }
 0x145   : > { %3016 = vmatmul.mubr.bf16.vlgmr.msra.gmra.mxu1 %v3876_v13  ;;  %3658 = vmatprep.subr.bf16.mxu0 %v3882_v18 }
 0x146   : > { %3679 = vmatpush3.bf16.msra.mxu1 %v3881_v17  ;;  %3097 = vmatprep.mubr.bf16.mxu1 %v3916_v50 }
 0x147   : > { %3680 = vmatprep.subr.bf16.mxu1 %v3884_v20 }
 0x148   : > { %3659 = vmatpush3.bf16.msra.mxu0 %v3883_v19 }
 0x149   : > { %3660 = vmatprep.subr.bf16.mxu0 %v3886_v22 }
 0x14a   : > { %3681 = vmatpush3.bf16.msra.mxu1 %v3885_v21 }
 0x14b   : > { %3682 = vmatprep.subr.bf16.mxu1 %v3888_v24  ;;  %v3344_v24 = vld [vmem:[%s1507_s6] ss:$0 sm:$0xff] }
 0x14c   : > { %3661 = vmatpush3.bf16.msra.mxu0 %v3887_v23 }
 0x14d   : > { %3662 = vmatprep.subr.bf16.mxu0 %v3890_v26 }
 0x14e   : > { %3683 = vmatpush3.bf16.msra.mxu1 %v3889_v25 }
 0x14f   : > { %3684 = vmatprep.subr.bf16.mxu1 %v3892_v28 }
 0x150   : > { %3663 = vmatpush3.bf16.msra.mxu0 %v3891_v27 }
 0x151   : > { %3664 = vmatprep.subr.bf16.mxu0 %v3894_v30 }
 0x152   : > { %3685 = vmatpush3.bf16.msra.mxu1 %v3893_v29 }
 0x153   : > { %3686 = vmatprep.subr.bf16.mxu1 %v3896_v32 }
 0x154   : > { %3665 = vmatpush3.bf16.msra.mxu0 %v3895_v31 }
 0x155   : > { %3666 = vmatprep.subr.bf16.mxu0 %v3898_v34 }
 0x156   : > { %3687 = vmatpush3.bf16.msra.mxu1 %v3897_v33 }
 0x157   : > { %3688 = vmatprep.subr.bf16.mxu1 %v3900_v36 }
 0x158   : > { %3667 = vmatpush3.bf16.msra.mxu0 %v3899_v35 }
 0x159   : > { %3668 = vmatprep.subr.bf16.mxu0 %v3902_v38 }
 0x15a   : > { %3689 = vmatpush3.bf16.msra.mxu1 %v3901_v37 }
 0x15b   : > { %3690 = vmatprep.subr.bf16.mxu1 %v3904_v40 }
 0x15c   : > { %3669 = vmatpush3.bf16.msra.mxu0 %v3903_v39 }
 0x15d   : > { %3670 = vmatprep.subr.bf16.mxu0 %v3906_v42 }
 0x15e   : > { %3691 = vmatpush3.bf16.msra.mxu1 %v3905_v41 }
 0x15f   : > { %3692 = vmatprep.subr.bf16.mxu1 %v3908_v44 }
 0x160   : > { %3671 = vmatpush3.bf16.msra.mxu0 %v3907_v43 }
 0x161   : > { %3700 = vmatprep.subr.bf16.mxu0 %v3913_v48 }
 0x162   : > { %3693 = vmatpush3.bf16.msra.mxu1 %v3912_v47 }
 0x163   : > { %3057 = vmatmul.mubr.bf16.vlgmr.msra.gmra.mxu0 %v3909_v45 }
 0x164   : > { %3701 = vmatpush3.bf16.msra.mxu0 %v3917_v51  ;;  %3138 = vmatprep.mubr.bf16.mxu0 %v3934_v61 }
 0x165   : > { %3098 = vmatmul.mubr.bf16.vlgmr.msra.gmra.mxu1 %v3914_v49  ;;  %3702 = vmatprep.subr.bf16.mxu0 %v3918_v52 }
 0x168   : > { %3703 = vmatpush3.bf16.msra.mxu0 %v3919_v53 }
 0x169   : > { %3704 = vmatprep.subr.bf16.mxu0 %v3920_v54 }
 0x16c   : > { %3705 = vmatpush3.bf16.msra.mxu0 %v3921_v55 }
 0x16d   : > { %3706 = vmatprep.subr.bf16.mxu0 %v3922_v56 }
 0x170   : > { %3707 = vmatpush3.bf16.msra.mxu0 %v3923_v57 }
 0x171   : > { %3708 = vmatprep.subr.bf16.mxu0 %v3924_v58 }
 0x174   : > { %3709 = vmatpush3.bf16.msra.mxu0 %v3925_v59 }
 0x175   : > { %3710 = vmatprep.subr.bf16.mxu0 %v3926_v60 }
 0x178   : > { %3711 = vmatpush3.bf16.msra.mxu0 %v3927_v62 }
 0x179   : > { %3712 = vmatprep.subr.bf16.mxu0 %v3928_v63 }
 0x17c   : > { %3713 = vmatpush3.bf16.msra.mxu0 %v3929_v0 }
 0x17d   : > { %3714 = vmatprep.subr.bf16.mxu0 %v3930_v1 }
 0x180   : > { %3715 = vmatpush3.bf16.msra.mxu0 %v3931_v2 }
 0x183   : > { %3139 = vmatmul.mubr.bf16.vlgmr.msra.gmra.mxu0 %v3932_v3  ;;  %v3516_v3 = vld [vmem:[%s1463_s8] sm:$0xff]  }
 0x1c3   : > { %v3540_v4 = vpop.f32.mrf.mxu0 }
 0x1c5   : > { %v3541_v5 = vpop.f32.mrf.mxu0  ;;  %v3562_v6 = vpop.f32.mrf.mxu1 }
 0x1c6   : > { %v3542_v23 = vadd.f32 %v3541_v5, %v3540_v4 }
 0x1c7   : > { %v3543_v7 = vpop.f32.mrf.mxu0  ;;  %v3563_v8 = vpop.f32.mrf.mxu1 }
 0x1c8   : > { %v2813_v27 = vadd.f32 %v3542_v23, %v3344_v24  ;;  %v3564_v28 = vadd.f32 %v3563_v8, %v3562_v6 }
 0x1c9   : > { %v3544_v9 = vpop.f32.mrf.mxu0  ;;  %v3565_v10 = vpop.f32.mrf.mxu1 }
 0x1ca   : > { %v3545_v29 = vadd.f32 %v3544_v9, %v3543_v7  ;;  %v2854_v34 = vadd.f32 %v3564_v28, %v2813_v27 }
 0x1cb   : > { %v3566_v12 = vpop.f32.mrf.mxu1 }
 0x1cc   : > { %v2816_v35 = vadd.f32 %v3545_v29, %v3344_v24  ;;  %v3567_v36 = vadd.f32 %v3566_v12, %v3565_v10  ;;  %v3517_v10 = vunpack.c.l.bf16 %v3516_v3 }
 0x1ce   : > { %v2857_v43 = vadd.f32 %v3567_v36, %v2816_v35 }
 0x1e3   : > { %v3584_v11 = vpop.f32.mrf.mxu0 }
 0x1e5   : > { %v3585_v13 = vpop.f32.mrf.mxu0  ;;  %v3606_v14 = vpop.f32.mrf.mxu1 }
 0x1e6   : > { %v3586_v32 = vadd.f32 %v3585_v13, %v3584_v11 }
 0x1e7   : > { %v3587_v15 = vpop.f32.mrf.mxu0  ;;  %v3607_v16 = vpop.f32.mrf.mxu1 }
 0x1e8   : > { %v2895_v38 = vadd.f32 %v3586_v32, %v2854_v34  ;;  %v3608_v39 = vadd.f32 %v3607_v16, %v3606_v14  ;;  %v3518_v14 = vunpack.c.h.bf16 %v3516_v3 }
 0x1e9   : > { %v3588_v17 = vpop.f32.mrf.mxu0  ;;  %v3609_v18 = vpop.f32.mrf.mxu1 }
 0x1ea   : > { %v3589_v40 = vadd.f32 %v3588_v17, %v3587_v15  ;;  %v2936_v45 = vadd.f32 %v3608_v39, %v2895_v38 }
 0x1eb   : > { %v3610_v20 = vpop.f32.mrf.mxu1 }
 0x1ec   : > { %v2898_v46 = vadd.f32 %v3589_v40, %v2857_v43  ;;  %v3611_v47 = vadd.f32 %v3610_v20, %v3609_v18 }
 0x1ee   : > { %v2939_v53 = vadd.f32 %v3611_v47, %v2898_v46 }
 0x203   : > { %v3628_v19 = vpop.f32.mrf.mxu0 }
 0x205   : > { %v3629_v21 = vpop.f32.mrf.mxu0  ;;  %v3650_v22 = vpop.f32.mrf.mxu1 }
 0x206   : > { %v3630_v44 = vadd.f32 %v3629_v21, %v3628_v19 }
 0x207   : > { %v3631_v25 = vpop.f32.mrf.mxu0  ;;  %v3651_v26 = vpop.f32.mrf.mxu1 }
 0x208   : > { %v2977_v50 = vadd.f32 %v3630_v44, %v2936_v45  ;;  %v3652_v51 = vadd.f32 %v3651_v26, %v3650_v22 }
 0x209   : > { %v3632_v30 = vpop.f32.mrf.mxu0  ;;  %v3653_v31 = vpop.f32.mrf.mxu1 }
 0x20a   : > { %v3633_v52 = vadd.f32 %v3632_v30, %v3631_v25  ;;  %v3018_v57 = vadd.f32 %v3652_v51, %v2977_v50 }
 0x20b   : > { %v3654_v37 = vpop.f32.mrf.mxu1 }
 0x20c   : > { %v2980_v58 = vadd.f32 %v3633_v52, %v2939_v53  ;;  %v3655_v59 = vadd.f32 %v3654_v37, %v3653_v31 }
 0x20e   : > { %v3021_v1 = vadd.f32 %v3655_v59, %v2980_v58 }
 0x223   : > { %v3672_v33 = vpop.f32.mrf.mxu0 }
 0x225   : > { %v3673_v41 = vpop.f32.mrf.mxu0  ;;  %v3694_v42 = vpop.f32.mrf.mxu1 }
 0x226   : > { %v3674_v54 = vadd.f32 %v3673_v41, %v3672_v33 }
 0x227   : > { %v3675_v48 = vpop.f32.mrf.mxu0  ;;  %v3695_v49 = vpop.f32.mrf.mxu1 }
 0x228   : > { %v3059_v60 = vadd.f32 %v3674_v54, %v3018_v57  ;;  %v3696_v61 = vadd.f32 %v3695_v49, %v3694_v42 }
 0x229   : > { %v3676_v55 = vpop.f32.mrf.mxu0  ;;  %v3697_v56 = vpop.f32.mrf.mxu1 }
 0x22a   : > { %v3677_v62 = vadd.f32 %v3676_v55, %v3675_v48  ;;  %v3100_v4 = vadd.f32 %v3696_v61, %v3059_v60 }
 0x22b   : > { %v3698_v63 = vpop.f32.mrf.mxu1 }
 0x22c   : > { %v3062_v5 = vadd.f32 %v3677_v62, %v3021_v1  ;;  %v3699_v6 = vadd.f32 %v3698_v63, %v3697_v56 }
 0x22e   : > { %v3103_v12 = vadd.f32 %v3699_v6, %v3062_v5 }
 0x243   : > { %v3716_v0 = vpop.f32.mrf.mxu0 }
 0x245   : > { %v3717_v2 = vpop.f32.mrf.mxu0 }
 0x246   : > { %v3718_v7 = vadd.f32 %v3717_v2, %v3716_v0 }
 0x247   : > { %v3719_v8 = vpop.f32.mrf.mxu0 }
 0x248   : > { %v3141_v9 = vadd.f32 %v3718_v7, %v3100_v4 }
 0x249   : > { %v3720_v11 = vpop.f32.mrf.mxu0 }
 0x24a   : > { %v3721_v13 = vadd.f32 %v3720_v11, %v3719_v8  ;;  %v3151_v15 = vadd.f32 %v3517_v10, %v3141_v9 }
 0x24c   : > { %v3144_v16 = vadd.f32 %v3721_v13, %v3103_v12  ;;  %v3153_v18 = vmax.f32 %v3151_v15, 0.0 }
 0x24e   : > { %v3152_v17 = vadd.f32 %v3518_v14, %v3144_v16 }
 0x250   : > { %v3154_v19 = vmax.f32 %v3152_v17, 0.0  ;;  %3171 = sbr.rel (!%p4039_p6) target bundleno = 605 (0x25d), region = 122 }
 0x252   : > { %v3522_v20 = vpack.c.bf16 %v3154_v19, %v3153_v18 }
 0x254   : > { %3523 = vst [vmem:[%s1497_s15] sm:$0xff] %v3522_v20  }
 0x25b   : > { %v3193_v21 = vld [vmem:[%s1497_s15] sm:$0xf]  ;;  %v3195_v22 = vld [vmem:[%s1497_s15 + $0x4] sm:$0xf] }
 0x25c   : > { %3194 = vst [vmem:[%s3176_s11] sm:$0xf] %v3193_v21  ;;  %3196 = vst [vmem:[%s3176_s11 + $0x8] sm:$0xf] %v3195_v22 }
 0x25d PF: > { %s14_s19 = sadd.s32 1, %s3973_s19   ;;  %s4881_s15 = smov %s3961_s16 }
 0x25e   : > { %p11_p12 = scmp.ge.s32.totalorder %s14_s19, 4   ;;  %s4882_s16 = smov %s4044_s26 }
 0x25f   : > { %s4883_s17 = smov %s3969_s18  ;;  %s4884_s18 = smov %s4886_s20 }
 0x260   :  { %13 = sbr.rel (!%p11_p12) target bundleno = 3 (0x3), region = 208 }

</bundles_post_ra>
